<compile_context>
chip_gen: v6e
topology: v6e:2x2x1
jax: 0.10.0
libtpu: 0.0.40
codegen_flags: <defaults>
</compile_context>

<pallas_src>
import functools
import math

import jax
import jax.numpy as jnp
from jax.experimental import pallas as pl
from jax.experimental.pallas import tpu as pltpu


# ----------------------------------------------------------------------------
# helpers
# ----------------------------------------------------------------------------
def _round_up(x, m):
    return (x + m - 1) // m * m


def _pick_tile(dim, prefs):
    for t in prefs:
        if t <= dim and dim % t == 0:
            return t
    return dim


# ----------------------------------------------------------------------------
# Tiled GEMM kernel with fused bias epilogue (bf16 operands, f32 accumulation)
# ----------------------------------------------------------------------------
def _matmul_bias_kernel(a_ref, b_ref, bias_ref, o_ref, acc_ref):
    k = pl.program_id(2)

    @pl.when(k == 0)
    def _():
        acc_ref[...] = jnp.zeros_like(acc_ref)

    acc_ref[...] += jnp.dot(a_ref[...], b_ref[...],
                            preferred_element_type=jnp.float32)

    @pl.when(k == pl.num_programs(2) - 1)
    def _():
        o_ref[...] = acc_ref[...] + bias_ref[...]


def pallas_matmul_bias(a, b, bias):
    """(M, K) @ (K, N) + bias[N] -> (M, N) f32, tiled over M/N/K."""
    M, K = a.shape
    _, N = b.shape
    Mp, Kp, Np = _round_up(M, 128), _round_up(K, 128), _round_up(N, 128)

    a16 = a.astype(jnp.bfloat16)
    b16 = b.astype(jnp.bfloat16)
    bias2 = bias.reshape(1, N).astype(jnp.float32)
    if (Mp, Kp) != (M, K):
        a16 = jnp.pad(a16, ((0, Mp - M), (0, Kp - K)))
    if (Kp, Np) != (K, N):
        b16 = jnp.pad(b16, ((0, Kp - K), (0, Np - N)))
    if Np != N:
        bias2 = jnp.pad(bias2, ((0, 0), (0, Np - N)))

    tm = _pick_tile(Mp, (256, 128))
    tn = _pick_tile(Np, (256, 128))
    tk = _pick_tile(Kp, (512, 256, 128))

    out = pl.pallas_call(
        _matmul_bias_kernel,
        out_shape=jax.ShapeDtypeStruct((Mp, Np), jnp.float32),
        grid=(Mp // tm, Np // tn, Kp // tk),
        in_specs=[pl.BlockSpec((tm, tk), lambda i, j, k: (i, k)),
                  pl.BlockSpec((tk, tn), lambda i, j, k: (k, j)),
                  pl.BlockSpec((1, tn), lambda i, j, k: (0, j))],
        out_specs=pl.BlockSpec((tm, tn), lambda i, j, k: (i, j)),
        scratch_shapes=[pltpu.VMEM((tm, tn), jnp.float32)],
        compiler_params=pltpu.CompilerParams(
            dimension_semantics=("parallel", "parallel", "arbitrary"),
            vmem_limit_bytes=32 * 1024 * 1024),
    )(a16, b16, bias2)
    return out[:M, :N]


# ----------------------------------------------------------------------------
# Fused InstanceNorm (+ activation, + optional residual add), NHWC, tiled (B, C)
# ----------------------------------------------------------------------------
def _apply_act(y, act):
    if act == "lrelu":
        return jnp.where(y >= 0, y, 0.2 * y)
    if act == "tanh":
        return jnp.tanh(y)
    return y


def _inorm_kernel(x_ref, g_ref, b_ref, o_ref, *, eps, act):
    x = x_ref[0]                                        # (HW, tc)
    mean = jnp.mean(x, axis=0, keepdims=True)
    var = jnp.mean(jnp.square(x - mean), axis=0, keepdims=True)   # biased (PyTorch IN)
    y = (x - mean) * jax.lax.rsqrt(var + eps)
    y = y * g_ref[...] + b_ref[...]
    o_ref[0] = _apply_act(y, act)


def _inorm_res_kernel(x_ref, g_ref, b_ref, r_ref, o_ref, *, eps, act):
    x = x_ref[0]
    mean = jnp.mean(x, axis=0, keepdims=True)
    var = jnp.mean(jnp.square(x - mean), axis=0, keepdims=True)
    y = (x - mean) * jax.lax.rsqrt(var + eps)
    y = y * g_ref[...] + b_ref[...]
    o_ref[0] = _apply_act(y, act) + r_ref[0]            # fused residual add


def instance_norm_nhwc(x, gamma, beta, act=None, residual=None, eps=1e-5):
    B, H, W, C = x.shape
    HW = H * W
    xr = x.reshape(B, HW, C).astype(jnp.float32)
    g = gamma.reshape(1, C).astype(jnp.float32)
    bt = beta.reshape(1, C).astype(jnp.float32)

    tc = C if C < 128 else (256 if C % 256 == 0 else 128)
    if C % tc != 0:
        tc = C

    in_specs = [pl.BlockSpec((1, HW, tc), lambda b, c: (b, 0, c)),
                pl.BlockSpec((1, tc), lambda b, c: (0, c)),
                pl.BlockSpec((1, tc), lambda b, c: (0, c))]
    args = [xr, g, bt]
    if residual is None:
        kern = functools.partial(_inorm_kernel, eps=eps, act=act)
    else:
        in_specs.append(pl.BlockSpec((1, HW, tc), lambda b, c: (b, 0, c)))
        args.append(residual.reshape(B, HW, C).astype(jnp.float32))
        kern = functools.partial(_inorm_res_kernel, eps=eps, act=act)

    y = pl.pallas_call(
        kern,
        out_shape=jax.ShapeDtypeStruct((B, HW, C), jnp.float32),
        grid=(B, C // tc),
        in_specs=in_specs,
        out_specs=pl.BlockSpec((1, HW, tc), lambda b, c: (b, 0, c)),
        compiler_params=pltpu.CompilerParams(
            dimension_semantics=("parallel", "parallel")),
    )(*args)
    return y.reshape(B, H, W, C)


# ----------------------------------------------------------------------------
# Self-attention: flash-style online softmax, fused "gamma*out + x" epilogue,
# lane-dense (N, C) output.
# ----------------------------------------------------------------------------
def _attn_kernel(gamma_ref, q_ref, k_ref, v_ref, x_ref, o_ref, m_sc, l_sc, acc_sc):
    kv = pl.program_id(1)

    @pl.when(kv == 0)
    def _():
        m_sc[...] = jnp.full_like(m_sc, -jnp.inf)
        l_sc[...] = jnp.zeros_like(l_sc)
        acc_sc[...] = jnp.zeros_like(acc_sc)

    q = q_ref[0]                                        # (N, Cq) bf16
    k = k_ref[0]                                        # (tkv, Cq) bf16
    v = v_ref[0]                                        # (tkv, C)  bf16
    # scores = q @ k^T without an explicit transpose (trans_b matmul)
    s = jax.lax.dot_general(q, k, (((1,), (1,)), ((), ())),
                            preferred_element_type=jnp.float32)   # (N, tkv)
    m_new = jnp.maximum(m_sc[...], jnp.max(s, axis=-1, keepdims=True))
    alpha = jnp.exp(m_sc[...] - m_new)
    p = jnp.exp(s - m_new)
    l_sc[...] = alpha * l_sc[...] + jnp.sum(p, axis=-1, keepdims=True)
    acc_sc[...] = alpha * acc_sc[...] + jnp.dot(p.astype(v.dtype), v,
                                                preferred_element_type=jnp.float32)
    m_sc[...] = m_new

    @pl.when(kv == pl.num_programs(1) - 1)
    def _():
        inv_l = pl.reciprocal(l_sc[...], approx=True)
        o_ref[0] = gamma_ref[0] * (acc_sc[...] * inv_l) + x_ref[0]


def pallas_attention(q, k, v, xres, gamma):
    """q,k: (B,N,Cq)  v,xres: (B,N,C)  ->  gamma*softmax(qk^T)@v + xres : (B,N,C)."""
    B, N, Cq = q.shape
    C = v.shape[2]
    tkv = 512 if N % 512 == 0 else N
    nk = N // tkv

    return pl.pallas_call(
        _attn_kernel,
        out_shape=jax.ShapeDtypeStruct((B, N, C), jnp.float32),
        grid=(B, nk),
        in_specs=[pl.BlockSpec(memory_space=pltpu.MemorySpace.SMEM),
                  pl.BlockSpec((1, N, Cq), lambda b, kv: (b, 0, 0)),
                  pl.BlockSpec((1, tkv, Cq), lambda b, kv: (b, kv, 0)),
                  pl.BlockSpec((1, tkv, C), lambda b, kv: (b, kv, 0)),
                  pl.BlockSpec((1, N, C), lambda b, kv: (b, 0, 0))],
        out_specs=pl.BlockSpec((1, N, C), lambda b, kv: (b, 0, 0)),
        scratch_shapes=[pltpu.VMEM((N, 1), jnp.float32),
                        pltpu.VMEM((N, 1), jnp.float32),
                        pltpu.VMEM((N, C), jnp.float32)],
        compiler_params=pltpu.CompilerParams(
            dimension_semantics=("parallel", "arbitrary"),
            vmem_limit_bytes=32 * 1024 * 1024),
    )(gamma.reshape(1).astype(jnp.float32),
      q.astype(jnp.bfloat16), k.astype(jnp.bfloat16), v.astype(jnp.bfloat16),
      xres.astype(jnp.float32))


# ----------------------------------------------------------------------------
# Small tiled elementwise kernels
# ----------------------------------------------------------------------------
def _add_kernel(a_ref, b_ref, o_ref):
    o_ref[...] = a_ref[...] + b_ref[...]


def pallas_add(a, b):
    shape = a.shape
    C = shape[-1]
    rows = math.prod(shape[:-1])
    a2 = a.reshape(rows, C).astype(jnp.float32)
    b2 = b.reshape(rows, C).astype(jnp.float32)
    tr = _pick_tile(rows, (512, 256, 128, 64, 32, 16, 8))
    y = pl.pallas_call(
        _add_kernel,
        out_shape=jax.ShapeDtypeStruct((rows, C), jnp.float32),
        grid=(rows // tr,),
        in_specs=[pl.BlockSpec((tr, C), lambda i: (i, 0)),
                  pl.BlockSpec((tr, C), lambda i: (i, 0))],
        out_specs=pl.BlockSpec((tr, C), lambda i: (i, 0)),
        compiler_params=pltpu.CompilerParams(dimension_semantics=("parallel",)),
    )(a2, b2)
    return y.reshape(shape)


def _final_kernel(g_ref, x_ref, r_ref, out_ref, wr_ref):
    g = g_ref[0]
    w = g * r_ref[...]
    wr_ref[...] = w
    out_ref[...] = jnp.tanh(x_ref[...] - w)


def pallas_final(gamma, x_nchw, residual_nchw):
    B, C, H, W = x_nchw.shape
    rows, cols = B * C, H * W
    x2 = x_nchw.reshape(rows, cols).astype(jnp.float32)
    r2 = residual_nchw.reshape(rows, cols).astype(jnp.float32)
    tcol = _pick_tile(cols, (2048, 1024, 512, 256, 128))
    out, w = pl.pallas_call(
        _final_kernel,
        out_shape=(jax.ShapeDtypeStruct((rows, cols), jnp.float32),
                   jax.ShapeDtypeStruct((rows, cols), jnp.float32)),
        grid=(cols // tcol,),
        in_specs=[pl.BlockSpec(memory_space=pltpu.MemorySpace.SMEM),
                  pl.BlockSpec((rows, tcol), lambda i: (0, i)),
                  pl.BlockSpec((rows, tcol), lambda i: (0, i))],
        out_specs=(pl.BlockSpec((rows, tcol), lambda i: (0, i)),
                   pl.BlockSpec((rows, tcol), lambda i: (0, i))),
        compiler_params=pltpu.CompilerParams(dimension_semantics=("parallel",)),
    )(gamma.reshape(1).astype(jnp.float32), x2, r2)
    return out.reshape(B, C, H, W), w.reshape(B, C, H, W)


# ----------------------------------------------------------------------------
# JAX glue (NHWC padding / im2col / pool / upsample) around the Pallas GEMMs
# ----------------------------------------------------------------------------
def conv2d_nhwc(x, w, b, stride=1, pad=0, pad_mode="zero"):
    """NHWC conv via im2col + Pallas GEMM. w: (Cout, Cin, kh, kw). Output NHWC f32."""
    B, H, W, Cin = x.shape
    Cout, _, kh, kw = w.shape
    if pad > 0:
        mode = "reflect" if pad_mode == "reflect" else "constant"
        x = jnp.pad(x, ((0, 0), (pad, pad), (pad, pad), (0, 0)), mode=mode)
    Hp, Wp = x.shape[1], x.shape[2]
    Ho = (Hp - kh) // stride + 1
    Wo = (Wp - kw) // stride + 1
    cols = []
    for i in range(kh):
        for j in range(kw):
            cols.append(jax.lax.slice(
                x, (0, i, j, 0),
                (B, i + stride * (Ho - 1) + 1, j + stride * (Wo - 1) + 1, Cin),
                (1, stride, stride, 1)))
    patches = jnp.stack(cols, axis=3)                    # (B, Ho, Wo, kh*kw, Cin)
    a = patches.reshape(B * Ho * Wo, kh * kw * Cin)
    wmat = jnp.transpose(w, (2, 3, 1, 0)).reshape(kh * kw * Cin, Cout)
    y = pallas_matmul_bias(a, wmat, b)                   # (B*Ho*Wo, Cout) f32
    return y.reshape(B, Ho, Wo, Cout)                    # already NHWC — no transpose


def avg_pool_3x3_s2_p1_nhwc(x):
    """AvgPool2d(3, 2, 1), count_include_pad=True (VPU/XLA; no N=1 GEMM)."""
    B, H, W, C = x.shape
    xp = jnp.pad(x, ((0, 0), (1, 1), (1, 1), (0, 0)))
    Ho = (H + 2 - 3) // 2 + 1
    Wo = (W + 2 - 3) // 2 + 1
    acc = jnp.zeros((B, Ho, Wo, C), jnp.float32)
    for i in range(3):
        for j in range(3):
            acc = acc + jax.lax.slice(
                xp, (0, i, j, 0),
                (B, i + 2 * (Ho - 1) + 1, j + 2 * (Wo - 1) + 1, C),
                (1, 2, 2, 1))
    return acc / 9.0


def upsample2x_nhwc(x):
    return jnp.repeat(jnp.repeat(x, 2, axis=1), 2, axis=2)


# ----------------------------------------------------------------------------
# Model blocks
# ----------------------------------------------------------------------------
def self_attn(x, p):
    B, H, W, C = x.shape
    N = H * W
    xf = x.reshape(B * N, C)
    Cq = p["wq"].shape[1]
    q = pallas_matmul_bias(xf, p["wq"], p["bq"]).reshape(B, N, Cq)
    k = pallas_matmul_bias(xf, p["wk"], p["bk"]).reshape(B, N, Cq)
    v = pallas_matmul_bias(xf, p["wv"], p["bv"]).reshape(B, N, C)
    out = pallas_attention(q, k, v, x.reshape(B, N, C), p["gamma"])   # (B,N,C)
    nxt = pallas_matmul_bias(out.reshape(B * N, C), p["wn"], p["bn"])
    nxt = avg_pool_3x3_s2_p1_nhwc(nxt.reshape(B, H, W, 2 * C))
    return out.reshape(B, H, W, C), nxt


def res_block(x, p):
    h = conv2d_nhwc(x, p["w1"], p["b1"], pad=1, pad_mode="reflect")
    h = instance_norm_nhwc(h, p["g1"], p["be1"], act="lrelu")
    h = conv2d_nhwc(h, p["w2"], p["b2"], pad=1, pad_mode="reflect")
    return instance_norm_nhwc(h, p["g2"], p["be2"], act=None, residual=x)  # x + block(x)


def generator_forward(params, x_nchw, PGBFP=True):
    x = jnp.transpose(x_nchw, (0, 2, 3, 1))              # NHWC internally
    pre = conv2d_nhwc(x, params["pre_w"], params["pre_b"], pad=3, pad_mode="reflect")
    pre = instance_norm_nhwc(pre, params["pre_g"], params["pre_be"], act="lrelu")
    dl1 = conv2d_nhwc(pre, params["d1_w"], params["d1_b"], stride=2, pad=1)
    dl1 = instance_norm_nhwc(dl1, params["d1_g"], params["d1_be"], act="lrelu")
    dl2 = conv2d_nhwc(dl1, params["d2_w"], params["d2_b"], stride=2, pad=1)
    dl2 = instance_norm_nhwc(dl2, params["d2_g"], params["d2_be"], act="lrelu")

    if not PGBFP:
        res = dl2
        for rb in params["res"]:
            res = res_block(res, rb)
        ul1 = upsample2x_nhwc(res)
        ul1 = conv2d_nhwc(ul1, params["u1_w"], params["u1_b"], pad=1)
        ul1 = instance_norm_nhwc(ul1, params["u1_g"], params["u1_be"], act="lrelu")
        ul2 = upsample2x_nhwc(ul1)
        ul2 = conv2d_nhwc(ul2, params["u2_w"], params["u2_b"], pad=1)
        ul2 = instance_norm_nhwc(ul2, params["u2_g"], params["u2_be"], act="lrelu")
    else:
        sa1, sa_next1 = self_attn(dl1, params["sa1"])
        res = dl2
        for rb in params["res"]:
            res = res_block(res, rb)
        sa2, _ = self_attn(pallas_add(dl2, sa_next1), params["sa2"])
        ul1 = upsample2x_nhwc(pallas_add(res, sa2))
        ul1 = conv2d_nhwc(ul1, params["u1_w"], params["u1_b"], pad=1)
        ul1 = instance_norm_nhwc(ul1, params["u1_g"], params["u1_be"], act="lrelu")
        ul2 = upsample2x_nhwc(pallas_add(ul1, sa1))
        ul2 = conv2d_nhwc(ul2, params["u2_w"], params["u2_b"], pad=1)
        ul2 = instance_norm_nhwc(ul2, params["u2_g"], params["u2_be"], act="lrelu")

    residual = conv2d_nhwc(ul2, params["post_w"], params["post_b"], pad=3, pad_mode="reflect")
    residual = instance_norm_nhwc(residual, params["post_g"], params["post_be"], act="tanh")
    residual_nchw = jnp.transpose(residual, (0, 3, 1, 2))

    out, weighted_residual = pallas_final(params["gamma"], x_nchw, residual_nchw)
    return out, weighted_residual


# ----------------------------------------------------------------------------
# Deterministic parameter init (mirrors Generator.initialize_weights)
# ----------------------------------------------------------------------------
def xavier_normal(key, cout, cin, kh, kw):
    fan_in, fan_out = cin * kh * kw, cout * kh * kw
    std = math.sqrt(2.0 / (fan_in + fan_out))
    return jax.random.normal(key, (cout, cin, kh, kw), jnp.float32) * std


def init_params(key, n_blocks=2, PGBFP=True):
    keys = iter(jax.random.split(key, 128))
    params = {}

    def conv_p(cout, cin, k):
        return xavier_normal(next(keys), cout, cin, k, k), jnp.zeros((cout,), jnp.float32)

    def norm_p(c):
        return jnp.ones((c,), jnp.float32), jnp.zeros((c,), jnp.float32)

    params["pre_w"], params["pre_b"] = conv_p(64, 3, 7)
    params["pre_g"], params["pre_be"] = norm_p(64)
    params["d1_w"], params["d1_b"] = conv_p(128, 64, 3)
    params["d1_g"], params["d1_be"] = norm_p(128)
    params["d2_w"], params["d2_b"] = conv_p(256, 128, 3)
    params["d2_g"], params["d2_be"] = norm_p(256)

    if PGBFP:
        def sa_p(c):
            p = {}
            wq, p["bq"] = conv_p(c // 8, c, 1); p["wq"] = wq.reshape(c // 8, c).T
            wk, p["bk"] = conv_p(c // 8, c, 1); p["wk"] = wk.reshape(c // 8, c).T
            wv, p["bv"] = conv_p(c, c, 1);      p["wv"] = wv.reshape(c, c).T
            wn, p["bn"] = conv_p(2 * c, c, 1);  p["wn"] = wn.reshape(2 * c, c).T
            p["gamma"] = jnp.zeros((1,), jnp.float32)
            return p
        params["sa1"] = sa_p(128)
        params["sa2"] = sa_p(256)

    params["res"] = []
    for _ in range(n_blocks):
        rb = {}
        rb["w1"], rb["b1"] = conv_p(256, 256, 3)
        rb["g1"], rb["be1"] = norm_p(256)
        rb["w2"], rb["b2"] = conv_p(256, 256, 3)
        rb["g2"], rb["be2"] = norm_p(256)
        params["res"].append(rb)

    params["u1_w"], params["u1_b"] = conv_p(128, 256, 3)
    params["u1_g"], params["u1_be"] = norm_p(128)
    params["u2_w"], params["u2_b"] = conv_p(64, 128, 3)
    params["u2_g"], params["u2_be"] = norm_p(64)
    params["post_w"], params["post_b"] = conv_p(3, 64, 7)
    params["post_g"], params["post_be"] = norm_p(3)
    params["gamma"] = jnp.zeros((1,), jnp.float32)       # Generator.gamma
    return params


if __name__ == "__main__":
    key = jax.random.PRNGKey(0)
    pkey, xkey = jax.random.split(key)
    PGBFP = True
    n_blocks = 2
    params = init_params(pkey, n_blocks=n_blocks, PGBFP=PGBFP)
    x = jax.random.normal(xkey, (2, 3, 16, 16), jnp.float32)   # NCHW, like PyTorch

    fwd = jax.jit(functools.partial(generator_forward, PGBFP=PGBFP))
    out, weighted_residual = fwd(params, x)
    jax.block_until_ready(out)
    jax.block_until_ready(weighted_residual)

    assert out.shape == (2, 3, 16, 16) and weighted_residual.shape == (2, 3, 16, 16)
    assert jnp.all(jnp.isfinite(out)) and jnp.all(jnp.isfinite(weighted_residual))
    print("KERNEL_OK")
</pallas_src>

<mosaic_0001>
module attributes {stable_mosaic.version = 11 : i64} {
  func.func @_inorm_kernel(%arg0: i32, %arg1: i32, %arg2: memref<1x256x64xf32, #tpu.memory_space<vmem>>, %arg3: memref<1x64xf32, #tpu.memory_space<vmem>>, %arg4: memref<1x64xf32, #tpu.memory_space<vmem>>, %arg5: memref<1x256x64xf32, #tpu.memory_space<vmem>>) attributes {dimension_semantics = [#tpu.dimension_semantics<parallel>, #tpu.dimension_semantics<parallel>], iteration_bounds = array<i64: 2, 1>, scalar_prefetch = 0 : i64, scratch_operands = 0 : i64, tpu.core_type = #tpu.core_type<tc>, window_params = [{transform_indices = @transform_0, window_bounds = array<i64: 1, 256, 64>}, {transform_indices = @transform_1, window_bounds = array<i64: 1, 64>}, {transform_indices = @transform_2, window_bounds = array<i64: 1, 64>}, {transform_indices = @transform_3, window_bounds = array<i64: 1, 256, 64>}]} {
    %c0 = arith.constant 0 : index
    %c0_0 = arith.constant 0 : index
    %c0_1 = arith.constant 0 : index
    %0 = vector.load %arg2[%c0, %c0_0, %c0_1] : memref<1x256x64xf32, #tpu.memory_space<vmem>>, vector<1x256x64xf32>
    %1 = vector.shape_cast %0 : vector<1x256x64xf32> to vector<256x64xf32>
    %cst = arith.constant dense<0.000000e+00> : vector<64xf32>
    %2 = vector.multi_reduction <add>, %1, %cst [0] : vector<256x64xf32> to vector<64xf32>
    %3 = vector.shape_cast %2 : vector<64xf32> to vector<1x64xf32>
    %cst_2 = arith.constant 2.560000e+02 : f32
    %4 = vector.broadcast %cst_2 : f32 to vector<1x64xf32>
    %5 = arith.divf %3, %4 : vector<1x64xf32>
    %6 = vector.broadcast %5 : vector<1x64xf32> to vector<256x64xf32>
    %7 = arith.subf %1, %6 : vector<256x64xf32>
    %8 = arith.mulf %7, %7 : vector<256x64xf32>
    %cst_3 = arith.constant dense<0.000000e+00> : vector<64xf32>
    %9 = vector.multi_reduction <add>, %8, %cst_3 [0] : vector<256x64xf32> to vector<64xf32>
    %10 = vector.shape_cast %9 : vector<64xf32> to vector<1x64xf32>
    %cst_4 = arith.constant 2.560000e+02 : f32
    %11 = vector.broadcast %cst_4 : f32 to vector<1x64xf32>
    %12 = arith.divf %10, %11 : vector<1x64xf32>
    %13 = vector.broadcast %5 : vector<1x64xf32> to vector<256x64xf32>
    %14 = arith.subf %1, %13 : vector<256x64xf32>
    %cst_5 = arith.constant 9.99999974E-6 : f32
    %15 = vector.broadcast %cst_5 : f32 to vector<1x64xf32>
    %16 = arith.addf %12, %15 : vector<1x64xf32>
    %17 = math.rsqrt %16 : vector<1x64xf32>
    %18 = vector.broadcast %17 : vector<1x64xf32> to vector<256x64xf32>
    %19 = arith.mulf %14, %18 : vector<256x64xf32>
    %c0_6 = arith.constant 0 : index
    %c0_7 = arith.constant 0 : index
    %20 = vector.load %arg3[%c0_6, %c0_7] : memref<1x64xf32, #tpu.memory_space<vmem>>, vector<1x64xf32>
    %21 = vector.broadcast %20 : vector<1x64xf32> to vector<256x64xf32>
    %22 = arith.mulf %19, %21 : vector<256x64xf32>
    %c0_8 = arith.constant 0 : index
    %c0_9 = arith.constant 0 : index
    %23 = vector.load %arg4[%c0_8, %c0_9] : memref<1x64xf32, #tpu.memory_space<vmem>>, vector<1x64xf32>
    %24 = vector.broadcast %23 : vector<1x64xf32> to vector<256x64xf32>
    %25 = arith.addf %22, %24 : vector<256x64xf32>
    %cst_10 = arith.constant 0.000000e+00 : f32
    %26 = vector.broadcast %cst_10 : f32 to vector<256x64xf32>
    %27 = arith.cmpf oge, %25, %26 : vector<256x64xf32>
    %cst_11 = arith.constant 2.000000e-01 : f32
    %28 = vector.broadcast %cst_11 : f32 to vector<256x64xf32>
    %29 = arith.mulf %28, %25 : vector<256x64xf32>
    %30 = arith.select %27, %25, %29 : vector<256x64xi1>, vector<256x64xf32>
    %c0_12 = arith.constant 0 : index
    %c0_13 = arith.constant 0 : index
    %c0_14 = arith.constant 0 : index
    %31 = vector.load %arg5[%c0_12, %c0_13, %c0_14] : memref<1x256x64xf32, #tpu.memory_space<vmem>>, vector<1x256x64xf32>
    %32 = vector.shape_cast %31 : vector<1x256x64xf32> to vector<256x64xf32>
    %33 = vector.shape_cast %30 : vector<256x64xf32> to vector<1x256x64xf32>
    tpu.vector_store %arg5[%c0_12, %c0_13, %c0_14], %33 {strides = array<i32>} : memref<1x256x64xf32, #tpu.memory_space<vmem>>, vector<1x256x64xf32>,
    return
  }
  func.func @transform_0(%arg0: i32, %arg1: i32) -> (i32, i32, i32) {
    %c0_i32 = arith.constant 0 : i32
    %c0_i32_0 = arith.constant 0 : i32
    return %arg0, %c0_i32, %arg1 : i32, i32, i32
  }
  func.func @transform_1(%arg0: i32, %arg1: i32) -> (i32, i32) {
    %c0_i32 = arith.constant 0 : i32
    %c0_i32_0 = arith.constant 0 : i32
    return %c0_i32, %arg1 : i32, i32
  }
  func.func @transform_2(%arg0: i32, %arg1: i32) -> (i32, i32) {
    %c0_i32 = arith.constant 0 : i32
    %c0_i32_0 = arith.constant 0 : i32
    return %c0_i32, %arg1 : i32, i32
  }
  func.func @transform_3(%arg0: i32, %arg1: i32) -> (i32, i32, i32) {
    %c0_i32 = arith.constant 0 : i32
    %c0_i32_0 = arith.constant 0 : i32
    return %arg0, %c0_i32, %arg1 : i32, i32, i32
  }
}

module attributes {stable_mosaic.version = 11 : i64} {
  func.func @_matmul_bias_kernel(%arg0: i32, %arg1: i32, %arg2: i32, %arg3: memref<256x256xbf16, #tpu.memory_space<vmem>>, %arg4: memref<256x128xbf16, #tpu.memory_space<vmem>>, %arg5: memref<1x128xf32, #tpu.memory_space<vmem>>, %arg6: memref<256x128xf32, #tpu.memory_space<vmem>>, %arg7: memref<256x128xf32, #tpu.memory_space<vmem>>) attributes {dimension_semantics = [#tpu.dimension_semantics<parallel>, #tpu.dimension_semantics<parallel>, #tpu.dimension_semantics<arbitrary>], iteration_bounds = array<i64: 2, 1, 1>, scalar_prefetch = 0 : i64, scratch_operands = 1 : i64, tpu.core_type = #tpu.core_type<tc>, window_params = [{transform_indices = @transform_0, window_bounds = array<i64: 256, 256>}, {transform_indices = @transform_1, window_bounds = array<i64: 256, 128>}, {transform_indices = @transform_2, window_bounds = array<i64: 1, 128>}, {transform_indices = @transform_3, window_bounds = array<i64: 256, 128>}]} {
    %c0_i32 = arith.constant 0 : i32
    %0 = arith.cmpi eq, %arg2, %c0_i32 : i32
    %1 = arith.extui %0 : i1 to i32
    %c0_i32_0 = arith.constant 0 : i32
    %2 = arith.cmpi ne, %1, %c0_i32_0 : i32
    scf.if %2 {
      %cst_10 = arith.constant 0.000000e+00 : f32
      %12 = vector.broadcast %cst_10 : f32 to vector<256x128xf32>
      %c0_11 = arith.constant 0 : index
      %c0_12 = arith.constant 0 : index
      %13 = vector.load %arg7[%c0_11, %c0_12] : memref<256x128xf32, #tpu.memory_space<vmem>>, vector<256x128xf32>
      tpu.vector_store %arg7[%c0_11, %c0_12], %12 {strides = array<i32>} : memref<256x128xf32, #tpu.memory_space<vmem>>, vector<256x128xf32>,
    } else {
    }
    %c0 = arith.constant 0 : index
    %c0_1 = arith.constant 0 : index
    %3 = vector.load %arg7[%c0, %c0_1] : memref<256x128xf32, #tpu.memory_space<vmem>>, vector<256x128xf32>
    %c0_2 = arith.constant 0 : index
    %c0_3 = arith.constant 0 : index
    %4 = vector.load %arg3[%c0_2, %c0_3] : memref<256x256xbf16, #tpu.memory_space<vmem>>, vector<256x256xbf16>
    %c0_4 = arith.constant 0 : index
    %c0_5 = arith.constant 0 : index
    %5 = vector.load %arg4[%c0_4, %c0_5] : memref<256x128xbf16, #tpu.memory_space<vmem>>, vector<256x128xbf16>
    %cst = arith.constant dense<0.000000e+00> : vector<256x128xf32>
    %6 = tpu.matmul %4, %5, %cst {dimension_numbers = #tpu.dot_dimension_numbers<[1], [0], [0], [1], [0, 0, 1, 1], [], []>} : vector<256x256xbf16>, vector<256x128xbf16>, vector<256x128xf32> -> vector<256x128xf32>
    %7 = arith.addf %3, %6 : vector<256x128xf32>
    %c0_6 = arith.constant 0 : index
    %c0_7 = arith.constant 0 : index
    %8 = vector.load %arg7[%c0_6, %c0_7] : memref<256x128xf32, #tpu.memory_space<vmem>>, vector<256x128xf32>
    tpu.vector_store %arg7[%c0_6, %c0_7], %7 {strides = array<i32>} : memref<256x128xf32, #tpu.memory_space<vmem>>, vector<256x128xf32>,
    %c0_i32_8 = arith.constant 0 : i32
    %9 = arith.cmpi eq, %arg2, %c0_i32_8 : i32
    %10 = arith.extui %9 : i1 to i32
    %c0_i32_9 = arith.constant 0 : i32
    %11 = arith.cmpi ne, %10, %c0_i32_9 : i32
    scf.if %11 {
      %c0_10 = arith.constant 0 : index
      %c0_11 = arith.constant 0 : index
      %12 = vector.load %arg7[%c0_10, %c0_11] : memref<256x128xf32, #tpu.memory_space<vmem>>, vector<256x128xf32>
      %c0_12 = arith.constant 0 : index
      %c0_13 = arith.constant 0 : index
      %13 = vector.load %arg5[%c0_12, %c0_13] : memref<1x128xf32, #tpu.memory_space<vmem>>, vector<1x128xf32>
      %14 = vector.broadcast %13 : vector<1x128xf32> to vector<256x128xf32>
      %15 = arith.addf %12, %14 : vector<256x128xf32>
      %c0_14 = arith.constant 0 : index
      %c0_15 = arith.constant 0 : index
      %16 = vector.load %arg6[%c0_14, %c0_15] : memref<256x128xf32, #tpu.memory_space<vmem>>, vector<256x128xf32>
      tpu.vector_store %arg6[%c0_14, %c0_15], %15 {strides = array<i32>} : memref<256x128xf32, #tpu.memory_space<vmem>>, vector<256x128xf32>,
    } else {
    }
    return
  }
  func.func @transform_0(%arg0: i32, %arg1: i32, %arg2: i32) -> (i32, i32) {
    %c0_i32 = arith.constant 0 : i32
    return %arg0, %arg2 : i32, i32
  }
  func.func @transform_1(%arg0: i32, %arg1: i32, %arg2: i32) -> (i32, i32) {
    %c0_i32 = arith.constant 0 : i32
    return %arg2, %arg1 : i32, i32
  }
  func.func @transform_2(%arg0: i32, %arg1: i32, %arg2: i32) -> (i32, i32) {
    %c0_i32 = arith.constant 0 : i32
    %c0_i32_0 = arith.constant 0 : i32
    return %c0_i32, %arg1 : i32, i32
  }
  func.func @transform_3(%arg0: i32, %arg1: i32, %arg2: i32) -> (i32, i32) {
    %c0_i32 = arith.constant 0 : i32
    return %arg0, %arg1 : i32, i32
  }
}

module attributes {stable_mosaic.version = 11 : i64} {
  func.func @_matmul_bias_kernel(%arg0: i32, %arg1: i32, %arg2: i32, %arg3: memref<128x128xbf16, #tpu.memory_space<vmem>>, %arg4: memref<128x128xbf16, #tpu.memory_space<vmem>>, %arg5: memref<1x128xf32, #tpu.memory_space<vmem>>, %arg6: memref<128x128xf32, #tpu.memory_space<vmem>>, %arg7: memref<128x128xf32, #tpu.memory_space<vmem>>) attributes {dimension_semantics = [#tpu.dimension_semantics<parallel>, #tpu.dimension_semantics<parallel>, #tpu.dimension_semantics<arbitrary>], iteration_bounds = array<i64: 1, 1, 5>, scalar_prefetch = 0 : i64, scratch_operands = 1 : i64, tpu.core_type = #tpu.core_type<tc>, window_params = [{transform_indices = @transform_0, window_bounds = array<i64: 128, 128>}, {transform_indices = @transform_1, window_bounds = array<i64: 128, 128>}, {transform_indices = @transform_2, window_bounds = array<i64: 1, 128>}, {transform_indices = @transform_3, window_bounds = array<i64: 128, 128>}]} {
    %c0_i32 = arith.constant 0 : i32
    %0 = arith.cmpi eq, %arg2, %c0_i32 : i32
    %1 = arith.extui %0 : i1 to i32
    %c0_i32_0 = arith.constant 0 : i32
    %2 = arith.cmpi ne, %1, %c0_i32_0 : i32
    scf.if %2 {
      %cst_9 = arith.constant 0.000000e+00 : f32
      %12 = vector.broadcast %cst_9 : f32 to vector<128x128xf32>
      %c0_10 = arith.constant 0 : index
      %c0_11 = arith.constant 0 : index
      %13 = vector.load %arg7[%c0_10, %c0_11] : memref<128x128xf32, #tpu.memory_space<vmem>>, vector<128x128xf32>
      tpu.vector_store %arg7[%c0_10, %c0_11], %12 {strides = array<i32>} : memref<128x128xf32, #tpu.memory_space<vmem>>, vector<128x128xf32>,
    } else {
    }
    %c0 = arith.constant 0 : index
    %c0_1 = arith.constant 0 : index
    %3 = vector.load %arg7[%c0, %c0_1] : memref<128x128xf32, #tpu.memory_space<vmem>>, vector<128x128xf32>
    %c0_2 = arith.constant 0 : index
    %c0_3 = arith.constant 0 : index
    %4 = vector.load %arg3[%c0_2, %c0_3] : memref<128x128xbf16, #tpu.memory_space<vmem>>, vector<128x128xbf16>
    %c0_4 = arith.constant 0 : index
    %c0_5 = arith.constant 0 : index
    %5 = vector.load %arg4[%c0_4, %c0_5] : memref<128x128xbf16, #tpu.memory_space<vmem>>, vector<128x128xbf16>
    %cst = arith.constant dense<0.000000e+00> : vector<128x128xf32>
    %6 = tpu.matmul %4, %5, %cst {dimension_numbers = #tpu.dot_dimension_numbers<[1], [0], [0], [1], [0, 0, 1, 1], [], []>} : vector<128x128xbf16>, vector<128x128xbf16>, vector<128x128xf32> -> vector<128x128xf32>
    %7 = arith.addf %3, %6 : vector<128x128xf32>
    %c0_6 = arith.constant 0 : index
    %c0_7 = arith.constant 0 : index
    %8 = vector.load %arg7[%c0_6, %c0_7] : memref<128x128xf32, #tpu.memory_space<vmem>>, vector<128x128xf32>
    tpu.vector_store %arg7[%c0_6, %c0_7], %7 {strides = array<i32>} : memref<128x128xf32, #tpu.memory_space<vmem>>, vector<128x128xf32>,
    %c4_i32 = arith.constant 4 : i32
    %9 = arith.cmpi eq, %arg2, %c4_i32 : i32
    %10 = arith.extui %9 : i1 to i32
    %c0_i32_8 = arith.constant 0 : i32
    %11 = arith.cmpi ne, %10, %c0_i32_8 : i32
    scf.if %11 {
      %c0_9 = arith.constant 0 : index
      %c0_10 = arith.constant 0 : index
      %12 = vector.load %arg7[%c0_9, %c0_10] : memref<128x128xf32, #tpu.memory_space<vmem>>, vector<128x128xf32>
      %c0_11 = arith.constant 0 : index
      %c0_12 = arith.constant 0 : index
      %13 = vector.load %arg5[%c0_11, %c0_12] : memref<1x128xf32, #tpu.memory_space<vmem>>, vector<1x128xf32>
      %14 = vector.broadcast %13 : vector<1x128xf32> to vector<128x128xf32>
      %15 = arith.addf %12, %14 : vector<128x128xf32>
      %c0_13 = arith.constant 0 : index
      %c0_14 = arith.constant 0 : index
      %16 = vector.load %arg6[%c0_13, %c0_14] : memref<128x128xf32, #tpu.memory_space<vmem>>, vector<128x128xf32>
      tpu.vector_store %arg6[%c0_13, %c0_14], %15 {strides = array<i32>} : memref<128x128xf32, #tpu.memory_space<vmem>>, vector<128x128xf32>,
    } else {
    }
    return
  }
  func.func @transform_0(%arg0: i32, %arg1: i32, %arg2: i32) -> (i32, i32) {
    %c0_i32 = arith.constant 0 : i32
    return %arg0, %arg2 : i32, i32
  }
  func.func @transform_1(%arg0: i32, %arg1: i32, %arg2: i32) -> (i32, i32) {
    %c0_i32 = arith.constant 0 : i32
    return %arg2, %arg1 : i32, i32
  }
  func.func @transform_2(%arg0: i32, %arg1: i32, %arg2: i32) -> (i32, i32) {
    %c0_i32 = arith.constant 0 : i32
    %c0_i32_0 = arith.constant 0 : i32
    return %c0_i32, %arg1 : i32, i32
  }
  func.func @transform_3(%arg0: i32, %arg1: i32, %arg2: i32) -> (i32, i32) {
    %c0_i32 = arith.constant 0 : i32
    return %arg0, %arg1 : i32, i32
  }
}

module attributes {stable_mosaic.version = 11 : i64} {
  func.func @_inorm_kernel(%arg0: i32, %arg1: i32, %arg2: memref<1x64x128xf32, #tpu.memory_space<vmem>>, %arg3: memref<1x128xf32, #tpu.memory_space<vmem>>, %arg4: memref<1x128xf32, #tpu.memory_space<vmem>>, %arg5: memref<1x64x128xf32, #tpu.memory_space<vmem>>) attributes {dimension_semantics = [#tpu.dimension_semantics<parallel>, #tpu.dimension_semantics<parallel>], iteration_bounds = array<i64: 2, 1>, scalar_prefetch = 0 : i64, scratch_operands = 0 : i64, tpu.core_type = #tpu.core_type<tc>, window_params = [{transform_indices = @transform_0, window_bounds = array<i64: 1, 64, 128>}, {transform_indices = @transform_1, window_bounds = array<i64: 1, 128>}, {transform_indices = @transform_2, window_bounds = array<i64: 1, 128>}, {transform_indices = @transform_3, window_bounds = array<i64: 1, 64, 128>}]} {
    %c0 = arith.constant 0 : index
    %c0_0 = arith.constant 0 : index
    %c0_1 = arith.constant 0 : index
    %0 = vector.load %arg2[%c0, %c0_0, %c0_1] : memref<1x64x128xf32, #tpu.memory_space<vmem>>, vector<1x64x128xf32>
    %1 = vector.shape_cast %0 : vector<1x64x128xf32> to vector<64x128xf32>
    %cst = arith.constant dense<0.000000e+00> : vector<128xf32>
    %2 = vector.multi_reduction <add>, %1, %cst [0] : vector<64x128xf32> to vector<128xf32>
    %3 = vector.shape_cast %2 : vector<128xf32> to vector<1x128xf32>
    %cst_2 = arith.constant 6.400000e+01 : f32
    %4 = vector.broadcast %cst_2 : f32 to vector<1x128xf32>
    %5 = arith.divf %3, %4 : vector<1x128xf32>
    %6 = vector.broadcast %5 : vector<1x128xf32> to vector<64x128xf32>
    %7 = arith.subf %1, %6 : vector<64x128xf32>
    %8 = arith.mulf %7, %7 : vector<64x128xf32>
    %cst_3 = arith.constant dense<0.000000e+00> : vector<128xf32>
    %9 = vector.multi_reduction <add>, %8, %cst_3 [0] : vector<64x128xf32> to vector<128xf32>
    %10 = vector.shape_cast %9 : vector<128xf32> to vector<1x128xf32>
    %cst_4 = arith.constant 6.400000e+01 : f32
    %11 = vector.broadcast %cst_4 : f32 to vector<1x128xf32>
    %12 = arith.divf %10, %11 : vector<1x128xf32>
    %13 = vector.broadcast %5 : vector<1x128xf32> to vector<64x128xf32>
    %14 = arith.subf %1, %13 : vector<64x128xf32>
    %cst_5 = arith.constant 9.99999974E-6 : f32
    %15 = vector.broadcast %cst_5 : f32 to vector<1x128xf32>
    %16 = arith.addf %12, %15 : vector<1x128xf32>
    %17 = math.rsqrt %16 : vector<1x128xf32>
    %18 = vector.broadcast %17 : vector<1x128xf32> to vector<64x128xf32>
    %19 = arith.mulf %14, %18 : vector<64x128xf32>
    %c0_6 = arith.constant 0 : index
    %c0_7 = arith.constant 0 : index
    %20 = vector.load %arg3[%c0_6, %c0_7] : memref<1x128xf32, #tpu.memory_space<vmem>>, vector<1x128xf32>
    %21 = vector.broadcast %20 : vector<1x128xf32> to vector<64x128xf32>
    %22 = arith.mulf %19, %21 : vector<64x128xf32>
    %c0_8 = arith.constant 0 : index
    %c0_9 = arith.constant 0 : index
    %23 = vector.load %arg4[%c0_8, %c0_9] : memref<1x128xf32, #tpu.memory_space<vmem>>, vector<1x128xf32>
    %24 = vector.broadcast %23 : vector<1x128xf32> to vector<64x128xf32>
    %25 = arith.addf %22, %24 : vector<64x128xf32>
    %cst_10 = arith.constant 0.000000e+00 : f32
    %26 = vector.broadcast %cst_10 : f32 to vector<64x128xf32>
    %27 = arith.cmpf oge, %25, %26 : vector<64x128xf32>
    %cst_11 = arith.constant 2.000000e-01 : f32
    %28 = vector.broadcast %cst_11 : f32 to vector<64x128xf32>
    %29 = arith.mulf %28, %25 : vector<64x128xf32>
    %30 = arith.select %27, %25, %29 : vector<64x128xi1>, vector<64x128xf32>
    %c0_12 = arith.constant 0 : index
    %c0_13 = arith.constant 0 : index
    %c0_14 = arith.constant 0 : index
    %31 = vector.load %arg5[%c0_12, %c0_13, %c0_14] : memref<1x64x128xf32, #tpu.memory_space<vmem>>, vector<1x64x128xf32>
    %32 = vector.shape_cast %31 : vector<1x64x128xf32> to vector<64x128xf32>
    %33 = vector.shape_cast %30 : vector<64x128xf32> to vector<1x64x128xf32>
    tpu.vector_store %arg5[%c0_12, %c0_13, %c0_14], %33 {strides = array<i32>} : memref<1x64x128xf32, #tpu.memory_space<vmem>>, vector<1x64x128xf32>,
    return
  }
  func.func @transform_0(%arg0: i32, %arg1: i32) -> (i32, i32, i32) {
    %c0_i32 = arith.constant 0 : i32
    %c0_i32_0 = arith.constant 0 : i32
    return %arg0, %c0_i32, %arg1 : i32, i32, i32
  }
  func.func @transform_1(%arg0: i32, %arg1: i32) -> (i32, i32) {
    %c0_i32 = arith.constant 0 : i32
    %c0_i32_0 = arith.constant 0 : i32
    return %c0_i32, %arg1 : i32, i32
  }
  func.func @transform_2(%arg0: i32, %arg1: i32) -> (i32, i32) {
    %c0_i32 = arith.constant 0 : i32
    %c0_i32_0 = arith.constant 0 : i32
    return %c0_i32, %arg1 : i32, i32
  }
  func.func @transform_3(%arg0: i32, %arg1: i32) -> (i32, i32, i32) {
    %c0_i32 = arith.constant 0 : i32
    %c0_i32_0 = arith.constant 0 : i32
    return %arg0, %c0_i32, %arg1 : i32, i32, i32
  }
}

module attributes {stable_mosaic.version = 11 : i64} {
  func.func @_matmul_bias_kernel(%arg0: i32, %arg1: i32, %arg2: i32, %arg3: memref<128x128xbf16, #tpu.memory_space<vmem>>, %arg4: memref<128x128xbf16, #tpu.memory_space<vmem>>, %arg5: memref<1x128xf32, #tpu.memory_space<vmem>>, %arg6: memref<128x128xf32, #tpu.memory_space<vmem>>, %arg7: memref<128x128xf32, #tpu.memory_space<vmem>>) attributes {dimension_semantics = [#tpu.dimension_semantics<parallel>, #tpu.dimension_semantics<parallel>, #tpu.dimension_semantics<arbitrary>], iteration_bounds = array<i64: 1, 1, 1>, scalar_prefetch = 0 : i64, scratch_operands = 1 : i64, tpu.core_type = #tpu.core_type<tc>, window_params = [{transform_indices = @transform_0, window_bounds = array<i64: 128, 128>}, {transform_indices = @transform_1, window_bounds = array<i64: 128, 128>}, {transform_indices = @transform_2, window_bounds = array<i64: 1, 128>}, {transform_indices = @transform_3, window_bounds = array<i64: 128, 128>}]} {
    %c0_i32 = arith.constant 0 : i32
    %0 = arith.cmpi eq, %arg2, %c0_i32 : i32
    %1 = arith.extui %0 : i1 to i32
    %c0_i32_0 = arith.constant 0 : i32
    %2 = arith.cmpi ne, %1, %c0_i32_0 : i32
    scf.if %2 {
      %cst_10 = arith.constant 0.000000e+00 : f32
      %12 = vector.broadcast %cst_10 : f32 to vector<128x128xf32>
      %c0_11 = arith.constant 0 : index
      %c0_12 = arith.constant 0 : index
      %13 = vector.load %arg7[%c0_11, %c0_12] : memref<128x128xf32, #tpu.memory_space<vmem>>, vector<128x128xf32>
      tpu.vector_store %arg7[%c0_11, %c0_12], %12 {strides = array<i32>} : memref<128x128xf32, #tpu.memory_space<vmem>>, vector<128x128xf32>,
    } else {
    }
    %c0 = arith.constant 0 : index
    %c0_1 = arith.constant 0 : index
    %3 = vector.load %arg7[%c0, %c0_1] : memref<128x128xf32, #tpu.memory_space<vmem>>, vector<128x128xf32>
    %c0_2 = arith.constant 0 : index
    %c0_3 = arith.constant 0 : index
    %4 = vector.load %arg3[%c0_2, %c0_3] : memref<128x128xbf16, #tpu.memory_space<vmem>>, vector<128x128xbf16>
    %c0_4 = arith.constant 0 : index
    %c0_5 = arith.constant 0 : index
    %5 = vector.load %arg4[%c0_4, %c0_5] : memref<128x128xbf16, #tpu.memory_space<vmem>>, vector<128x128xbf16>
    %cst = arith.constant dense<0.000000e+00> : vector<128x128xf32>
    %6 = tpu.matmul %4, %5, %cst {dimension_numbers = #tpu.dot_dimension_numbers<[1], [0], [0], [1], [0, 0, 1, 1], [], []>} : vector<128x128xbf16>, vector<128x128xbf16>, vector<128x128xf32> -> vector<128x128xf32>
    %7 = arith.addf %3, %6 : vector<128x128xf32>
    %c0_6 = arith.constant 0 : index
    %c0_7 = arith.constant 0 : index
    %8 = vector.load %arg7[%c0_6, %c0_7] : memref<128x128xf32, #tpu.memory_space<vmem>>, vector<128x128xf32>
    tpu.vector_store %arg7[%c0_6, %c0_7], %7 {strides = array<i32>} : memref<128x128xf32, #tpu.memory_space<vmem>>, vector<128x128xf32>,
    %c0_i32_8 = arith.constant 0 : i32
    %9 = arith.cmpi eq, %arg2, %c0_i32_8 : i32
    %10 = arith.extui %9 : i1 to i32
    %c0_i32_9 = arith.constant 0 : i32
    %11 = arith.cmpi ne, %10, %c0_i32_9 : i32
    scf.if %11 {
      %c0_10 = arith.constant 0 : index
      %c0_11 = arith.constant 0 : index
      %12 = vector.load %arg7[%c0_10, %c0_11] : memref<128x128xf32, #tpu.memory_space<vmem>>, vector<128x128xf32>
      %c0_12 = arith.constant 0 : index
      %c0_13 = arith.constant 0 : index
      %13 = vector.load %arg5[%c0_12, %c0_13] : memref<1x128xf32, #tpu.memory_space<vmem>>, vector<1x128xf32>
      %14 = vector.broadcast %13 : vector<1x128xf32> to vector<128x128xf32>
      %15 = arith.addf %12, %14 : vector<128x128xf32>
      %c0_14 = arith.constant 0 : index
      %c0_15 = arith.constant 0 : index
      %16 = vector.load %arg6[%c0_14, %c0_15] : memref<128x128xf32, #tpu.memory_space<vmem>>, vector<128x128xf32>
      tpu.vector_store %arg6[%c0_14, %c0_15], %15 {strides = array<i32>} : memref<128x128xf32, #tpu.memory_space<vmem>>, vector<128x128xf32>,
    } else {
    }
    return
  }
  func.func @transform_0(%arg0: i32, %arg1: i32, %arg2: i32) -> (i32, i32) {
    %c0_i32 = arith.constant 0 : i32
    return %arg0, %arg2 : i32, i32
  }
  func.func @transform_1(%arg0: i32, %arg1: i32, %arg2: i32) -> (i32, i32) {
    %c0_i32 = arith.constant 0 : i32
    return %arg2, %arg1 : i32, i32
  }
  func.func @transform_2(%arg0: i32, %arg1: i32, %arg2: i32) -> (i32, i32) {
    %c0_i32 = arith.constant 0 : i32
    %c0_i32_0 = arith.constant 0 : i32
    return %c0_i32, %arg1 : i32, i32
  }
  func.func @transform_3(%arg0: i32, %arg1: i32, %arg2: i32) -> (i32, i32) {
    %c0_i32 = arith.constant 0 : i32
    return %arg0, %arg1 : i32, i32
  }
}

module attributes {stable_mosaic.version = 11 : i64} {
  func.func @_matmul_bias_kernel(%arg0: i32, %arg1: i32, %arg2: i32, %arg3: memref<128x128xbf16, #tpu.memory_space<vmem>>, %arg4: memref<128x256xbf16, #tpu.memory_space<vmem>>, %arg5: memref<1x256xf32, #tpu.memory_space<vmem>>, %arg6: memref<128x256xf32, #tpu.memory_space<vmem>>, %arg7: memref<128x256xf32, #tpu.memory_space<vmem>>) attributes {dimension_semantics = [#tpu.dimension_semantics<parallel>, #tpu.dimension_semantics<parallel>, #tpu.dimension_semantics<arbitrary>], iteration_bounds = array<i64: 1, 1, 1>, scalar_prefetch = 0 : i64, scratch_operands = 1 : i64, tpu.core_type = #tpu.core_type<tc>, window_params = [{transform_indices = @transform_0, window_bounds = array<i64: 128, 128>}, {transform_indices = @transform_1, window_bounds = array<i64: 128, 256>}, {transform_indices = @transform_2, window_bounds = array<i64: 1, 256>}, {transform_indices = @transform_3, window_bounds = array<i64: 128, 256>}]} {
    %c0_i32 = arith.constant 0 : i32
    %0 = arith.cmpi eq, %arg2, %c0_i32 : i32
    %1 = arith.extui %0 : i1 to i32
    %c0_i32_0 = arith.constant 0 : i32
    %2 = arith.cmpi ne, %1, %c0_i32_0 : i32
    scf.if %2 {
      %cst_10 = arith.constant 0.000000e+00 : f32
      %12 = vector.broadcast %cst_10 : f32 to vector<128x256xf32>
      %c0_11 = arith.constant 0 : index
      %c0_12 = arith.constant 0 : index
      %13 = vector.load %arg7[%c0_11, %c0_12] : memref<128x256xf32, #tpu.memory_space<vmem>>, vector<128x256xf32>
      tpu.vector_store %arg7[%c0_11, %c0_12], %12 {strides = array<i32>} : memref<128x256xf32, #tpu.memory_space<vmem>>, vector<128x256xf32>,
    } else {
    }
    %c0 = arith.constant 0 : index
    %c0_1 = arith.constant 0 : index
    %3 = vector.load %arg7[%c0, %c0_1] : memref<128x256xf32, #tpu.memory_space<vmem>>, vector<128x256xf32>
    %c0_2 = arith.constant 0 : index
    %c0_3 = arith.constant 0 : index
    %4 = vector.load %arg3[%c0_2, %c0_3] : memref<128x128xbf16, #tpu.memory_space<vmem>>, vector<128x128xbf16>
    %c0_4 = arith.constant 0 : index
    %c0_5 = arith.constant 0 : index
    %5 = vector.load %arg4[%c0_4, %c0_5] : memref<128x256xbf16, #tpu.memory_space<vmem>>, vector<128x256xbf16>
    %cst = arith.constant dense<0.000000e+00> : vector<128x256xf32>
    %6 = tpu.matmul %4, %5, %cst {dimension_numbers = #tpu.dot_dimension_numbers<[1], [0], [0], [1], [0, 0, 1, 1], [], []>} : vector<128x128xbf16>, vector<128x256xbf16>, vector<128x256xf32> -> vector<128x256xf32>
    %7 = arith.addf %3, %6 : vector<128x256xf32>
    %c0_6 = arith.constant 0 : index
    %c0_7 = arith.constant 0 : index
    %8 = vector.load %arg7[%c0_6, %c0_7] : memref<128x256xf32, #tpu.memory_space<vmem>>, vector<128x256xf32>
    tpu.vector_store %arg7[%c0_6, %c0_7], %7 {strides = array<i32>} : memref<128x256xf32, #tpu.memory_space<vmem>>, vector<128x256xf32>,
    %c0_i32_8 = arith.constant 0 : i32
    %9 = arith.cmpi eq, %arg2, %c0_i32_8 : i32
    %10 = arith.extui %9 : i1 to i32
    %c0_i32_9 = arith.constant 0 : i32
    %11 = arith.cmpi ne, %10, %c0_i32_9 : i32
    scf.if %11 {
      %c0_10 = arith.constant 0 : index
      %c0_11 = arith.constant 0 : index
      %12 = vector.load %arg7[%c0_10, %c0_11] : memref<128x256xf32, #tpu.memory_space<vmem>>, vector<128x256xf32>
      %c0_12 = arith.constant 0 : index
      %c0_13 = arith.constant 0 : index
      %13 = vector.load %arg5[%c0_12, %c0_13] : memref<1x256xf32, #tpu.memory_space<vmem>>, vector<1x256xf32>
      %14 = vector.broadcast %13 : vector<1x256xf32> to vector<128x256xf32>
      %15 = arith.addf %12, %14 : vector<128x256xf32>
      %c0_14 = arith.constant 0 : index
      %c0_15 = arith.constant 0 : index
      %16 = vector.load %arg6[%c0_14, %c0_15] : memref<128x256xf32, #tpu.memory_space<vmem>>, vector<128x256xf32>
      tpu.vector_store %arg6[%c0_14, %c0_15], %15 {strides = array<i32>} : memref<128x256xf32, #tpu.memory_space<vmem>>, vector<128x256xf32>,
    } else {
    }
    return
  }
  func.func @transform_0(%arg0: i32, %arg1: i32, %arg2: i32) -> (i32, i32) {
    %c0_i32 = arith.constant 0 : i32
    return %arg0, %arg2 : i32, i32
  }
  func.func @transform_1(%arg0: i32, %arg1: i32, %arg2: i32) -> (i32, i32) {
    %c0_i32 = arith.constant 0 : i32
    return %arg2, %arg1 : i32, i32
  }
  func.func @transform_2(%arg0: i32, %arg1: i32, %arg2: i32) -> (i32, i32) {
    %c0_i32 = arith.constant 0 : i32
    %c0_i32_0 = arith.constant 0 : i32
    return %c0_i32, %arg1 : i32, i32
  }
  func.func @transform_3(%arg0: i32, %arg1: i32, %arg2: i32) -> (i32, i32) {
    %c0_i32 = arith.constant 0 : i32
    return %arg0, %arg1 : i32, i32
  }
}

module attributes {stable_mosaic.version = 11 : i64} {
  func.func @_attn_kernel(%arg0: i32, %arg1: i32, %arg2: memref<1xf32, #tpu.memory_space<smem>>, %arg3: memref<1x64x16xbf16, #tpu.memory_space<vmem>>, %arg4: memref<1x64x16xbf16, #tpu.memory_space<vmem>>, %arg5: memref<1x64x128xbf16, #tpu.memory_space<vmem>>, %arg6: memref<1x64x128xf32, #tpu.memory_space<vmem>>, %arg7: memref<1x64x128xf32, #tpu.memory_space<vmem>>, %arg8: memref<64x1xf32, #tpu.memory_space<vmem>>, %arg9: memref<64x1xf32, #tpu.memory_space<vmem>>, %arg10: memref<64x128xf32, #tpu.memory_space<vmem>>) attributes {dimension_semantics = [#tpu.dimension_semantics<parallel>, #tpu.dimension_semantics<arbitrary>], iteration_bounds = array<i64: 2, 1>, scalar_prefetch = 0 : i64, scratch_operands = 3 : i64, tpu.core_type = #tpu.core_type<tc>, window_params = [{transform_indices = @transform_0, window_bounds = array<i64: 1>}, {transform_indices = @transform_1, window_bounds = array<i64: 1, 64, 16>}, {transform_indices = @transform_2, window_bounds = array<i64: 1, 64, 16>}, {transform_indices = @transform_3, window_bounds = array<i64: 1, 64, 128>}, {transform_indices = @transform_4, window_bounds = array<i64: 1, 64, 128>}, {transform_indices = @transform_5, window_bounds = array<i64: 1, 64, 128>}]} {
    %c0_i32 = arith.constant 0 : i32
    %0 = arith.cmpi eq, %arg1, %c0_i32 : i32
    %1 = arith.extui %0 : i1 to i32
    %c0_i32_0 = arith.constant 0 : i32
    %2 = arith.cmpi ne, %1, %c0_i32_0 : i32
    scf.if %2 {
      %cst_28 = arith.constant 0xFF800000 : f32
      %37 = vector.broadcast %cst_28 : f32 to vector<64x1xf32>
      %c0_29 = arith.constant 0 : index
      %c0_30 = arith.constant 0 : index
      %38 = vector.load %arg8[%c0_29, %c0_30] : memref<64x1xf32, #tpu.memory_space<vmem>>, vector<64x1xf32>
      tpu.vector_store %arg8[%c0_29, %c0_30], %37 {strides = array<i32>} : memref<64x1xf32, #tpu.memory_space<vmem>>, vector<64x1xf32>,
      %cst_31 = arith.constant 0.000000e+00 : f32
      %39 = vector.broadcast %cst_31 : f32 to vector<64x1xf32>
      %c0_32 = arith.constant 0 : index
      %c0_33 = arith.constant 0 : index
      %40 = vector.load %arg9[%c0_32, %c0_33] : memref<64x1xf32, #tpu.memory_space<vmem>>, vector<64x1xf32>
      tpu.vector_store %arg9[%c0_32, %c0_33], %39 {strides = array<i32>} : memref<64x1xf32, #tpu.memory_space<vmem>>, vector<64x1xf32>,
      %cst_34 = arith.constant 0.000000e+00 : f32
      %41 = vector.broadcast %cst_34 : f32 to vector<64x128xf32>
      %c0_35 = arith.constant 0 : index
      %c0_36 = arith.constant 0 : index
      %42 = vector.load %arg10[%c0_35, %c0_36] : memref<64x128xf32, #tpu.memory_space<vmem>>, vector<64x128xf32>
      tpu.vector_store %arg10[%c0_35, %c0_36], %41 {strides = array<i32>} : memref<64x128xf32, #tpu.memory_space<vmem>>, vector<64x128xf32>,
    } else {
    }
    %c0 = arith.constant 0 : index
    %c0_1 = arith.constant 0 : index
    %c0_2 = arith.constant 0 : index
    %3 = vector.load %arg3[%c0, %c0_1, %c0_2] : memref<1x64x16xbf16, #tpu.memory_space<vmem>>, vector<1x64x16xbf16>
    %4 = vector.shape_cast %3 : vector<1x64x16xbf16> to vector<64x16xbf16>
    %c0_3 = arith.constant 0 : index
    %c0_4 = arith.constant 0 : index
    %c0_5 = arith.constant 0 : index
    %5 = vector.load %arg4[%c0_3, %c0_4, %c0_5] : memref<1x64x16xbf16, #tpu.memory_space<vmem>>, vector<1x64x16xbf16>
    %6 = vector.shape_cast %5 : vector<1x64x16xbf16> to vector<64x16xbf16>
    %c0_6 = arith.constant 0 : index
    %c0_7 = arith.constant 0 : index
    %c0_8 = arith.constant 0 : index
    %7 = vector.load %arg5[%c0_6, %c0_7, %c0_8] : memref<1x64x128xbf16, #tpu.memory_space<vmem>>, vector<1x64x128xbf16>
    %8 = vector.shape_cast %7 : vector<1x64x128xbf16> to vector<64x128xbf16>
    %cst = arith.constant dense<0.000000e+00> : vector<64x64xf32>
    %9 = tpu.matmul %4, %6, %cst {dimension_numbers = #tpu.dot_dimension_numbers<[1], [1], [0], [0], [0, 0, 1, 0], [], []>} : vector<64x16xbf16>, vector<64x16xbf16>, vector<64x64xf32> -> vector<64x64xf32>
    %c0_9 = arith.constant 0 : index
    %c0_10 = arith.constant 0 : index
    %10 = vector.load %arg8[%c0_9, %c0_10] : memref<64x1xf32, #tpu.memory_space<vmem>>, vector<64x1xf32>
    %cst_11 = arith.constant dense<0xFF800000> : vector<64xf32>
    %11 = vector.multi_reduction <maximumf>, %9, %cst_11 [1] : vector<64x64xf32> to vector<64xf32>
    %12 = vector.shape_cast %11 : vector<64xf32> to vector<64x1xf32>
    %13 = arith.maximumf %10, %12 : vector<64x1xf32>
    %c0_12 = arith.constant 0 : index
    %c0_13 = arith.constant 0 : index
    %14 = vector.load %arg8[%c0_12, %c0_13] : memref<64x1xf32, #tpu.memory_space<vmem>>, vector<64x1xf32>
    %15 = arith.subf %14, %13 : vector<64x1xf32>
    %16 = math.exp %15 : vector<64x1xf32>
    %17 = vector.broadcast %13 : vector<64x1xf32> to vector<64x64xf32>
    %18 = arith.subf %9, %17 : vector<64x64xf32>
    %19 = math.exp %18 : vector<64x64xf32>
    %c0_14 = arith.constant 0 : index
    %c0_15 = arith.constant 0 : index
    %20 = vector.load %arg9[%c0_14, %c0_15] : memref<64x1xf32, #tpu.memory_space<vmem>>, vector<64x1xf32>
    %21 = arith.mulf %16, %20 : vector<64x1xf32>
    %cst_16 = arith.constant dense<0.000000e+00> : vector<64xf32>
    %22 = vector.multi_reduction <add>, %19, %cst_16 [1] : vector<64x64xf32> to vector<64xf32>
    %23 = vector.shape_cast %22 : vector<64xf32> to vector<64x1xf32>
    %24 = arith.addf %21, %23 : vector<64x1xf32>
    %c0_17 = arith.constant 0 : index
    %c0_18 = arith.constant 0 : index
    %25 = vector.load %arg9[%c0_17, %c0_18] : memref<64x1xf32, #tpu.memory_space<vmem>>, vector<64x1xf32>
    tpu.vector_store %arg9[%c0_17, %c0_18], %24 {strides = array<i32>} : memref<64x1xf32, #tpu.memory_space<vmem>>, vector<64x1xf32>,
    %c0_19 = arith.constant 0 : index
    %c0_20 = arith.constant 0 : index
    %26 = vector.load %arg10[%c0_19, %c0_20] : memref<64x128xf32, #tpu.memory_space<vmem>>, vector<64x128xf32>
    %27 = vector.broadcast %16 : vector<64x1xf32> to vector<64x128xf32>
    %28 = arith.mulf %27, %26 : vector<64x128xf32>
    %29 = arith.truncf %19 : vector<64x64xf32> to vector<64x64xbf16>
    %cst_21 = arith.constant dense<0.000000e+00> : vector<64x128xf32>
    %30 = tpu.matmul %29, %8, %cst_21 {dimension_numbers = #tpu.dot_dimension_numbers<[1], [0], [0], [1], [0, 0, 1, 1], [], []>} : vector<64x64xbf16>, vector<64x128xbf16>, vector<64x128xf32> -> vector<64x128xf32>
    %31 = arith.addf %28, %30 : vector<64x128xf32>
    %c0_22 = arith.constant 0 : index
    %c0_23 = arith.constant 0 : index
    %32 = vector.load %arg10[%c0_22, %c0_23] : memref<64x128xf32, #tpu.memory_space<vmem>>, vector<64x128xf32>
    tpu.vector_store %arg10[%c0_22, %c0_23], %31 {strides = array<i32>} : memref<64x128xf32, #tpu.memory_space<vmem>>, vector<64x128xf32>,
    %c0_24 = arith.constant 0 : index
    %c0_25 = arith.constant 0 : index
    %33 = vector.load %arg8[%c0_24, %c0_25] : memref<64x1xf32, #tpu.memory_space<vmem>>, vector<64x1xf32>
    tpu.vector_store %arg8[%c0_24, %c0_25], %13 {strides = array<i32>} : memref<64x1xf32, #tpu.memory_space<vmem>>, vector<64x1xf32>,
    %c0_i32_26 = arith.constant 0 : i32
    %34 = arith.cmpi eq, %arg1, %c0_i32_26 : i32
    %35 = arith.extui %34 : i1 to i32
    %c0_i32_27 = arith.constant 0 : i32
    %36 = arith.cmpi ne, %35, %c0_i32_27 : i32
    scf.if %36 {
      %c0_28 = arith.constant 0 : index
      %c0_29 = arith.constant 0 : index
      %37 = vector.load %arg9[%c0_28, %c0_29] : memref<64x1xf32, #tpu.memory_space<vmem>>, vector<64x1xf32>
      %38 = tpu.reciprocal %37 {approx = true} : vector<64x1xf32> -> vector<64x1xf32>
      %c0_30 = arith.constant 0 : index
      %39 = memref.load %arg2[%c0_30] : memref<1xf32, #tpu.memory_space<smem>>
      %c0_31 = arith.constant 0 : index
      %c0_32 = arith.constant 0 : index
      %40 = vector.load %arg10[%c0_31, %c0_32] : memref<64x128xf32, #tpu.memory_space<vmem>>, vector<64x128xf32>
      %41 = vector.broadcast %38 : vector<64x1xf32> to vector<64x128xf32>
      %42 = arith.mulf %40, %41 : vector<64x128xf32>
      %43 = vector.broadcast %39 : f32 to vector<64x128xf32>
      %44 = arith.mulf %43, %42 : vector<64x128xf32>
      %c0_33 = arith.constant 0 : index
      %c0_34 = arith.constant 0 : index
      %c0_35 = arith.constant 0 : index
      %45 = vector.load %arg6[%c0_33, %c0_34, %c0_35] : memref<1x64x128xf32, #tpu.memory_space<vmem>>, vector<1x64x128xf32>
      %46 = vector.shape_cast %45 : vector<1x64x128xf32> to vector<64x128xf32>
      %47 = arith.addf %44, %46 : vector<64x128xf32>
      %c0_36 = arith.constant 0 : index
      %c0_37 = arith.constant 0 : index
      %c0_38 = arith.constant 0 : index
      %48 = vector.load %arg7[%c0_36, %c0_37, %c0_38] : memref<1x64x128xf32, #tpu.memory_space<vmem>>, vector<1x64x128xf32>
      %49 = vector.shape_cast %48 : vector<1x64x128xf32> to vector<64x128xf32>
      %50 = vector.shape_cast %47 : vector<64x128xf32> to vector<1x64x128xf32>
      tpu.vector_store %arg7[%c0_36, %c0_37, %c0_38], %50 {strides = array<i32>} : memref<1x64x128xf32, #tpu.memory_space<vmem>>, vector<1x64x128xf32>,
    } else {
    }
    return
  }
  func.func @transform_0(%arg0: i32, %arg1: i32) -> i32 {
    %c0_i32 = arith.constant 0 : i32
    %c0_i32_0 = arith.constant 0 : i32
    return %c0_i32 : i32
  }
  func.func @transform_1(%arg0: i32, %arg1: i32) -> (i32, i32, i32) {
    %c0_i32 = arith.constant 0 : i32
    %c0_i32_0 = arith.constant 0 : i32
    %c0_i32_1 = arith.constant 0 : i32
    return %arg0, %c0_i32, %c0_i32_0 : i32, i32, i32
  }
  func.func @transform_2(%arg0: i32, %arg1: i32) -> (i32, i32, i32) {
    %c0_i32 = arith.constant 0 : i32
    %c0_i32_0 = arith.constant 0 : i32
    return %arg0, %arg1, %c0_i32 : i32, i32, i32
  }
  func.func @transform_3(%arg0: i32, %arg1: i32) -> (i32, i32, i32) {
    %c0_i32 = arith.constant 0 : i32
    %c0_i32_0 = arith.constant 0 : i32
    return %arg0, %arg1, %c0_i32 : i32, i32, i32
  }
  func.func @transform_4(%arg0: i32, %arg1: i32) -> (i32, i32, i32) {
    %c0_i32 = arith.constant 0 : i32
    %c0_i32_0 = arith.constant 0 : i32
    %c0_i32_1 = arith.constant 0 : i32
    return %arg0, %c0_i32, %c0_i32_0 : i32, i32, i32
  }
  func.func @transform_5(%arg0: i32, %arg1: i32) -> (i32, i32, i32) {
    %c0_i32 = arith.constant 0 : i32
    %c0_i32_0 = arith.constant 0 : i32
    %c0_i32_1 = arith.constant 0 : i32
    return %arg0, %c0_i32, %c0_i32_0 : i32, i32, i32
  }
}

module attributes {stable_mosaic.version = 11 : i64} {
  func.func @_matmul_bias_kernel(%arg0: i32, %arg1: i32, %arg2: i32, %arg3: memref<128x128xbf16, #tpu.memory_space<vmem>>, %arg4: memref<128x256xbf16, #tpu.memory_space<vmem>>, %arg5: memref<1x256xf32, #tpu.memory_space<vmem>>, %arg6: memref<128x256xf32, #tpu.memory_space<vmem>>, %arg7: memref<128x256xf32, #tpu.memory_space<vmem>>) attributes {dimension_semantics = [#tpu.dimension_semantics<parallel>, #tpu.dimension_semantics<parallel>, #tpu.dimension_semantics<arbitrary>], iteration_bounds = array<i64: 1, 1, 9>, scalar_prefetch = 0 : i64, scratch_operands = 1 : i64, tpu.core_type = #tpu.core_type<tc>, window_params = [{transform_indices = @transform_0, window_bounds = array<i64: 128, 128>}, {transform_indices = @transform_1, window_bounds = array<i64: 128, 256>}, {transform_indices = @transform_2, window_bounds = array<i64: 1, 256>}, {transform_indices = @transform_3, window_bounds = array<i64: 128, 256>}]} {
    %c0_i32 = arith.constant 0 : i32
    %0 = arith.cmpi eq, %arg2, %c0_i32 : i32
    %1 = arith.extui %0 : i1 to i32
    %c0_i32_0 = arith.constant 0 : i32
    %2 = arith.cmpi ne, %1, %c0_i32_0 : i32
    scf.if %2 {
      %cst_9 = arith.constant 0.000000e+00 : f32
      %12 = vector.broadcast %cst_9 : f32 to vector<128x256xf32>
      %c0_10 = arith.constant 0 : index
      %c0_11 = arith.constant 0 : index
      %13 = vector.load %arg7[%c0_10, %c0_11] : memref<128x256xf32, #tpu.memory_space<vmem>>, vector<128x256xf32>
      tpu.vector_store %arg7[%c0_10, %c0_11], %12 {strides = array<i32>} : memref<128x256xf32, #tpu.memory_space<vmem>>, vector<128x256xf32>,
    } else {
    }
    %c0 = arith.constant 0 : index
    %c0_1 = arith.constant 0 : index
    %3 = vector.load %arg7[%c0, %c0_1] : memref<128x256xf32, #tpu.memory_space<vmem>>, vector<128x256xf32>
    %c0_2 = arith.constant 0 : index
    %c0_3 = arith.constant 0 : index
    %4 = vector.load %arg3[%c0_2, %c0_3] : memref<128x128xbf16, #tpu.memory_space<vmem>>, vector<128x128xbf16>
    %c0_4 = arith.constant 0 : index
    %c0_5 = arith.constant 0 : index
    %5 = vector.load %arg4[%c0_4, %c0_5] : memref<128x256xbf16, #tpu.memory_space<vmem>>, vector<128x256xbf16>
    %cst = arith.constant dense<0.000000e+00> : vector<128x256xf32>
    %6 = tpu.matmul %4, %5, %cst {dimension_numbers = #tpu.dot_dimension_numbers<[1], [0], [0], [1], [0, 0, 1, 1], [], []>} : vector<128x128xbf16>, vector<128x256xbf16>, vector<128x256xf32> -> vector<128x256xf32>
    %7 = arith.addf %3, %6 : vector<128x256xf32>
    %c0_6 = arith.constant 0 : index
    %c0_7 = arith.constant 0 : index
    %8 = vector.load %arg7[%c0_6, %c0_7] : memref<128x256xf32, #tpu.memory_space<vmem>>, vector<128x256xf32>
    tpu.vector_store %arg7[%c0_6, %c0_7], %7 {strides = array<i32>} : memref<128x256xf32, #tpu.memory_space<vmem>>, vector<128x256xf32>,
    %c8_i32 = arith.constant 8 : i32
    %9 = arith.cmpi eq, %arg2, %c8_i32 : i32
    %10 = arith.extui %9 : i1 to i32
    %c0_i32_8 = arith.constant 0 : i32
    %11 = arith.cmpi ne, %10, %c0_i32_8 : i32
    scf.if %11 {
      %c0_9 = arith.constant 0 : index
      %c0_10 = arith.constant 0 : index
      %12 = vector.load %arg7[%c0_9, %c0_10] : memref<128x256xf32, #tpu.memory_space<vmem>>, vector<128x256xf32>
      %c0_11 = arith.constant 0 : index
      %c0_12 = arith.constant 0 : index
      %13 = vector.load %arg5[%c0_11, %c0_12] : memref<1x256xf32, #tpu.memory_space<vmem>>, vector<1x256xf32>
      %14 = vector.broadcast %13 : vector<1x256xf32> to vector<128x256xf32>
      %15 = arith.addf %12, %14 : vector<128x256xf32>
      %c0_13 = arith.constant 0 : index
      %c0_14 = arith.constant 0 : index
      %16 = vector.load %arg6[%c0_13, %c0_14] : memref<128x256xf32, #tpu.memory_space<vmem>>, vector<128x256xf32>
      tpu.vector_store %arg6[%c0_13, %c0_14], %15 {strides = array<i32>} : memref<128x256xf32, #tpu.memory_space<vmem>>, vector<128x256xf32>,
    } else {
    }
    return
  }
  func.func @transform_0(%arg0: i32, %arg1: i32, %arg2: i32) -> (i32, i32) {
    %c0_i32 = arith.constant 0 : i32
    return %arg0, %arg2 : i32, i32
  }
  func.func @transform_1(%arg0: i32, %arg1: i32, %arg2: i32) -> (i32, i32) {
    %c0_i32 = arith.constant 0 : i32
    return %arg2, %arg1 : i32, i32
  }
  func.func @transform_2(%arg0: i32, %arg1: i32, %arg2: i32) -> (i32, i32) {
    %c0_i32 = arith.constant 0 : i32
    %c0_i32_0 = arith.constant 0 : i32
    return %c0_i32, %arg1 : i32, i32
  }
  func.func @transform_3(%arg0: i32, %arg1: i32, %arg2: i32) -> (i32, i32) {
    %c0_i32 = arith.constant 0 : i32
    return %arg0, %arg1 : i32, i32
  }
}

module attributes {stable_mosaic.version = 11 : i64} {
  func.func @_inorm_kernel(%arg0: i32, %arg1: i32, %arg2: memref<1x16x256xf32, #tpu.memory_space<vmem>>, %arg3: memref<1x256xf32, #tpu.memory_space<vmem>>, %arg4: memref<1x256xf32, #tpu.memory_space<vmem>>, %arg5: memref<1x16x256xf32, #tpu.memory_space<vmem>>) attributes {dimension_semantics = [#tpu.dimension_semantics<parallel>, #tpu.dimension_semantics<parallel>], iteration_bounds = array<i64: 2, 1>, scalar_prefetch = 0 : i64, scratch_operands = 0 : i64, tpu.core_type = #tpu.core_type<tc>, window_params = [{transform_indices = @transform_0, window_bounds = array<i64: 1, 16, 256>}, {transform_indices = @transform_1, window_bounds = array<i64: 1, 256>}, {transform_indices = @transform_2, window_bounds = array<i64: 1, 256>}, {transform_indices = @transform_3, window_bounds = array<i64: 1, 16, 256>}]} {
    %c0 = arith.constant 0 : index
    %c0_0 = arith.constant 0 : index
    %c0_1 = arith.constant 0 : index
    %0 = vector.load %arg2[%c0, %c0_0, %c0_1] : memref<1x16x256xf32, #tpu.memory_space<vmem>>, vector<1x16x256xf32>
    %1 = vector.shape_cast %0 : vector<1x16x256xf32> to vector<16x256xf32>
    %cst = arith.constant dense<0.000000e+00> : vector<256xf32>
    %2 = vector.multi_reduction <add>, %1, %cst [0] : vector<16x256xf32> to vector<256xf32>
    %3 = vector.shape_cast %2 : vector<256xf32> to vector<1x256xf32>
    %cst_2 = arith.constant 1.600000e+01 : f32
    %4 = vector.broadcast %cst_2 : f32 to vector<1x256xf32>
    %5 = arith.divf %3, %4 : vector<1x256xf32>
    %6 = vector.broadcast %5 : vector<1x256xf32> to vector<16x256xf32>
    %7 = arith.subf %1, %6 : vector<16x256xf32>
    %8 = arith.mulf %7, %7 : vector<16x256xf32>
    %cst_3 = arith.constant dense<0.000000e+00> : vector<256xf32>
    %9 = vector.multi_reduction <add>, %8, %cst_3 [0] : vector<16x256xf32> to vector<256xf32>
    %10 = vector.shape_cast %9 : vector<256xf32> to vector<1x256xf32>
    %cst_4 = arith.constant 1.600000e+01 : f32
    %11 = vector.broadcast %cst_4 : f32 to vector<1x256xf32>
    %12 = arith.divf %10, %11 : vector<1x256xf32>
    %13 = vector.broadcast %5 : vector<1x256xf32> to vector<16x256xf32>
    %14 = arith.subf %1, %13 : vector<16x256xf32>
    %cst_5 = arith.constant 9.99999974E-6 : f32
    %15 = vector.broadcast %cst_5 : f32 to vector<1x256xf32>
    %16 = arith.addf %12, %15 : vector<1x256xf32>
    %17 = math.rsqrt %16 : vector<1x256xf32>
    %18 = vector.broadcast %17 : vector<1x256xf32> to vector<16x256xf32>
    %19 = arith.mulf %14, %18 : vector<16x256xf32>
    %c0_6 = arith.constant 0 : index
    %c0_7 = arith.constant 0 : index
    %20 = vector.load %arg3[%c0_6, %c0_7] : memref<1x256xf32, #tpu.memory_space<vmem>>, vector<1x256xf32>
    %21 = vector.broadcast %20 : vector<1x256xf32> to vector<16x256xf32>
    %22 = arith.mulf %19, %21 : vector<16x256xf32>
    %c0_8 = arith.constant 0 : index
    %c0_9 = arith.constant 0 : index
    %23 = vector.load %arg4[%c0_8, %c0_9] : memref<1x256xf32, #tpu.memory_space<vmem>>, vector<1x256xf32>
    %24 = vector.broadcast %23 : vector<1x256xf32> to vector<16x256xf32>
    %25 = arith.addf %22, %24 : vector<16x256xf32>
    %cst_10 = arith.constant 0.000000e+00 : f32
    %26 = vector.broadcast %cst_10 : f32 to vector<16x256xf32>
    %27 = arith.cmpf oge, %25, %26 : vector<16x256xf32>
    %cst_11 = arith.constant 2.000000e-01 : f32
    %28 = vector.broadcast %cst_11 : f32 to vector<16x256xf32>
    %29 = arith.mulf %28, %25 : vector<16x256xf32>
    %30 = arith.select %27, %25, %29 : vector<16x256xi1>, vector<16x256xf32>
    %c0_12 = arith.constant 0 : index
    %c0_13 = arith.constant 0 : index
    %c0_14 = arith.constant 0 : index
    %31 = vector.load %arg5[%c0_12, %c0_13, %c0_14] : memref<1x16x256xf32, #tpu.memory_space<vmem>>, vector<1x16x256xf32>
    %32 = vector.shape_cast %31 : vector<1x16x256xf32> to vector<16x256xf32>
    %33 = vector.shape_cast %30 : vector<16x256xf32> to vector<1x16x256xf32>
    tpu.vector_store %arg5[%c0_12, %c0_13, %c0_14], %33 {strides = array<i32>} : memref<1x16x256xf32, #tpu.memory_space<vmem>>, vector<1x16x256xf32>,
    return
  }
  func.func @transform_0(%arg0: i32, %arg1: i32) -> (i32, i32, i32) {
    %c0_i32 = arith.constant 0 : i32
    %c0_i32_0 = arith.constant 0 : i32
    return %arg0, %c0_i32, %arg1 : i32, i32, i32
  }
  func.func @transform_1(%arg0: i32, %arg1: i32) -> (i32, i32) {
    %c0_i32 = arith.constant 0 : i32
    %c0_i32_0 = arith.constant 0 : i32
    return %c0_i32, %arg1 : i32, i32
  }
  func.func @transform_2(%arg0: i32, %arg1: i32) -> (i32, i32) {
    %c0_i32 = arith.constant 0 : i32
    %c0_i32_0 = arith.constant 0 : i32
    return %c0_i32, %arg1 : i32, i32
  }
  func.func @transform_3(%arg0: i32, %arg1: i32) -> (i32, i32, i32) {
    %c0_i32 = arith.constant 0 : i32
    %c0_i32_0 = arith.constant 0 : i32
    return %arg0, %c0_i32, %arg1 : i32, i32, i32
  }
}

module attributes {stable_mosaic.version = 11 : i64} {
  func.func @_add_kernel(%arg0: i32, %arg1: memref<32x256xf32, #tpu.memory_space<vmem>>, %arg2: memref<32x256xf32, #tpu.memory_space<vmem>>, %arg3: memref<32x256xf32, #tpu.memory_space<vmem>>) attributes {dimension_semantics = [#tpu.dimension_semantics<parallel>], iteration_bounds = array<i64: 1>, scalar_prefetch = 0 : i64, scratch_operands = 0 : i64, tpu.core_type = #tpu.core_type<tc>, window_params = [{transform_indices = @transform_0, window_bounds = array<i64: 32, 256>}, {transform_indices = @transform_1, window_bounds = array<i64: 32, 256>}, {transform_indices = @transform_2, window_bounds = array<i64: 32, 256>}]} {
    %c0 = arith.constant 0 : index
    %c0_0 = arith.constant 0 : index
    %0 = vector.load %arg1[%c0, %c0_0] : memref<32x256xf32, #tpu.memory_space<vmem>>, vector<32x256xf32>
    %c0_1 = arith.constant 0 : index
    %c0_2 = arith.constant 0 : index
    %1 = vector.load %arg2[%c0_1, %c0_2] : memref<32x256xf32, #tpu.memory_space<vmem>>, vector<32x256xf32>
    %2 = arith.addf %0, %1 : vector<32x256xf32>
    %c0_3 = arith.constant 0 : index
    %c0_4 = arith.constant 0 : index
    %3 = vector.load %arg3[%c0_3, %c0_4] : memref<32x256xf32, #tpu.memory_space<vmem>>, vector<32x256xf32>
    tpu.vector_store %arg3[%c0_3, %c0_4], %2 {strides = array<i32>} : memref<32x256xf32, #tpu.memory_space<vmem>>, vector<32x256xf32>,
    return
  }
  func.func @transform_0(%arg0: i32) -> (i32, i32) {
    %c0_i32 = arith.constant 0 : i32
    %c0_i32_0 = arith.constant 0 : i32
    return %arg0, %c0_i32 : i32, i32
  }
  func.func @transform_1(%arg0: i32) -> (i32, i32) {
    %c0_i32 = arith.constant 0 : i32
    %c0_i32_0 = arith.constant 0 : i32
    return %arg0, %c0_i32 : i32, i32
  }
  func.func @transform_2(%arg0: i32) -> (i32, i32) {
    %c0_i32 = arith.constant 0 : i32
    %c0_i32_0 = arith.constant 0 : i32
    return %arg0, %c0_i32 : i32, i32
  }
}

module attributes {stable_mosaic.version = 11 : i64} {
  func.func @_matmul_bias_kernel(%arg0: i32, %arg1: i32, %arg2: i32, %arg3: memref<128x256xbf16, #tpu.memory_space<vmem>>, %arg4: memref<256x256xbf16, #tpu.memory_space<vmem>>, %arg5: memref<1x256xf32, #tpu.memory_space<vmem>>, %arg6: memref<128x256xf32, #tpu.memory_space<vmem>>, %arg7: memref<128x256xf32, #tpu.memory_space<vmem>>) attributes {dimension_semantics = [#tpu.dimension_semantics<parallel>, #tpu.dimension_semantics<parallel>, #tpu.dimension_semantics<arbitrary>], iteration_bounds = array<i64: 1, 1, 1>, scalar_prefetch = 0 : i64, scratch_operands = 1 : i64, tpu.core_type = #tpu.core_type<tc>, window_params = [{transform_indices = @transform_0, window_bounds = array<i64: 128, 256>}, {transform_indices = @transform_1, window_bounds = array<i64: 256, 256>}, {transform_indices = @transform_2, window_bounds = array<i64: 1, 256>}, {transform_indices = @transform_3, window_bounds = array<i64: 128, 256>}]} {
    %c0_i32 = arith.constant 0 : i32
    %0 = arith.cmpi eq, %arg2, %c0_i32 : i32
    %1 = arith.extui %0 : i1 to i32
    %c0_i32_0 = arith.constant 0 : i32
    %2 = arith.cmpi ne, %1, %c0_i32_0 : i32
    scf.if %2 {
      %cst_10 = arith.constant 0.000000e+00 : f32
      %12 = vector.broadcast %cst_10 : f32 to vector<128x256xf32>
      %c0_11 = arith.constant 0 : index
      %c0_12 = arith.constant 0 : index
      %13 = vector.load %arg7[%c0_11, %c0_12] : memref<128x256xf32, #tpu.memory_space<vmem>>, vector<128x256xf32>
      tpu.vector_store %arg7[%c0_11, %c0_12], %12 {strides = array<i32>} : memref<128x256xf32, #tpu.memory_space<vmem>>, vector<128x256xf32>,
    } else {
    }
    %c0 = arith.constant 0 : index
    %c0_1 = arith.constant 0 : index
    %3 = vector.load %arg7[%c0, %c0_1] : memref<128x256xf32, #tpu.memory_space<vmem>>, vector<128x256xf32>
    %c0_2 = arith.constant 0 : index
    %c0_3 = arith.constant 0 : index
    %4 = vector.load %arg3[%c0_2, %c0_3] : memref<128x256xbf16, #tpu.memory_space<vmem>>, vector<128x256xbf16>
    %c0_4 = arith.constant 0 : index
    %c0_5 = arith.constant 0 : index
    %5 = vector.load %arg4[%c0_4, %c0_5] : memref<256x256xbf16, #tpu.memory_space<vmem>>, vector<256x256xbf16>
    %cst = arith.constant dense<0.000000e+00> : vector<128x256xf32>
    %6 = tpu.matmul %4, %5, %cst {dimension_numbers = #tpu.dot_dimension_numbers<[1], [0], [0], [1], [0, 0, 1, 1], [], []>} : vector<128x256xbf16>, vector<256x256xbf16>, vector<128x256xf32> -> vector<128x256xf32>
    %7 = arith.addf %3, %6 : vector<128x256xf32>
    %c0_6 = arith.constant 0 : index
    %c0_7 = arith.constant 0 : index
    %8 = vector.load %arg7[%c0_6, %c0_7] : memref<128x256xf32, #tpu.memory_space<vmem>>, vector<128x256xf32>
    tpu.vector_store %arg7[%c0_6, %c0_7], %7 {strides = array<i32>} : memref<128x256xf32, #tpu.memory_space<vmem>>, vector<128x256xf32>,
    %c0_i32_8 = arith.constant 0 : i32
    %9 = arith.cmpi eq, %arg2, %c0_i32_8 : i32
    %10 = arith.extui %9 : i1 to i32
    %c0_i32_9 = arith.constant 0 : i32
    %11 = arith.cmpi ne, %10, %c0_i32_9 : i32
    scf.if %11 {
      %c0_10 = arith.constant 0 : index
      %c0_11 = arith.constant 0 : index
      %12 = vector.load %arg7[%c0_10, %c0_11] : memref<128x256xf32, #tpu.memory_space<vmem>>, vector<128x256xf32>
      %c0_12 = arith.constant 0 : index
      %c0_13 = arith.constant 0 : index
      %13 = vector.load %arg5[%c0_12, %c0_13] : memref<1x256xf32, #tpu.memory_space<vmem>>, vector<1x256xf32>
      %14 = vector.broadcast %13 : vector<1x256xf32> to vector<128x256xf32>
      %15 = arith.addf %12, %14 : vector<128x256xf32>
      %c0_14 = arith.constant 0 : index
      %c0_15 = arith.constant 0 : index
      %16 = vector.load %arg6[%c0_14, %c0_15] : memref<128x256xf32, #tpu.memory_space<vmem>>, vector<128x256xf32>
      tpu.vector_store %arg6[%c0_14, %c0_15], %15 {strides = array<i32>} : memref<128x256xf32, #tpu.memory_space<vmem>>, vector<128x256xf32>,
    } else {
    }
    return
  }
  func.func @transform_0(%arg0: i32, %arg1: i32, %arg2: i32) -> (i32, i32) {
    %c0_i32 = arith.constant 0 : i32
    return %arg0, %arg2 : i32, i32
  }
  func.func @transform_1(%arg0: i32, %arg1: i32, %arg2: i32) -> (i32, i32) {
    %c0_i32 = arith.constant 0 : i32
    return %arg2, %arg1 : i32, i32
  }
  func.func @transform_2(%arg0: i32, %arg1: i32, %arg2: i32) -> (i32, i32) {
    %c0_i32 = arith.constant 0 : i32
    %c0_i32_0 = arith.constant 0 : i32
    return %c0_i32, %arg1 : i32, i32
  }
  func.func @transform_3(%arg0: i32, %arg1: i32, %arg2: i32) -> (i32, i32) {
    %c0_i32 = arith.constant 0 : i32
    return %arg0, %arg1 : i32, i32
  }
}

module attributes {stable_mosaic.version = 11 : i64} {
  func.func @_attn_kernel(%arg0: i32, %arg1: i32, %arg2: memref<1xf32, #tpu.memory_space<smem>>, %arg3: memref<1x16x32xbf16, #tpu.memory_space<vmem>>, %arg4: memref<1x16x32xbf16, #tpu.memory_space<vmem>>, %arg5: memref<1x16x256xbf16, #tpu.memory_space<vmem>>, %arg6: memref<1x16x256xf32, #tpu.memory_space<vmem>>, %arg7: memref<1x16x256xf32, #tpu.memory_space<vmem>>, %arg8: memref<16x1xf32, #tpu.memory_space<vmem>>, %arg9: memref<16x1xf32, #tpu.memory_space<vmem>>, %arg10: memref<16x256xf32, #tpu.memory_space<vmem>>) attributes {dimension_semantics = [#tpu.dimension_semantics<parallel>, #tpu.dimension_semantics<arbitrary>], iteration_bounds = array<i64: 2, 1>, scalar_prefetch = 0 : i64, scratch_operands = 3 : i64, tpu.core_type = #tpu.core_type<tc>, window_params = [{transform_indices = @transform_0, window_bounds = array<i64: 1>}, {transform_indices = @transform_1, window_bounds = array<i64: 1, 16, 32>}, {transform_indices = @transform_2, window_bounds = array<i64: 1, 16, 32>}, {transform_indices = @transform_3, window_bounds = array<i64: 1, 16, 256>}, {transform_indices = @transform_4, window_bounds = array<i64: 1, 16, 256>}, {transform_indices = @transform_5, window_bounds = array<i64: 1, 16, 256>}]} {
    %c0_i32 = arith.constant 0 : i32
    %0 = arith.cmpi eq, %arg1, %c0_i32 : i32
    %1 = arith.extui %0 : i1 to i32
    %c0_i32_0 = arith.constant 0 : i32
    %2 = arith.cmpi ne, %1, %c0_i32_0 : i32
    scf.if %2 {
      %cst_28 = arith.constant 0xFF800000 : f32
      %37 = vector.broadcast %cst_28 : f32 to vector<16x1xf32>
      %c0_29 = arith.constant 0 : index
      %c0_30 = arith.constant 0 : index
      %38 = vector.load %arg8[%c0_29, %c0_30] : memref<16x1xf32, #tpu.memory_space<vmem>>, vector<16x1xf32>
      tpu.vector_store %arg8[%c0_29, %c0_30], %37 {strides = array<i32>} : memref<16x1xf32, #tpu.memory_space<vmem>>, vector<16x1xf32>,
      %cst_31 = arith.constant 0.000000e+00 : f32
      %39 = vector.broadcast %cst_31 : f32 to vector<16x1xf32>
      %c0_32 = arith.constant 0 : index
      %c0_33 = arith.constant 0 : index
      %40 = vector.load %arg9[%c0_32, %c0_33] : memref<16x1xf32, #tpu.memory_space<vmem>>, vector<16x1xf32>
      tpu.vector_store %arg9[%c0_32, %c0_33], %39 {strides = array<i32>} : memref<16x1xf32, #tpu.memory_space<vmem>>, vector<16x1xf32>,
      %cst_34 = arith.constant 0.000000e+00 : f32
      %41 = vector.broadcast %cst_34 : f32 to vector<16x256xf32>
      %c0_35 = arith.constant 0 : index
      %c0_36 = arith.constant 0 : index
      %42 = vector.load %arg10[%c0_35, %c0_36] : memref<16x256xf32, #tpu.memory_space<vmem>>, vector<16x256xf32>
      tpu.vector_store %arg10[%c0_35, %c0_36], %41 {strides = array<i32>} : memref<16x256xf32, #tpu.memory_space<vmem>>, vector<16x256xf32>,
    } else {
    }
    %c0 = arith.constant 0 : index
    %c0_1 = arith.constant 0 : index
    %c0_2 = arith.constant 0 : index
    %3 = vector.load %arg3[%c0, %c0_1, %c0_2] : memref<1x16x32xbf16, #tpu.memory_space<vmem>>, vector<1x16x32xbf16>
    %4 = vector.shape_cast %3 : vector<1x16x32xbf16> to vector<16x32xbf16>
    %c0_3 = arith.constant 0 : index
    %c0_4 = arith.constant 0 : index
    %c0_5 = arith.constant 0 : index
    %5 = vector.load %arg4[%c0_3, %c0_4, %c0_5] : memref<1x16x32xbf16, #tpu.memory_space<vmem>>, vector<1x16x32xbf16>
    %6 = vector.shape_cast %5 : vector<1x16x32xbf16> to vector<16x32xbf16>
    %c0_6 = arith.constant 0 : index
    %c0_7 = arith.constant 0 : index
    %c0_8 = arith.constant 0 : index
    %7 = vector.load %arg5[%c0_6, %c0_7, %c0_8] : memref<1x16x256xbf16, #tpu.memory_space<vmem>>, vector<1x16x256xbf16>
    %8 = vector.shape_cast %7 : vector<1x16x256xbf16> to vector<16x256xbf16>
    %cst = arith.constant dense<0.000000e+00> : vector<16x16xf32>
    %9 = tpu.matmul %4, %6, %cst {dimension_numbers = #tpu.dot_dimension_numbers<[1], [1], [0], [0], [0, 0, 1, 0], [], []>} : vector<16x32xbf16>, vector<16x32xbf16>, vector<16x16xf32> -> vector<16x16xf32>
    %c0_9 = arith.constant 0 : index
    %c0_10 = arith.constant 0 : index
    %10 = vector.load %arg8[%c0_9, %c0_10] : memref<16x1xf32, #tpu.memory_space<vmem>>, vector<16x1xf32>
    %cst_11 = arith.constant dense<0xFF800000> : vector<16xf32>
    %11 = vector.multi_reduction <maximumf>, %9, %cst_11 [1] : vector<16x16xf32> to vector<16xf32>
    %12 = vector.shape_cast %11 : vector<16xf32> to vector<16x1xf32>
    %13 = arith.maximumf %10, %12 : vector<16x1xf32>
    %c0_12 = arith.constant 0 : index
    %c0_13 = arith.constant 0 : index
    %14 = vector.load %arg8[%c0_12, %c0_13] : memref<16x1xf32, #tpu.memory_space<vmem>>, vector<16x1xf32>
    %15 = arith.subf %14, %13 : vector<16x1xf32>
    %16 = math.exp %15 : vector<16x1xf32>
    %17 = vector.broadcast %13 : vector<16x1xf32> to vector<16x16xf32>
    %18 = arith.subf %9, %17 : vector<16x16xf32>
    %19 = math.exp %18 : vector<16x16xf32>
    %c0_14 = arith.constant 0 : index
    %c0_15 = arith.constant 0 : index
    %20 = vector.load %arg9[%c0_14, %c0_15] : memref<16x1xf32, #tpu.memory_space<vmem>>, vector<16x1xf32>
    %21 = arith.mulf %16, %20 : vector<16x1xf32>
    %cst_16 = arith.constant dense<0.000000e+00> : vector<16xf32>
    %22 = vector.multi_reduction <add>, %19, %cst_16 [1] : vector<16x16xf32> to vector<16xf32>
    %23 = vector.shape_cast %22 : vector<16xf32> to vector<16x1xf32>
    %24 = arith.addf %21, %23 : vector<16x1xf32>
    %c0_17 = arith.constant 0 : index
    %c0_18 = arith.constant 0 : index
    %25 = vector.load %arg9[%c0_17, %c0_18] : memref<16x1xf32, #tpu.memory_space<vmem>>, vector<16x1xf32>
    tpu.vector_store %arg9[%c0_17, %c0_18], %24 {strides = array<i32>} : memref<16x1xf32, #tpu.memory_space<vmem>>, vector<16x1xf32>,
    %c0_19 = arith.constant 0 : index
    %c0_20 = arith.constant 0 : index
    %26 = vector.load %arg10[%c0_19, %c0_20] : memref<16x256xf32, #tpu.memory_space<vmem>>, vector<16x256xf32>
    %27 = vector.broadcast %16 : vector<16x1xf32> to vector<16x256xf32>
    %28 = arith.mulf %27, %26 : vector<16x256xf32>
    %29 = arith.truncf %19 : vector<16x16xf32> to vector<16x16xbf16>
    %cst_21 = arith.constant dense<0.000000e+00> : vector<16x256xf32>
    %30 = tpu.matmul %29, %8, %cst_21 {dimension_numbers = #tpu.dot_dimension_numbers<[1], [0], [0], [1], [0, 0, 1, 1], [], []>} : vector<16x16xbf16>, vector<16x256xbf16>, vector<16x256xf32> -> vector<16x256xf32>
    %31 = arith.addf %28, %30 : vector<16x256xf32>
    %c0_22 = arith.constant 0 : index
    %c0_23 = arith.constant 0 : index
    %32 = vector.load %arg10[%c0_22, %c0_23] : memref<16x256xf32, #tpu.memory_space<vmem>>, vector<16x256xf32>
    tpu.vector_store %arg10[%c0_22, %c0_23], %31 {strides = array<i32>} : memref<16x256xf32, #tpu.memory_space<vmem>>, vector<16x256xf32>,
    %c0_24 = arith.constant 0 : index
    %c0_25 = arith.constant 0 : index
    %33 = vector.load %arg8[%c0_24, %c0_25] : memref<16x1xf32, #tpu.memory_space<vmem>>, vector<16x1xf32>
    tpu.vector_store %arg8[%c0_24, %c0_25], %13 {strides = array<i32>} : memref<16x1xf32, #tpu.memory_space<vmem>>, vector<16x1xf32>,
    %c0_i32_26 = arith.constant 0 : i32
    %34 = arith.cmpi eq, %arg1, %c0_i32_26 : i32
    %35 = arith.extui %34 : i1 to i32
    %c0_i32_27 = arith.constant 0 : i32
    %36 = arith.cmpi ne, %35, %c0_i32_27 : i32
    scf.if %36 {
      %c0_28 = arith.constant 0 : index
      %c0_29 = arith.constant 0 : index
      %37 = vector.load %arg9[%c0_28, %c0_29] : memref<16x1xf32, #tpu.memory_space<vmem>>, vector<16x1xf32>
      %38 = tpu.reciprocal %37 {approx = true} : vector<16x1xf32> -> vector<16x1xf32>
      %c0_30 = arith.constant 0 : index
      %39 = memref.load %arg2[%c0_30] : memref<1xf32, #tpu.memory_space<smem>>
      %c0_31 = arith.constant 0 : index
      %c0_32 = arith.constant 0 : index
      %40 = vector.load %arg10[%c0_31, %c0_32] : memref<16x256xf32, #tpu.memory_space<vmem>>, vector<16x256xf32>
      %41 = vector.broadcast %38 : vector<16x1xf32> to vector<16x256xf32>
      %42 = arith.mulf %40, %41 : vector<16x256xf32>
      %43 = vector.broadcast %39 : f32 to vector<16x256xf32>
      %44 = arith.mulf %43, %42 : vector<16x256xf32>
      %c0_33 = arith.constant 0 : index
      %c0_34 = arith.constant 0 : index
      %c0_35 = arith.constant 0 : index
      %45 = vector.load %arg6[%c0_33, %c0_34, %c0_35] : memref<1x16x256xf32, #tpu.memory_space<vmem>>, vector<1x16x256xf32>
      %46 = vector.shape_cast %45 : vector<1x16x256xf32> to vector<16x256xf32>
      %47 = arith.addf %44, %46 : vector<16x256xf32>
      %c0_36 = arith.constant 0 : index
      %c0_37 = arith.constant 0 : index
      %c0_38 = arith.constant 0 : index
      %48 = vector.load %arg7[%c0_36, %c0_37, %c0_38] : memref<1x16x256xf32, #tpu.memory_space<vmem>>, vector<1x16x256xf32>
      %49 = vector.shape_cast %48 : vector<1x16x256xf32> to vector<16x256xf32>
      %50 = vector.shape_cast %47 : vector<16x256xf32> to vector<1x16x256xf32>
      tpu.vector_store %arg7[%c0_36, %c0_37, %c0_38], %50 {strides = array<i32>} : memref<1x16x256xf32, #tpu.memory_space<vmem>>, vector<1x16x256xf32>,
    } else {
    }
    return
  }
  func.func @transform_0(%arg0: i32, %arg1: i32) -> i32 {
    %c0_i32 = arith.constant 0 : i32
    %c0_i32_0 = arith.constant 0 : i32
    return %c0_i32 : i32
  }
  func.func @transform_1(%arg0: i32, %arg1: i32) -> (i32, i32, i32) {
    %c0_i32 = arith.constant 0 : i32
    %c0_i32_0 = arith.constant 0 : i32
    %c0_i32_1 = arith.constant 0 : i32
    return %arg0, %c0_i32, %c0_i32_0 : i32, i32, i32
  }
  func.func @transform_2(%arg0: i32, %arg1: i32) -> (i32, i32, i32) {
    %c0_i32 = arith.constant 0 : i32
    %c0_i32_0 = arith.constant 0 : i32
    return %arg0, %arg1, %c0_i32 : i32, i32, i32
  }
  func.func @transform_3(%arg0: i32, %arg1: i32) -> (i32, i32, i32) {
    %c0_i32 = arith.constant 0 : i32
    %c0_i32_0 = arith.constant 0 : i32
    return %arg0, %arg1, %c0_i32 : i32, i32, i32
  }
  func.func @transform_4(%arg0: i32, %arg1: i32) -> (i32, i32, i32) {
    %c0_i32 = arith.constant 0 : i32
    %c0_i32_0 = arith.constant 0 : i32
    %c0_i32_1 = arith.constant 0 : i32
    return %arg0, %c0_i32, %c0_i32_0 : i32, i32, i32
  }
  func.func @transform_5(%arg0: i32, %arg1: i32) -> (i32, i32, i32) {
    %c0_i32 = arith.constant 0 : i32
    %c0_i32_0 = arith.constant 0 : i32
    %c0_i32_1 = arith.constant 0 : i32
    return %arg0, %c0_i32, %c0_i32_0 : i32, i32, i32
  }
}

module attributes {stable_mosaic.version = 11 : i64} {
  func.func @_matmul_bias_kernel(%arg0: i32, %arg1: i32, %arg2: i32, %arg3: memref<128x256xbf16, #tpu.memory_space<vmem>>, %arg4: memref<256x128xbf16, #tpu.memory_space<vmem>>, %arg5: memref<1x128xf32, #tpu.memory_space<vmem>>, %arg6: memref<128x128xf32, #tpu.memory_space<vmem>>, %arg7: memref<128x128xf32, #tpu.memory_space<vmem>>) attributes {dimension_semantics = [#tpu.dimension_semantics<parallel>, #tpu.dimension_semantics<parallel>, #tpu.dimension_semantics<arbitrary>], iteration_bounds = array<i64: 1, 1, 1>, scalar_prefetch = 0 : i64, scratch_operands = 1 : i64, tpu.core_type = #tpu.core_type<tc>, window_params = [{transform_indices = @transform_0, window_bounds = array<i64: 128, 256>}, {transform_indices = @transform_1, window_bounds = array<i64: 256, 128>}, {transform_indices = @transform_2, window_bounds = array<i64: 1, 128>}, {transform_indices = @transform_3, window_bounds = array<i64: 128, 128>}]} {
    %c0_i32 = arith.constant 0 : i32
    %0 = arith.cmpi eq, %arg2, %c0_i32 : i32
    %1 = arith.extui %0 : i1 to i32
    %c0_i32_0 = arith.constant 0 : i32
    %2 = arith.cmpi ne, %1, %c0_i32_0 : i32
    scf.if %2 {
      %cst_10 = arith.constant 0.000000e+00 : f32
      %12 = vector.broadcast %cst_10 : f32 to vector<128x128xf32>
      %c0_11 = arith.constant 0 : index
      %c0_12 = arith.constant 0 : index
      %13 = vector.load %arg7[%c0_11, %c0_12] : memref<128x128xf32, #tpu.memory_space<vmem>>, vector<128x128xf32>
      tpu.vector_store %arg7[%c0_11, %c0_12], %12 {strides = array<i32>} : memref<128x128xf32, #tpu.memory_space<vmem>>, vector<128x128xf32>,
    } else {
    }
    %c0 = arith.constant 0 : index
    %c0_1 = arith.constant 0 : index
    %3 = vector.load %arg7[%c0, %c0_1] : memref<128x128xf32, #tpu.memory_space<vmem>>, vector<128x128xf32>
    %c0_2 = arith.constant 0 : index
    %c0_3 = arith.constant 0 : index
    %4 = vector.load %arg3[%c0_2, %c0_3] : memref<128x256xbf16, #tpu.memory_space<vmem>>, vector<128x256xbf16>
    %c0_4 = arith.constant 0 : index
    %c0_5 = arith.constant 0 : index
    %5 = vector.load %arg4[%c0_4, %c0_5] : memref<256x128xbf16, #tpu.memory_space<vmem>>, vector<256x128xbf16>
    %cst = arith.constant dense<0.000000e+00> : vector<128x128xf32>
    %6 = tpu.matmul %4, %5, %cst {dimension_numbers = #tpu.dot_dimension_numbers<[1], [0], [0], [1], [0, 0, 1, 1], [], []>} : vector<128x256xbf16>, vector<256x128xbf16>, vector<128x128xf32> -> vector<128x128xf32>
    %7 = arith.addf %3, %6 : vector<128x128xf32>
    %c0_6 = arith.constant 0 : index
    %c0_7 = arith.constant 0 : index
    %8 = vector.load %arg7[%c0_6, %c0_7] : memref<128x128xf32, #tpu.memory_space<vmem>>, vector<128x128xf32>
    tpu.vector_store %arg7[%c0_6, %c0_7], %7 {strides = array<i32>} : memref<128x128xf32, #tpu.memory_space<vmem>>, vector<128x128xf32>,
    %c0_i32_8 = arith.constant 0 : i32
    %9 = arith.cmpi eq, %arg2, %c0_i32_8 : i32
    %10 = arith.extui %9 : i1 to i32
    %c0_i32_9 = arith.constant 0 : i32
    %11 = arith.cmpi ne, %10, %c0_i32_9 : i32
    scf.if %11 {
      %c0_10 = arith.constant 0 : index
      %c0_11 = arith.constant 0 : index
      %12 = vector.load %arg7[%c0_10, %c0_11] : memref<128x128xf32, #tpu.memory_space<vmem>>, vector<128x128xf32>
      %c0_12 = arith.constant 0 : index
      %c0_13 = arith.constant 0 : index
      %13 = vector.load %arg5[%c0_12, %c0_13] : memref<1x128xf32, #tpu.memory_space<vmem>>, vector<1x128xf32>
      %14 = vector.broadcast %13 : vector<1x128xf32> to vector<128x128xf32>
      %15 = arith.addf %12, %14 : vector<128x128xf32>
      %c0_14 = arith.constant 0 : index
      %c0_15 = arith.constant 0 : index
      %16 = vector.load %arg6[%c0_14, %c0_15] : memref<128x128xf32, #tpu.memory_space<vmem>>, vector<128x128xf32>
      tpu.vector_store %arg6[%c0_14, %c0_15], %15 {strides = array<i32>} : memref<128x128xf32, #tpu.memory_space<vmem>>, vector<128x128xf32>,
    } else {
    }
    return
  }
  func.func @transform_0(%arg0: i32, %arg1: i32, %arg2: i32) -> (i32, i32) {
    %c0_i32 = arith.constant 0 : i32
    return %arg0, %arg2 : i32, i32
  }
  func.func @transform_1(%arg0: i32, %arg1: i32, %arg2: i32) -> (i32, i32) {
    %c0_i32 = arith.constant 0 : i32
    return %arg2, %arg1 : i32, i32
  }
  func.func @transform_2(%arg0: i32, %arg1: i32, %arg2: i32) -> (i32, i32) {
    %c0_i32 = arith.constant 0 : i32
    %c0_i32_0 = arith.constant 0 : i32
    return %c0_i32, %arg1 : i32, i32
  }
  func.func @transform_3(%arg0: i32, %arg1: i32, %arg2: i32) -> (i32, i32) {
    %c0_i32 = arith.constant 0 : i32
    return %arg0, %arg1 : i32, i32
  }
}

module attributes {stable_mosaic.version = 11 : i64} {
  func.func @_matmul_bias_kernel(%arg0: i32, %arg1: i32, %arg2: i32, %arg3: memref<128x256xbf16, #tpu.memory_space<vmem>>, %arg4: memref<256x256xbf16, #tpu.memory_space<vmem>>, %arg5: memref<1x256xf32, #tpu.memory_space<vmem>>, %arg6: memref<128x256xf32, #tpu.memory_space<vmem>>, %arg7: memref<128x256xf32, #tpu.memory_space<vmem>>) attributes {dimension_semantics = [#tpu.dimension_semantics<parallel>, #tpu.dimension_semantics<parallel>, #tpu.dimension_semantics<arbitrary>], iteration_bounds = array<i64: 1, 1, 9>, scalar_prefetch = 0 : i64, scratch_operands = 1 : i64, tpu.core_type = #tpu.core_type<tc>, window_params = [{transform_indices = @transform_0, window_bounds = array<i64: 128, 256>}, {transform_indices = @transform_1, window_bounds = array<i64: 256, 256>}, {transform_indices = @transform_2, window_bounds = array<i64: 1, 256>}, {transform_indices = @transform_3, window_bounds = array<i64: 128, 256>}]} {
    %c0_i32 = arith.constant 0 : i32
    %0 = arith.cmpi eq, %arg2, %c0_i32 : i32
    %1 = arith.extui %0 : i1 to i32
    %c0_i32_0 = arith.constant 0 : i32
    %2 = arith.cmpi ne, %1, %c0_i32_0 : i32
    scf.if %2 {
      %cst_9 = arith.constant 0.000000e+00 : f32
      %12 = vector.broadcast %cst_9 : f32 to vector<128x256xf32>
      %c0_10 = arith.constant 0 : index
      %c0_11 = arith.constant 0 : index
      %13 = vector.load %arg7[%c0_10, %c0_11] : memref<128x256xf32, #tpu.memory_space<vmem>>, vector<128x256xf32>
      tpu.vector_store %arg7[%c0_10, %c0_11], %12 {strides = array<i32>} : memref<128x256xf32, #tpu.memory_space<vmem>>, vector<128x256xf32>,
    } else {
    }
    %c0 = arith.constant 0 : index
    %c0_1 = arith.constant 0 : index
    %3 = vector.load %arg7[%c0, %c0_1] : memref<128x256xf32, #tpu.memory_space<vmem>>, vector<128x256xf32>
    %c0_2 = arith.constant 0 : index
    %c0_3 = arith.constant 0 : index
    %4 = vector.load %arg3[%c0_2, %c0_3] : memref<128x256xbf16, #tpu.memory_space<vmem>>, vector<128x256xbf16>
    %c0_4 = arith.constant 0 : index
    %c0_5 = arith.constant 0 : index
    %5 = vector.load %arg4[%c0_4, %c0_5] : memref<256x256xbf16, #tpu.memory_space<vmem>>, vector<256x256xbf16>
    %cst = arith.constant dense<0.000000e+00> : vector<128x256xf32>
    %6 = tpu.matmul %4, %5, %cst {dimension_numbers = #tpu.dot_dimension_numbers<[1], [0], [0], [1], [0, 0, 1, 1], [], []>} : vector<128x256xbf16>, vector<256x256xbf16>, vector<128x256xf32> -> vector<128x256xf32>
    %7 = arith.addf %3, %6 : vector<128x256xf32>
    %c0_6 = arith.constant 0 : index
    %c0_7 = arith.constant 0 : index
    %8 = vector.load %arg7[%c0_6, %c0_7] : memref<128x256xf32, #tpu.memory_space<vmem>>, vector<128x256xf32>
    tpu.vector_store %arg7[%c0_6, %c0_7], %7 {strides = array<i32>} : memref<128x256xf32, #tpu.memory_space<vmem>>, vector<128x256xf32>,
    %c8_i32 = arith.constant 8 : i32
    %9 = arith.cmpi eq, %arg2, %c8_i32 : i32
    %10 = arith.extui %9 : i1 to i32
    %c0_i32_8 = arith.constant 0 : i32
    %11 = arith.cmpi ne, %10, %c0_i32_8 : i32
    scf.if %11 {
      %c0_9 = arith.constant 0 : index
      %c0_10 = arith.constant 0 : index
      %12 = vector.load %arg7[%c0_9, %c0_10] : memref<128x256xf32, #tpu.memory_space<vmem>>, vector<128x256xf32>
      %c0_11 = arith.constant 0 : index
      %c0_12 = arith.constant 0 : index
      %13 = vector.load %arg5[%c0_11, %c0_12] : memref<1x256xf32, #tpu.memory_space<vmem>>, vector<1x256xf32>
      %14 = vector.broadcast %13 : vector<1x256xf32> to vector<128x256xf32>
      %15 = arith.addf %12, %14 : vector<128x256xf32>
      %c0_13 = arith.constant 0 : index
      %c0_14 = arith.constant 0 : index
      %16 = vector.load %arg6[%c0_13, %c0_14] : memref<128x256xf32, #tpu.memory_space<vmem>>, vector<128x256xf32>
      tpu.vector_store %arg6[%c0_13, %c0_14], %15 {strides = array<i32>} : memref<128x256xf32, #tpu.memory_space<vmem>>, vector<128x256xf32>,
    } else {
    }
    return
  }
  func.func @transform_0(%arg0: i32, %arg1: i32, %arg2: i32) -> (i32, i32) {
    %c0_i32 = arith.constant 0 : i32
    return %arg0, %arg2 : i32, i32
  }
  func.func @transform_1(%arg0: i32, %arg1: i32, %arg2: i32) -> (i32, i32) {
    %c0_i32 = arith.constant 0 : i32
    return %arg2, %arg1 : i32, i32
  }
  func.func @transform_2(%arg0: i32, %arg1: i32, %arg2: i32) -> (i32, i32) {
    %c0_i32 = arith.constant 0 : i32
    %c0_i32_0 = arith.constant 0 : i32
    return %c0_i32, %arg1 : i32, i32
  }
  func.func @transform_3(%arg0: i32, %arg1: i32, %arg2: i32) -> (i32, i32) {
    %c0_i32 = arith.constant 0 : i32
    return %arg0, %arg1 : i32, i32
  }
}

module attributes {stable_mosaic.version = 11 : i64} {
  func.func @_inorm_res_kernel(%arg0: i32, %arg1: i32, %arg2: memref<1x16x256xf32, #tpu.memory_space<vmem>>, %arg3: memref<1x256xf32, #tpu.memory_space<vmem>>, %arg4: memref<1x256xf32, #tpu.memory_space<vmem>>, %arg5: memref<1x16x256xf32, #tpu.memory_space<vmem>>, %arg6: memref<1x16x256xf32, #tpu.memory_space<vmem>>) attributes {dimension_semantics = [#tpu.dimension_semantics<parallel>, #tpu.dimension_semantics<parallel>], iteration_bounds = array<i64: 2, 1>, scalar_prefetch = 0 : i64, scratch_operands = 0 : i64, tpu.core_type = #tpu.core_type<tc>, window_params = [{transform_indices = @transform_0, window_bounds = array<i64: 1, 16, 256>}, {transform_indices = @transform_1, window_bounds = array<i64: 1, 256>}, {transform_indices = @transform_2, window_bounds = array<i64: 1, 256>}, {transform_indices = @transform_3, window_bounds = array<i64: 1, 16, 256>}, {transform_indices = @transform_4, window_bounds = array<i64: 1, 16, 256>}]} {
    %c0 = arith.constant 0 : index
    %c0_0 = arith.constant 0 : index
    %c0_1 = arith.constant 0 : index
    %0 = vector.load %arg2[%c0, %c0_0, %c0_1] : memref<1x16x256xf32, #tpu.memory_space<vmem>>, vector<1x16x256xf32>
    %1 = vector.shape_cast %0 : vector<1x16x256xf32> to vector<16x256xf32>
    %cst = arith.constant dense<0.000000e+00> : vector<256xf32>
    %2 = vector.multi_reduction <add>, %1, %cst [0] : vector<16x256xf32> to vector<256xf32>
    %3 = vector.shape_cast %2 : vector<256xf32> to vector<1x256xf32>
    %cst_2 = arith.constant 1.600000e+01 : f32
    %4 = vector.broadcast %cst_2 : f32 to vector<1x256xf32>
    %5 = arith.divf %3, %4 : vector<1x256xf32>
    %6 = vector.broadcast %5 : vector<1x256xf32> to vector<16x256xf32>
    %7 = arith.subf %1, %6 : vector<16x256xf32>
    %8 = arith.mulf %7, %7 : vector<16x256xf32>
    %cst_3 = arith.constant dense<0.000000e+00> : vector<256xf32>
    %9 = vector.multi_reduction <add>, %8, %cst_3 [0] : vector<16x256xf32> to vector<256xf32>
    %10 = vector.shape_cast %9 : vector<256xf32> to vector<1x256xf32>
    %cst_4 = arith.constant 1.600000e+01 : f32
    %11 = vector.broadcast %cst_4 : f32 to vector<1x256xf32>
    %12 = arith.divf %10, %11 : vector<1x256xf32>
    %13 = vector.broadcast %5 : vector<1x256xf32> to vector<16x256xf32>
    %14 = arith.subf %1, %13 : vector<16x256xf32>
    %cst_5 = arith.constant 9.99999974E-6 : f32
    %15 = vector.broadcast %cst_5 : f32 to vector<1x256xf32>
    %16 = arith.addf %12, %15 : vector<1x256xf32>
    %17 = math.rsqrt %16 : vector<1x256xf32>
    %18 = vector.broadcast %17 : vector<1x256xf32> to vector<16x256xf32>
    %19 = arith.mulf %14, %18 : vector<16x256xf32>
    %c0_6 = arith.constant 0 : index
    %c0_7 = arith.constant 0 : index
    %20 = vector.load %arg3[%c0_6, %c0_7] : memref<1x256xf32, #tpu.memory_space<vmem>>, vector<1x256xf32>
    %21 = vector.broadcast %20 : vector<1x256xf32> to vector<16x256xf32>
    %22 = arith.mulf %19, %21 : vector<16x256xf32>
    %c0_8 = arith.constant 0 : index
    %c0_9 = arith.constant 0 : index
    %23 = vector.load %arg4[%c0_8, %c0_9] : memref<1x256xf32, #tpu.memory_space<vmem>>, vector<1x256xf32>
    %24 = vector.broadcast %23 : vector<1x256xf32> to vector<16x256xf32>
    %25 = arith.addf %22, %24 : vector<16x256xf32>
    %c0_10 = arith.constant 0 : index
    %c0_11 = arith.constant 0 : index
    %c0_12 = arith.constant 0 : index
    %26 = vector.load %arg5[%c0_10, %c0_11, %c0_12] : memref<1x16x256xf32, #tpu.memory_space<vmem>>, vector<1x16x256xf32>
    %27 = vector.shape_cast %26 : vector<1x16x256xf32> to vector<16x256xf32>
    %28 = arith.addf %25, %27 : vector<16x256xf32>
    %c0_13 = arith.constant 0 : index
    %c0_14 = arith.constant 0 : index
    %c0_15 = arith.constant 0 : index
    %29 = vector.load %arg6[%c0_13, %c0_14, %c0_15] : memref<1x16x256xf32, #tpu.memory_space<vmem>>, vector<1x16x256xf32>
    %30 = vector.shape_cast %29 : vector<1x16x256xf32> to vector<16x256xf32>
    %31 = vector.shape_cast %28 : vector<16x256xf32> to vector<1x16x256xf32>
    tpu.vector_store %arg6[%c0_13, %c0_14, %c0_15], %31 {strides = array<i32>} : memref<1x16x256xf32, #tpu.memory_space<vmem>>, vector<1x16x256xf32>,
    return
  }
  func.func @transform_0(%arg0: i32, %arg1: i32) -> (i32, i32, i32) {
    %c0_i32 = arith.constant 0 : i32
    %c0_i32_0 = arith.constant 0 : i32
    return %arg0, %c0_i32, %arg1 : i32, i32, i32
  }
  func.func @transform_1(%arg0: i32, %arg1: i32) -> (i32, i32) {
    %c0_i32 = arith.constant 0 : i32
    %c0_i32_0 = arith.constant 0 : i32
    return %c0_i32, %arg1 : i32, i32
  }
  func.func @transform_2(%arg0: i32, %arg1: i32) -> (i32, i32) {
    %c0_i32 = arith.constant 0 : i32
    %c0_i32_0 = arith.constant 0 : i32
    return %c0_i32, %arg1 : i32, i32
  }
  func.func @transform_3(%arg0: i32, %arg1: i32) -> (i32, i32, i32) {
    %c0_i32 = arith.constant 0 : i32
    %c0_i32_0 = arith.constant 0 : i32
    return %arg0, %c0_i32, %arg1 : i32, i32, i32
  }
  func.func @transform_4(%arg0: i32, %arg1: i32) -> (i32, i32, i32) {
    %c0_i32 = arith.constant 0 : i32
    %c0_i32_0 = arith.constant 0 : i32
    return %arg0, %c0_i32, %arg1 : i32, i32, i32
  }
}

module attributes {stable_mosaic.version = 11 : i64} {
  func.func @_matmul_bias_kernel(%arg0: i32, %arg1: i32, %arg2: i32, %arg3: memref<128x256xbf16, #tpu.memory_space<vmem>>, %arg4: memref<256x128xbf16, #tpu.memory_space<vmem>>, %arg5: memref<1x128xf32, #tpu.memory_space<vmem>>, %arg6: memref<128x128xf32, #tpu.memory_space<vmem>>, %arg7: memref<128x128xf32, #tpu.memory_space<vmem>>) attributes {dimension_semantics = [#tpu.dimension_semantics<parallel>, #tpu.dimension_semantics<parallel>, #tpu.dimension_semantics<arbitrary>], iteration_bounds = array<i64: 1, 1, 9>, scalar_prefetch = 0 : i64, scratch_operands = 1 : i64, tpu.core_type = #tpu.core_type<tc>, window_params = [{transform_indices = @transform_0, window_bounds = array<i64: 128, 256>}, {transform_indices = @transform_1, window_bounds = array<i64: 256, 128>}, {transform_indices = @transform_2, window_bounds = array<i64: 1, 128>}, {transform_indices = @transform_3, window_bounds = array<i64: 128, 128>}]} {
    %c0_i32 = arith.constant 0 : i32
    %0 = arith.cmpi eq, %arg2, %c0_i32 : i32
    %1 = arith.extui %0 : i1 to i32
    %c0_i32_0 = arith.constant 0 : i32
    %2 = arith.cmpi ne, %1, %c0_i32_0 : i32
    scf.if %2 {
      %cst_9 = arith.constant 0.000000e+00 : f32
      %12 = vector.broadcast %cst_9 : f32 to vector<128x128xf32>
      %c0_10 = arith.constant 0 : index
      %c0_11 = arith.constant 0 : index
      %13 = vector.load %arg7[%c0_10, %c0_11] : memref<128x128xf32, #tpu.memory_space<vmem>>, vector<128x128xf32>
      tpu.vector_store %arg7[%c0_10, %c0_11], %12 {strides = array<i32>} : memref<128x128xf32, #tpu.memory_space<vmem>>, vector<128x128xf32>,
    } else {
    }
    %c0 = arith.constant 0 : index
    %c0_1 = arith.constant 0 : index
    %3 = vector.load %arg7[%c0, %c0_1] : memref<128x128xf32, #tpu.memory_space<vmem>>, vector<128x128xf32>
    %c0_2 = arith.constant 0 : index
    %c0_3 = arith.constant 0 : index
    %4 = vector.load %arg3[%c0_2, %c0_3] : memref<128x256xbf16, #tpu.memory_space<vmem>>, vector<128x256xbf16>
    %c0_4 = arith.constant 0 : index
    %c0_5 = arith.constant 0 : index
    %5 = vector.load %arg4[%c0_4, %c0_5] : memref<256x128xbf16, #tpu.memory_space<vmem>>, vector<256x128xbf16>
    %cst = arith.constant dense<0.000000e+00> : vector<128x128xf32>
    %6 = tpu.matmul %4, %5, %cst {dimension_numbers = #tpu.dot_dimension_numbers<[1], [0], [0], [1], [0, 0, 1, 1], [], []>} : vector<128x256xbf16>, vector<256x128xbf16>, vector<128x128xf32> -> vector<128x128xf32>
    %7 = arith.addf %3, %6 : vector<128x128xf32>
    %c0_6 = arith.constant 0 : index
    %c0_7 = arith.constant 0 : index
    %8 = vector.load %arg7[%c0_6, %c0_7] : memref<128x128xf32, #tpu.memory_space<vmem>>, vector<128x128xf32>
    tpu.vector_store %arg7[%c0_6, %c0_7], %7 {strides = array<i32>} : memref<128x128xf32, #tpu.memory_space<vmem>>, vector<128x128xf32>,
    %c8_i32 = arith.constant 8 : i32
    %9 = arith.cmpi eq, %arg2, %c8_i32 : i32
    %10 = arith.extui %9 : i1 to i32
    %c0_i32_8 = arith.constant 0 : i32
    %11 = arith.cmpi ne, %10, %c0_i32_8 : i32
    scf.if %11 {
      %c0_9 = arith.constant 0 : index
      %c0_10 = arith.constant 0 : index
      %12 = vector.load %arg7[%c0_9, %c0_10] : memref<128x128xf32, #tpu.memory_space<vmem>>, vector<128x128xf32>
      %c0_11 = arith.constant 0 : index
      %c0_12 = arith.constant 0 : index
      %13 = vector.load %arg5[%c0_11, %c0_12] : memref<1x128xf32, #tpu.memory_space<vmem>>, vector<1x128xf32>
      %14 = vector.broadcast %13 : vector<1x128xf32> to vector<128x128xf32>
      %15 = arith.addf %12, %14 : vector<128x128xf32>
      %c0_13 = arith.constant 0 : index
      %c0_14 = arith.constant 0 : index
      %16 = vector.load %arg6[%c0_13, %c0_14] : memref<128x128xf32, #tpu.memory_space<vmem>>, vector<128x128xf32>
      tpu.vector_store %arg6[%c0_13, %c0_14], %15 {strides = array<i32>} : memref<128x128xf32, #tpu.memory_space<vmem>>, vector<128x128xf32>,
    } else {
    }
    return
  }
  func.func @transform_0(%arg0: i32, %arg1: i32, %arg2: i32) -> (i32, i32) {
    %c0_i32 = arith.constant 0 : i32
    return %arg0, %arg2 : i32, i32
  }
  func.func @transform_1(%arg0: i32, %arg1: i32, %arg2: i32) -> (i32, i32) {
    %c0_i32 = arith.constant 0 : i32
    return %arg2, %arg1 : i32, i32
  }
  func.func @transform_2(%arg0: i32, %arg1: i32, %arg2: i32) -> (i32, i32) {
    %c0_i32 = arith.constant 0 : i32
    %c0_i32_0 = arith.constant 0 : i32
    return %c0_i32, %arg1 : i32, i32
  }
  func.func @transform_3(%arg0: i32, %arg1: i32, %arg2: i32) -> (i32, i32) {
    %c0_i32 = arith.constant 0 : i32
    return %arg0, %arg1 : i32, i32
  }
}

module attributes {stable_mosaic.version = 11 : i64} {
  func.func @_add_kernel(%arg0: i32, %arg1: memref<128x128xf32, #tpu.memory_space<vmem>>, %arg2: memref<128x128xf32, #tpu.memory_space<vmem>>, %arg3: memref<128x128xf32, #tpu.memory_space<vmem>>) attributes {dimension_semantics = [#tpu.dimension_semantics<parallel>], iteration_bounds = array<i64: 1>, scalar_prefetch = 0 : i64, scratch_operands = 0 : i64, tpu.core_type = #tpu.core_type<tc>, window_params = [{transform_indices = @transform_0, window_bounds = array<i64: 128, 128>}, {transform_indices = @transform_1, window_bounds = array<i64: 128, 128>}, {transform_indices = @transform_2, window_bounds = array<i64: 128, 128>}]} {
    %c0 = arith.constant 0 : index
    %c0_0 = arith.constant 0 : index
    %0 = vector.load %arg1[%c0, %c0_0] : memref<128x128xf32, #tpu.memory_space<vmem>>, vector<128x128xf32>
    %c0_1 = arith.constant 0 : index
    %c0_2 = arith.constant 0 : index
    %1 = vector.load %arg2[%c0_1, %c0_2] : memref<128x128xf32, #tpu.memory_space<vmem>>, vector<128x128xf32>
    %2 = arith.addf %0, %1 : vector<128x128xf32>
    %c0_3 = arith.constant 0 : index
    %c0_4 = arith.constant 0 : index
    %3 = vector.load %arg3[%c0_3, %c0_4] : memref<128x128xf32, #tpu.memory_space<vmem>>, vector<128x128xf32>
    tpu.vector_store %arg3[%c0_3, %c0_4], %2 {strides = array<i32>} : memref<128x128xf32, #tpu.memory_space<vmem>>, vector<128x128xf32>,
    return
  }
  func.func @transform_0(%arg0: i32) -> (i32, i32) {
    %c0_i32 = arith.constant 0 : i32
    %c0_i32_0 = arith.constant 0 : i32
    return %arg0, %c0_i32 : i32, i32
  }
  func.func @transform_1(%arg0: i32) -> (i32, i32) {
    %c0_i32 = arith.constant 0 : i32
    %c0_i32_0 = arith.constant 0 : i32
    return %arg0, %c0_i32 : i32, i32
  }
  func.func @transform_2(%arg0: i32) -> (i32, i32) {
    %c0_i32 = arith.constant 0 : i32
    %c0_i32_0 = arith.constant 0 : i32
    return %arg0, %c0_i32 : i32, i32
  }
}

module attributes {stable_mosaic.version = 11 : i64} {
  func.func @_matmul_bias_kernel(%arg0: i32, %arg1: i32, %arg2: i32, %arg3: memref<256x128xbf16, #tpu.memory_space<vmem>>, %arg4: memref<128x128xbf16, #tpu.memory_space<vmem>>, %arg5: memref<1x128xf32, #tpu.memory_space<vmem>>, %arg6: memref<256x128xf32, #tpu.memory_space<vmem>>, %arg7: memref<256x128xf32, #tpu.memory_space<vmem>>) attributes {dimension_semantics = [#tpu.dimension_semantics<parallel>, #tpu.dimension_semantics<parallel>, #tpu.dimension_semantics<arbitrary>], iteration_bounds = array<i64: 2, 1, 9>, scalar_prefetch = 0 : i64, scratch_operands = 1 : i64, tpu.core_type = #tpu.core_type<tc>, window_params = [{transform_indices = @transform_0, window_bounds = array<i64: 256, 128>}, {transform_indices = @transform_1, window_bounds = array<i64: 128, 128>}, {transform_indices = @transform_2, window_bounds = array<i64: 1, 128>}, {transform_indices = @transform_3, window_bounds = array<i64: 256, 128>}]} {
    %c0_i32 = arith.constant 0 : i32
    %0 = arith.cmpi eq, %arg2, %c0_i32 : i32
    %1 = arith.extui %0 : i1 to i32
    %c0_i32_0 = arith.constant 0 : i32
    %2 = arith.cmpi ne, %1, %c0_i32_0 : i32
    scf.if %2 {
      %cst_9 = arith.constant 0.000000e+00 : f32
      %12 = vector.broadcast %cst_9 : f32 to vector<256x128xf32>
      %c0_10 = arith.constant 0 : index
      %c0_11 = arith.constant 0 : index
      %13 = vector.load %arg7[%c0_10, %c0_11] : memref<256x128xf32, #tpu.memory_space<vmem>>, vector<256x128xf32>
      tpu.vector_store %arg7[%c0_10, %c0_11], %12 {strides = array<i32>} : memref<256x128xf32, #tpu.memory_space<vmem>>, vector<256x128xf32>,
    } else {
    }
    %c0 = arith.constant 0 : index
    %c0_1 = arith.constant 0 : index
    %3 = vector.load %arg7[%c0, %c0_1] : memref<256x128xf32, #tpu.memory_space<vmem>>, vector<256x128xf32>
    %c0_2 = arith.constant 0 : index
    %c0_3 = arith.constant 0 : index
    %4 = vector.load %arg3[%c0_2, %c0_3] : memref<256x128xbf16, #tpu.memory_space<vmem>>, vector<256x128xbf16>
    %c0_4 = arith.constant 0 : index
    %c0_5 = arith.constant 0 : index
    %5 = vector.load %arg4[%c0_4, %c0_5] : memref<128x128xbf16, #tpu.memory_space<vmem>>, vector<128x128xbf16>
    %cst = arith.constant dense<0.000000e+00> : vector<256x128xf32>
    %6 = tpu.matmul %4, %5, %cst {dimension_numbers = #tpu.dot_dimension_numbers<[1], [0], [0], [1], [0, 0, 1, 1], [], []>} : vector<256x128xbf16>, vector<128x128xbf16>, vector<256x128xf32> -> vector<256x128xf32>
    %7 = arith.addf %3, %6 : vector<256x128xf32>
    %c0_6 = arith.constant 0 : index
    %c0_7 = arith.constant 0 : index
    %8 = vector.load %arg7[%c0_6, %c0_7] : memref<256x128xf32, #tpu.memory_space<vmem>>, vector<256x128xf32>
    tpu.vector_store %arg7[%c0_6, %c0_7], %7 {strides = array<i32>} : memref<256x128xf32, #tpu.memory_space<vmem>>, vector<256x128xf32>,
    %c8_i32 = arith.constant 8 : i32
    %9 = arith.cmpi eq, %arg2, %c8_i32 : i32
    %10 = arith.extui %9 : i1 to i32
    %c0_i32_8 = arith.constant 0 : i32
    %11 = arith.cmpi ne, %10, %c0_i32_8 : i32
    scf.if %11 {
      %c0_9 = arith.constant 0 : index
      %c0_10 = arith.constant 0 : index
      %12 = vector.load %arg7[%c0_9, %c0_10] : memref<256x128xf32, #tpu.memory_space<vmem>>, vector<256x128xf32>
      %c0_11 = arith.constant 0 : index
      %c0_12 = arith.constant 0 : index
      %13 = vector.load %arg5[%c0_11, %c0_12] : memref<1x128xf32, #tpu.memory_space<vmem>>, vector<1x128xf32>
      %14 = vector.broadcast %13 : vector<1x128xf32> to vector<256x128xf32>
      %15 = arith.addf %12, %14 : vector<256x128xf32>
      %c0_13 = arith.constant 0 : index
      %c0_14 = arith.constant 0 : index
      %16 = vector.load %arg6[%c0_13, %c0_14] : memref<256x128xf32, #tpu.memory_space<vmem>>, vector<256x128xf32>
      tpu.vector_store %arg6[%c0_13, %c0_14], %15 {strides = array<i32>} : memref<256x128xf32, #tpu.memory_space<vmem>>, vector<256x128xf32>,
    } else {
    }
    return
  }
  func.func @transform_0(%arg0: i32, %arg1: i32, %arg2: i32) -> (i32, i32) {
    %c0_i32 = arith.constant 0 : i32
    return %arg0, %arg2 : i32, i32
  }
  func.func @transform_1(%arg0: i32, %arg1: i32, %arg2: i32) -> (i32, i32) {
    %c0_i32 = arith.constant 0 : i32
    return %arg2, %arg1 : i32, i32
  }
  func.func @transform_2(%arg0: i32, %arg1: i32, %arg2: i32) -> (i32, i32) {
    %c0_i32 = arith.constant 0 : i32
    %c0_i32_0 = arith.constant 0 : i32
    return %c0_i32, %arg1 : i32, i32
  }
  func.func @transform_3(%arg0: i32, %arg1: i32, %arg2: i32) -> (i32, i32) {
    %c0_i32 = arith.constant 0 : i32
    return %arg0, %arg1 : i32, i32
  }
}

module attributes {stable_mosaic.version = 11 : i64} {
  func.func @_matmul_bias_kernel(%arg0: i32, %arg1: i32, %arg2: i32, %arg3: memref<256x128xbf16, #tpu.memory_space<vmem>>, %arg4: memref<128x128xbf16, #tpu.memory_space<vmem>>, %arg5: memref<1x128xf32, #tpu.memory_space<vmem>>, %arg6: memref<256x128xf32, #tpu.memory_space<vmem>>, %arg7: memref<256x128xf32, #tpu.memory_space<vmem>>) attributes {dimension_semantics = [#tpu.dimension_semantics<parallel>, #tpu.dimension_semantics<parallel>, #tpu.dimension_semantics<arbitrary>], iteration_bounds = array<i64: 2, 1, 25>, scalar_prefetch = 0 : i64, scratch_operands = 1 : i64, tpu.core_type = #tpu.core_type<tc>, window_params = [{transform_indices = @transform_0, window_bounds = array<i64: 256, 128>}, {transform_indices = @transform_1, window_bounds = array<i64: 128, 128>}, {transform_indices = @transform_2, window_bounds = array<i64: 1, 128>}, {transform_indices = @transform_3, window_bounds = array<i64: 256, 128>}]} {
    %c0_i32 = arith.constant 0 : i32
    %0 = arith.cmpi eq, %arg2, %c0_i32 : i32
    %1 = arith.extui %0 : i1 to i32
    %c0_i32_0 = arith.constant 0 : i32
    %2 = arith.cmpi ne, %1, %c0_i32_0 : i32
    scf.if %2 {
      %cst_9 = arith.constant 0.000000e+00 : f32
      %12 = vector.broadcast %cst_9 : f32 to vector<256x128xf32>
      %c0_10 = arith.constant 0 : index
      %c0_11 = arith.constant 0 : index
      %13 = vector.load %arg7[%c0_10, %c0_11] : memref<256x128xf32, #tpu.memory_space<vmem>>, vector<256x128xf32>
      tpu.vector_store %arg7[%c0_10, %c0_11], %12 {strides = array<i32>} : memref<256x128xf32, #tpu.memory_space<vmem>>, vector<256x128xf32>,
    } else {
    }
    %c0 = arith.constant 0 : index
    %c0_1 = arith.constant 0 : index
    %3 = vector.load %arg7[%c0, %c0_1] : memref<256x128xf32, #tpu.memory_space<vmem>>, vector<256x128xf32>
    %c0_2 = arith.constant 0 : index
    %c0_3 = arith.constant 0 : index
    %4 = vector.load %arg3[%c0_2, %c0_3] : memref<256x128xbf16, #tpu.memory_space<vmem>>, vector<256x128xbf16>
    %c0_4 = arith.constant 0 : index
    %c0_5 = arith.constant 0 : index
    %5 = vector.load %arg4[%c0_4, %c0_5] : memref<128x128xbf16, #tpu.memory_space<vmem>>, vector<128x128xbf16>
    %cst = arith.constant dense<0.000000e+00> : vector<256x128xf32>
    %6 = tpu.matmul %4, %5, %cst {dimension_numbers = #tpu.dot_dimension_numbers<[1], [0], [0], [1], [0, 0, 1, 1], [], []>} : vector<256x128xbf16>, vector<128x128xbf16>, vector<256x128xf32> -> vector<256x128xf32>
    %7 = arith.addf %3, %6 : vector<256x128xf32>
    %c0_6 = arith.constant 0 : index
    %c0_7 = arith.constant 0 : index
    %8 = vector.load %arg7[%c0_6, %c0_7] : memref<256x128xf32, #tpu.memory_space<vmem>>, vector<256x128xf32>
    tpu.vector_store %arg7[%c0_6, %c0_7], %7 {strides = array<i32>} : memref<256x128xf32, #tpu.memory_space<vmem>>, vector<256x128xf32>,
    %c24_i32 = arith.constant 24 : i32
    %9 = arith.cmpi eq, %arg2, %c24_i32 : i32
    %10 = arith.extui %9 : i1 to i32
    %c0_i32_8 = arith.constant 0 : i32
    %11 = arith.cmpi ne, %10, %c0_i32_8 : i32
    scf.if %11 {
      %c0_9 = arith.constant 0 : index
      %c0_10 = arith.constant 0 : index
      %12 = vector.load %arg7[%c0_9, %c0_10] : memref<256x128xf32, #tpu.memory_space<vmem>>, vector<256x128xf32>
      %c0_11 = arith.constant 0 : index
      %c0_12 = arith.constant 0 : index
      %13 = vector.load %arg5[%c0_11, %c0_12] : memref<1x128xf32, #tpu.memory_space<vmem>>, vector<1x128xf32>
      %14 = vector.broadcast %13 : vector<1x128xf32> to vector<256x128xf32>
      %15 = arith.addf %12, %14 : vector<256x128xf32>
      %c0_13 = arith.constant 0 : index
      %c0_14 = arith.constant 0 : index
      %16 = vector.load %arg6[%c0_13, %c0_14] : memref<256x128xf32, #tpu.memory_space<vmem>>, vector<256x128xf32>
      tpu.vector_store %arg6[%c0_13, %c0_14], %15 {strides = array<i32>} : memref<256x128xf32, #tpu.memory_space<vmem>>, vector<256x128xf32>,
    } else {
    }
    return
  }
  func.func @transform_0(%arg0: i32, %arg1: i32, %arg2: i32) -> (i32, i32) {
    %c0_i32 = arith.constant 0 : i32
    return %arg0, %arg2 : i32, i32
  }
  func.func @transform_1(%arg0: i32, %arg1: i32, %arg2: i32) -> (i32, i32) {
    %c0_i32 = arith.constant 0 : i32
    return %arg2, %arg1 : i32, i32
  }
  func.func @transform_2(%arg0: i32, %arg1: i32, %arg2: i32) -> (i32, i32) {
    %c0_i32 = arith.constant 0 : i32
    %c0_i32_0 = arith.constant 0 : i32
    return %c0_i32, %arg1 : i32, i32
  }
  func.func @transform_3(%arg0: i32, %arg1: i32, %arg2: i32) -> (i32, i32) {
    %c0_i32 = arith.constant 0 : i32
    return %arg0, %arg1 : i32, i32
  }
}

module attributes {stable_mosaic.version = 11 : i64} {
  func.func @_inorm_kernel(%arg0: i32, %arg1: i32, %arg2: memref<1x256x3xf32, #tpu.memory_space<vmem>>, %arg3: memref<1x3xf32, #tpu.memory_space<vmem>>, %arg4: memref<1x3xf32, #tpu.memory_space<vmem>>, %arg5: memref<1x256x3xf32, #tpu.memory_space<vmem>>) attributes {dimension_semantics = [#tpu.dimension_semantics<parallel>, #tpu.dimension_semantics<parallel>], iteration_bounds = array<i64: 2, 1>, scalar_prefetch = 0 : i64, scratch_operands = 0 : i64, tpu.core_type = #tpu.core_type<tc>, window_params = [{transform_indices = @transform_0, window_bounds = array<i64: 1, 256, 3>}, {transform_indices = @transform_1, window_bounds = array<i64: 1, 3>}, {transform_indices = @transform_2, window_bounds = array<i64: 1, 3>}, {transform_indices = @transform_3, window_bounds = array<i64: 1, 256, 3>}]} {
    %c0 = arith.constant 0 : index
    %c0_0 = arith.constant 0 : index
    %c0_1 = arith.constant 0 : index
    %0 = vector.load %arg2[%c0, %c0_0, %c0_1] : memref<1x256x3xf32, #tpu.memory_space<vmem>>, vector<1x256x3xf32>
    %1 = vector.shape_cast %0 : vector<1x256x3xf32> to vector<256x3xf32>
    %cst = arith.constant dense<0.000000e+00> : vector<3xf32>
    %2 = vector.multi_reduction <add>, %1, %cst [0] : vector<256x3xf32> to vector<3xf32>
    %3 = vector.shape_cast %2 : vector<3xf32> to vector<1x3xf32>
    %cst_2 = arith.constant 2.560000e+02 : f32
    %4 = vector.broadcast %cst_2 : f32 to vector<1x3xf32>
    %5 = arith.divf %3, %4 : vector<1x3xf32>
    %6 = vector.broadcast %5 : vector<1x3xf32> to vector<256x3xf32>
    %7 = arith.subf %1, %6 : vector<256x3xf32>
    %8 = arith.mulf %7, %7 : vector<256x3xf32>
    %cst_3 = arith.constant dense<0.000000e+00> : vector<3xf32>
    %9 = vector.multi_reduction <add>, %8, %cst_3 [0] : vector<256x3xf32> to vector<3xf32>
    %10 = vector.shape_cast %9 : vector<3xf32> to vector<1x3xf32>
    %cst_4 = arith.constant 2.560000e+02 : f32
    %11 = vector.broadcast %cst_4 : f32 to vector<1x3xf32>
    %12 = arith.divf %10, %11 : vector<1x3xf32>
    %13 = vector.broadcast %5 : vector<1x3xf32> to vector<256x3xf32>
    %14 = arith.subf %1, %13 : vector<256x3xf32>
    %cst_5 = arith.constant 9.99999974E-6 : f32
    %15 = vector.broadcast %cst_5 : f32 to vector<1x3xf32>
    %16 = arith.addf %12, %15 : vector<1x3xf32>
    %17 = math.rsqrt %16 : vector<1x3xf32>
    %18 = vector.broadcast %17 : vector<1x3xf32> to vector<256x3xf32>
    %19 = arith.mulf %14, %18 : vector<256x3xf32>
    %c0_6 = arith.constant 0 : index
    %c0_7 = arith.constant 0 : index
    %20 = vector.load %arg3[%c0_6, %c0_7] : memref<1x3xf32, #tpu.memory_space<vmem>>, vector<1x3xf32>
    %21 = vector.broadcast %20 : vector<1x3xf32> to vector<256x3xf32>
    %22 = arith.mulf %19, %21 : vector<256x3xf32>
    %c0_8 = arith.constant 0 : index
    %c0_9 = arith.constant 0 : index
    %23 = vector.load %arg4[%c0_8, %c0_9] : memref<1x3xf32, #tpu.memory_space<vmem>>, vector<1x3xf32>
    %24 = vector.broadcast %23 : vector<1x3xf32> to vector<256x3xf32>
    %25 = arith.addf %22, %24 : vector<256x3xf32>
    %26 = math.tanh %25 : vector<256x3xf32>
    %c0_10 = arith.constant 0 : index
    %c0_11 = arith.constant 0 : index
    %c0_12 = arith.constant 0 : index
    %27 = vector.load %arg5[%c0_10, %c0_11, %c0_12] : memref<1x256x3xf32, #tpu.memory_space<vmem>>, vector<1x256x3xf32>
    %28 = vector.shape_cast %27 : vector<1x256x3xf32> to vector<256x3xf32>
    %29 = vector.shape_cast %26 : vector<256x3xf32> to vector<1x256x3xf32>
    tpu.vector_store %arg5[%c0_10, %c0_11, %c0_12], %29 {strides = array<i32>} : memref<1x256x3xf32, #tpu.memory_space<vmem>>, vector<1x256x3xf32>,
    return
  }
  func.func @transform_0(%arg0: i32, %arg1: i32) -> (i32, i32, i32) {
    %c0_i32 = arith.constant 0 : i32
    %c0_i32_0 = arith.constant 0 : i32
    return %arg0, %c0_i32, %arg1 : i32, i32, i32
  }
  func.func @transform_1(%arg0: i32, %arg1: i32) -> (i32, i32) {
    %c0_i32 = arith.constant 0 : i32
    %c0_i32_0 = arith.constant 0 : i32
    return %c0_i32, %arg1 : i32, i32
  }
  func.func @transform_2(%arg0: i32, %arg1: i32) -> (i32, i32) {
    %c0_i32 = arith.constant 0 : i32
    %c0_i32_0 = arith.constant 0 : i32
    return %c0_i32, %arg1 : i32, i32
  }
  func.func @transform_3(%arg0: i32, %arg1: i32) -> (i32, i32, i32) {
    %c0_i32 = arith.constant 0 : i32
    %c0_i32_0 = arith.constant 0 : i32
    return %arg0, %c0_i32, %arg1 : i32, i32, i32
  }
}

module attributes {stable_mosaic.version = 11 : i64} {
  func.func @_final_kernel(%arg0: i32, %arg1: memref<1xf32, #tpu.memory_space<smem>>, %arg2: memref<6x256xf32, #tpu.memory_space<vmem>>, %arg3: memref<6x256xf32, #tpu.memory_space<vmem>>, %arg4: memref<6x256xf32, #tpu.memory_space<vmem>>, %arg5: memref<6x256xf32, #tpu.memory_space<vmem>>) attributes {dimension_semantics = [#tpu.dimension_semantics<parallel>], iteration_bounds = array<i64: 1>, scalar_prefetch = 0 : i64, scratch_operands = 0 : i64, tpu.core_type = #tpu.core_type<tc>, window_params = [{transform_indices = @transform_0, window_bounds = array<i64: 1>}, {transform_indices = @transform_1, window_bounds = array<i64: 6, 256>}, {transform_indices = @transform_2, window_bounds = array<i64: 6, 256>}, {transform_indices = @transform_3, window_bounds = array<i64: 6, 256>}, {transform_indices = @transform_4, window_bounds = array<i64: 6, 256>}]} {
    %c0 = arith.constant 0 : index
    %0 = memref.load %arg1[%c0] : memref<1xf32, #tpu.memory_space<smem>>
    %c0_0 = arith.constant 0 : index
    %c0_1 = arith.constant 0 : index
    %1 = vector.load %arg3[%c0_0, %c0_1] : memref<6x256xf32, #tpu.memory_space<vmem>>, vector<6x256xf32>
    %2 = vector.broadcast %0 : f32 to vector<6x256xf32>
    %3 = arith.mulf %2, %1 : vector<6x256xf32>
    %c0_2 = arith.constant 0 : index
    %c0_3 = arith.constant 0 : index
    %4 = vector.load %arg5[%c0_2, %c0_3] : memref<6x256xf32, #tpu.memory_space<vmem>>, vector<6x256xf32>
    tpu.vector_store %arg5[%c0_2, %c0_3], %3 {strides = array<i32>} : memref<6x256xf32, #tpu.memory_space<vmem>>, vector<6x256xf32>,
    %c0_4 = arith.constant 0 : index
    %c0_5 = arith.constant 0 : index
    %5 = vector.load %arg2[%c0_4, %c0_5] : memref<6x256xf32, #tpu.memory_space<vmem>>, vector<6x256xf32>
    %6 = arith.subf %5, %3 : vector<6x256xf32>
    %7 = math.tanh %6 : vector<6x256xf32>
    %c0_6 = arith.constant 0 : index
    %c0_7 = arith.constant 0 : index
    %8 = vector.load %arg4[%c0_6, %c0_7] : memref<6x256xf32, #tpu.memory_space<vmem>>, vector<6x256xf32>
    tpu.vector_store %arg4[%c0_6, %c0_7], %7 {strides = array<i32>} : memref<6x256xf32, #tpu.memory_space<vmem>>, vector<6x256xf32>,
    return
  }
  func.func @transform_0(%arg0: i32) -> i32 {
    %c0_i32 = arith.constant 0 : i32
    %c0_i32_0 = arith.constant 0 : i32
    return %c0_i32 : i32
  }
  func.func @transform_1(%arg0: i32) -> (i32, i32) {
    %c0_i32 = arith.constant 0 : i32
    %c0_i32_0 = arith.constant 0 : i32
    return %c0_i32, %arg0 : i32, i32
  }
  func.func @transform_2(%arg0: i32) -> (i32, i32) {
    %c0_i32 = arith.constant 0 : i32
    %c0_i32_0 = arith.constant 0 : i32
    return %c0_i32, %arg0 : i32, i32
  }
  func.func @transform_3(%arg0: i32) -> (i32, i32) {
    %c0_i32 = arith.constant 0 : i32
    %c0_i32_0 = arith.constant 0 : i32
    return %c0_i32, %arg0 : i32, i32
  }
  func.func @transform_4(%arg0: i32) -> (i32, i32) {
    %c0_i32 = arith.constant 0 : i32
    %c0_i32_0 = arith.constant 0 : i32
    return %c0_i32, %arg0 : i32, i32
  }
}

</mosaic_0001>

<bundles_post_ra>
// kernel: generator_forward.34
= control target key start
LH: loop header
LB: loop body
LE: loop exit
PB: predicated region body
PF: predicated region fallthrough
CT: control target
= control target key end

     0   :  { %s903_s12 = smov 0   ;;  %s905_s13 = smov 0   ;;  %s1537_s0 = inlined_call_operand.vmem [shape: f32[2,256,64], index: 0, kind: input, shape index: {}]   ;;  %s1538_s1 = inlined_call_operand.vmem [shape: f32[1,64], index: 1, kind: input, shape index: {}]   ;;  %s1539_s2 = inlined_call_operand.vmem [shape: f32[1,64], index: 2, kind: input, shape index: {}]   ;;  %s1540_s3 = inlined_call_operand.vmem [shape: f32[2,256,64], index: 3, kind: output, shape index: {}]  }
   0x1   :  { %s907_s14 = smov 0  }
   0x2 LB: > { %s25_s15 = sadd.s32 1, %s877_s13  ;;  %p822_p0 = scmp.ge.s32.totalorder %s881_s14, 1  ;;  %s881_s14 = sphi %s907_s14, %s13_s14   ;;  %s877_s13 = sphi %s905_s13, %s1542_s13   ;;  %s873_s12 = sphi %s903_s12, %s1541_s12  }
   0x3   : > { %p27_p1 = scmp.ge.s32.totalorder %s25_s15, 2  ;;  %p172_p2 = scmp.lt.s32.totalorder %s881_s14, 3 }
   0x5   : > { %s1544_s15 = smov (%p27_p1, %s25_s15), 0  ;;  %p173_p3 = pnand %p822_p0, %p172_p2 }
   0x6   : > { %p208_p4 = scmp.lt.s32.totalorder (!%p173_p3), %s873_s12, 1 }
   0x7   : > { %176 = sbr.rel (%p173_p3) target bundleno = 243 (0xf3), region = 32 }
   0xc   : > { %s1546_s12 = smov (!%p208_p4, %s873_s12), 1  ;;  %vm262_vm0 = vcmask 523264  }
   0xd   : > { %s831_s16 = sshll.u32 %s1546_s12, 8 }
   0xe   : > { %s929_s19 = scalar_lea.vmem %s1537_s0, %s831_s16  ;;  %s1366_s26 = scalar_lea.vmem %s1540_s3, %s831_s16 }
   0xf   : > { %v932_v0 = vld [vmem:[%s929_s19] sm:$0xff]  ;;  %v935_v1 = vld [vmem:[%s929_s19 + $0x8] sm:$0xff]  ;;  %v938_v2 = vld [vmem:[%s929_s19 + $0x10] sm:$0xff] }
  0x10   : > { %v941_v3 = vld [vmem:[%s929_s19 + $0x18] sm:$0xff]  ;;  %v263_v4 = vsel %vm262_vm0, %v932_v0, 0.0  ;;  %v264_v5 = vsel %vm262_vm0, %v935_v1, 0.0  ;;  %v266_v6 = vsel %vm262_vm0, %v938_v2, 0.0  ;;  %v950_v7 = vld [vmem:[%s929_s19 + $0x20] sm:$0xff]  ;;  %v955_v10 = vld [vmem:[%s929_s19 + $0x28] sm:$0xff] }
  0x11   : > { %v265_v8 = vadd.f32 %v264_v5, %v263_v4  ;;  %v268_v9 = vsel %vm262_vm0, %v941_v3, 0.0  ;;  %v270_v12 = vsel %vm262_vm0, %v950_v7, 0.0  ;;  %v960_v13 = vld [vmem:[%s929_s19 + $0x30] sm:$0xff]  ;;  %v272_v15 = vsel %vm262_vm0, %v955_v10, 0.0  ;;  %v965_v16 = vld [vmem:[%s929_s19 + $0x38] sm:$0xff]  ;;  %v970_v19 = vld [vmem:[%s929_s19 + $0x40] sm:$0xff] }
  0x12   : > { %v274_v18 = vsel %vm262_vm0, %v960_v13, 0.0  ;;  %v276_v21 = vsel %vm262_vm0, %v965_v16, 0.0  ;;  %v975_v22 = vld [vmem:[%s929_s19 + $0x48] sm:$0xff]  ;;  %v278_v24 = vsel %vm262_vm0, %v970_v19, 0.0  ;;  %v980_v25 = vld [vmem:[%s929_s19 + $0x50] sm:$0xff]  ;;  %v985_v28 = vld [vmem:[%s929_s19 + $0x58] sm:$0xff] }
  0x13   : > { %v267_v11 = vadd.f32 %v266_v6, %v265_v8  ;;  %v280_v27 = vsel %vm262_vm0, %v975_v22, 0.0  ;;  %v282_v30 = vsel %vm262_vm0, %v980_v25, 0.0  ;;  %v990_v31 = vld [vmem:[%s929_s19 + $0x60] sm:$0xff]  ;;  %v284_v33 = vsel %vm262_vm0, %v985_v28, 0.0  ;;  %v995_v34 = vld [vmem:[%s929_s19 + $0x68] sm:$0xff]  ;;  %v1000_v37 = vld [vmem:[%s929_s19 + $0x70] sm:$0xff] }
  0x14   : > { %v286_v36 = vsel %vm262_vm0, %v990_v31, 0.0  ;;  %v288_v39 = vsel %vm262_vm0, %v995_v34, 0.0  ;;  %v1005_v40 = vld [vmem:[%s929_s19 + $0x78] sm:$0xff]  ;;  %v290_v42 = vsel %vm262_vm0, %v1000_v37, 0.0  ;;  %v1010_v43 = vld [vmem:[%s929_s19 + $0x80] sm:$0xff]  ;;  %v1015_v46 = vld [vmem:[%s929_s19 + $0x88] sm:$0xff] }
  0x15   : > { %v269_v14 = vadd.f32 %v268_v9, %v267_v11  ;;  %v292_v45 = vsel %vm262_vm0, %v1005_v40, 0.0  ;;  %v294_v48 = vsel %vm262_vm0, %v1010_v43, 0.0  ;;  %v1020_v49 = vld [vmem:[%s929_s19 + $0x90] sm:$0xff]  ;;  %v296_v51 = vsel %vm262_vm0, %v1015_v46, 0.0  ;;  %v1025_v52 = vld [vmem:[%s929_s19 + $0x98] sm:$0xff]  ;;  %v1030_v55 = vld [vmem:[%s929_s19 + $0xa0] sm:$0xff] }
  0x16   : > { %v298_v54 = vsel %vm262_vm0, %v1020_v49, 0.0  ;;  %v300_v57 = vsel %vm262_vm0, %v1025_v52, 0.0  ;;  %v1035_v58 = vld [vmem:[%s929_s19 + $0xa8] sm:$0xff]  ;;  %v302_v60 = vsel %vm262_vm0, %v1030_v55, 0.0  ;;  %v1040_v61 = vld [vmem:[%s929_s19 + $0xb0] sm:$0xff]  ;;  %v1045_v4 = vld [vmem:[%s929_s19 + $0xb8] sm:$0xff] }
  0x17   : > { %v271_v17 = vadd.f32 %v270_v12, %v269_v14  ;;  %v304_v63 = vsel %vm262_vm0, %v1035_v58, 0.0  ;;  %v306_v6 = vsel %vm262_vm0, %v1040_v61, 0.0  ;;  %v1050_v8 = vld [vmem:[%s929_s19 + $0xc0] sm:$0xff]  ;;  %v308_v11 = vsel %vm262_vm0, %v1045_v4, 0.0  ;;  %v1055_v12 = vld [vmem:[%s929_s19 + $0xc8] sm:$0xff] }
  0x19   : > { %v273_v20 = vadd.f32 %v272_v15, %v271_v17  ;;  %v310_v15 = vsel %vm262_vm0, %v1050_v8, 0.0  ;;  %v1060_v17 = vld [vmem:[%s929_s19 + $0xd0] sm:$0xff] }
  0x1b   : > { %v275_v23 = vadd.f32 %v274_v18, %v273_v20  ;;  %v312_v20 = vsel %vm262_vm0, %v1055_v12, 0.0 }
  0x1d   : > { %v277_v26 = vadd.f32 %v276_v21, %v275_v23  ;;  %v1065_v21 = vld [vmem:[%s929_s19 + $0xd8] sm:$0xff] }
  0x1f   : > { %v279_v29 = vadd.f32 %v278_v24, %v277_v26  ;;  %v314_v24 = vsel %vm262_vm0, %v1060_v17, 0.0  ;;  %v1070_v26 = vld [vmem:[%s929_s19 + $0xe0] sm:$0xff] }
  0x21   : > { %v281_v32 = vadd.f32 %v280_v27, %v279_v29  ;;  %v316_v29 = vsel %vm262_vm0, %v1065_v21, 0.0 }
  0x23   : > { %v283_v35 = vadd.f32 %v282_v30, %v281_v32  ;;  %v1075_v30 = vld [vmem:[%s929_s19 + $0xe8] sm:$0xff] }
  0x25   : > { %v285_v38 = vadd.f32 %v284_v33, %v283_v35  ;;  %v318_v33 = vsel %vm262_vm0, %v1070_v26, 0.0  ;;  %v1080_v35 = vld [vmem:[%s929_s19 + $0xf0] sm:$0xff] }
  0x27   : > { %v287_v41 = vadd.f32 %v286_v36, %v285_v38  ;;  %v320_v38 = vsel %vm262_vm0, %v1075_v30, 0.0 }
  0x29   : > { %v289_v44 = vadd.f32 %v288_v39, %v287_v41  ;;  %v1085_v39 = vld [vmem:[%s929_s19 + $0xf8] sm:$0xff] }
  0x2b   : > { %v291_v47 = vadd.f32 %v290_v42, %v289_v44  ;;  %v322_v42 = vsel %vm262_vm0, %v1080_v35, 0.0 }
  0x2d   : > { %v293_v50 = vadd.f32 %v292_v45, %v291_v47  ;;  %v324_v45 = vsel %vm262_vm0, %v1085_v39, 0.0 }
  0x2f   : > { %v295_v53 = vadd.f32 %v294_v48, %v293_v50 }
  0x31   : > { %v297_v56 = vadd.f32 %v296_v51, %v295_v53 }
  0x33   : > { %v299_v59 = vadd.f32 %v298_v54, %v297_v56 }
  0x35   : > { %v301_v62 = vadd.f32 %v300_v57, %v299_v59 }
  0x37   : > { %v303_v5 = vadd.f32 %v302_v60, %v301_v62 }
  0x39   : > { %v305_v9 = vadd.f32 %v304_v63, %v303_v5 }
  0x3b   : > { %v307_v14 = vadd.f32 %v306_v6, %v305_v9 }
  0x3d   : > { %v309_v18 = vadd.f32 %v308_v11, %v307_v14 }
  0x3f   : > { %v311_v23 = vadd.f32 %v310_v15, %v309_v18 }
  0x41   : > { %v313_v27 = vadd.f32 %v312_v20, %v311_v23 }
  0x43   : > { %v315_v32 = vadd.f32 %v314_v24, %v313_v27 }
  0x45   : > { %v317_v36 = vadd.f32 %v316_v29, %v315_v32 }
  0x47   : > { %v319_v41 = vadd.f32 %v318_v33, %v317_v36 }
  0x49   : > { %v321_v44 = vadd.f32 %v320_v38, %v319_v41 }
  0x4b   : > { %v323_v47 = vadd.f32 %v322_v42, %v321_v44 }
  0x4d   : > { %v325_v48 = vadd.f32 %v324_v45, %v323_v47 }
  0x4f   : > { %v326_v50 = vrot.slane %v325_v48, 4 }
  0x51   : > { %v327_v51 = vadd.f32 %v326_v50, %v325_v48 }
  0x53   : > { %v328_v53 = vrot.slane %v327_v51, 2 }
  0x55   : > { %v329_v54 = vadd.f32 %v328_v53, %v327_v51 }
  0x57   : > { %v330_v56 = vrot.slane %v329_v54, 1 }
  0x59   : > { %v331_v57 = vadd.f32 %v330_v56, %v329_v54 }
  0x5b   : > { %v1091_v59 = vmul.f32 0.00390625, %v331_v57 }
  0x5d   : > { %v1095_v60 = vsub.f32 %v932_v0, %v1091_v59  ;;  %v1099_v62 = vsub.f32 %v935_v1, %v1091_v59  ;;  %v1103_v63 = vsub.f32 %v938_v2, %v1091_v59  ;;  %v1107_v5 = vsub.f32 %v941_v3, %v1091_v59 }
  0x5e   : > { %v1111_v6 = vsub.f32 %v950_v7, %v1091_v59  ;;  %v1121_v2 = vsub.f32 %v955_v10, %v1091_v59  ;;  %v1127_v7 = vsub.f32 %v960_v13, %v1091_v59  ;;  %v1136_v10 = vsub.f32 %v965_v16, %v1091_v59 }
  0x5f   : > { %v366_v0 = vmul.f32 %v1095_v60, %v1095_v60  ;;  %v367_v9 = vmul.f32 %v1099_v62, %v1099_v62  ;;  %v368_v1 = vmul.f32 %v1103_v63, %v1103_v63  ;;  %v369_v3 = vmul.f32 %v1107_v5, %v1107_v5 }
  0x60   : > { %v370_v11 = vmul.f32 %v1111_v6, %v1111_v6  ;;  %v371_v23 = vmul.f32 %v1121_v2, %v1121_v2  ;;  %v1143_v27 = vsub.f32 %v970_v19, %v1091_v59  ;;  %v372_v29 = vmul.f32 %v1127_v7, %v1127_v7 }
  0x61   : > { %v398_v14 = vsel %vm262_vm0, %v366_v0, 0.0  ;;  %v399_v15 = vsel %vm262_vm0, %v367_v9, 0.0  ;;  %v401_v18 = vsel %vm262_vm0, %v368_v1, 0.0  ;;  %v403_v13 = vsel %vm262_vm0, %v369_v3, 0.0 }
  0x62   : > { %v400_v20 = vadd.f32 %v399_v15, %v398_v14  ;;  %v405_v32 = vsel %vm262_vm0, %v370_v11, 0.0  ;;  %v1150_v16 = vsub.f32 %v975_v22, %v1091_v59  ;;  %v373_v36 = vmul.f32 %v1136_v10, %v1136_v10 }
  0x63   : > { %v407_v38 = vsel %vm262_vm0, %v371_v23, 0.0  ;;  %v1157_v19 = vsub.f32 %v980_v25, %v1091_v59  ;;  %v374_v42 = vmul.f32 %v1143_v27, %v1143_v27  ;;  %v409_v44 = vsel %vm262_vm0, %v372_v29, 0.0 }
  0x64   : > { %v402_v24 = vadd.f32 %v401_v18, %v400_v20  ;;  %v1164_v22 = vsub.f32 %v985_v28, %v1091_v59  ;;  %v375_v47 = vmul.f32 %v1150_v16, %v1150_v16  ;;  %v411_v48 = vsel %vm262_vm0, %v373_v36, 0.0 }
  0x65   : > { %v1171_v25 = vsub.f32 %v990_v31, %v1091_v59  ;;  %v376_v51 = vmul.f32 %v1157_v19, %v1157_v19  ;;  %v413_v53 = vsel %vm262_vm0, %v374_v42, 0.0  ;;  %v1178_v28 = vsub.f32 %v995_v34, %v1091_v59 }
  0x66   : > { %v404_v33 = vadd.f32 %v403_v13, %v402_v24  ;;  %v377_v56 = vmul.f32 %v1164_v22, %v1164_v22  ;;  %v415_v57 = vsel %vm262_vm0, %v375_v47, 0.0  ;;  %v1185_v31 = vsub.f32 %v1000_v37, %v1091_v59 }
  0x67   : > { %v378_v9 = vmul.f32 %v1171_v25, %v1171_v25  ;;  %v417_v1 = vsel %vm262_vm0, %v376_v51, 0.0  ;;  %v1192_v34 = vsub.f32 %v1005_v40, %v1091_v59  ;;  %v379_v11 = vmul.f32 %v1178_v28, %v1178_v28 }
  0x68   : > { %v406_v41 = vadd.f32 %v405_v32, %v404_v33  ;;  %v419_v14 = vsel %vm262_vm0, %v377_v56, 0.0  ;;  %v1199_v37 = vsub.f32 %v1010_v43, %v1091_v59  ;;  %v380_v18 = vmul.f32 %v1185_v31, %v1185_v31 }
  0x69   : > { %v421_v20 = vsel %vm262_vm0, %v378_v9, 0.0  ;;  %v1206_v40 = vsub.f32 %v1015_v46, %v1091_v59  ;;  %v381_v13 = vmul.f32 %v1192_v34, %v1192_v34  ;;  %v423_v24 = vsel %vm262_vm0, %v379_v11, 0.0 }
  0x6a   : > { %v408_v45 = vadd.f32 %v407_v38, %v406_v41  ;;  %v1213_v43 = vsub.f32 %v1020_v49, %v1091_v59  ;;  %v382_v32 = vmul.f32 %v1199_v37, %v1199_v37  ;;  %v425_v33 = vsel %vm262_vm0, %v380_v18, 0.0 }
  0x6b   : > { %v1220_v46 = vsub.f32 %v1025_v52, %v1091_v59  ;;  %v383_v38 = vmul.f32 %v1206_v40, %v1206_v40  ;;  %v427_v41 = vsel %vm262_vm0, %v381_v13, 0.0  ;;  %v1227_v49 = vsub.f32 %v1030_v55, %v1091_v59 }
  0x6c   : > { %v410_v50 = vadd.f32 %v409_v44, %v408_v45  ;;  %v384_v44 = vmul.f32 %v1213_v43, %v1213_v43  ;;  %v429_v45 = vsel %vm262_vm0, %v382_v32, 0.0  ;;  %v1234_v52 = vsub.f32 %v1035_v58, %v1091_v59 }
  0x6d   : > { %v1241_v55 = vsub.f32 %v1040_v61, %v1091_v59  ;;  %v1248_v58 = vsub.f32 %v1045_v4, %v1091_v59  ;;  %v1255_v61 = vsub.f32 %v1050_v8, %v1091_v59  ;;  %v1262_v4 = vsub.f32 %v1055_v12, %v1091_v59 }
  0x6e   : > { %v412_v54 = vadd.f32 %v411_v48, %v410_v50  ;;  %v385_v48 = vmul.f32 %v1220_v46, %v1220_v46  ;;  %v431_v50 = vsel %vm262_vm0, %v383_v38, 0.0  ;;  %v1269_v8 = vsub.f32 %v1060_v17, %v1091_v59 }
  0x6f   : > { %v1276_v12 = vsub.f32 %v1065_v21, %v1091_v59  ;;  %v1283_v17 = vsub.f32 %v1070_v26, %v1091_v59  ;;  %v1290_v21 = vsub.f32 %v1075_v30, %v1091_v59  ;;  %v1297_v26 = vsub.f32 %v1080_v35, %v1091_v59 }
  0x70   : > { %v414_v0 = vadd.f32 %v413_v53, %v412_v54  ;;  %v386_v53 = vmul.f32 %v1227_v49, %v1227_v49  ;;  %v433_v54 = vsel %vm262_vm0, %v384_v44, 0.0  ;;  %v1304_v30 = vsub.f32 %v1085_v39, %v1091_v59 }
  0x71   : > { %v396_v35 = vmul.f32 %v1297_v26, %v1297_v26 }
  0x72   : > { %v416_v3 = vadd.f32 %v415_v57, %v414_v0  ;;  %v387_v57 = vmul.f32 %v1234_v52, %v1234_v52  ;;  %v435_v0 = vsel %vm262_vm0, %v385_v48, 0.0 }
  0x73   : > { %v457_v39 = vsel %vm262_vm0, %v396_v35, 0.0 }
  0x74   : > { %v418_v15 = vadd.f32 %v417_v1, %v416_v3  ;;  %v388_v1 = vmul.f32 %v1241_v55, %v1241_v55  ;;  %v437_v3 = vsel %vm262_vm0, %v386_v53, 0.0 }
  0x76   : > { %v420_v23 = vadd.f32 %v419_v14, %v418_v15  ;;  %v389_v14 = vmul.f32 %v1248_v58, %v1248_v58  ;;  %v439_v15 = vsel %vm262_vm0, %v387_v57, 0.0  ;;  %v397_v57 = vmul.f32 %v1304_v30, %v1304_v30 }
  0x78   : > { %v422_v29 = vadd.f32 %v421_v20, %v420_v23  ;;  %v390_v20 = vmul.f32 %v1255_v61, %v1255_v61  ;;  %v441_v23 = vsel %vm262_vm0, %v388_v1, 0.0  ;;  %v459_v1 = vsel %vm262_vm0, %v397_v57, 0.0 }
  0x7a   : > { %v424_v36 = vadd.f32 %v423_v24, %v422_v29  ;;  %v391_v24 = vmul.f32 %v1262_v4, %v1262_v4  ;;  %v443_v29 = vsel %vm262_vm0, %v389_v14, 0.0 }
  0x7c   : > { %v426_v42 = vadd.f32 %v425_v33, %v424_v36  ;;  %v392_v33 = vmul.f32 %v1269_v8, %v1269_v8  ;;  %v445_v36 = vsel %vm262_vm0, %v390_v20, 0.0 }
  0x7e   : > { %v428_v47 = vadd.f32 %v427_v41, %v426_v42  ;;  %v393_v41 = vmul.f32 %v1276_v12, %v1276_v12  ;;  %v447_v42 = vsel %vm262_vm0, %v391_v24, 0.0 }
  0x80   : > { %v430_v51 = vadd.f32 %v429_v45, %v428_v47  ;;  %v394_v45 = vmul.f32 %v1283_v17, %v1283_v17  ;;  %v449_v47 = vsel %vm262_vm0, %v392_v33, 0.0  ;;  %v1322_v33 = vld [vmem:[%s1538_s1] ss:$0 sm:$0xff] }
  0x82   : > { %v432_v56 = vadd.f32 %v431_v50, %v430_v51  ;;  %v395_v50 = vmul.f32 %v1290_v21, %v1290_v21  ;;  %v451_v51 = vsel %vm262_vm0, %v393_v41, 0.0 }
  0x84   : > { %v434_v9 = vadd.f32 %v433_v54, %v432_v56  ;;  %v453_v54 = vsel %vm262_vm0, %v394_v45, 0.0 }
  0x86   : > { %v436_v11 = vadd.f32 %v435_v0, %v434_v9  ;;  %v455_v0 = vsel %vm262_vm0, %v395_v50, 0.0 }
  0x88   : > { %v438_v18 = vadd.f32 %v437_v3, %v436_v11 }
  0x8a   : > { %v440_v13 = vadd.f32 %v439_v15, %v438_v18 }
  0x8c   : > { %v442_v32 = vadd.f32 %v441_v23, %v440_v13 }
  0x8e   : > { %v444_v38 = vadd.f32 %v443_v29, %v442_v32 }
  0x90   : > { %v446_v44 = vadd.f32 %v445_v36, %v444_v38 }
  0x92   : > { %v448_v48 = vadd.f32 %v447_v42, %v446_v44  ;;  %v1335_v44 = vld [vmem:[%s1539_s2] ss:$0 sm:$0xff] }
  0x94   : > { %v450_v53 = vadd.f32 %v449_v47, %v448_v48 }
  0x96   : > { %v452_v56 = vadd.f32 %v451_v51, %v450_v53 }
  0x98   : > { %v454_v9 = vadd.f32 %v453_v54, %v452_v56 }
  0x9a   : > { %v456_v59 = vadd.f32 %v455_v0, %v454_v9 }
  0x9c   : > { %v458_v3 = vadd.f32 %v457_v39, %v456_v59 }
  0x9e   : > { %v460_v11 = vadd.f32 %v459_v1, %v458_v3 }
  0xa0   : > { %v461_v14 = vrot.slane %v460_v11, 4 }
  0xa2   : > { %v462_v15 = vadd.f32 %v461_v14, %v460_v11 }
  0xa4   : > { %v463_v18 = vrot.slane %v462_v15, 2 }
  0xa6   : > { %v464_v20 = vadd.f32 %v463_v18, %v462_v15 }
  0xa8   : > { %v465_v23 = vrot.slane %v464_v20, 1 }
  0xaa   : > { %v466_v13 = vadd.f32 %v465_v23, %v464_v20 }
  0xac   : > { %v467_v24 = vmul.f32 0.00390625, %v466_v13 }
  0xae   : > { %v468_v29 = vadd.f32 1e-05, %v467_v24 }
  0xb0   : > { %857 = vrsqrt.f32 %v468_v29 }
  0xbd   : > { %v1317_v32 = vpop.eup %857 }
  0xbe   : > { %v470_v36 = vmul.f32 %v1317_v32, %v1095_v60  ;;  %v471_v38 = vmul.f32 %v1317_v32, %v1099_v62  ;;  %v472_v41 = vmul.f32 %v1317_v32, %v1103_v63  ;;  %v473_v42 = vmul.f32 %v1317_v32, %v1107_v5 }
  0xbf   : > { %v474_v45 = vmul.f32 %v1317_v32, %v1111_v6  ;;  %v475_v60 = vmul.f32 %v1317_v32, %v1121_v2  ;;  %v476_v62 = vmul.f32 %v1317_v32, %v1127_v7  ;;  %v477_v63 = vmul.f32 %v1317_v32, %v1136_v10 }
  0xc0   : > { %v509_v47 = vmul.f32 %v1322_v33, %v470_v36  ;;  %v510_v5 = vmul.f32 %v1322_v33, %v471_v38  ;;  %v511_v48 = vmul.f32 %v1322_v33, %v472_v41  ;;  %v512_v50 = vmul.f32 %v1322_v33, %v473_v42 }
  0xc1   : > { %v513_v6 = vmul.f32 %v1322_v33, %v474_v45  ;;  %v514_v51 = vmul.f32 %v1322_v33, %v475_v60  ;;  %v515_v2 = vmul.f32 %v1322_v33, %v476_v62  ;;  %v516_v7 = vmul.f32 %v1322_v33, %v477_v63 }
  0xc2   : > { %v548_v53 = vadd.f32 %v1335_v44, %v509_v47  ;;  %v549_v10 = vadd.f32 %v1335_v44, %v510_v5  ;;  %v550_v35 = vadd.f32 %v1335_v44, %v511_v48  ;;  %v551_v54 = vadd.f32 %v1335_v44, %v512_v50 }
  0xc3   : > { %v552_v56 = vadd.f32 %v1335_v44, %v513_v6  ;;  %v553_v57 = vadd.f32 %v1335_v44, %v514_v51  ;;  %v554_v0 = vadd.f32 %v1335_v44, %v515_v2  ;;  %v555_v9 = vadd.f32 %v1335_v44, %v516_v7 }
  0xc4   : > { %vm580_vm1 = vcmp.ge.f32.partialorder %v548_v53, 0.0  ;;  %v612_v39 = vmul.f32 0.2, %v548_v53  ;;  %vm581_vm2 = vcmp.ge.f32.partialorder %v549_v10, 0.0  ;;  %v613_v59 = vmul.f32 0.2, %v549_v10 }
  0xc5   : > { %vm582_vm3 = vcmp.ge.f32.partialorder %v550_v35, 0.0  ;;  %v614_v1 = vmul.f32 0.2, %v550_v35  ;;  %vm583_vm4 = vcmp.ge.f32.partialorder %v551_v54, 0.0  ;;  %v615_v3 = vmul.f32 0.2, %v551_v54 }
  0xc6   : > { %v644_v11 = vsel %vm580_vm1, %v548_v53, %v612_v39  ;;  %v645_v14 = vsel %vm581_vm2, %v549_v10, %v613_v59  ;;  %vm584_vm5 = vcmp.ge.f32.partialorder %v552_v56, 0.0  ;;  %v616_v15 = vmul.f32 0.2, %v552_v56 }
  0xc7   : > { %676 = vst.msk [vmem:[%s1366_s26] sm:$0xff] %vm262_vm0, %v644_v11  ;;  %677 = vst.msk [vmem:[%s1366_s26 + $0x8] sm:$0xff] %vm262_vm0, %v645_v14  ;;  %v646_v18 = vsel %vm582_vm3, %v550_v35, %v614_v1  ;;  %v647_v20 = vsel %vm583_vm4, %v551_v54, %v615_v3  ;;  %vm585_vm6 = vcmp.ge.f32.partialorder %v553_v57, 0.0  ;;  %v617_v23 = vmul.f32 0.2, %v553_v57 }
  0xc8   : > { %678 = vst.msk [vmem:[%s1366_s26 + $0x10] sm:$0xff] %vm262_vm0, %v646_v18  ;;  %679 = vst.msk [vmem:[%s1366_s26 + $0x18] sm:$0xff] %vm262_vm0, %v647_v20  ;;  %v648_v13 = vsel %vm584_vm5, %v552_v56, %v616_v15  ;;  %vm586_vm7 = vcmp.ge.f32.partialorder %v554_v0, 0.0  ;;  %v618_v24 = vmul.f32 0.2, %v554_v0  ;;  %vm587_vm8 = vcmp.ge.f32.partialorder %v555_v9, 0.0 }
  0xc9   : > { %680 = vst.msk [vmem:[%s1366_s26 + $0x20] sm:$0xff] %vm262_vm0, %v648_v13  ;;  %v649_v29 = vsel %vm585_vm6, %v553_v57, %v617_v23  ;;  %v619_v36 = vmul.f32 0.2, %v555_v9  ;;  %v478_v38 = vmul.f32 %v1317_v32, %v1143_v27  ;;  %v479_v41 = vmul.f32 %v1317_v32, %v1150_v16 }
  0xca   : > { %681 = vst.msk [vmem:[%s1366_s26 + $0x28] sm:$0xff] %vm262_vm0, %v649_v29  ;;  %v650_v42 = vsel %vm586_vm7, %v554_v0, %v618_v24  ;;  %v480_v45 = vmul.f32 %v1317_v32, %v1157_v19  ;;  %v481_v60 = vmul.f32 %v1317_v32, %v1164_v22  ;;  %v482_v62 = vmul.f32 %v1317_v32, %v1171_v25 }
  0xcb   : > { %682 = vst.msk [vmem:[%s1366_s26 + $0x30] sm:$0xff] %vm262_vm0, %v650_v42  ;;  %v651_v63 = vsel %vm587_vm8, %v555_v9, %v619_v36  ;;  %v517_v27 = vmul.f32 %v1322_v33, %v478_v38  ;;  %v518_v47 = vmul.f32 %v1322_v33, %v479_v41  ;;  %v483_v16 = vmul.f32 %v1317_v32, %v1178_v28 }
  0xcc   : > { %683 = vst.msk [vmem:[%s1366_s26 + $0x38] sm:$0xff] %vm262_vm0, %v651_v63  ;;  %v519_v19 = vmul.f32 %v1322_v33, %v480_v45  ;;  %v520_v5 = vmul.f32 %v1322_v33, %v481_v60  ;;  %v521_v22 = vmul.f32 %v1322_v33, %v482_v62  ;;  %v484_v25 = vmul.f32 %v1317_v32, %v1185_v31 }
  0xcd   : > { %v556_v48 = vadd.f32 %v1335_v44, %v517_v27  ;;  %v557_v50 = vadd.f32 %v1335_v44, %v518_v47  ;;  %v522_v6 = vmul.f32 %v1322_v33, %v483_v16  ;;  %v485_v28 = vmul.f32 %v1317_v32, %v1192_v34 }
  0xce   : > { %v558_v51 = vadd.f32 %v1335_v44, %v519_v19  ;;  %v559_v2 = vadd.f32 %v1335_v44, %v520_v5  ;;  %v560_v7 = vadd.f32 %v1335_v44, %v521_v22  ;;  %v523_v53 = vmul.f32 %v1322_v33, %v484_v25 }
  0xcf   : > { %vm588_vm9 = vcmp.ge.f32.partialorder %v556_v48, 0.0  ;;  %v620_v31 = vmul.f32 0.2, %v556_v48  ;;  %vm589_vm10 = vcmp.ge.f32.partialorder %v557_v50, 0.0  ;;  %v621_v10 = vmul.f32 0.2, %v557_v50 }
  0xd0   : > { %vm590_vm11 = vcmp.ge.f32.partialorder %v558_v51, 0.0  ;;  %v622_v35 = vmul.f32 0.2, %v558_v51  ;;  %vm591_vm12 = vcmp.ge.f32.partialorder %v559_v2, 0.0  ;;  %v623_v34 = vmul.f32 0.2, %v559_v2 }
  0xd1   : > { %v652_v54 = vsel %vm588_vm9, %v556_v48, %v620_v31  ;;  %v653_v56 = vsel %vm589_vm10, %v557_v50, %v621_v10  ;;  %vm592_vm13 = vcmp.ge.f32.partialorder %v560_v7, 0.0  ;;  %v624_v57 = vmul.f32 0.2, %v560_v7 }
  0xd2   : > { %684 = vst.msk [vmem:[%s1366_s26 + $0x40] sm:$0xff] %vm262_vm0, %v652_v54  ;;  %685 = vst.msk [vmem:[%s1366_s26 + $0x48] sm:$0xff] %vm262_vm0, %v653_v56  ;;  %v654_v0 = vsel %vm590_vm11, %v558_v51, %v622_v35  ;;  %v655_v9 = vsel %vm591_vm12, %v559_v2, %v623_v34  ;;  %v561_v39 = vadd.f32 %v1335_v44, %v522_v6 }
  0xd3   : > { %v562_v59 = vadd.f32 %v1335_v44, %v523_v53  ;;  %686 = vst.msk [vmem:[%s1366_s26 + $0x50] sm:$0xff] %vm262_vm0, %v654_v0  ;;  %687 = vst.msk [vmem:[%s1366_s26 + $0x58] sm:$0xff] %vm262_vm0, %v655_v9  ;;  %v656_v1 = vsel %vm592_vm13, %v560_v7, %v624_v57  ;;  %v524_v3 = vmul.f32 %v1322_v33, %v485_v28 }
  0xd4   : > { %v486_v11 = vmul.f32 %v1317_v32, %v1199_v37  ;;  %v487_v14 = vmul.f32 %v1317_v32, %v1206_v40  ;;  %688 = vst.msk [vmem:[%s1366_s26 + $0x60] sm:$0xff] %vm262_vm0, %v656_v1  ;;  %vm593_vm14 = vcmp.ge.f32.partialorder %v561_v39, 0.0  ;;  %v625_v15 = vmul.f32 0.2, %v561_v39 }
  0xd5   : > { %vm594_vm15 = vcmp.ge.f32.partialorder %v562_v59, 0.0  ;;  %v626_v18 = vmul.f32 0.2, %v562_v59  ;;  %v563_v20 = vadd.f32 %v1335_v44, %v524_v3  ;;  %v488_v24 = vmul.f32 %v1317_v32, %v1213_v43 }
  0xd6   : > { %v525_v23 = vmul.f32 %v1322_v33, %v486_v11  ;;  %v526_v13 = vmul.f32 %v1322_v33, %v487_v14  ;;  %v657_v37 = vsel %vm593_vm14, %v561_v39, %v625_v15  ;;  %v489_v40 = vmul.f32 %v1317_v32, %v1220_v46 }
  0xd7   : > { %v658_v29 = vsel %vm594_vm15, %v562_v59, %v626_v18  ;;  %v490_v36 = vmul.f32 %v1317_v32, %v1227_v49  ;;  %689 = vst.msk [vmem:[%s1366_s26 + $0x68] sm:$0xff] %vm262_vm0, %v657_v37  ;;  %vm595_vm1 = vcmp.ge.f32.partialorder %v563_v20, 0.0  ;;  %v627_v38 = vmul.f32 0.2, %v563_v20 }
  0xd8   : > { %690 = vst.msk [vmem:[%s1366_s26 + $0x70] sm:$0xff] %vm262_vm0, %v658_v29  ;;  %v564_v41 = vadd.f32 %v1335_v44, %v525_v23  ;;  %v565_v42 = vadd.f32 %v1335_v44, %v526_v13  ;;  %v527_v43 = vmul.f32 %v1322_v33, %v488_v24  ;;  %v528_v45 = vmul.f32 %v1322_v33, %v489_v40 }
  0xd9   : > { %v529_v46 = vmul.f32 %v1322_v33, %v490_v36  ;;  %v491_v49 = vmul.f32 %v1317_v32, %v1234_v52  ;;  %v659_v60 = vsel %vm595_vm1, %v563_v20, %v627_v38  ;;  %v492_v52 = vmul.f32 %v1317_v32, %v1241_v55 }
  0xda   : > { %vm596_vm2 = vcmp.ge.f32.partialorder %v564_v41, 0.0  ;;  %v628_v62 = vmul.f32 0.2, %v564_v41  ;;  %vm597_vm3 = vcmp.ge.f32.partialorder %v565_v42, 0.0  ;;  %691 = vst.msk [vmem:[%s1366_s26 + $0x78] sm:$0xff] %vm262_vm0, %v659_v60  ;;  %v566_v27 = vadd.f32 %v1335_v44, %v527_v43 }
  0xdb   : > { %v629_v63 = vmul.f32 0.2, %v565_v42  ;;  %v567_v47 = vadd.f32 %v1335_v44, %v528_v45  ;;  %v568_v16 = vadd.f32 %v1335_v44, %v529_v46  ;;  %v530_v5 = vmul.f32 %v1322_v33, %v491_v49 }
  0xdc   : > { %v660_v19 = vsel %vm596_vm2, %v564_v41, %v628_v62  ;;  %v493_v22 = vmul.f32 %v1317_v32, %v1248_v58  ;;  %vm598_vm4 = vcmp.ge.f32.partialorder %v566_v27, 0.0  ;;  %v630_v48 = vmul.f32 0.2, %v566_v27 }
  0xdd   : > { %692 = vst.msk [vmem:[%s1366_s26 + $0x80] sm:$0xff] %vm262_vm0, %v660_v19  ;;  %v661_v25 = vsel %vm597_vm3, %v565_v42, %v629_v63  ;;  %vm599_vm5 = vcmp.ge.f32.partialorder %v567_v47, 0.0  ;;  %v631_v50 = vmul.f32 0.2, %v567_v47  ;;  %vm600_vm6 = vcmp.ge.f32.partialorder %v568_v16, 0.0 }
  0xde   : > { %693 = vst.msk [vmem:[%s1366_s26 + $0x88] sm:$0xff] %vm262_vm0, %v661_v25  ;;  %v632_v6 = vmul.f32 0.2, %v568_v16  ;;  %v569_v28 = vadd.f32 %v1335_v44, %v530_v5  ;;  %v662_v55 = vsel %vm598_vm4, %v566_v27, %v630_v48  ;;  %v531_v51 = vmul.f32 %v1322_v33, %v492_v52 }
  0xdf   : > { %v532_v58 = vmul.f32 %v1322_v33, %v493_v22  ;;  %v494_v2 = vmul.f32 %v1317_v32, %v1255_v61  ;;  %694 = vst.msk [vmem:[%s1366_s26 + $0x90] sm:$0xff] %vm262_vm0, %v662_v55  ;;  %v663_v7 = vsel %vm599_vm5, %v567_v47, %v631_v50  ;;  %v495_v61 = vmul.f32 %v1317_v32, %v1262_v4 }
  0xe0   : > { %v664_v53 = vsel %vm600_vm6, %v568_v16, %v632_v6  ;;  %vm601_vm7 = vcmp.ge.f32.partialorder %v569_v28, 0.0  ;;  %v633_v31 = vmul.f32 0.2, %v569_v28  ;;  %695 = vst.msk [vmem:[%s1366_s26 + $0x98] sm:$0xff] %vm262_vm0, %v663_v7  ;;  %v570_v10 = vadd.f32 %v1335_v44, %v531_v51 }
  0xe1   : > { %696 = vst.msk [vmem:[%s1366_s26 + $0xa0] sm:$0xff] %vm262_vm0, %v664_v53  ;;  %v571_v35 = vadd.f32 %v1335_v44, %v532_v58  ;;  %v533_v34 = vmul.f32 %v1322_v33, %v494_v2  ;;  %v496_v56 = vmul.f32 %v1317_v32, %v1269_v8  ;;  %v497_v57 = vmul.f32 %v1317_v32, %v1276_v12 }
  0xe2   : > { %v665_v54 = vsel %vm601_vm7, %v569_v28, %v633_v31  ;;  %v498_v0 = vmul.f32 %v1317_v32, %v1283_v17  ;;  %vm602_vm8 = vcmp.ge.f32.partialorder %v570_v10, 0.0  ;;  %v634_v9 = vmul.f32 0.2, %v570_v10 }
  0xe3   : > { %697 = vst.msk [vmem:[%s1366_s26 + $0xa8] sm:$0xff] %vm262_vm0, %v665_v54  ;;  %vm603_vm9 = vcmp.ge.f32.partialorder %v571_v35, 0.0  ;;  %v635_v39 = vmul.f32 0.2, %v571_v35  ;;  %v572_v4 = vadd.f32 %v1335_v44, %v533_v34  ;;  %v534_v59 = vmul.f32 %v1322_v33, %v495_v61 }
  0xe4   : > { %v535_v8 = vmul.f32 %v1322_v33, %v496_v56  ;;  %v536_v1 = vmul.f32 %v1322_v33, %v497_v57  ;;  %v666_v3 = vsel %vm602_vm8, %v570_v10, %v634_v9  ;;  %v537_v11 = vmul.f32 %v1322_v33, %v498_v0 }
  0xe5   : > { %v667_v12 = vsel %vm603_vm9, %v571_v35, %v635_v39  ;;  %v499_v17 = vmul.f32 %v1317_v32, %v1290_v21  ;;  %698 = vst.msk [vmem:[%s1366_s26 + $0xb0] sm:$0xff] %vm262_vm0, %v666_v3  ;;  %vm604_vm10 = vcmp.ge.f32.partialorder %v572_v4, 0.0  ;;  %v636_v14 = vmul.f32 0.2, %v572_v4 }
  0xe6   : > { %699 = vst.msk [vmem:[%s1366_s26 + $0xb8] sm:$0xff] %vm262_vm0, %v667_v12  ;;  %v573_v15 = vadd.f32 %v1335_v44, %v534_v59  ;;  %v574_v18 = vadd.f32 %v1335_v44, %v535_v8  ;;  %v575_v20 = vadd.f32 %v1335_v44, %v536_v1  ;;  %v576_v23 = vadd.f32 %v1335_v44, %v537_v11 }
  0xe7   : > { %v538_v13 = vmul.f32 %v1322_v33, %v499_v17  ;;  %v500_v21 = vmul.f32 %v1317_v32, %v1297_v26  ;;  %v668_v24 = vsel %vm604_vm10, %v572_v4, %v636_v14  ;;  %v501_v45 = vmul.f32 %v1317_v32, %v1304_v30 }
  0xe8   : > { %vm605_vm11 = vcmp.ge.f32.partialorder %v573_v15, 0.0  ;;  %v637_v37 = vmul.f32 0.2, %v573_v15  ;;  %vm606_vm12 = vcmp.ge.f32.partialorder %v574_v18, 0.0  ;;  %700 = vst.msk [vmem:[%s1366_s26 + $0xc0] sm:$0xff] %vm262_vm0, %v668_v24  ;;  %vm607_vm13 = vcmp.ge.f32.partialorder %v575_v20, 0.0 }
  0xe9   : > { %v638_v29 = vmul.f32 0.2, %v574_v18  ;;  %v639_v40 = vmul.f32 0.2, %v575_v20  ;;  %vm608_vm14 = vcmp.ge.f32.partialorder %v576_v23, 0.0  ;;  %v577_v41 = vadd.f32 %v1335_v44, %v538_v13 }
  0xea   : > { %v669_v36 = vsel %vm605_vm11, %v573_v15, %v637_v37  ;;  %v640_v38 = vmul.f32 0.2, %v576_v23  ;;  %v539_v42 = vmul.f32 %v1322_v33, %v500_v21  ;;  %v540_v62 = vmul.f32 %v1322_v33, %v501_v45 }
  0xeb   : > { %701 = vst.msk [vmem:[%s1366_s26 + $0xc8] sm:$0xff] %vm262_vm0, %v669_v36  ;;  %v670_v26 = vsel %vm606_vm12, %v574_v18, %v638_v29  ;;  %v671_v43 = vsel %vm607_vm13, %v575_v20, %v639_v40  ;;  %vm609_vm15 = vcmp.ge.f32.partialorder %v577_v41, 0.0  ;;  %v641_v49 = vmul.f32 0.2, %v577_v41 }
  0xec   : > { %702 = vst.msk [vmem:[%s1366_s26 + $0xd0] sm:$0xff] %vm262_vm0, %v670_v26  ;;  %703 = vst.msk [vmem:[%s1366_s26 + $0xd8] sm:$0xff] %vm262_vm0, %v671_v43  ;;  %v672_v46 = vsel %vm608_vm14, %v576_v23, %v640_v38  ;;  %v578_v60 = vadd.f32 %v1335_v44, %v539_v42  ;;  %v579_v30 = vadd.f32 %v1335_v44, %v540_v62 }
  0xed   : > { %704 = vst.msk [vmem:[%s1366_s26 + $0xe0] sm:$0xff] %vm262_vm0, %v672_v46  ;;  %v673_v63 = vsel %vm609_vm15, %v577_v41, %v641_v49 }
  0xee   : > { %vm610_vm1 = vcmp.ge.f32.partialorder %v578_v60, 0.0  ;;  %v642_v27 = vmul.f32 0.2, %v578_v60  ;;  %705 = vst.msk [vmem:[%s1366_s26 + $0xe8] sm:$0xff] %vm262_vm0, %v673_v63  ;;  %vm611_vm2 = vcmp.ge.f32.partialorder %v579_v30, 0.0 }
  0xef   : > { %v643_v47 = vmul.f32 0.2, %v579_v30 }
  0xf0   : > { %v674_v32 = vsel %vm610_vm1, %v578_v60, %v642_v27 }
  0xf1   : > { %706 = vst.msk [vmem:[%s1366_s26 + $0xf0] sm:$0xff] %vm262_vm0, %v674_v32  ;;  %v675_v16 = vsel %vm611_vm2, %v579_v30, %v643_v47 }
  0xf2   : > { %707 = vst.msk [vmem:[%s1366_s26 + $0xf8] sm:$0xff] %vm262_vm0, %v675_v16 }
  0xf3 PF: > { %s13_s14 = sadd.s32 1, %s881_s14   ;;  %s1541_s12 = smov %s877_s13 }
  0xf4   : > { %p10_p5 = scmp.ge.s32.totalorder %s13_s14, 4   ;;  %s1542_s13 = smov %s1544_s15 }
  0xf6   :  { %12 = sbr.rel (!%p10_p5) target bundleno = 2 (0x2), region = 68 }

// kernel: generator_forward.33
= control target key start
LH: loop header
LB: loop body
LE: loop exit
PB: predicated region body
PF: predicated region fallthrough
CT: control target
= control target key end

     0   :  { %s1425_s12 = smov 0   ;;  %s1427_s13 = smov 0   ;;  %s1618_s0 = inlined_call_operand.vmem [shape: bf16[512,256], index: 0, kind: input, shape index: {}]   ;;  %s1619_s1 = inlined_call_operand.vmem [shape: bf16[256,128], index: 1, kind: input, shape index: {}]   ;;  %s1620_s2 = inlined_call_operand.vmem [shape: f32[1,128], index: 2, kind: input, shape index: {}]   ;;  %s1621_s3 = inlined_call_operand.vmem [shape: f32[512,128], index: 3, kind: output, shape index: {}]  }
   0x1   :  { %s1429_s14 = smov 0  }
   0x2 LB: > { %s32_s15 = sadd.s32 1, %s1399_s13  ;;  %p1107_p0 = scmp.ge.s32.totalorder %s1403_s14, 1  ;;  %s1403_s14 = sphi %s1429_s14, %s13_s14   ;;  %s1399_s13 = sphi %s1427_s13, %s1623_s13   ;;  %s1395_s12 = sphi %s1425_s12, %s1622_s12  }
   0x3   : > { %p34_p1 = scmp.ge.s32.totalorder %s32_s15, 2  ;;  %p191_p2 = scmp.lt.s32.totalorder %s1403_s14, 3 }
   0x5   : > { %s1625_s15 = smov (%p34_p1, %s32_s15), 0  ;;  %p192_p3 = pnand %p1107_p0, %p191_p2 }
   0x6   : > { %s1108_s18 = sshll.u32 (!%p192_p3), %s1395_s12, 5 }
   0x7   : > { %195 = sbr.rel (%p192_p3) target bundleno = 305 (0x131), region = 32  ;;  %p236_p4 = scmp.lt.s32.totalorder (!%p192_p3), %s1108_s18, 63 }
   0xc   : > { %v1317_v0 = vld [vmem:[%s1619_s1 + $0x78] sm:$0xff]   ;;  %v1319_v2 = vld [vmem:[%s1619_s1 + $0x70] sm:$0xff]   ;;  %v1321_v4 = vld [vmem:[%s1619_s1 + $0x68] sm:$0xff]   ;;  %s1627_s18 = smov (!%p236_p4, %s1108_s18), 63 }
   0xd   : > { %v1318_v1 = vld [vmem:[%s1619_s1 + $0x38] sm:$0xff]   ;;  %1165 = vmatprep.subr.bf16.mxu0 %v1317_v0  ;;  %1277 = vmatprep.subr.bf16.mxu1 %v1317_v0  ;;  %v1320_v3 = vld [vmem:[%s1619_s1 + $0x30] sm:$0xff]   ;;  %v1322_v5 = vld [vmem:[%s1619_s1 + $0x28] sm:$0xff]   ;;  %s1164_s6 = sshll.u32 %s1627_s18, 3 }
   0xe   : > { %1166 = vmatpush3.bf16.msra.mxu0 %v1318_v1  ;;  %1285 = vmatpush3.bf16.msra.mxu1 %v1318_v1  ;;  %v1323_v6 = vld [vmem:[%s1619_s1 + $0x60] sm:$0xff]   ;;  %v1325_v8 = vld [vmem:[%s1619_s1 + $0x58] sm:$0xff]   ;;  %s1478_s11 = scalar_lea.vmem %s1618_s0, %s1164_s6  ;;  %v1327_v10 = vld [vmem:[%s1619_s1 + $0x50] sm:$0xff]   ;;  %s1543_s8 = scalar_lea.vmem %s1621_s3, %s1164_s6 }
   0xf   : > { %1167 = vmatprep.subr.bf16.mxu0 %v1319_v2  ;;  %1278 = vmatprep.subr.bf16.mxu1 %v1319_v2  ;;  %v1324_v7 = vld [vmem:[%s1619_s1 + $0x20] sm:$0xff]   ;;  %v1326_v9 = vld [vmem:[%s1619_s1 + $0x18] sm:$0xff]   ;;  %v1328_v13 = vld [vmem:[%s1619_s1 + $0x10] sm:$0xff]  }
  0x10   : > { %v1335_v11 = vld [vmem:[%s1478_s11 + $0x4] ss:$8 sps:$4 sm:$0xff]   ;;  %v1333_v18 = vld [vmem:[%s1478_s11] ss:$8 sps:$4 sm:$0xff]   ;;  %v1339_v20 = vld [vmem:[%s1478_s11 + $0x14] ss:$8 sps:$4 sm:$0xff]  }
  0x11   : > { %v1338_v12 = vld [vmem:[%s1478_s11 + $0x84] ss:$8 sps:$4 sm:$0xff]   ;;  %688 = vmatprep.mubr.bf16.mxu0 %v1335_v11  ;;  %v1336_v19 = vld [vmem:[%s1478_s11 + $0x80] ss:$8 sps:$4 sm:$0xff]   ;;  %v1341_v21 = vld [vmem:[%s1478_s11 + $0x94] ss:$8 sps:$4 sm:$0xff]  }
  0x12   : > { %1168 = vmatpush3.bf16.msra.mxu0 %v1320_v3  ;;  %1286 = vmatpush3.bf16.msra.mxu1 %v1320_v3  ;;  %v1329_v14 = vld [vmem:[%s1619_s1 + $0x48] sm:$0xff]   ;;  %v1331_v16 = vld [vmem:[%s1619_s1 + $0x40] sm:$0xff]   ;;  %v1343_v22 = vld [vmem:[%s1478_s11 + $0x10] ss:$8 sps:$4 sm:$0xff]  }
  0x13   : > { %1169 = vmatprep.subr.bf16.mxu0 %v1321_v4  ;;  %1279 = vmatprep.subr.bf16.mxu1 %v1321_v4  ;;  %v1330_v15 = vld [vmem:[%s1619_s1 + $0x8] sm:$0xff]   ;;  %v1332_v17 = vld [vmem:[%s1619_s1] sm:$0xff]   ;;  %v1344_v23 = vld [vmem:[%s1478_s11 + $0x90] ss:$8 sps:$4 sm:$0xff]  }
  0x14   : > { %752 = vmatprep.mubr.bf16.mxu1 %v1338_v12  ;;  %v1345_v24 = vld [vmem:[%s1478_s11 + $0x24] ss:$8 sps:$4 sm:$0xff]   ;;  %v1349_v26 = vld [vmem:[%s1478_s11 + $0x20] ss:$8 sps:$4 sm:$0xff]   ;;  %v1351_v28 = vld [vmem:[%s1478_s11 + $0x34] ss:$8 sps:$4 sm:$0xff]  }
  0x15   : > { %v1347_v25 = vld [vmem:[%s1478_s11 + $0xa4] ss:$8 sps:$4 sm:$0xff]   ;;  %v1350_v27 = vld [vmem:[%s1478_s11 + $0xa0] ss:$8 sps:$4 sm:$0xff]   ;;  %v1353_v29 = vld [vmem:[%s1478_s11 + $0xb4] ss:$8 sps:$4 sm:$0xff]  }
  0x16   : > { %1170 = vmatpush3.bf16.msra.mxu0 %v1322_v5  ;;  %1287 = vmatpush3.bf16.msra.mxu1 %v1322_v5  ;;  %v1355_v30 = vld [vmem:[%s1478_s11 + $0x30] ss:$8 sps:$4 sm:$0xff]   ;;  %v1357_v32 = vld [vmem:[%s1478_s11 + $0x44] ss:$8 sps:$4 sm:$0xff]   ;;  %v1361_v34 = vld [vmem:[%s1478_s11 + $0x40] ss:$8 sps:$4 sm:$0xff]  }
  0x17   : > { %1171 = vmatprep.subr.bf16.mxu0 %v1323_v6  ;;  %1280 = vmatprep.subr.bf16.mxu1 %v1323_v6  ;;  %v1356_v31 = vld [vmem:[%s1478_s11 + $0xb0] ss:$8 sps:$4 sm:$0xff]   ;;  %v1359_v33 = vld [vmem:[%s1478_s11 + $0xc4] ss:$8 sps:$4 sm:$0xff]   ;;  %v1362_v35 = vld [vmem:[%s1478_s11 + $0xc0] ss:$8 sps:$4 sm:$0xff]  }
  0x18   : > { %v1363_v36 = vld [vmem:[%s1478_s11 + $0x54] ss:$8 sps:$4 sm:$0xff]   ;;  %v1367_v38 = vld [vmem:[%s1478_s11 + $0x50] ss:$8 sps:$4 sm:$0xff]   ;;  %v1369_v40 = vld [vmem:[%s1478_s11 + $0x64] ss:$8 sps:$4 sm:$0xff]  }
  0x19   : > { %v1365_v37 = vld [vmem:[%s1478_s11 + $0xd4] ss:$8 sps:$4 sm:$0xff]   ;;  %v1368_v39 = vld [vmem:[%s1478_s11 + $0xd0] ss:$8 sps:$4 sm:$0xff]   ;;  %v1371_v41 = vld [vmem:[%s1478_s11 + $0xe4] ss:$8 sps:$4 sm:$0xff]  }
  0x1a   : > { %1172 = vmatpush3.bf16.msra.mxu0 %v1324_v7  ;;  %1288 = vmatpush3.bf16.msra.mxu1 %v1324_v7  ;;  %v1373_v42 = vld [vmem:[%s1478_s11 + $0x60] ss:$8 sps:$4 sm:$0xff]   ;;  %v1375_v44 = vld [vmem:[%s1478_s11 + $0x74] ss:$8 sps:$4 sm:$0xff]   ;;  %v1379_v46 = vld [vmem:[%s1478_s11 + $0x70] ss:$8 sps:$4 sm:$0xff]  }
  0x1b   : > { %1173 = vmatprep.subr.bf16.mxu0 %v1325_v8  ;;  %1281 = vmatprep.subr.bf16.mxu1 %v1325_v8  ;;  %v1374_v43 = vld [vmem:[%s1478_s11 + $0xe0] ss:$8 sps:$4 sm:$0xff]   ;;  %v1377_v45 = vld [vmem:[%s1478_s11 + $0xf4] ss:$8 sps:$4 sm:$0xff]   ;;  %v1380_v47 = vld [vmem:[%s1478_s11 + $0xf0] ss:$8 sps:$4 sm:$0xff]  }
  0x1c   : > { %v1536_v51 = vld [vmem:[%s1620_s2] ss:$0 sm:$0xff] }
  0x1e   : > { %1174 = vmatpush3.bf16.msra.mxu0 %v1326_v9  ;;  %1289 = vmatpush3.bf16.msra.mxu1 %v1326_v9 }
  0x1f   : > { %1175 = vmatprep.subr.bf16.mxu0 %v1327_v10  ;;  %1282 = vmatprep.subr.bf16.mxu1 %v1327_v10 }
  0x22   : > { %1176 = vmatpush3.bf16.msra.mxu0 %v1328_v13  ;;  %1290 = vmatpush3.bf16.msra.mxu1 %v1328_v13 }
  0x23   : > { %1177 = vmatprep.subr.bf16.mxu0 %v1329_v14  ;;  %1283 = vmatprep.subr.bf16.mxu1 %v1329_v14 }
  0x26   : > { %1178 = vmatpush3.bf16.msra.mxu0 %v1330_v15  ;;  %1291 = vmatpush3.bf16.msra.mxu1 %v1330_v15 }
  0x27   : > { %1179 = vmatprep.subr.bf16.mxu0 %v1331_v16  ;;  %1284 = vmatprep.subr.bf16.mxu1 %v1331_v16 }
  0x2a   : > { %1180 = vmatpush3.bf16.msra.mxu0 %v1332_v17  ;;  %1292 = vmatpush3.bf16.msra.mxu1 %v1332_v17 }
  0x2d   : > { %689 = vmatmul.mubr.bf16.vlgmr.msra.gmra.mxu0 %v1333_v18  ;;  %753 = vmatmul.mubr.bf16.vlgmr.msra.gmra.mxu1 %v1336_v19 }
  0x2e   : > { %696 = vmatprep.mubr.bf16.mxu0 %v1339_v20  ;;  %760 = vmatprep.mubr.bf16.mxu1 %v1341_v21 }
  0x35   : > { %697 = vmatmul.mubr.bf16.gmra.mxu0 %v1343_v22  ;;  %761 = vmatmul.mubr.bf16.gmra.mxu1 %v1344_v23 }
  0x36   : > { %704 = vmatprep.mubr.bf16.mxu0 %v1345_v24  ;;  %768 = vmatprep.mubr.bf16.mxu1 %v1347_v25 }
  0x3d   : > { %705 = vmatmul.mubr.bf16.gmra.mxu0 %v1349_v26  ;;  %769 = vmatmul.mubr.bf16.gmra.mxu1 %v1350_v27 }
  0x3e   : > { %712 = vmatprep.mubr.bf16.mxu0 %v1351_v28  ;;  %776 = vmatprep.mubr.bf16.mxu1 %v1353_v29 }
  0x45   : > { %713 = vmatmul.mubr.bf16.gmra.mxu0 %v1355_v30  ;;  %777 = vmatmul.mubr.bf16.gmra.mxu1 %v1356_v31 }
  0x46   : > { %720 = vmatprep.mubr.bf16.mxu0 %v1357_v32  ;;  %784 = vmatprep.mubr.bf16.mxu1 %v1359_v33 }
  0x4d   : > { %721 = vmatmul.mubr.bf16.gmra.mxu0 %v1361_v34  ;;  %785 = vmatmul.mubr.bf16.gmra.mxu1 %v1362_v35 }
  0x4e   : > { %728 = vmatprep.mubr.bf16.mxu0 %v1363_v36  ;;  %792 = vmatprep.mubr.bf16.mxu1 %v1365_v37 }
  0x55   : > { %729 = vmatmul.mubr.bf16.gmra.mxu0 %v1367_v38  ;;  %793 = vmatmul.mubr.bf16.gmra.mxu1 %v1368_v39 }
  0x56   : > { %736 = vmatprep.mubr.bf16.mxu0 %v1369_v40  ;;  %800 = vmatprep.mubr.bf16.mxu1 %v1371_v41 }
  0x5d   : > { %737 = vmatmul.mubr.bf16.gmra.mxu0 %v1373_v42  ;;  %801 = vmatmul.mubr.bf16.gmra.mxu1 %v1374_v43 }
  0x5e   : > { %744 = vmatprep.mubr.bf16.mxu0 %v1375_v44  ;;  %808 = vmatprep.mubr.bf16.mxu1 %v1377_v45 }
  0x65   : > { %745 = vmatmul.mubr.bf16.gmra.mxu0 %v1379_v46  ;;  %809 = vmatmul.mubr.bf16.gmra.mxu1 %v1380_v47 }
  0xed   : > { %v1181_v48 = vpop.f32.mrf.mxu0  ;;  %v1229_v49 = vpop.f32.mrf.mxu1 }
  0xef   : > { %v1182_v50 = vpop.f32.mrf.mxu0  ;;  %v1230_v52 = vpop.f32.mrf.mxu1 }
  0xf0   : > { %v1183_v53 = vadd.f32 %v1182_v50, %v1181_v48  ;;  %v1231_v54 = vadd.f32 %v1230_v52, %v1229_v49 }
  0xf1   : > { %v1184_v55 = vpop.f32.mrf.mxu0  ;;  %v1232_v56 = vpop.f32.mrf.mxu1 }
  0xf2   : > { %v923_v57 = vadd.f32 %v1183_v53, %v1536_v51  ;;  %v939_v58 = vadd.f32 %v1231_v54, %v1536_v51 }
  0xf3   : > { %v1185_v59 = vpop.f32.mrf.mxu0  ;;  %v1233_v60 = vpop.f32.mrf.mxu1 }
  0xf4   : > { %955 = vst [vmem:[%s1543_s8] sm:$0xff] %v923_v57  ;;  %971 = vst [vmem:[%s1543_s8 + $0x80] sm:$0xff] %v939_v58  ;;  %v1186_v61 = vadd.f32 %v1185_v59, %v1184_v55  ;;  %v1234_v62 = vadd.f32 %v1233_v60, %v1232_v56 }
  0xf5   : > { %v1187_v63 = vpop.f32.mrf.mxu0  ;;  %v1235_v0 = vpop.f32.mrf.mxu1 }
  0xf6   : > { %v924_v1 = vadd.f32 %v1186_v61, %v1536_v51  ;;  %v940_v2 = vadd.f32 %v1234_v62, %v1536_v51 }
  0xf7   : > { %v1188_v3 = vpop.f32.mrf.mxu0  ;;  %v1236_v4 = vpop.f32.mrf.mxu1 }
  0xf8   : > { %956 = vst [vmem:[%s1543_s8 + $0x8] sm:$0xff] %v924_v1  ;;  %972 = vst [vmem:[%s1543_s8 + $0x88] sm:$0xff] %v940_v2  ;;  %v1189_v5 = vadd.f32 %v1188_v3, %v1187_v63  ;;  %v1237_v6 = vadd.f32 %v1236_v4, %v1235_v0 }
  0xf9   : > { %v1190_v7 = vpop.f32.mrf.mxu0  ;;  %v1238_v8 = vpop.f32.mrf.mxu1 }
  0xfa   : > { %v925_v9 = vadd.f32 %v1189_v5, %v1536_v51  ;;  %v941_v10 = vadd.f32 %v1237_v6, %v1536_v51 }
  0xfb   : > { %v1191_v11 = vpop.f32.mrf.mxu0  ;;  %v1239_v12 = vpop.f32.mrf.mxu1 }
  0xfc   : > { %957 = vst [vmem:[%s1543_s8 + $0x10] sm:$0xff] %v925_v9  ;;  %973 = vst [vmem:[%s1543_s8 + $0x90] sm:$0xff] %v941_v10  ;;  %v1192_v13 = vadd.f32 %v1191_v11, %v1190_v7  ;;  %v1240_v14 = vadd.f32 %v1239_v12, %v1238_v8 }
  0xfd   : > { %v1193_v15 = vpop.f32.mrf.mxu0  ;;  %v1241_v16 = vpop.f32.mrf.mxu1 }
  0xfe   : > { %v926_v17 = vadd.f32 %v1192_v13, %v1536_v51  ;;  %v942_v18 = vadd.f32 %v1240_v14, %v1536_v51 }
  0xff   : > { %v1194_v19 = vpop.f32.mrf.mxu0  ;;  %v1242_v20 = vpop.f32.mrf.mxu1 }
 0x100   : > { %958 = vst [vmem:[%s1543_s8 + $0x18] sm:$0xff] %v926_v17  ;;  %974 = vst [vmem:[%s1543_s8 + $0x98] sm:$0xff] %v942_v18  ;;  %v1195_v21 = vadd.f32 %v1194_v19, %v1193_v15  ;;  %v1243_v22 = vadd.f32 %v1242_v20, %v1241_v16 }
 0x101   : > { %v1196_v23 = vpop.f32.mrf.mxu0  ;;  %v1244_v24 = vpop.f32.mrf.mxu1 }
 0x102   : > { %v927_v25 = vadd.f32 %v1195_v21, %v1536_v51  ;;  %v943_v26 = vadd.f32 %v1243_v22, %v1536_v51 }
 0x103   : > { %v1197_v27 = vpop.f32.mrf.mxu0  ;;  %v1245_v28 = vpop.f32.mrf.mxu1 }
 0x104   : > { %959 = vst [vmem:[%s1543_s8 + $0x20] sm:$0xff] %v927_v25  ;;  %975 = vst [vmem:[%s1543_s8 + $0xa0] sm:$0xff] %v943_v26  ;;  %v1198_v29 = vadd.f32 %v1197_v27, %v1196_v23  ;;  %v1246_v30 = vadd.f32 %v1245_v28, %v1244_v24 }
 0x105   : > { %v1199_v31 = vpop.f32.mrf.mxu0  ;;  %v1247_v32 = vpop.f32.mrf.mxu1 }
 0x106   : > { %v928_v33 = vadd.f32 %v1198_v29, %v1536_v51  ;;  %v944_v34 = vadd.f32 %v1246_v30, %v1536_v51 }
 0x107   : > { %v1200_v35 = vpop.f32.mrf.mxu0  ;;  %v1248_v36 = vpop.f32.mrf.mxu1 }
 0x108   : > { %960 = vst [vmem:[%s1543_s8 + $0x28] sm:$0xff] %v928_v33  ;;  %976 = vst [vmem:[%s1543_s8 + $0xa8] sm:$0xff] %v944_v34  ;;  %v1201_v37 = vadd.f32 %v1200_v35, %v1199_v31  ;;  %v1249_v38 = vadd.f32 %v1248_v36, %v1247_v32 }
 0x109   : > { %v1202_v39 = vpop.f32.mrf.mxu0  ;;  %v1250_v40 = vpop.f32.mrf.mxu1 }
 0x10a   : > { %v929_v41 = vadd.f32 %v1201_v37, %v1536_v51  ;;  %v945_v42 = vadd.f32 %v1249_v38, %v1536_v51 }
 0x10b   : > { %v1203_v43 = vpop.f32.mrf.mxu0  ;;  %v1251_v44 = vpop.f32.mrf.mxu1 }
 0x10c   : > { %961 = vst [vmem:[%s1543_s8 + $0x30] sm:$0xff] %v929_v41  ;;  %977 = vst [vmem:[%s1543_s8 + $0xb0] sm:$0xff] %v945_v42  ;;  %v1204_v45 = vadd.f32 %v1203_v43, %v1202_v39  ;;  %v1252_v46 = vadd.f32 %v1251_v44, %v1250_v40 }
 0x10d   : > { %v1205_v47 = vpop.f32.mrf.mxu0  ;;  %v1253_v48 = vpop.f32.mrf.mxu1 }
 0x10e   : > { %v930_v49 = vadd.f32 %v1204_v45, %v1536_v51  ;;  %v946_v50 = vadd.f32 %v1252_v46, %v1536_v51 }
 0x10f   : > { %v1206_v52 = vpop.f32.mrf.mxu0  ;;  %v1254_v53 = vpop.f32.mrf.mxu1 }
 0x110   : > { %962 = vst [vmem:[%s1543_s8 + $0x38] sm:$0xff] %v930_v49  ;;  %978 = vst [vmem:[%s1543_s8 + $0xb8] sm:$0xff] %v946_v50  ;;  %v1207_v54 = vadd.f32 %v1206_v52, %v1205_v47  ;;  %v1255_v55 = vadd.f32 %v1254_v53, %v1253_v48 }
 0x111   : > { %v1208_v56 = vpop.f32.mrf.mxu0  ;;  %v1256_v57 = vpop.f32.mrf.mxu1 }
 0x112   : > { %v931_v58 = vadd.f32 %v1207_v54, %v1536_v51  ;;  %v947_v59 = vadd.f32 %v1255_v55, %v1536_v51 }
 0x113   : > { %v1209_v60 = vpop.f32.mrf.mxu0  ;;  %v1257_v61 = vpop.f32.mrf.mxu1 }
 0x114   : > { %963 = vst [vmem:[%s1543_s8 + $0x40] sm:$0xff] %v931_v58  ;;  %979 = vst [vmem:[%s1543_s8 + $0xc0] sm:$0xff] %v947_v59  ;;  %v1210_v62 = vadd.f32 %v1209_v60, %v1208_v56  ;;  %v1258_v63 = vadd.f32 %v1257_v61, %v1256_v57 }
 0x115   : > { %v1211_v0 = vpop.f32.mrf.mxu0  ;;  %v1259_v1 = vpop.f32.mrf.mxu1 }
 0x116   : > { %v932_v2 = vadd.f32 %v1210_v62, %v1536_v51  ;;  %v948_v3 = vadd.f32 %v1258_v63, %v1536_v51 }
 0x117   : > { %v1212_v4 = vpop.f32.mrf.mxu0  ;;  %v1260_v5 = vpop.f32.mrf.mxu1 }
 0x118   : > { %964 = vst [vmem:[%s1543_s8 + $0x48] sm:$0xff] %v932_v2  ;;  %980 = vst [vmem:[%s1543_s8 + $0xc8] sm:$0xff] %v948_v3  ;;  %v1213_v6 = vadd.f32 %v1212_v4, %v1211_v0  ;;  %v1261_v7 = vadd.f32 %v1260_v5, %v1259_v1 }
 0x119   : > { %v1214_v8 = vpop.f32.mrf.mxu0  ;;  %v1262_v9 = vpop.f32.mrf.mxu1 }
 0x11a   : > { %v933_v10 = vadd.f32 %v1213_v6, %v1536_v51  ;;  %v949_v11 = vadd.f32 %v1261_v7, %v1536_v51 }
 0x11b   : > { %v1215_v12 = vpop.f32.mrf.mxu0  ;;  %v1263_v13 = vpop.f32.mrf.mxu1 }
 0x11c   : > { %965 = vst [vmem:[%s1543_s8 + $0x50] sm:$0xff] %v933_v10  ;;  %981 = vst [vmem:[%s1543_s8 + $0xd0] sm:$0xff] %v949_v11  ;;  %v1216_v14 = vadd.f32 %v1215_v12, %v1214_v8  ;;  %v1264_v15 = vadd.f32 %v1263_v13, %v1262_v9 }
 0x11d   : > { %v1217_v16 = vpop.f32.mrf.mxu0  ;;  %v1265_v17 = vpop.f32.mrf.mxu1 }
 0x11e   : > { %v934_v18 = vadd.f32 %v1216_v14, %v1536_v51  ;;  %v950_v19 = vadd.f32 %v1264_v15, %v1536_v51 }
 0x11f   : > { %v1218_v20 = vpop.f32.mrf.mxu0  ;;  %v1266_v21 = vpop.f32.mrf.mxu1 }
 0x120   : > { %966 = vst [vmem:[%s1543_s8 + $0x58] sm:$0xff] %v934_v18  ;;  %982 = vst [vmem:[%s1543_s8 + $0xd8] sm:$0xff] %v950_v19  ;;  %v1219_v22 = vadd.f32 %v1218_v20, %v1217_v16  ;;  %v1267_v23 = vadd.f32 %v1266_v21, %v1265_v17 }
 0x121   : > { %v1220_v24 = vpop.f32.mrf.mxu0  ;;  %v1268_v25 = vpop.f32.mrf.mxu1 }
 0x122   : > { %v935_v26 = vadd.f32 %v1219_v22, %v1536_v51  ;;  %v951_v27 = vadd.f32 %v1267_v23, %v1536_v51 }
 0x123   : > { %v1221_v28 = vpop.f32.mrf.mxu0  ;;  %v1269_v29 = vpop.f32.mrf.mxu1 }
 0x124   : > { %967 = vst [vmem:[%s1543_s8 + $0x60] sm:$0xff] %v935_v26  ;;  %983 = vst [vmem:[%s1543_s8 + $0xe0] sm:$0xff] %v951_v27  ;;  %v1222_v30 = vadd.f32 %v1221_v28, %v1220_v24  ;;  %v1270_v31 = vadd.f32 %v1269_v29, %v1268_v25 }
 0x125   : > { %v1223_v32 = vpop.f32.mrf.mxu0  ;;  %v1271_v33 = vpop.f32.mrf.mxu1 }
 0x126   : > { %v936_v34 = vadd.f32 %v1222_v30, %v1536_v51  ;;  %v952_v35 = vadd.f32 %v1270_v31, %v1536_v51 }
 0x127   : > { %v1224_v36 = vpop.f32.mrf.mxu0  ;;  %v1272_v37 = vpop.f32.mrf.mxu1 }
 0x128   : > { %968 = vst [vmem:[%s1543_s8 + $0x68] sm:$0xff] %v936_v34  ;;  %984 = vst [vmem:[%s1543_s8 + $0xe8] sm:$0xff] %v952_v35  ;;  %v1225_v38 = vadd.f32 %v1224_v36, %v1223_v32  ;;  %v1273_v39 = vadd.f32 %v1272_v37, %v1271_v33 }
 0x129   : > { %v1226_v40 = vpop.f32.mrf.mxu0  ;;  %v1274_v41 = vpop.f32.mrf.mxu1 }
 0x12a   : > { %v937_v42 = vadd.f32 %v1225_v38, %v1536_v51  ;;  %v953_v43 = vadd.f32 %v1273_v39, %v1536_v51 }
 0x12b   : > { %v1227_v44 = vpop.f32.mrf.mxu0  ;;  %v1275_v45 = vpop.f32.mrf.mxu1 }
 0x12c   : > { %969 = vst [vmem:[%s1543_s8 + $0x70] sm:$0xff] %v937_v42  ;;  %985 = vst [vmem:[%s1543_s8 + $0xf0] sm:$0xff] %v953_v43  ;;  %v1228_v46 = vadd.f32 %v1227_v44, %v1226_v40  ;;  %v1276_v47 = vadd.f32 %v1275_v45, %v1274_v41 }
 0x12e   : > { %v938_v48 = vadd.f32 %v1228_v46, %v1536_v51  ;;  %v954_v49 = vadd.f32 %v1276_v47, %v1536_v51 }
 0x130   : > { %970 = vst [vmem:[%s1543_s8 + $0x78] sm:$0xff] %v938_v48  ;;  %986 = vst [vmem:[%s1543_s8 + $0xf8] sm:$0xff] %v954_v49 }
 0x131 PF: > { %s13_s14 = sadd.s32 1, %s1403_s14   ;;  %s1622_s12 = smov %s1399_s13 }
 0x132   : > { %p10_p5 = scmp.ge.s32.totalorder %s13_s14, 4   ;;  %s1623_s13 = smov %s1625_s15 }
 0x134   :  { %12 = sbr.rel (!%p10_p5) target bundleno = 2 (0x2), region = 76 }

// kernel: generator_forward.35
= control target key start
LH: loop header
LB: loop body
LE: loop exit
PB: predicated region body
PF: predicated region fallthrough
CT: control target
= control target key end

     0   :  { %s1033_s12 = smov 0   ;;  %s1035_s13 = smov 0   ;;  %s1189_s0 = inlined_call_operand.vmem [shape: bf16[128,640], index: 0, kind: input, shape index: {}]   ;;  %s1190_s1 = inlined_call_operand.vmem [shape: bf16[640,128], index: 1, kind: input, shape index: {}]   ;;  %s1191_s2 = inlined_call_operand.vmem [shape: f32[1,128], index: 2, kind: input, shape index: {}]   ;;  %s1192_s3 = inlined_call_operand.vmem [shape: f32[128,128], index: 3, kind: output, shape index: {}]  }
   0x1   :  { %s1037_s14 = smov 0   ;;  %s1039_s15 = smov 0  }
   0x2   :  { %s1041_s16 = smov 0  }
   0x3 LB: > { %s25_s17 = sadd.s32 1, %s1006_s15  ;;  %p48_p1 = scmp.ne.s32.totalorder %s998_s13, %s994_s12  ;;  %s1010_s16 = sphi %s1041_s16, %s13_s16   ;;  %s1006_s15 = sphi %s1039_s15, %s1196_s15   ;;  %s1002_s14 = sphi %s1037_s14, %s1195_s14   ;;  %s998_s13 = sphi %s1035_s13, %s1194_s13   ;;  %s994_s12 = sphi %s1033_s12, %s1193_s12  }
   0x4   : > { %p26_p0 = scmp.ge.s32.totalorder %s25_s17, 5  ;;  %p49_p2 = scmp.eq.s32.totalorder %s1010_s16, 0 }
   0x5   : > { %s41_s19 = sadd.s32 1, %s998_s13  ;;  %p821_p5 = scmp.ge.s32.totalorder %s1010_s16, 5 }
   0x6   : > { %s1198_s17 = smov (%p26_p0, %s25_s17), 0  ;;  %p50_p3 = por %p49_p2, %p48_p1 }
   0x7   : > { %s37_s18 = ssub.s32 %s1006_s15, %s1198_s17  ;;  %162 = sbr.rel (%p821_p5) target bundleno = 26 (0x1a), region = 20 }
   0x8   : > { %p39_p4 = scmp.eq.s32.totalorder %s37_s18, 0 }
   0xa   : > { %s1068_s20 = scalar_select %p39_p4, %s998_s13, %s41_s19  }
   0xc   : > { %165 = sbr.rel (!%p50_p3) target bundleno = 26 (0x1a), region = 24  ;;  %s167_s21 = sand.u32 (%p50_p3), 1, %s998_s13  }
   0xd   : > { %s823_s22 = sshll.u32 (%p50_p3), %s1006_s15, 2  ;;  %s822_s23 = sshll.u32 (%p50_p3), %s167_s21, 6 }
   0xe   : > { %s1076_s26 = scalar_lea.vmem (%p50_p3), %s1189_s0, %s823_s22  ;;  %s169_s27 = scalar_lea.vmem (%p50_p3), [#allocation3], %s822_s23 }
   0xf   : > { %v191_v0 = vld [vmem:[%s1076_s26] sm:$0xf] (%p50_p3)  ;;  %v193_v1 = vld [vmem:[%s1076_s26 + $0x14] sm:$0xf] (%p50_p3)  ;;  %v195_v2 = vld [vmem:[%s1076_s26 + $0x28] sm:$0xf] (%p50_p3) }
  0x10   : > { %192 = vst [vmem:[%s169_s27] sm:$0xf] (%p50_p3), %v191_v0  ;;  %194 = vst [vmem:[%s169_s27 + $0x4] sm:$0xf] (%p50_p3), %v193_v1  ;;  %v197_v3 = vld [vmem:[%s1076_s26 + $0x3c] sm:$0xf] (%p50_p3) }
  0x11   : > { %v199_v4 = vld [vmem:[%s1076_s26 + $0x50] sm:$0xf]  ;;  %196 = vst [vmem:[%s169_s27 + $0x8] sm:$0xf] %v195_v2  ;;  %198 = vst [vmem:[%s169_s27 + $0xc] sm:$0xf] %v197_v3 }
  0x12   : > { %200 = vst [vmem:[%s169_s27 + $0x10] sm:$0xf] %v199_v4  ;;  %v201_v5 = vld [vmem:[%s1076_s26 + $0x64] sm:$0xf]  ;;  %v203_v6 = vld [vmem:[%s1076_s26 + $0x78] sm:$0xf] }
  0x13   : > { %v205_v7 = vld [vmem:[%s1076_s26 + $0x8c] sm:$0xf]  ;;  %202 = vst [vmem:[%s169_s27 + $0x14] sm:$0xf] %v201_v5  ;;  %204 = vst [vmem:[%s169_s27 + $0x18] sm:$0xf] %v203_v6 }
  0x14   : > { %206 = vst [vmem:[%s169_s27 + $0x1c] sm:$0xf] %v205_v7  ;;  %v207_v8 = vld [vmem:[%s1076_s26 + $0xa0] sm:$0xf]  ;;  %v209_v9 = vld [vmem:[%s1076_s26 + $0xb4] sm:$0xf] }
  0x15   : > { %v211_v10 = vld [vmem:[%s1076_s26 + $0xc8] sm:$0xf]  ;;  %208 = vst [vmem:[%s169_s27 + $0x20] sm:$0xf] %v207_v8  ;;  %210 = vst [vmem:[%s169_s27 + $0x24] sm:$0xf] %v209_v9 }
  0x16   : > { %212 = vst [vmem:[%s169_s27 + $0x28] sm:$0xf] %v211_v10  ;;  %v213_v11 = vld [vmem:[%s1076_s26 + $0xdc] sm:$0xf]  ;;  %v215_v12 = vld [vmem:[%s1076_s26 + $0xf0] sm:$0xf] }
  0x17   : > { %v217_v13 = vld [vmem:[%s1076_s26 + $0x104] sm:$0xf]  ;;  %214 = vst [vmem:[%s169_s27 + $0x2c] sm:$0xf] %v213_v11  ;;  %216 = vst [vmem:[%s169_s27 + $0x30] sm:$0xf] %v215_v12 }
  0x18   : > { %218 = vst [vmem:[%s169_s27 + $0x34] sm:$0xf] %v217_v13  ;;  %v219_v14 = vld [vmem:[%s1076_s26 + $0x118] sm:$0xf]  ;;  %v221_v15 = vld [vmem:[%s1076_s26 + $0x12c] sm:$0xf] }
  0x19   : > { %220 = vst [vmem:[%s169_s27 + $0x38] sm:$0xf] %v219_v14  ;;  %222 = vst [vmem:[%s169_s27 + $0x3c] sm:$0xf] %v221_v15 }
  0x1a PF: > { %p824_p6 = scmp.ge.s32.totalorder %s1010_s16, 1  ;;  %p289_p7 = scmp.lt.s32.totalorder %s1010_s16, 6 }
  0x1c   : > { %p290_p8 = pnand %p824_p6, %p289_p7 }
  0x1d   : > { %s296_s28 = sand.u32 (!%p290_p8), 1, %s994_s12   ;;  %s826_s29 = sshll.u32 (!%p290_p8), %s1002_s14, 4 }
  0x1e   : > { %293 = sbr.rel (%p290_p8) target bundleno = 303 (0x12f), region = 69  ;;  %s825_s30 = sshll.u32 (!%p290_p8), %s296_s28, 6 }
  0x1f   : > { %p335_p9 = scmp.lt.s32.totalorder (!%p290_p8), %s826_s29, 79  ;;  %s1103_s8 = scalar_lea.vmem (!%p290_p8), [#allocation3], %s825_s30 }
  0x20   : > { %p828_p10 = scmp.ne.s32.totalorder (!%p290_p8), %s1002_s14, 0 }
  0x23   : > { %s1200_s29 = smov (!%p335_p9, %s826_s29), 79  ;;  %359 = sbr.rel (%p828_p10) target bundleno = 49 (0x31), region = 77 }
  0x24   : > { %s827_s4 = sshll.u32 %s1200_s29, 2 }
  0x25   : > { %s1101_s7 = scalar_lea.vmem %s1190_s1, %s827_s4 }
  0x28   : > { %v1012_v16 = vmov 0.0  }
  0x29   : > { %360 = vst [vmem:[#allocation2 + $0x30] sm:$0xff] %v1012_v16  ;;  %361 = vst [vmem:[#allocation2] sm:$0xff] %v1012_v16 }
  0x2a   : > { %362 = vst [vmem:[#allocation2 + $0x58] sm:$0xff] %v1012_v16  ;;  %363 = vst [vmem:[#allocation2 + $0x18] sm:$0xff] %v1012_v16 }
  0x2b   : > { %364 = vst [vmem:[#allocation2 + $0x50] sm:$0xff] %v1012_v16  ;;  %365 = vst [vmem:[#allocation2 + $0x68] sm:$0xff] %v1012_v16 }
  0x2c   : > { %366 = vst [vmem:[#allocation2 + $0x8] sm:$0xff] %v1012_v16  ;;  %367 = vst [vmem:[#allocation2 + $0x48] sm:$0xff] %v1012_v16 }
  0x2d   : > { %368 = vst [vmem:[#allocation2 + $0x40] sm:$0xff] %v1012_v16  ;;  %369 = vst [vmem:[#allocation2 + $0x20] sm:$0xff] %v1012_v16 }
  0x2e   : > { %370 = vst [vmem:[#allocation2 + $0x10] sm:$0xff] %v1012_v16  ;;  %371 = vst [vmem:[#allocation2 + $0x38] sm:$0xff] %v1012_v16 }
  0x2f   : > { %372 = vst [vmem:[#allocation2 + $0x60] sm:$0xff] %v1012_v16  ;;  %373 = vst [vmem:[#allocation2 + $0x70] sm:$0xff] %v1012_v16 }
  0x30   : > { %374 = vst [vmem:[#allocation2 + $0x78] sm:$0xff] %v1012_v16  ;;  %375 = vst [vmem:[#allocation2 + $0x28] sm:$0xff] %v1012_v16 }
  0x31 PF: > { %v956_v17 = vld [vmem:[%s1101_s7 + $0x38] sm:$0xff]   ;;  %v957_v18 = vld [vmem:[%s1101_s7 + $0x30] sm:$0xff]   ;;  %v958_v19 = vld [vmem:[%s1101_s7 + $0x28] sm:$0xff]   ;;  %p845_p11 = scmp.ne.s32.totalorder %s1002_s14, 4 }
  0x32   : > { %867 = vmatprep.subr.bf16.mxu0 %v956_v17  ;;  %899 = vmatprep.subr.bf16.mxu1 %v956_v17  ;;  %v959_v20 = vld [vmem:[%s1101_s7 + $0x20] sm:$0xff]   ;;  %v960_v23 = vld [vmem:[%s1101_s7 + $0x18] sm:$0xff]   ;;  %v961_v24 = vld [vmem:[%s1101_s7 + $0x10] sm:$0xff]  }
  0x33   : > { %868 = vmatpush3.bf16.msra.mxu0 %v956_v17  ;;  %907 = vmatpush3.bf16.msra.mxu1 %v956_v17  ;;  %v964_v21 = vld [vmem:[%s1103_s8] sm:$0xff]   ;;  %v962_v25 = vld [vmem:[%s1101_s7 + $0x8] sm:$0xff]   ;;  %v968_v29 = vld [vmem:[%s1103_s8 + $0x10] sm:$0xff]  }
  0x34   : > { %869 = vmatprep.subr.bf16.mxu0 %v957_v18  ;;  %900 = vmatprep.subr.bf16.mxu1 %v957_v18  ;;  %v965_v22 = vld [vmem:[%s1103_s8 + $0x20] sm:$0xff]   ;;  %v966_v27 = vld [vmem:[%s1103_s8 + $0x8] sm:$0xff]   ;;  %v969_v30 = vld [vmem:[%s1103_s8 + $0x30] sm:$0xff]  }
  0x35   : > { %883 = vmatprep.mubr.bf16.mxu0 %v964_v21  ;;  %891 = vmatprep.mubr.bf16.mxu1 %v965_v22  ;;  %v963_v26 = vld [vmem:[%s1101_s7] sm:$0xff]   ;;  %v967_v28 = vld [vmem:[%s1103_s8 + $0x28] sm:$0xff]   ;;  %v970_v31 = vld [vmem:[%s1103_s8 + $0x18] sm:$0xff]  }
  0x36   : > { %v971_v32 = vld [vmem:[%s1103_s8 + $0x38] sm:$0xff]   ;;  %v386_v34 = vld [vmem:[#allocation2 + $0x10] sm:$0xff]  ;;  %v384_v38 = vld [vmem:[#allocation2 + $0x40] sm:$0xff] }
  0x37   : > { %870 = vmatpush3.bf16.msra.mxu0 %v957_v18  ;;  %908 = vmatpush3.bf16.msra.mxu1 %v957_v18  ;;  %v378_v33 = vld [vmem:[#allocation2 + $0x58] sm:$0xff]  ;;  %v376_v37 = vld [vmem:[#allocation2 + $0x30] sm:$0xff]  ;;  %v377_v49 = vld [vmem:[#allocation2] sm:$0xff] }
  0x38   : > { %871 = vmatprep.subr.bf16.mxu0 %v958_v19  ;;  %901 = vmatprep.subr.bf16.mxu1 %v958_v19  ;;  %v379_v43 = vld [vmem:[#allocation2 + $0x18] sm:$0xff]  ;;  %v385_v50 = vld [vmem:[#allocation2 + $0x20] sm:$0xff]  ;;  %v382_v55 = vld [vmem:[#allocation2 + $0x8] sm:$0xff] }
  0x39   : > { %v387_v44 = vld [vmem:[#allocation2 + $0x38] sm:$0xff]  ;;  %v380_v61 = vld [vmem:[#allocation2 + $0x50] sm:$0xff]  ;;  %v388_v62 = vld [vmem:[#allocation2 + $0x60] sm:$0xff] }
  0x3a   : > { %v390_v56 = vld [vmem:[#allocation2 + $0x78] sm:$0xff]  ;;  %v383_v3 = vld [vmem:[#allocation2 + $0x48] sm:$0xff]  ;;  %v389_v10 = vld [vmem:[#allocation2 + $0x70] sm:$0xff] }
  0x3b   : > { %872 = vmatpush3.bf16.msra.mxu0 %v958_v19  ;;  %909 = vmatpush3.bf16.msra.mxu1 %v958_v19  ;;  %v391_v4 = vld [vmem:[#allocation2 + $0x28] sm:$0xff] }
  0x3c   : > { %873 = vmatprep.subr.bf16.mxu0 %v959_v20  ;;  %902 = vmatprep.subr.bf16.mxu1 %v959_v20  ;;  %v381_v9 = vld [vmem:[#allocation2 + $0x68] sm:$0xff] }
  0x3f   : > { %874 = vmatpush3.bf16.msra.mxu0 %v959_v20  ;;  %910 = vmatpush3.bf16.msra.mxu1 %v959_v20 }
  0x40   : > { %875 = vmatprep.subr.bf16.mxu0 %v960_v23  ;;  %903 = vmatprep.subr.bf16.mxu1 %v960_v23 }
  0x43   : > { %876 = vmatpush3.bf16.msra.mxu0 %v960_v23  ;;  %911 = vmatpush3.bf16.msra.mxu1 %v960_v23 }
  0x44   : > { %877 = vmatprep.subr.bf16.mxu0 %v961_v24  ;;  %904 = vmatprep.subr.bf16.mxu1 %v961_v24 }
  0x47   : > { %878 = vmatpush3.bf16.msra.mxu0 %v961_v24  ;;  %912 = vmatpush3.bf16.msra.mxu1 %v961_v24 }
  0x48   : > { %879 = vmatprep.subr.bf16.mxu0 %v962_v25  ;;  %905 = vmatprep.subr.bf16.mxu1 %v962_v25 }
  0x4b   : > { %880 = vmatpush3.bf16.msra.mxu0 %v962_v25  ;;  %913 = vmatpush3.bf16.msra.mxu1 %v962_v25 }
  0x4c   : > { %881 = vmatprep.subr.bf16.mxu0 %v963_v26  ;;  %906 = vmatprep.subr.bf16.mxu1 %v963_v26 }
  0x4f   : > { %882 = vmatpush3.bf16.msra.mxu0 %v963_v26  ;;  %914 = vmatpush3.bf16.msra.mxu1 %v963_v26 }
  0x52   : > { %884 = vmatmul.mubr.bf16.vlgmr.msra.gmra.mxu0 %v966_v27  ;;  %892 = vmatmul.mubr.bf16.vlgmr.msra.gmra.mxu1 %v967_v28 }
  0x53   : > { %887 = vmatprep.mubr.bf16.mxu0 %v968_v29  ;;  %895 = vmatprep.mubr.bf16.mxu1 %v969_v30 }
  0x5a   : > { %888 = vmatmul.mubr.bf16.gmra.mxu0 %v970_v31  ;;  %896 = vmatmul.mubr.bf16.gmra.mxu1 %v971_v32 }
 0x112   : > { %v885_v35 = vpop.f32.mrf.mxu0  ;;  %v893_v36 = vpop.f32.mrf.mxu1 }
 0x113   : > { %v619_v39 = vadd.f32 %v885_v35, %v378_v33  ;;  %v627_v40 = vadd.f32 %v893_v36, %v386_v34 }
 0x114   : > { %v554_v41 = vpop.f32.mrf.mxu0  ;;  %v586_v42 = vpop.f32.mrf.mxu1 }
 0x115   : > { %635 = vst [vmem:[#allocation2 + $0x58] sm:$0xff] %v619_v39  ;;  %643 = vst [vmem:[#allocation2 + $0x10] sm:$0xff] %v627_v40  ;;  %v617_v45 = vadd.f32 %v554_v41, %v376_v37  ;;  %v625_v46 = vadd.f32 %v586_v42, %v384_v38 }
 0x116   : > { %v886_v47 = vpop.f32.mrf.mxu0  ;;  %v894_v48 = vpop.f32.mrf.mxu1 }
 0x117   : > { %633 = vst [vmem:[#allocation2 + $0x30] sm:$0xff] %v617_v45  ;;  %641 = vst [vmem:[#allocation2 + $0x40] sm:$0xff] %v625_v46  ;;  %v620_v51 = vadd.f32 %v886_v47, %v379_v43  ;;  %v628_v52 = vadd.f32 %v894_v48, %v387_v44 }
 0x118   : > { %v557_v53 = vpop.f32.mrf.mxu0  ;;  %v589_v54 = vpop.f32.mrf.mxu1 }
 0x119   : > { %636 = vst [vmem:[#allocation2 + $0x18] sm:$0xff] %v620_v51  ;;  %644 = vst [vmem:[#allocation2 + $0x38] sm:$0xff] %v628_v52  ;;  %v618_v57 = vadd.f32 %v557_v53, %v377_v49  ;;  %v626_v58 = vadd.f32 %v589_v54, %v385_v50 }
 0x11a   : > { %v889_v59 = vpop.f32.mrf.mxu0  ;;  %v897_v60 = vpop.f32.mrf.mxu1 }
 0x11b   : > { %634 = vst [vmem:[#allocation2] sm:$0xff] %v618_v57  ;;  %642 = vst [vmem:[#allocation2 + $0x20] sm:$0xff] %v626_v58  ;;  %v623_v63 = vadd.f32 %v889_v59, %v382_v55  ;;  %v631_v0 = vadd.f32 %v897_v60, %v390_v56 }
 0x11c   : > { %v570_v1 = vpop.f32.mrf.mxu0  ;;  %v602_v2 = vpop.f32.mrf.mxu1 }
 0x11d   : > { %639 = vst [vmem:[#allocation2 + $0x8] sm:$0xff] %v623_v63  ;;  %647 = vst [vmem:[#allocation2 + $0x78] sm:$0xff] %v631_v0  ;;  %v621_v5 = vadd.f32 %v570_v1, %v380_v61  ;;  %v629_v6 = vadd.f32 %v602_v2, %v388_v62 }
 0x11e   : > { %v890_v7 = vpop.f32.mrf.mxu0  ;;  %v898_v8 = vpop.f32.mrf.mxu1 }
 0x11f   : > { %637 = vst [vmem:[#allocation2 + $0x50] sm:$0xff] %v621_v5  ;;  %645 = vst [vmem:[#allocation2 + $0x60] sm:$0xff] %v629_v6  ;;  %v624_v11 = vadd.f32 %v890_v7, %v383_v3  ;;  %v632_v12 = vadd.f32 %v898_v8, %v391_v4  ;;  %652 = sbr.rel (%p845_p11) target bundleno = 303 (0x12f), region = 81 }
 0x120   : > { %v573_v13 = vpop.f32.mrf.mxu0  ;;  %v605_v14 = vpop.f32.mrf.mxu1 }
 0x121   : > { %640 = vst [vmem:[#allocation2 + $0x48] sm:$0xff] %v624_v11  ;;  %648 = vst [vmem:[#allocation2 + $0x28] sm:$0xff] %v632_v12  ;;  %v622_v15 = vadd.f32 %v573_v13, %v381_v9  ;;  %v630_v16 = vadd.f32 %v605_v14, %v389_v10 }
 0x123   : > { %638 = vst [vmem:[#allocation2 + $0x68] sm:$0xff] %v622_v15  ;;  %646 = vst [vmem:[#allocation2 + $0x70] sm:$0xff] %v630_v16 }
 0x124   : > { %v653_v17 = vld [vmem:[#allocation2 + $0x30] sm:$0xff]  ;;  %v846_v18 = vld [vmem:[%s1191_s2] ss:$0 sm:$0xff]  ;;  %v655_v22 = vld [vmem:[#allocation2 + $0x58] sm:$0xff] }
 0x125   : > { %v654_v19 = vld [vmem:[#allocation2] sm:$0xff]  ;;  %v676_v20 = vadd.f32 %v846_v18, %v653_v17  ;;  %v656_v23 = vld [vmem:[#allocation2 + $0x18] sm:$0xff]  ;;  %v678_v25 = vadd.f32 %v846_v18, %v655_v22  ;;  %v659_v29 = vld [vmem:[#allocation2 + $0x8] sm:$0xff] }
 0x126   : > { %v677_v21 = vadd.f32 %v846_v18, %v654_v19  ;;  %v657_v24 = vld [vmem:[#allocation2 + $0x50] sm:$0xff]  ;;  %v679_v26 = vadd.f32 %v846_v18, %v656_v23  ;;  %v682_v32 = vadd.f32 %v846_v18, %v659_v29  ;;  %v661_v34 = vld [vmem:[#allocation2 + $0x40] sm:$0xff]  ;;  %v664_v40 = vld [vmem:[#allocation2 + $0x38] sm:$0xff] }
 0x127   : > { %v680_v27 = vadd.f32 %v846_v18, %v657_v24  ;;  %692 = vst [vmem:[%s1192_s3] sm:$0xff] %v676_v20  ;;  %v662_v35 = vld [vmem:[#allocation2 + $0x20] sm:$0xff]  ;;  %v663_v36 = vld [vmem:[#allocation2 + $0x10] sm:$0xff]  ;;  %694 = vst [vmem:[%s1192_s3 + $0x10] sm:$0xff] %v678_v25  ;;  %v684_v37 = vadd.f32 %v846_v18, %v661_v34  ;;  %v687_v43 = vadd.f32 %v846_v18, %v664_v40 }
 0x128   : > { %v660_v30 = vld [vmem:[#allocation2 + $0x48] sm:$0xff]  ;;  %693 = vst [vmem:[%s1192_s3 + $0x8] sm:$0xff] %v677_v21  ;;  %695 = vst [vmem:[%s1192_s3 + $0x18] sm:$0xff] %v679_v26  ;;  %v685_v38 = vadd.f32 %v846_v18, %v662_v35  ;;  %v686_v39 = vadd.f32 %v846_v18, %v663_v36  ;;  %v665_v41 = vld [vmem:[#allocation2 + $0x60] sm:$0xff] }
 0x129   : > { %v683_v33 = vadd.f32 %v846_v18, %v660_v30  ;;  %696 = vst [vmem:[%s1192_s3 + $0x20] sm:$0xff] %v680_v27  ;;  %698 = vst [vmem:[%s1192_s3 + $0x30] sm:$0xff] %v682_v32  ;;  %v688_v44 = vadd.f32 %v846_v18, %v665_v41  ;;  %v667_v46 = vld [vmem:[#allocation2 + $0x78] sm:$0xff]  ;;  %v668_v47 = vld [vmem:[#allocation2 + $0x28] sm:$0xff] }
 0x12a   : > { %v658_v28 = vld [vmem:[#allocation2 + $0x68] sm:$0xff]  ;;  %v666_v42 = vld [vmem:[#allocation2 + $0x70] sm:$0xff]  ;;  %700 = vst [vmem:[%s1192_s3 + $0x40] sm:$0xff] %v684_v37  ;;  %701 = vst [vmem:[%s1192_s3 + $0x48] sm:$0xff] %v685_v38  ;;  %v690_v48 = vadd.f32 %v846_v18, %v667_v46  ;;  %v691_v49 = vadd.f32 %v846_v18, %v668_v47 }
 0x12b   : > { %v681_v31 = vadd.f32 %v846_v18, %v658_v28  ;;  %699 = vst [vmem:[%s1192_s3 + $0x38] sm:$0xff] %v683_v33  ;;  %v689_v45 = vadd.f32 %v846_v18, %v666_v42  ;;  %702 = vst [vmem:[%s1192_s3 + $0x50] sm:$0xff] %v686_v39 }
 0x12c   : > { %703 = vst [vmem:[%s1192_s3 + $0x58] sm:$0xff] %v687_v43  ;;  %704 = vst [vmem:[%s1192_s3 + $0x60] sm:$0xff] %v688_v44 }
 0x12d   : > { %697 = vst [vmem:[%s1192_s3 + $0x28] sm:$0xff] %v681_v31  ;;  %705 = vst [vmem:[%s1192_s3 + $0x68] sm:$0xff] %v689_v45 }
 0x12e   : > { %706 = vst [vmem:[%s1192_s3 + $0x70] sm:$0xff] %v690_v48  ;;  %707 = vst [vmem:[%s1192_s3 + $0x78] sm:$0xff] %v691_v49 }
 0x12f PF: > { %s13_s16 = sadd.s32 1, %s1010_s16   ;;  %s1193_s12 = smov %s998_s13 }
 0x130   : > { %p10_p12 = scmp.ge.s32.totalorder %s13_s16, 7   ;;  %s1194_s13 = smov %s1068_s20 }
 0x131   : > { %s1195_s14 = smov %s1006_s15  ;;  %s1196_s15 = smov %s1198_s17 }
 0x132   :  { %12 = sbr.rel (!%p10_p12) target bundleno = 3 (0x3), region = 122 }

// kernel: generator_forward.36
= control target key start
LH: loop header
LB: loop body
LE: loop exit
PB: predicated region body
PF: predicated region fallthrough
CT: control target
= control target key end

     0   :  { %s550_s12 = smov 0   ;;  %s552_s13 = smov 0   ;;  %s606_s0 = inlined_call_operand.vmem [shape: f32[2,64,128], index: 0, kind: input, shape index: {}]   ;;  %s607_s1 = inlined_call_operand.vmem [shape: f32[1,128], index: 1, kind: input, shape index: {}]   ;;  %s608_s2 = inlined_call_operand.vmem [shape: f32[1,128], index: 2, kind: input, shape index: {}]   ;;  %s609_s3 = inlined_call_operand.vmem [shape: f32[2,64,128], index: 3, kind: output, shape index: {}]  }
   0x1   :  { %s554_s14 = smov 0  }
   0x2 LB: > { %s25_s15 = sadd.s32 1, %s524_s13  ;;  %p469_p0 = scmp.ge.s32.totalorder %s528_s14, 1  ;;  %s528_s14 = sphi %s554_s14, %s13_s14   ;;  %s524_s13 = sphi %s552_s13, %s611_s13   ;;  %s520_s12 = sphi %s550_s12, %s610_s12  }
   0x3   : > { %p27_p1 = scmp.ge.s32.totalorder %s25_s15, 2  ;;  %p172_p2 = scmp.lt.s32.totalorder %s528_s14, 3 }
   0x5   : > { %s613_s15 = smov (%p27_p1, %s25_s15), 0  ;;  %p173_p3 = pnand %p469_p0, %p172_p2 }
   0x6   : > { %p208_p4 = scmp.lt.s32.totalorder (!%p173_p3), %s520_s12, 1 }
   0x7   : > { %176 = sbr.rel (%p173_p3) target bundleno = 107 (0x6b), region = 32 }
   0xc   : > { %s615_s12 = smov (!%p208_p4, %s520_s12), 1  ;;  %v474_v54 = vld [vmem:[%s607_s1] ss:$0 sm:$0xff] }
   0xd   : > { %s478_s16 = sshll.u32 %s615_s12, 6  ;;  %v475_v59 = vld [vmem:[%s608_s2] ss:$0 sm:$0xff] }
   0xe   : > { %s215_s19 = scalar_lea.vmem %s606_s0, %s478_s16  ;;  %s587_s26 = scalar_lea.vmem %s609_s3, %s478_s16 }
   0xf   : > { %v230_v0 = vld [vmem:[%s215_s19] sm:$0xff]  ;;  %v231_v1 = vld [vmem:[%s215_s19 + $0x8] sm:$0xff]  ;;  %v232_v2 = vld [vmem:[%s215_s19 + $0x10] sm:$0xff] }
  0x10   : > { %v238_v3 = vadd.f32 %v231_v1, %v230_v0  ;;  %v233_v4 = vld [vmem:[%s215_s19 + $0x18] sm:$0xff]  ;;  %v234_v6 = vld [vmem:[%s215_s19 + $0x20] sm:$0xff]  ;;  %v235_v8 = vld [vmem:[%s215_s19 + $0x28] sm:$0xff] }
  0x11   : > { %v236_v10 = vld [vmem:[%s215_s19 + $0x30] sm:$0xff]  ;;  %v237_v12 = vld [vmem:[%s215_s19 + $0x38] sm:$0xff] }
  0x12   : > { %v239_v5 = vadd.f32 %v238_v3, %v232_v2 }
  0x14   : > { %v240_v7 = vadd.f32 %v239_v5, %v233_v4 }
  0x16   : > { %v241_v9 = vadd.f32 %v240_v7, %v234_v6 }
  0x18   : > { %v242_v11 = vadd.f32 %v241_v9, %v235_v8 }
  0x1a   : > { %v243_v13 = vadd.f32 %v242_v11, %v236_v10 }
  0x1c   : > { %v244_v14 = vadd.f32 %v243_v13, %v237_v12 }
  0x1e   : > { %v245_v15 = vrot.slane %v244_v14, 4 }
  0x20   : > { %v246_v16 = vadd.f32 %v245_v15, %v244_v14 }
  0x22   : > { %v247_v17 = vrot.slane %v246_v16, 2 }
  0x24   : > { %v248_v18 = vadd.f32 %v247_v17, %v246_v16 }
  0x26   : > { %v249_v19 = vrot.slane %v248_v18, 1 }
  0x28   : > { %v250_v20 = vadd.f32 %v249_v19, %v248_v18 }
  0x2a   : > { %v252_v21 = vmul.f32 0.015625, %v250_v20 }
  0x2c   : > { %v253_v22 = vsub.f32 %v230_v0, %v252_v21  ;;  %v254_v23 = vsub.f32 %v231_v1, %v252_v21  ;;  %v255_v24 = vsub.f32 %v232_v2, %v252_v21  ;;  %v256_v25 = vsub.f32 %v233_v4, %v252_v21 }
  0x2d   : > { %v257_v26 = vsub.f32 %v234_v6, %v252_v21  ;;  %v258_v30 = vsub.f32 %v235_v8, %v252_v21  ;;  %v259_v33 = vsub.f32 %v236_v10, %v252_v21  ;;  %v260_v36 = vsub.f32 %v237_v12, %v252_v21 }
  0x2e   : > { %v261_v27 = vmul.f32 %v253_v22, %v253_v22  ;;  %v262_v28 = vmul.f32 %v254_v23, %v254_v23  ;;  %v263_v29 = vmul.f32 %v255_v24, %v255_v24  ;;  %v264_v31 = vmul.f32 %v256_v25, %v256_v25 }
  0x2f   : > { %v265_v34 = vmul.f32 %v257_v26, %v257_v26  ;;  %v266_v37 = vmul.f32 %v258_v30, %v258_v30  ;;  %v267_v39 = vmul.f32 %v259_v33, %v259_v33  ;;  %v268_v41 = vmul.f32 %v260_v36, %v260_v36 }
  0x30   : > { %v269_v32 = vadd.f32 %v262_v28, %v261_v27 }
  0x32   : > { %v270_v35 = vadd.f32 %v269_v32, %v263_v29 }
  0x34   : > { %v271_v38 = vadd.f32 %v270_v35, %v264_v31 }
  0x36   : > { %v272_v40 = vadd.f32 %v271_v38, %v265_v34 }
  0x38   : > { %v273_v42 = vadd.f32 %v272_v40, %v266_v37 }
  0x3a   : > { %v274_v43 = vadd.f32 %v273_v42, %v267_v39 }
  0x3c   : > { %v275_v44 = vadd.f32 %v274_v43, %v268_v41 }
  0x3e   : > { %v276_v45 = vrot.slane %v275_v44, 4 }
  0x40   : > { %v277_v46 = vadd.f32 %v276_v45, %v275_v44 }
  0x42   : > { %v278_v47 = vrot.slane %v277_v46, 2 }
  0x44   : > { %v279_v48 = vadd.f32 %v278_v47, %v277_v46 }
  0x46   : > { %v280_v49 = vrot.slane %v279_v48, 1 }
  0x48   : > { %v281_v50 = vadd.f32 %v280_v49, %v279_v48 }
  0x4a   : > { %v282_v51 = vmul.f32 0.015625, %v281_v50 }
  0x4c   : > { %v283_v52 = vadd.f32 1e-05, %v282_v51 }
  0x4e   : > { %504 = vrsqrt.f32 %v283_v52 }
  0x5b   : > { %v505_v53 = vpop.eup %504 }
  0x5c   : > { %v285_v55 = vmul.f32 %v505_v53, %v253_v22  ;;  %v286_v56 = vmul.f32 %v505_v53, %v254_v23  ;;  %v287_v57 = vmul.f32 %v505_v53, %v255_v24  ;;  %v288_v58 = vmul.f32 %v505_v53, %v256_v25 }
  0x5d   : > { %v289_v60 = vmul.f32 %v505_v53, %v257_v26  ;;  %v290_v61 = vmul.f32 %v505_v53, %v258_v30  ;;  %v291_v62 = vmul.f32 %v505_v53, %v259_v33  ;;  %v292_v63 = vmul.f32 %v505_v53, %v260_v36 }
  0x5e   : > { %v300_v0 = vmul.f32 %v474_v54, %v285_v55  ;;  %v301_v1 = vmul.f32 %v474_v54, %v286_v56  ;;  %v302_v2 = vmul.f32 %v474_v54, %v287_v57  ;;  %v303_v3 = vmul.f32 %v474_v54, %v288_v58 }
  0x5f   : > { %v304_v4 = vmul.f32 %v474_v54, %v289_v60  ;;  %v305_v5 = vmul.f32 %v474_v54, %v290_v61  ;;  %v306_v6 = vmul.f32 %v474_v54, %v291_v62  ;;  %v307_v7 = vmul.f32 %v474_v54, %v292_v63 }
  0x60   : > { %v315_v8 = vadd.f32 %v475_v59, %v300_v0  ;;  %v316_v9 = vadd.f32 %v475_v59, %v301_v1  ;;  %v317_v10 = vadd.f32 %v475_v59, %v302_v2  ;;  %v318_v11 = vadd.f32 %v475_v59, %v303_v3 }
  0x61   : > { %v319_v12 = vadd.f32 %v475_v59, %v304_v4  ;;  %v320_v13 = vadd.f32 %v475_v59, %v305_v5  ;;  %v321_v14 = vadd.f32 %v475_v59, %v306_v6  ;;  %v322_v15 = vadd.f32 %v475_v59, %v307_v7 }
  0x62   : > { %vm323_vm0 = vcmp.ge.f32.partialorder %v315_v8, 0.0  ;;  %v331_v16 = vmul.f32 0.2, %v315_v8  ;;  %vm324_vm1 = vcmp.ge.f32.partialorder %v316_v9, 0.0  ;;  %v332_v17 = vmul.f32 0.2, %v316_v9 }
  0x63   : > { %vm325_vm2 = vcmp.ge.f32.partialorder %v317_v10, 0.0  ;;  %v333_v18 = vmul.f32 0.2, %v317_v10  ;;  %vm326_vm3 = vcmp.ge.f32.partialorder %v318_v11, 0.0  ;;  %v334_v19 = vmul.f32 0.2, %v318_v11 }
  0x64   : > { %v339_v20 = vsel %vm323_vm0, %v315_v8, %v331_v16  ;;  %v340_v21 = vsel %vm324_vm1, %v316_v9, %v332_v17  ;;  %vm327_vm4 = vcmp.ge.f32.partialorder %v319_v12, 0.0  ;;  %v335_v22 = vmul.f32 0.2, %v319_v12 }
  0x65   : > { %347 = vst [vmem:[%s587_s26] sm:$0xff] %v339_v20  ;;  %348 = vst [vmem:[%s587_s26 + $0x8] sm:$0xff] %v340_v21  ;;  %v341_v23 = vsel %vm325_vm2, %v317_v10, %v333_v18  ;;  %v342_v24 = vsel %vm326_vm3, %v318_v11, %v334_v19  ;;  %vm328_vm5 = vcmp.ge.f32.partialorder %v320_v13, 0.0  ;;  %v336_v25 = vmul.f32 0.2, %v320_v13 }
  0x66   : > { %349 = vst [vmem:[%s587_s26 + $0x10] sm:$0xff] %v341_v23  ;;  %350 = vst [vmem:[%s587_s26 + $0x18] sm:$0xff] %v342_v24  ;;  %v343_v26 = vsel %vm327_vm4, %v319_v12, %v335_v22  ;;  %vm329_vm6 = vcmp.ge.f32.partialorder %v321_v14, 0.0  ;;  %v337_v27 = vmul.f32 0.2, %v321_v14  ;;  %vm330_vm7 = vcmp.ge.f32.partialorder %v322_v15, 0.0 }
  0x67   : > { %351 = vst [vmem:[%s587_s26 + $0x20] sm:$0xff] %v343_v26  ;;  %v344_v28 = vsel %vm328_vm5, %v320_v13, %v336_v25  ;;  %v338_v29 = vmul.f32 0.2, %v322_v15 }
  0x68   : > { %352 = vst [vmem:[%s587_s26 + $0x28] sm:$0xff] %v344_v28  ;;  %v345_v30 = vsel %vm329_vm6, %v321_v14, %v337_v27 }
  0x69   : > { %353 = vst [vmem:[%s587_s26 + $0x30] sm:$0xff] %v345_v30  ;;  %v346_v31 = vsel %vm330_vm7, %v322_v15, %v338_v29 }
  0x6a   : > { %354 = vst [vmem:[%s587_s26 + $0x38] sm:$0xff] %v346_v31 }
  0x6b PF: > { %s13_s14 = sadd.s32 1, %s528_s14   ;;  %s610_s12 = smov %s524_s13 }
  0x6c   : > { %p10_p5 = scmp.ge.s32.totalorder %s13_s14, 4   ;;  %s611_s13 = smov %s613_s15 }
  0x6e   :  { %12 = sbr.rel (!%p10_p5) target bundleno = 2 (0x2), region = 68 }

// kernel: generator_forward.39
= control target key start
LH: loop header
LB: loop body
LE: loop exit
PB: predicated region body
PF: predicated region fallthrough
CT: control target
= control target key end

     0   :  { %s586_s1 = inlined_call_operand.vmem [shape: bf16[128,128], index: 1, kind: input, shape index: {}]   ;;  %s587_s0 = inlined_call_operand.vmem [shape: bf16[128,128], index: 0, kind: input, shape index: {}]   ;;  %s588_s2 = inlined_call_operand.vmem [shape: f32[1,128], index: 2, kind: input, shape index: {}]   ;;  %s589_s3 = inlined_call_operand.vmem [shape: f32[128,128], index: 3, kind: output, shape index: {}]  }
   0x1   :  { %v451_v0 = vld [vmem:[%s586_s1 + $0x38] sm:$0xff]   ;;  %v452_v1 = vld [vmem:[%s586_s1 + $0x30] sm:$0xff]   ;;  %v453_v2 = vld [vmem:[%s586_s1 + $0x28] sm:$0xff]  }
   0x2   :  { %403 = vmatprep.subr.bf16.mxu0 %v451_v0  ;;  %435 = vmatprep.subr.bf16.mxu1 %v451_v0  ;;  %v454_v3 = vld [vmem:[%s586_s1 + $0x20] sm:$0xff]   ;;  %v455_v6 = vld [vmem:[%s586_s1 + $0x18] sm:$0xff]   ;;  %v456_v7 = vld [vmem:[%s586_s1 + $0x10] sm:$0xff]  }
   0x3   :  { %404 = vmatpush3.bf16.msra.mxu0 %v451_v0  ;;  %443 = vmatpush3.bf16.msra.mxu1 %v451_v0  ;;  %v459_v4 = vld [vmem:[%s587_s0] sm:$0xff]   ;;  %v457_v8 = vld [vmem:[%s586_s1 + $0x8] sm:$0xff]   ;;  %v463_v12 = vld [vmem:[%s587_s0 + $0x10] sm:$0xff]  }
   0x4   :  { %405 = vmatprep.subr.bf16.mxu0 %v452_v1  ;;  %436 = vmatprep.subr.bf16.mxu1 %v452_v1  ;;  %v460_v5 = vld [vmem:[%s587_s0 + $0x20] sm:$0xff]   ;;  %v461_v10 = vld [vmem:[%s587_s0 + $0x8] sm:$0xff]   ;;  %v464_v13 = vld [vmem:[%s587_s0 + $0x30] sm:$0xff]  }
   0x5   :  { %419 = vmatprep.mubr.bf16.mxu0 %v459_v4  ;;  %427 = vmatprep.mubr.bf16.mxu1 %v460_v5  ;;  %v458_v9 = vld [vmem:[%s586_s1] sm:$0xff]   ;;  %v462_v11 = vld [vmem:[%s587_s0 + $0x28] sm:$0xff]   ;;  %v465_v14 = vld [vmem:[%s587_s0 + $0x18] sm:$0xff]  }
   0x6   :  { %v466_v15 = vld [vmem:[%s587_s0 + $0x38] sm:$0xff]   ;;  %v386_v16 = vld [vmem:[%s588_s2] ss:$0 sm:$0xff] }
   0x7   :  { %406 = vmatpush3.bf16.msra.mxu0 %v452_v1  ;;  %444 = vmatpush3.bf16.msra.mxu1 %v452_v1 }
   0x8   :  { %407 = vmatprep.subr.bf16.mxu0 %v453_v2  ;;  %437 = vmatprep.subr.bf16.mxu1 %v453_v2 }
   0xb   :  { %408 = vmatpush3.bf16.msra.mxu0 %v453_v2  ;;  %445 = vmatpush3.bf16.msra.mxu1 %v453_v2 }
   0xc   :  { %409 = vmatprep.subr.bf16.mxu0 %v454_v3  ;;  %438 = vmatprep.subr.bf16.mxu1 %v454_v3 }
   0xf   :  { %410 = vmatpush3.bf16.msra.mxu0 %v454_v3  ;;  %446 = vmatpush3.bf16.msra.mxu1 %v454_v3 }
  0x10   :  { %411 = vmatprep.subr.bf16.mxu0 %v455_v6  ;;  %439 = vmatprep.subr.bf16.mxu1 %v455_v6 }
  0x13   :  { %412 = vmatpush3.bf16.msra.mxu0 %v455_v6  ;;  %447 = vmatpush3.bf16.msra.mxu1 %v455_v6 }
  0x14   :  { %413 = vmatprep.subr.bf16.mxu0 %v456_v7  ;;  %440 = vmatprep.subr.bf16.mxu1 %v456_v7 }
  0x17   :  { %414 = vmatpush3.bf16.msra.mxu0 %v456_v7  ;;  %448 = vmatpush3.bf16.msra.mxu1 %v456_v7 }
  0x18   :  { %415 = vmatprep.subr.bf16.mxu0 %v457_v8  ;;  %441 = vmatprep.subr.bf16.mxu1 %v457_v8 }
  0x1b   :  { %416 = vmatpush3.bf16.msra.mxu0 %v457_v8  ;;  %449 = vmatpush3.bf16.msra.mxu1 %v457_v8 }
  0x1c   :  { %417 = vmatprep.subr.bf16.mxu0 %v458_v9  ;;  %442 = vmatprep.subr.bf16.mxu1 %v458_v9 }
  0x1f   :  { %418 = vmatpush3.bf16.msra.mxu0 %v458_v9  ;;  %450 = vmatpush3.bf16.msra.mxu1 %v458_v9 }
  0x22   :  { %420 = vmatmul.mubr.bf16.vlgmr.msra.gmra.mxu0 %v461_v10  ;;  %428 = vmatmul.mubr.bf16.vlgmr.msra.gmra.mxu1 %v462_v11 }
  0x23   :  { %423 = vmatprep.mubr.bf16.mxu0 %v463_v12  ;;  %431 = vmatprep.mubr.bf16.mxu1 %v464_v13 }
  0x2a   :  { %424 = vmatmul.mubr.bf16.gmra.mxu0 %v465_v14  ;;  %432 = vmatmul.mubr.bf16.gmra.mxu1 %v466_v15 }
  0xe2   :  { %v421_v17 = vpop.f32.mrf.mxu0  ;;  %v429_v18 = vpop.f32.mrf.mxu1 }
  0xe3   :  { %v336_v19 = vadd.f32 %v421_v17, %v386_v16  ;;  %v344_v20 = vadd.f32 %v429_v18, %v386_v16 }
  0xe4   :  { %v213_v21 = vpop.f32.mrf.mxu0  ;;  %v245_v22 = vpop.f32.mrf.mxu1 }
  0xe5   :  { %352 = vst [vmem:[%s589_s3 + $0x10] sm:$0xff] %v336_v19  ;;  %360 = vst [vmem:[%s589_s3 + $0x50] sm:$0xff] %v344_v20  ;;  %v334_v23 = vadd.f32 %v386_v16, %v213_v21  ;;  %v342_v24 = vadd.f32 %v386_v16, %v245_v22 }
  0xe6   :  { %v422_v25 = vpop.f32.mrf.mxu0  ;;  %v430_v26 = vpop.f32.mrf.mxu1 }
  0xe7   :  { %350 = vst [vmem:[%s589_s3] sm:$0xff] %v334_v23  ;;  %358 = vst [vmem:[%s589_s3 + $0x40] sm:$0xff] %v342_v24  ;;  %v337_v27 = vadd.f32 %v422_v25, %v386_v16  ;;  %v345_v28 = vadd.f32 %v430_v26, %v386_v16 }
  0xe8   :  { %v216_v29 = vpop.f32.mrf.mxu0  ;;  %v248_v30 = vpop.f32.mrf.mxu1 }
  0xe9   :  { %353 = vst [vmem:[%s589_s3 + $0x18] sm:$0xff] %v337_v27  ;;  %361 = vst [vmem:[%s589_s3 + $0x58] sm:$0xff] %v345_v28  ;;  %v335_v31 = vadd.f32 %v386_v16, %v216_v29  ;;  %v343_v32 = vadd.f32 %v386_v16, %v248_v30 }
  0xea   :  { %v425_v33 = vpop.f32.mrf.mxu0  ;;  %v433_v34 = vpop.f32.mrf.mxu1 }
  0xeb   :  { %351 = vst [vmem:[%s589_s3 + $0x8] sm:$0xff] %v335_v31  ;;  %359 = vst [vmem:[%s589_s3 + $0x48] sm:$0xff] %v343_v32  ;;  %v340_v35 = vadd.f32 %v425_v33, %v386_v16  ;;  %v348_v36 = vadd.f32 %v433_v34, %v386_v16 }
  0xec   :  { %v229_v37 = vpop.f32.mrf.mxu0  ;;  %v261_v38 = vpop.f32.mrf.mxu1 }
  0xed   :  { %356 = vst [vmem:[%s589_s3 + $0x30] sm:$0xff] %v340_v35  ;;  %364 = vst [vmem:[%s589_s3 + $0x70] sm:$0xff] %v348_v36  ;;  %v338_v39 = vadd.f32 %v386_v16, %v229_v37  ;;  %v346_v40 = vadd.f32 %v386_v16, %v261_v38 }
  0xee   :  { %v426_v41 = vpop.f32.mrf.mxu0  ;;  %v434_v42 = vpop.f32.mrf.mxu1 }
  0xef   :  { %354 = vst [vmem:[%s589_s3 + $0x20] sm:$0xff] %v338_v39  ;;  %362 = vst [vmem:[%s589_s3 + $0x60] sm:$0xff] %v346_v40  ;;  %v341_v43 = vadd.f32 %v426_v41, %v386_v16  ;;  %v349_v44 = vadd.f32 %v434_v42, %v386_v16 }
  0xf0   :  { %v232_v45 = vpop.f32.mrf.mxu0  ;;  %v264_v46 = vpop.f32.mrf.mxu1 }
  0xf1   :  { %357 = vst [vmem:[%s589_s3 + $0x38] sm:$0xff] %v341_v43  ;;  %365 = vst [vmem:[%s589_s3 + $0x78] sm:$0xff] %v349_v44  ;;  %v339_v47 = vadd.f32 %v386_v16, %v232_v45  ;;  %v347_v48 = vadd.f32 %v386_v16, %v264_v46 }
  0xf3   :  { %355 = vst [vmem:[%s589_s3 + $0x28] sm:$0xff] %v339_v47  ;;  %363 = vst [vmem:[%s589_s3 + $0x68] sm:$0xff] %v347_v48 }

// kernel: generator_forward.43
= control target key start
LH: loop header
LB: loop body
LE: loop exit
PB: predicated region body
PF: predicated region fallthrough
CT: control target
= control target key end

     0   :  { %v608_v1 = vmov 0   ;;  %v457_v25 = vlaneseq  ;;  %s844_s1 = inlined_call_operand.vmem [shape: bf16[128,256], index: 1, kind: input, shape index: {}]   ;;  %s845_s0 = inlined_call_operand.vmem [shape: bf16[128,128], index: 0, kind: input, shape index: {}]   ;;  %s846_s2 = inlined_call_operand.vmem [shape: f32[1,256], index: 2, kind: input, shape index: {}]   ;;  %s847_s3 = inlined_call_operand.vmem [shape: f32[128,256], index: 3, kind: output, shape index: {}]  }
   0x1   :  { %v576_v0 = vld [vmem:[%s844_s1 + $0x74] ss:$8 sps:$4 sm:$0xff]   ;;  %275 = vmatprep.mubr.bf16.mxu0 %v608_v1  ;;  %315 = vmatprep.mubr.bf16.mxu1 %v608_v1  ;;  %v578_v2 = vld [vmem:[%s844_s1 + $0x70] ss:$8 sps:$4 sm:$0xff]   ;;  %v579_v3 = vld [vmem:[%s844_s1 + $0x64] ss:$8 sps:$4 sm:$0xff]  }
   0x2   :  { %243 = vmatprep.subr.bf16.mxu0 %v576_v0  ;;  %559 = vmatprep.subr.bf16.mxu1 %v576_v0  ;;  %v581_v4 = vld [vmem:[%s844_s1 + $0x60] ss:$8 sps:$4 sm:$0xff]   ;;  %v582_v5 = vld [vmem:[%s844_s1 + $0x54] ss:$8 sps:$4 sm:$0xff]   ;;  %v584_v6 = vld [vmem:[%s844_s1 + $0x50] ss:$8 sps:$4 sm:$0xff]  }
   0x3   :  { %244 = vmatpush1.bf16.msra.mxu0 %v578_v2  ;;  %567 = vmatpush1.bf16.msra.mxu1 %v578_v2  ;;  %v585_v7 = vld [vmem:[%s844_s1 + $0x44] ss:$8 sps:$4 sm:$0xff]   ;;  %v587_v8 = vld [vmem:[%s844_s1 + $0x40] ss:$8 sps:$4 sm:$0xff]   ;;  %v588_v9 = vld [vmem:[%s844_s1 + $0x34] ss:$8 sps:$4 sm:$0xff]  }
   0x4   :  { %245 = vmatprep.subr.bf16.mxu0 %v579_v3  ;;  %560 = vmatprep.subr.bf16.mxu1 %v579_v3  ;;  %v590_v10 = vld [vmem:[%s844_s1 + $0x30] ss:$8 sps:$4 sm:$0xff]   ;;  %v591_v11 = vld [vmem:[%s844_s1 + $0x24] ss:$8 sps:$4 sm:$0xff]   ;;  %v593_v12 = vld [vmem:[%s844_s1 + $0x20] ss:$8 sps:$4 sm:$0xff]  }
   0x5   :  { %v594_v13 = vld [vmem:[%s844_s1 + $0x14] ss:$8 sps:$4 sm:$0xff]   ;;  %v596_v14 = vld [vmem:[%s844_s1 + $0x10] ss:$8 sps:$4 sm:$0xff]   ;;  %v597_v15 = vld [vmem:[%s844_s1 + $0x4] ss:$8 sps:$4 sm:$0xff]  }
   0x6   :  { %v599_v16 = vld [vmem:[%s844_s1] ss:$8 sps:$4 sm:$0xff]   ;;  %v604_v21 = vld [vmem:[%s845_s0 + $0x10] sm:$0xff]   ;;  %v606_v23 = vld [vmem:[%s845_s0 + $0x18] sm:$0xff]   ;;  %v458_v26 = vshrl.u32 %v457_v25, 7 }
   0x7   :  { %246 = vmatpush1.bf16.msra.mxu0 %v581_v4  ;;  %568 = vmatpush1.bf16.msra.mxu1 %v581_v4  ;;  %v600_v17 = vld [vmem:[%s845_s0] sm:$0xff]   ;;  %v602_v19 = vld [vmem:[%s845_s0 + $0x8] sm:$0xff]   ;;  %v605_v22 = vld [vmem:[%s845_s0 + $0x30] sm:$0xff]  }
   0x8   :  { %247 = vmatprep.subr.bf16.mxu0 %v582_v5  ;;  %561 = vmatprep.subr.bf16.mxu1 %v582_v5  ;;  %v601_v18 = vld [vmem:[%s845_s0 + $0x20] sm:$0xff]   ;;  %v603_v20 = vld [vmem:[%s845_s0 + $0x28] sm:$0xff]   ;;  %v607_v24 = vld [vmem:[%s845_s0 + $0x38] sm:$0xff]   ;;  %v459_v27 = vsub.s32 0, %v458_v26  ;;  %v463_v29 = vsub.s32 1, %v458_v26 }
   0x9   :  { %v455_v28 = vld [vmem:[%s846_s2] sm:$0x3] }
   0xa   :  { %v712_v30 = vrot.slane %v455_v28, %v459_v27  ;;  %v714_v31 = vrot.slane %v455_v28, %v463_v29 }
   0xb   :  { %248 = vmatpush1.bf16.msra.mxu0 %v584_v6  ;;  %569 = vmatpush1.bf16.msra.mxu1 %v584_v6 }
   0xc   :  { %249 = vmatprep.subr.bf16.mxu0 %v585_v7  ;;  %562 = vmatprep.subr.bf16.mxu1 %v585_v7 }
   0xf   :  { %250 = vmatpush1.bf16.msra.mxu0 %v587_v8  ;;  %570 = vmatpush1.bf16.msra.mxu1 %v587_v8 }
  0x10   :  { %251 = vmatprep.subr.bf16.mxu0 %v588_v9  ;;  %563 = vmatprep.subr.bf16.mxu1 %v588_v9 }
  0x13   :  { %252 = vmatpush1.bf16.msra.mxu0 %v590_v10  ;;  %571 = vmatpush1.bf16.msra.mxu1 %v590_v10 }
  0x14   :  { %253 = vmatprep.subr.bf16.mxu0 %v591_v11  ;;  %564 = vmatprep.subr.bf16.mxu1 %v591_v11 }
  0x17   :  { %254 = vmatpush1.bf16.msra.mxu0 %v593_v12  ;;  %572 = vmatpush1.bf16.msra.mxu1 %v593_v12 }
  0x18   :  { %255 = vmatprep.subr.bf16.mxu0 %v594_v13  ;;  %565 = vmatprep.subr.bf16.mxu1 %v594_v13 }
  0x1b   :  { %256 = vmatpush1.bf16.msra.mxu0 %v596_v14  ;;  %573 = vmatpush1.bf16.msra.mxu1 %v596_v14 }
  0x1c   :  { %257 = vmatprep.subr.bf16.mxu0 %v597_v15  ;;  %566 = vmatprep.subr.bf16.mxu1 %v597_v15 }
  0x1f   :  { %258 = vmatpush1.bf16.msra.mxu0 %v599_v16  ;;  %574 = vmatpush1.bf16.msra.mxu1 %v599_v16 }
  0x22   :  { %276 = vmatmul.mubr.bf16.vlgmr.msra.gmra.mxu0 %v600_v17  ;;  %316 = vmatmul.mubr.bf16.vlgmr.msra.gmra.mxu1 %v601_v18 }
  0x23   :  { %285 = vmatprep.mubr.bf16.mxu0 %v608_v1  ;;  %325 = vmatprep.mubr.bf16.mxu1 %v608_v1 }
  0x2a   :  { %286 = vmatmul.mubr.bf16.gmra.mxu0 %v602_v19  ;;  %326 = vmatmul.mubr.bf16.gmra.mxu1 %v603_v20 }
  0x2b   :  { %295 = vmatprep.mubr.bf16.mxu0 %v608_v1  ;;  %335 = vmatprep.mubr.bf16.mxu1 %v608_v1 }
  0x32   :  { %296 = vmatmul.mubr.bf16.gmra.mxu0 %v604_v21  ;;  %336 = vmatmul.mubr.bf16.gmra.mxu1 %v605_v22 }
  0x33   :  { %305 = vmatprep.mubr.bf16.mxu0 %v608_v1  ;;  %345 = vmatprep.mubr.bf16.mxu1 %v608_v1 }
  0x3a   :  { %306 = vmatmul.mubr.bf16.gmra.mxu0 %v606_v23  ;;  %346 = vmatmul.mubr.bf16.gmra.mxu1 %v607_v24 }
  0xe2   :  { %v277_v32 = vpop.f32.mrf.mxu0  ;;  %v317_v33 = vpop.f32.mrf.mxu1 }
  0xe3   :  { %v467_v34 = vadd.f32 %v712_v30, %v277_v32  ;;  %v483_v35 = vadd.f32 %v712_v30, %v317_v33 }
  0xe4   :  { %v279_v36 = vpop.f32.mrf.mxu0  ;;  %v319_v37 = vpop.f32.mrf.mxu1 }
  0xe5   :  { %499 = vst [vmem:[%s847_s3] sm:$0xff] %v467_v34  ;;  %515 = vst [vmem:[%s847_s3 + $0x80] sm:$0xff] %v483_v35  ;;  %v468_v38 = vadd.f32 %v714_v31, %v279_v36  ;;  %v484_v39 = vadd.f32 %v714_v31, %v319_v37 }
  0xe6   :  { %v281_v40 = vpop.f32.mrf.mxu0  ;;  %v321_v41 = vpop.f32.mrf.mxu1 }
  0xe7   :  { %500 = vst [vmem:[%s847_s3 + $0x8] sm:$0xff] %v468_v38  ;;  %516 = vst [vmem:[%s847_s3 + $0x88] sm:$0xff] %v484_v39  ;;  %v469_v42 = vadd.f32 %v712_v30, %v281_v40  ;;  %v485_v43 = vadd.f32 %v712_v30, %v321_v41 }
  0xe8   :  { %v283_v44 = vpop.f32.mrf.mxu0  ;;  %v323_v45 = vpop.f32.mrf.mxu1 }
  0xe9   :  { %501 = vst [vmem:[%s847_s3 + $0x10] sm:$0xff] %v469_v42  ;;  %517 = vst [vmem:[%s847_s3 + $0x90] sm:$0xff] %v485_v43  ;;  %v470_v46 = vadd.f32 %v714_v31, %v283_v44  ;;  %v486_v47 = vadd.f32 %v714_v31, %v323_v45 }
  0xea   :  { %v287_v48 = vpop.f32.mrf.mxu0  ;;  %v327_v49 = vpop.f32.mrf.mxu1 }
  0xeb   :  { %502 = vst [vmem:[%s847_s3 + $0x18] sm:$0xff] %v470_v46  ;;  %518 = vst [vmem:[%s847_s3 + $0x98] sm:$0xff] %v486_v47  ;;  %v471_v50 = vadd.f32 %v712_v30, %v287_v48  ;;  %v487_v51 = vadd.f32 %v712_v30, %v327_v49 }
  0xec   :  { %v289_v52 = vpop.f32.mrf.mxu0  ;;  %v329_v53 = vpop.f32.mrf.mxu1 }
  0xed   :  { %503 = vst [vmem:[%s847_s3 + $0x20] sm:$0xff] %v471_v50  ;;  %519 = vst [vmem:[%s847_s3 + $0xa0] sm:$0xff] %v487_v51  ;;  %v472_v54 = vadd.f32 %v714_v31, %v289_v52  ;;  %v488_v55 = vadd.f32 %v714_v31, %v329_v53 }
  0xee   :  { %v291_v56 = vpop.f32.mrf.mxu0  ;;  %v331_v57 = vpop.f32.mrf.mxu1 }
  0xef   :  { %504 = vst [vmem:[%s847_s3 + $0x28] sm:$0xff] %v472_v54  ;;  %520 = vst [vmem:[%s847_s3 + $0xa8] sm:$0xff] %v488_v55  ;;  %v473_v58 = vadd.f32 %v712_v30, %v291_v56  ;;  %v489_v59 = vadd.f32 %v712_v30, %v331_v57 }
  0xf0   :  { %v293_v60 = vpop.f32.mrf.mxu0  ;;  %v333_v61 = vpop.f32.mrf.mxu1 }
  0xf1   :  { %505 = vst [vmem:[%s847_s3 + $0x30] sm:$0xff] %v473_v58  ;;  %521 = vst [vmem:[%s847_s3 + $0xb0] sm:$0xff] %v489_v59  ;;  %v474_v62 = vadd.f32 %v714_v31, %v293_v60  ;;  %v490_v63 = vadd.f32 %v714_v31, %v333_v61 }
  0xf2   :  { %v297_v0 = vpop.f32.mrf.mxu0  ;;  %v337_v1 = vpop.f32.mrf.mxu1 }
  0xf3   :  { %506 = vst [vmem:[%s847_s3 + $0x38] sm:$0xff] %v474_v62  ;;  %522 = vst [vmem:[%s847_s3 + $0xb8] sm:$0xff] %v490_v63  ;;  %v475_v2 = vadd.f32 %v712_v30, %v297_v0  ;;  %v491_v3 = vadd.f32 %v712_v30, %v337_v1 }
  0xf4   :  { %v299_v4 = vpop.f32.mrf.mxu0  ;;  %v339_v5 = vpop.f32.mrf.mxu1 }
  0xf5   :  { %507 = vst [vmem:[%s847_s3 + $0x40] sm:$0xff] %v475_v2  ;;  %523 = vst [vmem:[%s847_s3 + $0xc0] sm:$0xff] %v491_v3  ;;  %v476_v6 = vadd.f32 %v714_v31, %v299_v4  ;;  %v492_v7 = vadd.f32 %v714_v31, %v339_v5 }
  0xf6   :  { %v301_v8 = vpop.f32.mrf.mxu0  ;;  %v341_v9 = vpop.f32.mrf.mxu1 }
  0xf7   :  { %508 = vst [vmem:[%s847_s3 + $0x48] sm:$0xff] %v476_v6  ;;  %524 = vst [vmem:[%s847_s3 + $0xc8] sm:$0xff] %v492_v7  ;;  %v477_v10 = vadd.f32 %v712_v30, %v301_v8  ;;  %v493_v11 = vadd.f32 %v712_v30, %v341_v9 }
  0xf8   :  { %v303_v12 = vpop.f32.mrf.mxu0  ;;  %v343_v13 = vpop.f32.mrf.mxu1 }
  0xf9   :  { %509 = vst [vmem:[%s847_s3 + $0x50] sm:$0xff] %v477_v10  ;;  %525 = vst [vmem:[%s847_s3 + $0xd0] sm:$0xff] %v493_v11  ;;  %v478_v14 = vadd.f32 %v714_v31, %v303_v12  ;;  %v494_v15 = vadd.f32 %v714_v31, %v343_v13 }
  0xfa   :  { %v307_v16 = vpop.f32.mrf.mxu0  ;;  %v347_v17 = vpop.f32.mrf.mxu1 }
  0xfb   :  { %510 = vst [vmem:[%s847_s3 + $0x58] sm:$0xff] %v478_v14  ;;  %526 = vst [vmem:[%s847_s3 + $0xd8] sm:$0xff] %v494_v15  ;;  %v479_v18 = vadd.f32 %v712_v30, %v307_v16  ;;  %v495_v19 = vadd.f32 %v712_v30, %v347_v17 }
  0xfc   :  { %v309_v20 = vpop.f32.mrf.mxu0  ;;  %v349_v21 = vpop.f32.mrf.mxu1 }
  0xfd   :  { %511 = vst [vmem:[%s847_s3 + $0x60] sm:$0xff] %v479_v18  ;;  %527 = vst [vmem:[%s847_s3 + $0xe0] sm:$0xff] %v495_v19  ;;  %v480_v22 = vadd.f32 %v714_v31, %v309_v20  ;;  %v496_v23 = vadd.f32 %v714_v31, %v349_v21 }
  0xfe   :  { %v311_v24 = vpop.f32.mrf.mxu0  ;;  %v351_v25 = vpop.f32.mrf.mxu1 }
  0xff   :  { %512 = vst [vmem:[%s847_s3 + $0x68] sm:$0xff] %v480_v22  ;;  %528 = vst [vmem:[%s847_s3 + $0xe8] sm:$0xff] %v496_v23  ;;  %v481_v26 = vadd.f32 %v712_v30, %v311_v24  ;;  %v497_v27 = vadd.f32 %v712_v30, %v351_v25 }
 0x100   :  { %v313_v28 = vpop.f32.mrf.mxu0  ;;  %v353_v29 = vpop.f32.mrf.mxu1 }
 0x101   :  { %513 = vst [vmem:[%s847_s3 + $0x70] sm:$0xff] %v481_v26  ;;  %529 = vst [vmem:[%s847_s3 + $0xf0] sm:$0xff] %v497_v27  ;;  %v482_v32 = vadd.f32 %v714_v31, %v313_v28  ;;  %v498_v33 = vadd.f32 %v714_v31, %v353_v29 }
 0x103   :  { %514 = vst [vmem:[%s847_s3 + $0x78] sm:$0xff] %v482_v32  ;;  %530 = vst [vmem:[%s847_s3 + $0xf8] sm:$0xff] %v498_v33 }

// kernel: generator_forward.42
= control target key start
LH: loop header
LB: loop body
LE: loop exit
PB: predicated region body
PF: predicated region fallthrough
CT: control target
= control target key end

     0   :  { %s1348_s20 = smov 0   ;;  %s1350_s21 = smov 0   ;;  %s1621_s0 = inlined_call_operand.<no memory space> [shape: f32[1], index: 0, kind: input, shape index: {}]   ;;  %s1622_s1 = inlined_call_operand.vmem [shape: bf16[2,64,16], index: 1, kind: input, shape index: {}]   ;;  %s1623_s2 = inlined_call_operand.vmem [shape: bf16[2,64,16], index: 2, kind: input, shape index: {}]   ;;  %s1624_s3 = inlined_call_operand.vmem [shape: bf16[2,64,128], index: 3, kind: input, shape index: {}]   ;;  %s1625_s4 = inlined_call_operand.vmem [shape: f32[2,64,128], index: 4, kind: input, shape index: {}]   ;;  %s1626_s5 = inlined_call_operand.vmem [shape: f32[2,64,128], index: 5, kind: output, shape index: {}]  }
   0x1   :  { %10 = sst [smem:[#allocation5]] %s1621_s0  ;;  %s1352_s22 = smov 0  }
   0x2 LB: > { %s28_s0 = sadd.s32 1, %s1306_s21  ;;  %p1109_p0 = scmp.ge.s32.totalorder %s1310_s22, 1  ;;  %s1310_s22 = sphi %s1352_s22, %s16_s22   ;;  %s1306_s21 = sphi %s1350_s21, %s1628_s21   ;;  %s1302_s20 = sphi %s1348_s20, %s1627_s20  }
   0x3   : > { %p30_p1 = scmp.ge.s32.totalorder %s28_s0, 2  ;;  %p244_p2 = scmp.lt.s32.totalorder %s1310_s22, 3 }
   0x5   : > { %s1630_s0 = smov (%p30_p1, %s28_s0), 0  ;;  %p245_p3 = pnand %p1109_p0, %p244_p2 }
   0x6   : > { %p295_p4 = scmp.lt.s32.totalorder (!%p245_p3), %s1302_s20, 1  ;;  %s904_s8 = sld [smem:[#allocation5]] (!%p245_p3) }
   0x7   : > { %248 = sbr.rel (%p245_p3) target bundleno = 845 (0x34d), region = 40 }
   0xc   : > { %s1632_s20 = smov (!%p295_p4, %s1302_s20), 1  ;;  %vm424_vm0 = vcmask 130048   ;;  %vm335_vm1 = vcmask 7168   ;;  %v1312_v12 = vmov -inf   ;;  %vm522_vm2 = vcmask 523264  }
   0xd   : > { %s1369_s23 = sshll.u32 %s1632_s20, 5  ;;  %338 = vst.msk [vmem:[#allocation2 + $0x10] sm:$0xff] %vm335_vm1, %v1312_v12  ;;  %336 = vst.msk [vmem:[#allocation2] sm:$0xff] %vm335_vm1, %v1312_v12  ;;  %v1313_v25 = vmov 0   ;;  %v1314_v30 = vmov 0.0   ;;  %s1145_s9 = sshll.u32 %s1632_s20, 6 }
   0xe   : > { %s308_s26 = scalar_lea.vmem %s1623_s2, %s1369_s23  ;;  %s299_s29 = scalar_lea.vmem %s1622_s1, %s1369_s23  ;;  %337 = vst.msk [vmem:[#allocation2 + $0x8] sm:$0xff] %vm335_vm1, %v1312_v12  ;;  %339 = vst.msk [vmem:[#allocation2 + $0x18] sm:$0xff] %vm335_vm1, %v1312_v12  ;;  %1227 = vset.pattern.permute.xlu1 %v1313_v25  ;;  %1226 = vset.pattern.permute.xlu0 %v1313_v25 }
   0xf   : > { %v1228_v0 = vld [vmem:[%s308_s26 + $0x18] sm:$0xff]   ;;  %v1229_v1 = vld [vmem:[%s308_s26 + $0x10] sm:$0xff]   ;;  %v1232_v3 = vld [vmem:[%s299_s29] sm:$0xff]   ;;  %340 = vst.msk [vmem:[#allocation2 + $0x20] sm:$0xff] %vm335_vm1, %v1312_v12  ;;  %s318_s7 = scalar_lea.vmem %s1624_s3, %s1369_s23  ;;  %s1579_s12 = scalar_lea.vmem %s1625_s4, %s1145_s9 }
  0x10   : > { %1195 = vmatprep.subr.msk.bf16.mxu0 %vm424_vm0, %v1228_v0  ;;  %v447_v2 = vsel %vm424_vm0, %v1228_v0, 0  ;;  %1171 = vmatprep.mubr.msk.bf16.mxu0 %vm424_vm0, %v1232_v3  ;;  %v444_v4 = vsel %vm424_vm0, %v1229_v1, 0  ;;  %v1230_v5 = vld [vmem:[%s308_s26 + $0x8] sm:$0xff]   ;;  %v1231_v7 = vld [vmem:[%s308_s26] sm:$0xff]   ;;  %v1234_v10 = vld [vmem:[%s299_s29 + $0x10] sm:$0xff]   ;;  %341 = vst.msk [vmem:[#allocation2 + $0x28] sm:$0xff] %vm335_vm1, %v1312_v12  ;;  %s1588_s15 = scalar_lea.vmem %s1626_s5, %s1145_s9 }
  0x11   : > { %1164 = vmatpush3.bf16.xpose.msra.mxu0 %v447_v2  ;;  %v441_v6 = vsel %vm424_vm0, %v1230_v5, 0  ;;  %v438_v8 = vsel %vm424_vm0, %v1231_v7, 0  ;;  %v1233_v9 = vld [vmem:[%s299_s29 + $0x8] sm:$0xff]   ;;  %v1235_v11 = vld [vmem:[%s299_s29 + $0x18] sm:$0xff]   ;;  %342 = vst.msk [vmem:[#allocation2 + $0x30] sm:$0xff] %vm335_vm1, %v1312_v12  ;;  %343 = vst.msk [vmem:[#allocation2 + $0x38] sm:$0xff] %vm335_vm1, %v1312_v12 }
  0x12   : > { %1196 = vmatprep.subr.msk.bf16.mxu0 %vm424_vm0, %v1229_v1  ;;  %346 = vst.msk [vmem:[#allocation3 + $0x10] sm:$0xff] %vm335_vm1, %v1314_v30  ;;  %344 = vst.msk [vmem:[#allocation3] sm:$0xff] %vm335_vm1, %v1314_v30  ;;  %v1236_v52 = vld [vmem:[%s318_s7 + $0x18] sm:$0xff]   ;;  %v1237_v58 = vld [vmem:[%s318_s7 + $0x10] sm:$0xff]  }
  0x13   : > { %345 = vst.msk [vmem:[#allocation3 + $0x8] sm:$0xff] %vm335_vm1, %v1314_v30  ;;  %347 = vst.msk [vmem:[#allocation3 + $0x18] sm:$0xff] %vm335_vm1, %v1314_v30  ;;  %1179 = vmatprep.subr.bf16.mxu1 %v1236_v52  ;;  %v1238_v0 = vld [vmem:[%s318_s7 + $0x8] sm:$0xff]   ;;  %v1239_v2 = vld [vmem:[%s318_s7] sm:$0xff]  }
  0x14   : > { %348 = vst.msk [vmem:[#allocation3 + $0x20] sm:$0xff] %vm335_vm1, %v1314_v30  ;;  %349 = vst.msk [vmem:[#allocation3 + $0x28] sm:$0xff] %vm335_vm1, %v1314_v30  ;;  %v1439_v31 = vld [vmem:[#allocation2 + $0x10] sm:$0xff]  ;;  %v1441_v33 = vld [vmem:[#allocation2] sm:$0xff]  ;;  %1180 = vmatpush3.bf16.msra.mxu1 %v1236_v52 }
  0x15   : > { %350 = vst.msk [vmem:[#allocation3 + $0x30] sm:$0xff] %vm335_vm1, %v1314_v30  ;;  %351 = vst.msk [vmem:[#allocation3 + $0x38] sm:$0xff] %vm335_vm1, %v1314_v30  ;;  %v1446_v36 = vld [vmem:[#allocation2 + $0x18] sm:$0xff]  ;;  %v1456_v40 = vld [vmem:[#allocation2 + $0x8] sm:$0xff]  ;;  %1181 = vmatprep.subr.bf16.mxu1 %v1237_v58 }
  0x16   : > { %v1474_v46 = vld [vmem:[#allocation2 + $0x20] sm:$0xff] }
  0x17   : > { %v1490_v51 = vld [vmem:[#allocation2 + $0x28] sm:$0xff] }
  0x18   : > { %v1480_v49 = vld [vmem:[#allocation2 + $0x30] sm:$0xff]  ;;  %v1502_v59 = vld [vmem:[#allocation2 + $0x38] sm:$0xff]  ;;  %1182 = vmatpush3.bf16.msra.mxu1 %v1237_v58 }
  0x19   : > { %1166 = vmatpush3.bf16.xpose.msra.mxu0 %v444_v4  ;;  %1183 = vmatprep.subr.bf16.mxu1 %v1238_v0 }
  0x1a   : > { %1197 = vmatprep.subr.msk.bf16.mxu0 %vm424_vm0, %v1230_v5 }
  0x1c   : > { %1184 = vmatpush3.bf16.msra.mxu1 %v1238_v0 }
  0x1d   : > { %1185 = vmatprep.subr.bf16.mxu1 %v1239_v2 }
  0x20   : > { %1186 = vmatpush3.bf16.msra.mxu1 %v1239_v2 }
  0x21   : > { %1168 = vmatpush3.bf16.xpose.msra.mxu0 %v441_v6 }
  0x22   : > { %1198 = vmatprep.subr.msk.bf16.mxu0 %vm424_vm0, %v1231_v7 }
  0x29   : > { %1170 = vmatpush3.bf16.xpose.msra.mxu0 %v438_v8 }
  0x30   : > { %1172 = vmatmul.mubr.msk.bf16.vlgmr.msra.gmra.mxu0 %vm424_vm0, %v1233_v9 }
  0x31   : > { %1175 = vmatprep.mubr.msk.bf16.mxu0 %vm424_vm0, %v1234_v10 }
  0x38   : > { %1176 = vmatmul.mubr.msk.bf16.gmra.mxu0 %vm424_vm0, %v1235_v11 }
  0xf0   : > { %v1399_v13 = vpop.f32.mrf.mxu0 }
  0xf1   : > { %v529_v14 = vsel %vm522_vm2, %v1399_v13, -inf }
  0xf2   : > { %530 = vmax.xlane.f32.xlu1 %v529_v14  ;;  %v1403_v15 = vpop.f32.mrf.mxu0 }
  0xf3   : > { %v523_v16 = vsel %vm522_vm2, %v1403_v15, -inf }
  0xf4   : > { %524 = vmax.xlane.f32.xlu0 %v523_v16  ;;  %v1407_v17 = vpop.f32.mrf.mxu0 }
  0xf5   : > { %v532_v18 = vsel %vm522_vm2, %v1407_v17, -inf }
  0xf6   : > { %533 = vmax.xlane.f32.xlu1 %v532_v18  ;;  %v1411_v19 = vpop.f32.mrf.mxu0 }
  0xf7   : > { %v526_v20 = vsel %vm522_vm2, %v1411_v19, -inf }
  0xf8   : > { %527 = vmax.xlane.f32.xlu0 %v526_v20  ;;  %v1415_v21 = vpop.f32.mrf.mxu0 }
  0xf9   : > { %v541_v27 = vsel %vm522_vm2, %v1415_v21, -inf }
  0xfa   : > { %v1417_v22 = vpop.f32.mrf.mxu0 }
  0xfb   : > { %v535_v23 = vsel %vm522_vm2, %v1417_v22, -inf }
  0xfc   : > { %536 = vmax.xlane.f32.xlu0 %v535_v23  ;;  %v1421_v24 = vpop.f32.mrf.mxu0 }
  0xfd   : > { %v544_v29 = vsel %vm522_vm2, %v1421_v24, -inf }
  0xfe   : > { %v1423_v26 = vpop.f32.mrf.mxu0 }
  0xff   : > { %v538_v28 = vsel %vm522_vm2, %v1423_v26, -inf }
 0x100   : > { %542 = vmax.xlane.f32.xlu0 %v541_v27  ;;  %539 = vmax.xlane.f32.xlu1 %v538_v28 }
 0x104   : > { %545 = vmax.xlane.f32.xlu1 %v544_v29 }
 0x17b   : > { %v531_v32 = vpop.xlane.xlu1 %530 }
 0x17c   : > { %v1444_v34 = vmax.f32 %v1439_v31, %v531_v32 }
 0x17d   : > { %v525_v35 = vpop.xlane.xlu0 %524 }
 0x17e   : > { %v557_v37 = vsub.f32 %v1439_v31, %v1444_v34  ;;  %879 = vst.msk [vmem:[#allocation2 + $0x10] sm:$0xff] %vm335_vm1, %v1444_v34  ;;  %v1453_v38 = vmax.f32 %v1441_v33, %v525_v35  ;;  %591 = vperm.xlu1 %1227, %v1444_v34  }
 0x17f   : > { %v534_v39 = vpop.xlane.xlu1 %533 }
 0x180   : > { %v555_v41 = vsub.f32 %v1441_v33, %v1453_v38  ;;  %877 = vst.msk [vmem:[#allocation2] sm:$0xff] %vm335_vm1, %v1453_v38  ;;  %v1463_v42 = vmax.f32 %v1446_v36, %v534_v39  ;;  %581 = vperm.xlu0 %1226, %v1453_v38  }
 0x181   : > { %v528_v43 = vpop.xlane.xlu0 %527 }
 0x182   : > { %v558_v44 = vsub.f32 %v1446_v36, %v1463_v42  ;;  %880 = vst.msk [vmem:[#allocation2 + $0x18] sm:$0xff] %vm335_vm1, %v1463_v42  ;;  %v1471_v45 = vmax.f32 %v1456_v40, %v528_v43  ;;  %596 = vperm.xlu1 %1227, %v1463_v42  }
 0x184   : > { %v556_v47 = vsub.f32 %v1456_v40, %v1471_v45  ;;  %878 = vst.msk [vmem:[#allocation2 + $0x8] sm:$0xff] %vm335_vm1, %v1471_v45  ;;  %v569_v40 = vmul.f32 1.442695, %v558_v44 }
 0x185   : > { %v537_v48 = vpop.xlane.xlu0 %536 }
 0x186   : > { %v1487_v50 = vmax.f32 %v1474_v46, %v537_v48  ;;  %586 = vperm.xlu1 %1227, %v1471_v45  }
 0x188   : > { %v559_v53 = vsub.f32 %v1474_v46, %v1487_v50  ;;  %881 = vst.msk [vmem:[#allocation2 + $0x20] sm:$0xff] %vm335_vm1, %v1487_v50 }
 0x189   : > { %v543_v54 = vpop.xlane.xlu0 %542  ;;  %v540_v55 = vpop.xlane.xlu1 %539 }
 0x18a   : > { %v1497_v56 = vmax.f32 %v1480_v49, %v543_v54  ;;  %v1500_v57 = vmax.f32 %v1490_v51, %v540_v55  ;;  %v571_v45 = vmul.f32 1.442695, %v559_v53 }
 0x18c   : > { %v561_v60 = vsub.f32 %v1480_v49, %v1497_v56  ;;  %883 = vst.msk [vmem:[#allocation2 + $0x30] sm:$0xff] %vm335_vm1, %v1497_v56  ;;  %v560_v61 = vsub.f32 %v1490_v51, %v1500_v57  ;;  %882 = vst.msk [vmem:[#allocation2 + $0x28] sm:$0xff] %vm335_vm1, %v1500_v57  ;;  %611 = vperm.xlu1 %1227, %v1497_v56   ;;  %v645_v49 = vld [vmem:[#allocation3 + $0x10] sm:$0xff] }
 0x18d   : > { %v546_v62 = vpop.xlane.xlu1 %545 }
 0x18e   : > { %v1514_v63 = vmax.f32 %v1502_v59, %v546_v62  ;;  %v573_v33 = vmul.f32 1.442695, %v560_v61  ;;  %v575_v31 = vmul.f32 1.442695, %v561_v60  ;;  %v646_v60 = vld [vmem:[#allocation3 + $0x18] sm:$0xff] }
 0x190   : > { %v562_v1 = vsub.f32 %v1502_v59, %v1514_v63  ;;  %884 = vst.msk [vmem:[#allocation2 + $0x38] sm:$0xff] %vm335_vm1, %v1514_v63  ;;  %601 = vperm.xlu1 %1227, %v1487_v50   ;;  %v643_v50 = vld [vmem:[#allocation3] sm:$0xff] }
 0x192   : > { %v577_v34 = vmul.f32 1.442695, %v562_v1 }
 0x194   : > { %606 = vperm.xlu1 %1227, %v1500_v57  }
 0x198   : > { %616 = vperm.xlu1 %1227, %v1514_v63   ;;  %v644_v63 = vld [vmem:[#allocation3 + $0x8] sm:$0xff] }
 0x1f9   : > { %v592_v3 = vpop.permute.xlu1 %591 }
 0x1fa   : > { %v621_v4 = vsub.f32 %v1399_v13, %v592_v3 }
 0x1fb   : > { %v582_v5 = vpop.permute.xlu0 %581 }
 0x1fc   : > { %v631_v6 = vmul.f32 1.442695, %v621_v4  ;;  %v619_v7 = vsub.f32 %v1403_v15, %v582_v5  ;;  %v565_v5 = vmul.f32 1.442695, %v556_v47 }
 0x1fd   : > { %v597_v8 = vpop.permute.xlu1 %596 }
 0x1fe   : > { %1240 = vpow2.f32 %v631_v6  ;;  %v627_v9 = vmul.f32 1.442695, %v619_v7  ;;  %v622_v10 = vsub.f32 %v1407_v17, %v597_v8  ;;  %v563_v8 = vmul.f32 1.442695, %v555_v41 }
 0x200   : > { %1242 = vpow2.f32 %v627_v9  ;;  %v633_v11 = vmul.f32 1.442695, %v622_v10  ;;  %v567_v9 = vmul.f32 1.442695, %v557_v37 }
 0x201   : > { %v587_v12 = vpop.permute.xlu1 %586 }
 0x202   : > { %1244 = vpow2.f32 %v633_v11  ;;  %v620_v14 = vsub.f32 %v1411_v19, %v587_v12 }
 0x204   : > { %v629_v16 = vmul.f32 1.442695, %v620_v14 }
 0x206   : > { %1246 = vpow2.f32 %v629_v16 }
 0x207   : > { %v612_v18 = vpop.permute.xlu1 %611 }
 0x208   : > { %v625_v13 = vsub.f32 %v1415_v21, %v612_v18 }
 0x20a   : > { %v639_v17 = vmul.f32 1.442695, %v625_v13 }
 0x20b   : > { %v1241_v20 = vpop.eup %1240  ;;  %v602_v23 = vpop.permute.xlu1 %601 }
 0x20c   : > { %v623_v15 = vsub.f32 %v1417_v22, %v602_v23  ;;  %v665_v25 = vsel %vm522_vm2, %v1241_v20, 0.0 }
 0x20d   : > { %v1243_v27 = vpop.eup %1242  ;;  %666 = vadd.xlane.f32.xlu0 %v665_v25 }
 0x20e   : > { %v635_v28 = vmul.f32 1.442695, %v623_v15  ;;  %v659_v29 = vsel %vm522_vm2, %v1243_v27, 0.0 }
 0x20f   : > { %v1245_v30 = vpop.eup %1244  ;;  %660 = vadd.xlane.f32.xlu1 %v659_v29  ;;  %v607_v19 = vpop.permute.xlu1 %606 }
 0x210   : > { %1248 = vpow2.f32 %v635_v28  ;;  %v624_v32 = vsub.f32 %v1423_v26, %v607_v19  ;;  %v668_v35 = vsel %vm522_vm2, %v1245_v30, 0.0  ;;  %v757_v54 = vpack.c.bf16 %v1245_v30, %v1241_v20  ;;  %v647_v20 = vld [vmem:[#allocation3 + $0x20] sm:$0xff] }
 0x211   : > { %1250 = vpow2.f32 %v639_v17  ;;  %v648_v17 = vld [vmem:[#allocation3 + $0x28] sm:$0xff] }
 0x212   : > { %v637_v21 = vmul.f32 1.442695, %v624_v32 }
 0x213   : > { %v1247_v39 = vpop.eup %1246  ;;  %669 = vadd.xlane.f32.xlu1 %v668_v35  ;;  %v617_v22 = vpop.permute.xlu1 %616  ;;  %v650_v35 = vld [vmem:[#allocation3 + $0x38] sm:$0xff] }
 0x214   : > { %1252 = vpow2.f32 %v637_v21  ;;  %v626_v43 = vsub.f32 %v1421_v24, %v617_v22  ;;  %v662_v48 = vsel %vm522_vm2, %v1247_v39, 0.0  ;;  %v756_v52 = vpack.c.bf16 %v1247_v39, %v1243_v27  ;;  %v649_v27 = vld [vmem:[#allocation3 + $0x30] sm:$0xff] }
 0x215   : > { %663 = vadd.xlane.f32.xlu0 %v662_v48 }
 0x216   : > { %v641_v55 = vmul.f32 1.442695, %v626_v43  ;;  %1187 = vmatprep.mubr.msk.bf16.mxu1 %vm522_vm2, %v756_v52 }
 0x217   : > { %1188 = vmatmul.mubr.msk.bf16.vlgmr.msra.gmra.mxu1 %vm522_vm2, %v757_v54 }
 0x218   : > { %1254 = vpow2.f32 %v641_v55 }
 0x219   : > { %1256 = vpow2.f32 %v565_v5 }
 0x21a   : > { %1258 = vpow2.f32 %v563_v8 }
 0x21b   : > { %1260 = vpow2.f32 %v567_v9 }
 0x21c   : > { %1262 = vpow2.f32 %v569_v40 }
 0x21d   : > { %v1249_v26 = vpop.eup %1248  ;;  %1264 = vpow2.f32 %v571_v45 }
 0x21e   : > { %v671_v58 = vsel %vm522_vm2, %v1249_v26, 0.0  ;;  %v1251_v62 = vpop.eup %1250  ;;  %1266 = vpow2.f32 %v573_v33 }
 0x21f   : > { %672 = vadd.xlane.f32.xlu0 %v671_v58  ;;  %v677_v2 = vsel %vm522_vm2, %v1251_v62, 0.0  ;;  %1268 = vpow2.f32 %v575_v31 }
 0x220   : > { %1270 = vpow2.f32 %v577_v34 }
 0x221   : > { %v1253_v0 = vpop.eup %1252 }
 0x222   : > { %v674_v24 = vsel %vm522_vm2, %v1253_v0, 0.0  ;;  %v758_v3 = vpack.c.bf16 %v1253_v0, %v1249_v26 }
 0x223   : > { %678 = vadd.xlane.f32.xlu0 %v677_v2  ;;  %675 = vadd.xlane.f32.xlu1 %v674_v24 }
 0x224   : > { %1191 = vmatprep.mubr.msk.bf16.mxu1 %vm522_vm2, %v758_v3 }
 0x225   : > { %v1255_v4 = vpop.eup %1254 }
 0x226   : > { %v680_v6 = vsel %vm522_vm2, %v1255_v4, 0.0  ;;  %v759_v7 = vpack.c.bf16 %v1255_v4, %v1251_v62  ;;  %v1257_v36 = vpop.eup %1256 }
 0x227   : > { %681 = vadd.xlane.f32.xlu1 %v680_v6  ;;  %v1259_v37 = vpop.eup %1258  ;;  %v652_v12 = vmul.f32 %v1257_v36, %v644_v63 }
 0x228   : > { %1192 = vmatmul.mubr.msk.bf16.gmra.mxu1 %vm522_vm2, %v759_v7  ;;  %v1261_v38 = vpop.eup %1260  ;;  %v651_v57 = vmul.f32 %v1259_v37, %v643_v50  ;;  %v972_v50 = vld [vmem:[%s1579_s12 + $0x10] sm:$0xff] }
 0x229   : > { %v1263_v41 = vpop.eup %1262  ;;  %v653_v51 = vmul.f32 %v1261_v38, %v645_v49 }
 0x22a   : > { %v1265_v42 = vpop.eup %1264  ;;  %v654_v1 = vmul.f32 %v1263_v41, %v646_v60 }
 0x22b   : > { %v1267_v44 = vpop.eup %1266  ;;  %v655_v15 = vmul.f32 %v1265_v42, %v647_v20 }
 0x22c   : > { %v1269_v46 = vpop.eup %1268  ;;  %v656_v19 = vmul.f32 %v1267_v44, %v648_v17 }
 0x22d   : > { %v1271_v47 = vpop.eup %1270  ;;  %v657_v30 = vmul.f32 %v1269_v46, %v649_v27 }
 0x22e   : > { %v658_v48 = vmul.f32 %v1271_v47, %v650_v35 }
 0x238   : > { %715 = vperm.xlu1 %1227, %v1257_v36  }
 0x239   : > { %710 = vperm.xlu0 %1226, %v1259_v37  }
 0x23c   : > { %720 = vperm.xlu1 %1227, %v1261_v38  }
 0x23d   : > { %725 = vperm.xlu0 %1226, %v1263_v41   ;;  %v1581_v41 = vstv %s904_s8 }
 0x240   : > { %730 = vperm.xlu1 %1227, %v1265_v42  }
 0x241   : > { %735 = vperm.xlu0 %1226, %v1267_v44  }
 0x244   : > { %740 = vperm.xlu1 %1227, %v1269_v46  }
 0x245   : > { %745 = vperm.xlu0 %1226, %v1271_v47  }
 0x296   : > { %v667_v53 = vpop.xlane.xlu0 %666 }
 0x297   : > { %v685_v56 = vadd.f32 %v667_v53, %v653_v51 }
 0x298   : > { %v661_v59 = vpop.xlane.xlu1 %660 }
 0x299   : > { %694 = vst.msk [vmem:[#allocation3 + $0x10] sm:$0xff] %vm335_vm1, %v685_v56  ;;  %v683_v61 = vadd.f32 %v661_v59, %v651_v57 }
 0x29b   : > { %692 = vst.msk [vmem:[#allocation3] sm:$0xff] %vm335_vm1, %v683_v61 }
 0x29c   : > { %v670_v10 = vpop.xlane.xlu1 %669 }
 0x29d   : > { %v686_v11 = vadd.f32 %v670_v10, %v654_v1  ;;  %v970_v1 = vld [vmem:[%s1579_s12] sm:$0xff] }
 0x29e   : > { %v664_v14 = vpop.xlane.xlu0 %663 }
 0x29f   : > { %695 = vst.msk [vmem:[#allocation3 + $0x18] sm:$0xff] %vm335_vm1, %v686_v11  ;;  %v684_v16 = vadd.f32 %v664_v14, %v652_v12 }
 0x2a0   : > { %v890_v18 = vld [vmem:[#allocation3 + $0x10] sm:$0xff] }
 0x2a1   : > { %693 = vst.msk [vmem:[#allocation3 + $0x8] sm:$0xff] %vm335_vm1, %v684_v16  ;;  %1272 = vrcp.f32 %v890_v18  ;;  %v973_v18 = vld [vmem:[%s1579_s12 + $0x18] sm:$0xff] }
 0x2a2   : > { %v888_v13 = vld [vmem:[#allocation3] sm:$0xff] }
 0x2a3   : > { %1274 = vrcp.f32 %v888_v13 }
 0x2a6   : > { %v891_v23 = vld [vmem:[#allocation3 + $0x18] sm:$0xff] }
 0x2a7   : > { %1276 = vrcp.f32 %v891_v23 }
 0x2a8   : > { %v673_v25 = vpop.xlane.xlu0 %672  ;;  %v889_v28 = vld [vmem:[#allocation3 + $0x8] sm:$0xff] }
 0x2a9   : > { %v687_v29 = vadd.f32 %v673_v25, %v655_v15  ;;  %1278 = vrcp.f32 %v889_v28  ;;  %v971_v28 = vld [vmem:[%s1579_s12 + $0x8] sm:$0xff] }
 0x2ab   : > { %696 = vst.msk [vmem:[#allocation3 + $0x20] sm:$0xff] %vm335_vm1, %v687_v29 }
 0x2ac   : > { %v679_v32 = vpop.xlane.xlu0 %678  ;;  %v676_v21 = vpop.xlane.xlu1 %675 }
 0x2ad   : > { %v689_v39 = vadd.f32 %v679_v32, %v657_v30  ;;  %v688_v22 = vadd.f32 %v676_v21, %v656_v19 }
 0x2ae   : > { %v1273_v43 = vpop.eup %1272 }
 0x2af   : > { %698 = vst.msk [vmem:[#allocation3 + $0x30] sm:$0xff] %vm335_vm1, %v689_v39  ;;  %697 = vst.msk [vmem:[#allocation3 + $0x28] sm:$0xff] %vm335_vm1, %v688_v22  ;;  %925 = vperm.xlu1 %1227, %v1273_v43  }
 0x2b0   : > { %v682_v52 = vpop.xlane.xlu1 %681  ;;  %v1275_v55 = vpop.eup %1274 }
 0x2b1   : > { %v690_v54 = vadd.f32 %v682_v52, %v658_v48  ;;  %v974_v52 = vld [vmem:[%s1579_s12 + $0x20] sm:$0xff] }
 0x2b2   : > { %v892_v26 = vld [vmem:[#allocation3 + $0x20] sm:$0xff] }
 0x2b3   : > { %699 = vst.msk [vmem:[#allocation3 + $0x38] sm:$0xff] %vm335_vm1, %v690_v54  ;;  %915 = vperm.xlu1 %1227, %v1275_v55   ;;  %1280 = vrcp.f32 %v892_v26 }
 0x2b4   : > { %v1277_v58 = vpop.eup %1276  ;;  %v716_v7 = vpop.permute.xlu1 %715 }
 0x2b5   : > { %930 = vperm.xlu0 %1226, %v1277_v58   ;;  %v711_v8 = vpop.permute.xlu0 %710  ;;  %v749_v11 = vmul.f32 0.0, %v716_v7 }
 0x2b6   : > { %v894_v62 = vld [vmem:[#allocation3 + $0x30] sm:$0xff]  ;;  %v893_v0 = vld [vmem:[#allocation3 + $0x28] sm:$0xff]  ;;  %v1279_v2 = vpop.eup %1278  ;;  %v748_v44 = vmul.f32 0.0, %v711_v8 }
 0x2b7   : > { %1282 = vrcp.f32 %v894_v62 }
 0x2b8   : > { %1284 = vrcp.f32 %v893_v0  ;;  %v721_v9 = vpop.permute.xlu1 %720 }
 0x2b9   : > { %920 = vperm.xlu0 %1226, %v1279_v2   ;;  %v726_v40 = vpop.permute.xlu0 %725  ;;  %v750_v36 = vmul.f32 0.0, %v721_v9 }
 0x2ba   : > { %v895_v24 = vld [vmem:[#allocation3 + $0x38] sm:$0xff]  ;;  %v751_v51 = vmul.f32 0.0, %v726_v40 }
 0x2bb   : > { %1286 = vrcp.f32 %v895_v24 }
 0x2bc   : > { %v731_v45 = vpop.permute.xlu1 %730 }
 0x2bd   : > { %v736_v31 = vpop.permute.xlu0 %735  ;;  %v752_v30 = vmul.f32 0.0, %v731_v45 }
 0x2be   : > { %v753_v48 = vmul.f32 0.0, %v736_v31  ;;  %v977_v31 = vld [vmem:[%s1579_s12 + $0x38] sm:$0xff] }
 0x2c0   : > { %v1281_v3 = vpop.eup %1280  ;;  %v741_v34 = vpop.permute.xlu1 %740 }
 0x2c1   : > { %935 = vperm.xlu1 %1227, %v1281_v3   ;;  %v746_v49 = vpop.permute.xlu0 %745  ;;  %v754_v39 = vmul.f32 0.0, %v741_v34 }
 0x2c2   : > { %v755_v24 = vmul.f32 0.0, %v746_v49 }
 0x2c4   : > { %v1283_v4 = vpop.eup %1282 }
 0x2c5   : > { %v1285_v5 = vpop.eup %1284  ;;  %945 = vperm.xlu1 %1227, %v1283_v4   ;;  %v976_v4 = vld [vmem:[%s1579_s12 + $0x30] sm:$0xff] }
 0x2c6   : > { %940 = vperm.xlu0 %1226, %v1285_v5   ;;  %v975_v5 = vld [vmem:[%s1579_s12 + $0x28] sm:$0xff] }
 0x2c8   : > { %v1287_v6 = vpop.eup %1286 }
 0x2ca   : > { %950 = vperm.xlu0 %1226, %v1287_v6  }
 0x2d7   : > { %v1189_v33 = vpop.f32.mrf.mxu1 }
 0x2d8   : > { %v863_v38 = vadd.f32 %v1189_v33, %v750_v36 }
 0x2d9   : > { %v830_v37 = vpop.f32.mrf.mxu1 }
 0x2da   : > { %v861_v53 = vadd.f32 %v830_v37, %v748_v44 }
 0x2db   : > { %v1190_v46 = vpop.f32.mrf.mxu1 }
 0x2dc   : > { %v864_v59 = vadd.f32 %v1190_v46, %v751_v51 }
 0x2dd   : > { %v833_v60 = vpop.f32.mrf.mxu1 }
 0x2de   : > { %v862_v13 = vadd.f32 %v833_v60, %v749_v11 }
 0x2e8   : > { %v1193_v12 = vpop.f32.mrf.mxu1 }
 0x2e9   : > { %v867_v54 = vadd.f32 %v1193_v12, %v754_v39 }
 0x2ea   : > { %v846_v25 = vpop.f32.mrf.mxu1 }
 0x2eb   : > { %v865_v21 = vadd.f32 %v846_v25, %v752_v30 }
 0x2ec   : > { %v1194_v19 = vpop.f32.mrf.mxu1 }
 0x2ed   : > { %v868_v7 = vadd.f32 %v1194_v19, %v755_v24 }
 0x2ee   : > { %v849_v22 = vpop.f32.mrf.mxu1 }
 0x2ef   : > { %v866_v26 = vadd.f32 %v849_v22, %v753_v48 }
 0x32a   : > { %v926_v42 = vpop.permute.xlu1 %925 }
 0x32b   : > { %v955_v47 = vmul.f32 %v926_v42, %v863_v38 }
 0x32d   : > { %v964_v56 = vmul.f32 %v1581_v41, %v955_v47 }
 0x32e   : > { %v916_v57 = vpop.permute.xlu1 %915 }
 0x32f   : > { %v980_v61 = vadd.f32 %v972_v50, %v964_v56  ;;  %v953_v63 = vmul.f32 %v916_v57, %v861_v53 }
 0x330   : > { %v931_v10 = vpop.permute.xlu0 %930 }
 0x331   : > { %988 = vst [vmem:[%s1588_s15 + $0x10] sm:$0xff] %v980_v61  ;;  %v962_v14 = vmul.f32 %v1581_v41, %v953_v63  ;;  %v956_v16 = vmul.f32 %v931_v10, %v864_v59 }
 0x333   : > { %v978_v20 = vadd.f32 %v970_v1, %v962_v14  ;;  %v965_v23 = vmul.f32 %v1581_v41, %v956_v16 }
 0x334   : > { %v921_v15 = vpop.permute.xlu0 %920 }
 0x335   : > { %986 = vst [vmem:[%s1588_s15] sm:$0xff] %v978_v20  ;;  %v981_v27 = vadd.f32 %v973_v18, %v965_v23  ;;  %v954_v17 = vmul.f32 %v921_v15, %v862_v13 }
 0x337   : > { %989 = vst [vmem:[%s1588_s15 + $0x18] sm:$0xff] %v981_v27  ;;  %v963_v29 = vmul.f32 %v1581_v41, %v954_v17 }
 0x339   : > { %v979_v32 = vadd.f32 %v971_v28, %v963_v29 }
 0x33b   : > { %987 = vst [vmem:[%s1588_s15 + $0x8] sm:$0xff] %v979_v32 }
 0x33c   : > { %v936_v35 = vpop.permute.xlu1 %935 }
 0x33d   : > { %v957_v43 = vmul.f32 %v936_v35, %v865_v21 }
 0x33f   : > { %v966_v55 = vmul.f32 %v1581_v41, %v957_v43 }
 0x340   : > { %v946_v58 = vpop.permute.xlu1 %945 }
 0x341   : > { %v982_v62 = vadd.f32 %v974_v52, %v966_v55  ;;  %v941_v0 = vpop.permute.xlu0 %940  ;;  %v959_v2 = vmul.f32 %v946_v58, %v867_v54 }
 0x342   : > { %v958_v3 = vmul.f32 %v941_v0, %v866_v26 }
 0x343   : > { %990 = vst [vmem:[%s1588_s15 + $0x20] sm:$0xff] %v982_v62  ;;  %v968_v6 = vmul.f32 %v1581_v41, %v959_v2 }
 0x344   : > { %v967_v8 = vmul.f32 %v1581_v41, %v958_v3 }
 0x345   : > { %v984_v9 = vadd.f32 %v976_v4, %v968_v6  ;;  %v951_v40 = vpop.permute.xlu0 %950 }
 0x346   : > { %v983_v45 = vadd.f32 %v975_v5, %v967_v8  ;;  %v960_v33 = vmul.f32 %v951_v40, %v868_v7 }
 0x347   : > { %992 = vst [vmem:[%s1588_s15 + $0x30] sm:$0xff] %v984_v9 }
 0x348   : > { %991 = vst [vmem:[%s1588_s15 + $0x28] sm:$0xff] %v983_v45  ;;  %v969_v34 = vmul.f32 %v1581_v41, %v960_v33 }
 0x34a   : > { %v985_v36 = vadd.f32 %v977_v31, %v969_v34 }
 0x34c   : > { %993 = vst [vmem:[%s1588_s15 + $0x38] sm:$0xff] %v985_v36 }
 0x34d PF: > { %s16_s22 = sadd.s32 1, %s1310_s22   ;;  %s1627_s20 = smov %s1306_s21 }
 0x34e   : > { %p13_p5 = scmp.ge.s32.totalorder %s16_s22, 4   ;;  %s1628_s21 = smov %s1630_s0 }
 0x350   :  { %15 = sbr.rel (!%p13_p5) target bundleno = 2 (0x2), region = 87 }

// kernel: generator_forward.37
= control target key start
LH: loop header
LB: loop body
LE: loop exit
PB: predicated region body
PF: predicated region fallthrough
CT: control target
= control target key end

     0   :  { %s1207_s12 = smov 0   ;;  %s1209_s13 = smov 0   ;;  %s1463_s0 = inlined_call_operand.vmem [shape: bf16[128,1152], index: 0, kind: input, shape index: {}]   ;;  %s1464_s1 = inlined_call_operand.vmem [shape: bf16[1152,256], index: 1, kind: input, shape index: {}]   ;;  %s1465_s2 = inlined_call_operand.vmem [shape: f32[1,256], index: 2, kind: input, shape index: {}]   ;;  %s1466_s3 = inlined_call_operand.vmem [shape: f32[128,256], index: 3, kind: output, shape index: {}]  }
   0x1   :  { %s1211_s14 = smov 0   ;;  %s1213_s15 = smov 0  }
   0x2   :  { %s1215_s16 = smov 0  }
   0x3 LB: > { %s25_s17 = sadd.s32 1, %s1179_s15  ;;  %p48_p1 = scmp.ne.s32.totalorder %s1171_s13, %s1167_s12  ;;  %s1183_s16 = sphi %s1215_s16, %s13_s16   ;;  %s1179_s15 = sphi %s1213_s15, %s1470_s15   ;;  %s1175_s14 = sphi %s1211_s14, %s1469_s14   ;;  %s1171_s13 = sphi %s1209_s13, %s1468_s13   ;;  %s1167_s12 = sphi %s1207_s12, %s1467_s12  }
   0x4   : > { %p26_p0 = scmp.ge.s32.totalorder %s25_s17, 9  ;;  %p49_p2 = scmp.eq.s32.totalorder %s1183_s16, 0 }
   0x5   : > { %s41_s19 = sadd.s32 1, %s1171_s13  ;;  %p1016_p5 = scmp.ge.s32.totalorder %s1183_s16, 9 }
   0x6   : > { %s1472_s17 = smov (%p26_p0, %s25_s17), 0  ;;  %p50_p3 = por %p49_p2, %p48_p1 }
   0x7   : > { %s37_s18 = ssub.s32 %s1179_s15, %s1472_s17  ;;  %164 = sbr.rel (%p1016_p5) target bundleno = 26 (0x1a), region = 20 }
   0x8   : > { %p39_p4 = scmp.eq.s32.totalorder %s37_s18, 0 }
   0xa   : > { %s1242_s20 = scalar_select %p39_p4, %s1171_s13, %s41_s19  }
   0xc   : > { %167 = sbr.rel (!%p50_p3) target bundleno = 26 (0x1a), region = 24  ;;  %s169_s21 = sand.u32 (%p50_p3), 1, %s1171_s13  }
   0xd   : > { %s1018_s22 = sshll.u32 (%p50_p3), %s1179_s15, 2  ;;  %s1017_s23 = sshll.u32 (%p50_p3), %s169_s21, 6 }
   0xe   : > { %s1250_s26 = scalar_lea.vmem (%p50_p3), %s1463_s0, %s1018_s22  ;;  %s171_s27 = scalar_lea.vmem (%p50_p3), [#allocation3], %s1017_s23 }
   0xf   : > { %v193_v0 = vld [vmem:[%s1250_s26] sm:$0xf] (%p50_p3)  ;;  %v195_v1 = vld [vmem:[%s1250_s26 + $0x24] sm:$0xf] (%p50_p3)  ;;  %v197_v2 = vld [vmem:[%s1250_s26 + $0x48] sm:$0xf] (%p50_p3) }
  0x10   : > { %194 = vst [vmem:[%s171_s27] sm:$0xf] (%p50_p3), %v193_v0  ;;  %196 = vst [vmem:[%s171_s27 + $0x4] sm:$0xf] (%p50_p3), %v195_v1  ;;  %v199_v3 = vld [vmem:[%s1250_s26 + $0x6c] sm:$0xf] (%p50_p3) }
  0x11   : > { %v201_v4 = vld [vmem:[%s1250_s26 + $0x90] sm:$0xf]  ;;  %198 = vst [vmem:[%s171_s27 + $0x8] sm:$0xf] %v197_v2  ;;  %200 = vst [vmem:[%s171_s27 + $0xc] sm:$0xf] %v199_v3 }
  0x12   : > { %202 = vst [vmem:[%s171_s27 + $0x10] sm:$0xf] %v201_v4  ;;  %v203_v5 = vld [vmem:[%s1250_s26 + $0xb4] sm:$0xf]  ;;  %v205_v6 = vld [vmem:[%s1250_s26 + $0xd8] sm:$0xf] }
  0x13   : > { %v207_v7 = vld [vmem:[%s1250_s26 + $0xfc] sm:$0xf]  ;;  %204 = vst [vmem:[%s171_s27 + $0x14] sm:$0xf] %v203_v5  ;;  %206 = vst [vmem:[%s171_s27 + $0x18] sm:$0xf] %v205_v6 }
  0x14   : > { %208 = vst [vmem:[%s171_s27 + $0x1c] sm:$0xf] %v207_v7  ;;  %v209_v8 = vld [vmem:[%s1250_s26 + $0x120] sm:$0xf]  ;;  %v211_v9 = vld [vmem:[%s1250_s26 + $0x144] sm:$0xf] }
  0x15   : > { %v213_v10 = vld [vmem:[%s1250_s26 + $0x168] sm:$0xf]  ;;  %210 = vst [vmem:[%s171_s27 + $0x20] sm:$0xf] %v209_v8  ;;  %212 = vst [vmem:[%s171_s27 + $0x24] sm:$0xf] %v211_v9 }
  0x16   : > { %214 = vst [vmem:[%s171_s27 + $0x28] sm:$0xf] %v213_v10  ;;  %v215_v11 = vld [vmem:[%s1250_s26 + $0x18c] sm:$0xf]  ;;  %v217_v12 = vld [vmem:[%s1250_s26 + $0x1b0] sm:$0xf] }
  0x17   : > { %v219_v13 = vld [vmem:[%s1250_s26 + $0x1d4] sm:$0xf]  ;;  %216 = vst [vmem:[%s171_s27 + $0x2c] sm:$0xf] %v215_v11  ;;  %218 = vst [vmem:[%s171_s27 + $0x30] sm:$0xf] %v217_v12 }
  0x18   : > { %220 = vst [vmem:[%s171_s27 + $0x34] sm:$0xf] %v219_v13  ;;  %v221_v14 = vld [vmem:[%s1250_s26 + $0x1f8] sm:$0xf]  ;;  %v223_v15 = vld [vmem:[%s1250_s26 + $0x21c] sm:$0xf] }
  0x19   : > { %222 = vst [vmem:[%s171_s27 + $0x38] sm:$0xf] %v221_v14  ;;  %224 = vst [vmem:[%s171_s27 + $0x3c] sm:$0xf] %v223_v15 }
  0x1a PF: > { %p1019_p6 = scmp.ge.s32.totalorder %s1183_s16, 1  ;;  %p294_p7 = scmp.lt.s32.totalorder %s1183_s16, 10 }
  0x1c   : > { %p295_p8 = pnand %p1019_p6, %p294_p7 }
  0x1d   : > { %s301_s28 = sand.u32 (!%p295_p8), 1, %s1167_s12   ;;  %s1021_s29 = sshll.u32 (!%p295_p8), %s1175_s14, 4 }
  0x1e   : > { %298 = sbr.rel (%p295_p8) target bundleno = 343 (0x157), region = 69  ;;  %s1020_s30 = sshll.u32 (!%p295_p8), %s301_s28, 6 }
  0x1f   : > { %p346_p9 = scmp.lt.s32.totalorder (!%p295_p8), %s1021_s29, 143  ;;  %s1277_s8 = scalar_lea.vmem (!%p295_p8), [#allocation3], %s1020_s30 }
  0x20   : > { %p1024_p10 = scmp.ne.s32.totalorder (!%p295_p8), %s1175_s14, 0 }
  0x23   : > { %s1474_s29 = smov (!%p346_p9, %s1021_s29), 143  ;;  %377 = sbr.rel (%p1024_p10) target bundleno = 57 (0x39), region = 77 }
  0x24   : > { %s1054_s4 = sshll.u32 %s1474_s29, 3 }
  0x25   : > { %s1275_s7 = scalar_lea.vmem %s1464_s1, %s1054_s4 }
  0x28   : > { %v1185_v16 = vmov 0.0  }
  0x29   : > { %378 = vst [vmem:[#allocation2 + $0xb0] sm:$0xff] %v1185_v16  ;;  %379 = vst [vmem:[#allocation2] sm:$0xff] %v1185_v16 }
  0x2a   : > { %380 = vst [vmem:[#allocation2 + $0xd8] sm:$0xff] %v1185_v16  ;;  %381 = vst [vmem:[#allocation2 + $0x18] sm:$0xff] %v1185_v16 }
  0x2b   : > { %382 = vst [vmem:[#allocation2 + $0x50] sm:$0xff] %v1185_v16  ;;  %383 = vst [vmem:[#allocation2 + $0x68] sm:$0xff] %v1185_v16 }
  0x2c   : > { %384 = vst [vmem:[#allocation2 + $0x30] sm:$0xff] %v1185_v16  ;;  %385 = vst [vmem:[#allocation2 + $0x48] sm:$0xff] %v1185_v16 }
  0x2d   : > { %386 = vst [vmem:[#allocation2 + $0x80] sm:$0xff] %v1185_v16  ;;  %387 = vst [vmem:[#allocation2 + $0x88] sm:$0xff] %v1185_v16 }
  0x2e   : > { %388 = vst [vmem:[#allocation2 + $0xe8] sm:$0xff] %v1185_v16  ;;  %389 = vst [vmem:[#allocation2 + $0xb8] sm:$0xff] %v1185_v16 }
  0x2f   : > { %390 = vst [vmem:[#allocation2 + $0x60] sm:$0xff] %v1185_v16  ;;  %391 = vst [vmem:[#allocation2 + $0xf0] sm:$0xff] %v1185_v16 }
  0x30   : > { %392 = vst [vmem:[#allocation2 + $0x8] sm:$0xff] %v1185_v16  ;;  %393 = vst [vmem:[#allocation2 + $0x78] sm:$0xff] %v1185_v16 }
  0x31   : > { %394 = vst [vmem:[#allocation2 + $0x38] sm:$0xff] %v1185_v16  ;;  %395 = vst [vmem:[#allocation2 + $0x58] sm:$0xff] %v1185_v16 }
  0x32   : > { %396 = vst [vmem:[#allocation2 + $0x40] sm:$0xff] %v1185_v16  ;;  %397 = vst [vmem:[#allocation2 + $0xc8] sm:$0xff] %v1185_v16 }
  0x33   : > { %398 = vst [vmem:[#allocation2 + $0xe0] sm:$0xff] %v1185_v16  ;;  %399 = vst [vmem:[#allocation2 + $0x90] sm:$0xff] %v1185_v16 }
  0x34   : > { %400 = vst [vmem:[#allocation2 + $0x70] sm:$0xff] %v1185_v16  ;;  %401 = vst [vmem:[#allocation2 + $0xc0] sm:$0xff] %v1185_v16 }
  0x35   : > { %402 = vst [vmem:[#allocation2 + $0xa8] sm:$0xff] %v1185_v16  ;;  %403 = vst [vmem:[#allocation2 + $0xd0] sm:$0xff] %v1185_v16 }
  0x36   : > { %404 = vst [vmem:[#allocation2 + $0x10] sm:$0xff] %v1185_v16  ;;  %405 = vst [vmem:[#allocation2 + $0x28] sm:$0xff] %v1185_v16 }
  0x37   : > { %406 = vst [vmem:[#allocation2 + $0xa0] sm:$0xff] %v1185_v16  ;;  %407 = vst [vmem:[#allocation2 + $0xf8] sm:$0xff] %v1185_v16 }
  0x38   : > { %408 = vst [vmem:[#allocation2 + $0x20] sm:$0xff] %v1185_v16  ;;  %409 = vst [vmem:[#allocation2 + $0x98] sm:$0xff] %v1185_v16 }
  0x39 PF: > { %v1113_v17 = vld [vmem:[%s1275_s7 + $0x74] ss:$8 sps:$4 sm:$0xff]   ;;  %v1115_v18 = vld [vmem:[%s1275_s7 + $0x70] ss:$8 sps:$4 sm:$0xff]   ;;  %v1186_v19 = vmov 0   ;;  %v1137_v34 = vld [vmem:[%s1277_s8] sm:$0xff]  }
  0x3a   : > { %634 = vmatprep.mubr.bf16.mxu0 %v1186_v19  ;;  %674 = vmatprep.mubr.bf16.mxu1 %v1186_v19  ;;  %v1116_v20 = vld [vmem:[%s1275_s7 + $0x64] ss:$8 sps:$4 sm:$0xff]   ;;  %v1118_v21 = vld [vmem:[%s1275_s7 + $0x60] ss:$8 sps:$4 sm:$0xff]   ;;  %v1119_v22 = vld [vmem:[%s1275_s7 + $0x54] ss:$8 sps:$4 sm:$0xff]  }
  0x3b   : > { %602 = vmatprep.subr.bf16.mxu0 %v1113_v17  ;;  %1055 = vmatprep.subr.bf16.mxu1 %v1113_v17  ;;  %v1121_v23 = vld [vmem:[%s1275_s7 + $0x50] ss:$8 sps:$4 sm:$0xff]   ;;  %v1122_v24 = vld [vmem:[%s1275_s7 + $0x44] ss:$8 sps:$4 sm:$0xff]   ;;  %v1124_v25 = vld [vmem:[%s1275_s7 + $0x40] ss:$8 sps:$4 sm:$0xff]  }
  0x3c   : > { %603 = vmatpush1.bf16.msra.mxu0 %v1115_v18  ;;  %1063 = vmatpush1.bf16.msra.mxu1 %v1115_v18  ;;  %v1125_v26 = vld [vmem:[%s1275_s7 + $0x34] ss:$8 sps:$4 sm:$0xff]   ;;  %v1127_v27 = vld [vmem:[%s1275_s7 + $0x30] ss:$8 sps:$4 sm:$0xff]   ;;  %v1128_v28 = vld [vmem:[%s1275_s7 + $0x24] ss:$8 sps:$4 sm:$0xff]  }
  0x3d   : > { %604 = vmatprep.subr.bf16.mxu0 %v1116_v20  ;;  %1056 = vmatprep.subr.bf16.mxu1 %v1116_v20  ;;  %v1130_v29 = vld [vmem:[%s1275_s7 + $0x20] ss:$8 sps:$4 sm:$0xff]   ;;  %v1131_v30 = vld [vmem:[%s1275_s7 + $0x14] ss:$8 sps:$4 sm:$0xff]   ;;  %v1133_v31 = vld [vmem:[%s1275_s7 + $0x10] ss:$8 sps:$4 sm:$0xff]  }
  0x3e   : > { %v1134_v32 = vld [vmem:[%s1275_s7 + $0x4] ss:$8 sps:$4 sm:$0xff]   ;;  %v1136_v33 = vld [vmem:[%s1275_s7] ss:$8 sps:$4 sm:$0xff]   ;;  %v1141_v38 = vld [vmem:[%s1277_s8 + $0x10] sm:$0xff]   ;;  %p1049_p11 = scmp.ne.s32.totalorder %s1175_s14, 8 }
  0x3f   : > { %v1138_v35 = vld [vmem:[%s1277_s8 + $0x20] sm:$0xff]   ;;  %v1139_v36 = vld [vmem:[%s1277_s8 + $0x8] sm:$0xff]   ;;  %v1142_v39 = vld [vmem:[%s1277_s8 + $0x30] sm:$0xff]  }
  0x40   : > { %605 = vmatpush1.bf16.msra.mxu0 %v1118_v21  ;;  %1064 = vmatpush1.bf16.msra.mxu1 %v1118_v21  ;;  %v1140_v37 = vld [vmem:[%s1277_s8 + $0x28] sm:$0xff]   ;;  %v1143_v40 = vld [vmem:[%s1277_s8 + $0x18] sm:$0xff]   ;;  %v410_v42 = vld [vmem:[#allocation2 + $0xb0] sm:$0xff] }
  0x41   : > { %606 = vmatprep.subr.bf16.mxu0 %v1119_v22  ;;  %1057 = vmatprep.subr.bf16.mxu1 %v1119_v22  ;;  %v1144_v41 = vld [vmem:[%s1277_s8 + $0x38] sm:$0xff]   ;;  %v411_v46 = vld [vmem:[#allocation2] sm:$0xff]  ;;  %v429_v59 = vld [vmem:[#allocation2 + $0xc8] sm:$0xff] }
  0x42   : > { %v426_v43 = vld [vmem:[#allocation2 + $0x38] sm:$0xff]  ;;  %v428_v53 = vld [vmem:[#allocation2 + $0x40] sm:$0xff]  ;;  %v414_v0 = vld [vmem:[#allocation2 + $0x50] sm:$0xff] }
  0x43   : > { %v427_v47 = vld [vmem:[#allocation2 + $0x58] sm:$0xff]  ;;  %v430_v1 = vld [vmem:[#allocation2 + $0xe0] sm:$0xff]  ;;  %v415_v6 = vld [vmem:[#allocation2 + $0x68] sm:$0xff] }
  0x44   : > { %607 = vmatpush1.bf16.msra.mxu0 %v1121_v23  ;;  %1065 = vmatpush1.bf16.msra.mxu1 %v1121_v23  ;;  %v412_v52 = vld [vmem:[#allocation2 + $0xd8] sm:$0xff]  ;;  %v431_v7 = vld [vmem:[#allocation2 + $0x90] sm:$0xff]  ;;  %v417_v18 = vld [vmem:[#allocation2 + $0x48] sm:$0xff] }
  0x45   : > { %608 = vmatprep.subr.bf16.mxu0 %v1122_v24  ;;  %1058 = vmatprep.subr.bf16.mxu1 %v1122_v24  ;;  %v413_v58 = vld [vmem:[#allocation2 + $0x18] sm:$0xff]  ;;  %v416_v12 = vld [vmem:[#allocation2 + $0x30] sm:$0xff]  ;;  %v418_v24 = vld [vmem:[#allocation2 + $0x80] sm:$0xff] }
  0x46   : > { %v432_v13 = vld [vmem:[#allocation2 + $0x70] sm:$0xff] }
  0x48   : > { %609 = vmatpush1.bf16.msra.mxu0 %v1124_v25  ;;  %1066 = vmatpush1.bf16.msra.mxu1 %v1124_v25  ;;  %v434_v25 = vld [vmem:[#allocation2 + $0xa8] sm:$0xff] }
  0x49   : > { %610 = vmatprep.subr.bf16.mxu0 %v1125_v26  ;;  %1059 = vmatprep.subr.bf16.mxu1 %v1125_v26 }
  0x4c   : > { %611 = vmatpush1.bf16.msra.mxu0 %v1127_v27  ;;  %1067 = vmatpush1.bf16.msra.mxu1 %v1127_v27 }
  0x4d   : > { %612 = vmatprep.subr.bf16.mxu0 %v1128_v28  ;;  %1060 = vmatprep.subr.bf16.mxu1 %v1128_v28 }
  0x50   : > { %613 = vmatpush1.bf16.msra.mxu0 %v1130_v29  ;;  %1068 = vmatpush1.bf16.msra.mxu1 %v1130_v29 }
  0x51   : > { %614 = vmatprep.subr.bf16.mxu0 %v1131_v30  ;;  %1061 = vmatprep.subr.bf16.mxu1 %v1131_v30  ;;  %v419_v30 = vld [vmem:[#allocation2 + $0x88] sm:$0xff] }
  0x54   : > { %615 = vmatpush1.bf16.msra.mxu0 %v1133_v31  ;;  %1069 = vmatpush1.bf16.msra.mxu1 %v1133_v31  ;;  %v435_v31 = vld [vmem:[#allocation2 + $0xd0] sm:$0xff] }
  0x55   : > { %616 = vmatprep.subr.bf16.mxu0 %v1134_v32  ;;  %1062 = vmatprep.subr.bf16.mxu1 %v1134_v32 }
  0x58   : > { %617 = vmatpush1.bf16.msra.mxu0 %v1136_v33  ;;  %1070 = vmatpush1.bf16.msra.mxu1 %v1136_v33 }
  0x5b   : > { %635 = vmatmul.mubr.bf16.vlgmr.msra.gmra.mxu0 %v1137_v34  ;;  %675 = vmatmul.mubr.bf16.vlgmr.msra.gmra.mxu1 %v1138_v35 }
  0x5c   : > { %644 = vmatprep.mubr.bf16.mxu0 %v1186_v19  ;;  %684 = vmatprep.mubr.bf16.mxu1 %v1186_v19 }
  0x63   : > { %645 = vmatmul.mubr.bf16.gmra.mxu0 %v1139_v36  ;;  %685 = vmatmul.mubr.bf16.gmra.mxu1 %v1140_v37  ;;  %v420_v36 = vld [vmem:[#allocation2 + $0xe8] sm:$0xff]  ;;  %v436_v37 = vld [vmem:[#allocation2 + $0x10] sm:$0xff] }
  0x64   : > { %654 = vmatprep.mubr.bf16.mxu0 %v1186_v19  ;;  %694 = vmatprep.mubr.bf16.mxu1 %v1186_v19 }
  0x6b   : > { %655 = vmatmul.mubr.bf16.gmra.mxu0 %v1141_v38  ;;  %695 = vmatmul.mubr.bf16.gmra.mxu1 %v1142_v39 }
  0x6c   : > { %664 = vmatprep.mubr.bf16.mxu0 %v1186_v19  ;;  %704 = vmatprep.mubr.bf16.mxu1 %v1186_v19  ;;  %v433_v19 = vld [vmem:[#allocation2 + $0xc0] sm:$0xff] }
  0x73   : > { %665 = vmatmul.mubr.bf16.gmra.mxu0 %v1143_v40  ;;  %705 = vmatmul.mubr.bf16.gmra.mxu1 %v1144_v41 }
 0x11b   : > { %v636_v44 = vpop.f32.mrf.mxu0  ;;  %v676_v45 = vpop.f32.mrf.mxu1 }
 0x11c   : > { %v715_v48 = vadd.f32 %v636_v44, %v410_v42  ;;  %v731_v49 = vadd.f32 %v676_v45, %v426_v43  ;;  %v421_v42 = vld [vmem:[#allocation2 + $0xb8] sm:$0xff]  ;;  %v437_v43 = vld [vmem:[#allocation2 + $0x28] sm:$0xff] }
 0x11d   : > { %v638_v50 = vpop.f32.mrf.mxu0  ;;  %v678_v51 = vpop.f32.mrf.mxu1 }
 0x11e   : > { %747 = vst [vmem:[#allocation2 + $0xb0] sm:$0xff] %v715_v48  ;;  %763 = vst [vmem:[#allocation2 + $0x38] sm:$0xff] %v731_v49  ;;  %v716_v54 = vadd.f32 %v638_v50, %v411_v46  ;;  %v732_v55 = vadd.f32 %v678_v51, %v427_v47  ;;  %v422_v48 = vld [vmem:[#allocation2 + $0x60] sm:$0xff] }
 0x11f   : > { %v640_v56 = vpop.f32.mrf.mxu0  ;;  %v680_v57 = vpop.f32.mrf.mxu1  ;;  %v438_v49 = vld [vmem:[#allocation2 + $0xa0] sm:$0xff] }
 0x120   : > { %748 = vst [vmem:[#allocation2] sm:$0xff] %v716_v54  ;;  %764 = vst [vmem:[#allocation2 + $0x58] sm:$0xff] %v732_v55  ;;  %v717_v60 = vadd.f32 %v640_v56, %v412_v52  ;;  %v733_v61 = vadd.f32 %v680_v57, %v428_v53  ;;  %v423_v54 = vld [vmem:[#allocation2 + $0xf0] sm:$0xff]  ;;  %v439_v55 = vld [vmem:[#allocation2 + $0xf8] sm:$0xff] }
 0x121   : > { %v642_v62 = vpop.f32.mrf.mxu0  ;;  %v682_v63 = vpop.f32.mrf.mxu1 }
 0x122   : > { %749 = vst [vmem:[#allocation2 + $0xd8] sm:$0xff] %v717_v60  ;;  %765 = vst [vmem:[#allocation2 + $0x40] sm:$0xff] %v733_v61  ;;  %v718_v2 = vadd.f32 %v642_v62, %v413_v58  ;;  %v734_v3 = vadd.f32 %v682_v63, %v429_v59  ;;  %v424_v60 = vld [vmem:[#allocation2 + $0x8] sm:$0xff]  ;;  %v440_v61 = vld [vmem:[#allocation2 + $0x20] sm:$0xff] }
 0x123   : > { %v646_v4 = vpop.f32.mrf.mxu0  ;;  %v686_v5 = vpop.f32.mrf.mxu1 }
 0x124   : > { %750 = vst [vmem:[#allocation2 + $0x18] sm:$0xff] %v718_v2  ;;  %766 = vst [vmem:[#allocation2 + $0xc8] sm:$0xff] %v734_v3  ;;  %v719_v8 = vadd.f32 %v646_v4, %v414_v0  ;;  %v735_v9 = vadd.f32 %v686_v5, %v430_v1  ;;  %v425_v2 = vld [vmem:[#allocation2 + $0x78] sm:$0xff] }
 0x125   : > { %v648_v10 = vpop.f32.mrf.mxu0  ;;  %v688_v11 = vpop.f32.mrf.mxu1  ;;  %v441_v3 = vld [vmem:[#allocation2 + $0x98] sm:$0xff] }
 0x126   : > { %751 = vst [vmem:[#allocation2 + $0x50] sm:$0xff] %v719_v8  ;;  %767 = vst [vmem:[#allocation2 + $0xe0] sm:$0xff] %v735_v9  ;;  %v720_v14 = vadd.f32 %v648_v10, %v415_v6  ;;  %v736_v15 = vadd.f32 %v688_v11, %v431_v7 }
 0x127   : > { %v650_v16 = vpop.f32.mrf.mxu0  ;;  %v690_v17 = vpop.f32.mrf.mxu1 }
 0x128   : > { %752 = vst [vmem:[#allocation2 + $0x68] sm:$0xff] %v720_v14  ;;  %768 = vst [vmem:[#allocation2 + $0x90] sm:$0xff] %v736_v15  ;;  %v721_v20 = vadd.f32 %v650_v16, %v416_v12  ;;  %v737_v21 = vadd.f32 %v690_v17, %v432_v13 }
 0x129   : > { %v652_v22 = vpop.f32.mrf.mxu0  ;;  %v692_v23 = vpop.f32.mrf.mxu1 }
 0x12a   : > { %753 = vst [vmem:[#allocation2 + $0x30] sm:$0xff] %v721_v20  ;;  %769 = vst [vmem:[#allocation2 + $0x70] sm:$0xff] %v737_v21  ;;  %v722_v26 = vadd.f32 %v652_v22, %v417_v18  ;;  %v738_v27 = vadd.f32 %v692_v23, %v433_v19 }
 0x12b   : > { %v656_v28 = vpop.f32.mrf.mxu0  ;;  %v696_v29 = vpop.f32.mrf.mxu1 }
 0x12c   : > { %754 = vst [vmem:[#allocation2 + $0x48] sm:$0xff] %v722_v26  ;;  %770 = vst [vmem:[#allocation2 + $0xc0] sm:$0xff] %v738_v27  ;;  %v723_v32 = vadd.f32 %v656_v28, %v418_v24  ;;  %v739_v33 = vadd.f32 %v696_v29, %v434_v25 }
 0x12d   : > { %v658_v34 = vpop.f32.mrf.mxu0  ;;  %v698_v35 = vpop.f32.mrf.mxu1 }
 0x12e   : > { %755 = vst [vmem:[#allocation2 + $0x80] sm:$0xff] %v723_v32  ;;  %771 = vst [vmem:[#allocation2 + $0xa8] sm:$0xff] %v739_v33  ;;  %v724_v38 = vadd.f32 %v658_v34, %v419_v30  ;;  %v740_v39 = vadd.f32 %v698_v35, %v435_v31 }
 0x12f   : > { %v660_v40 = vpop.f32.mrf.mxu0  ;;  %v700_v41 = vpop.f32.mrf.mxu1 }
 0x130   : > { %756 = vst [vmem:[#allocation2 + $0x88] sm:$0xff] %v724_v38  ;;  %772 = vst [vmem:[#allocation2 + $0xd0] sm:$0xff] %v740_v39  ;;  %v725_v44 = vadd.f32 %v660_v40, %v420_v36  ;;  %v741_v45 = vadd.f32 %v700_v41, %v436_v37 }
 0x131   : > { %v662_v46 = vpop.f32.mrf.mxu0  ;;  %v702_v47 = vpop.f32.mrf.mxu1 }
 0x132   : > { %757 = vst [vmem:[#allocation2 + $0xe8] sm:$0xff] %v725_v44  ;;  %773 = vst [vmem:[#allocation2 + $0x10] sm:$0xff] %v741_v45  ;;  %v726_v50 = vadd.f32 %v662_v46, %v421_v42  ;;  %v742_v51 = vadd.f32 %v702_v47, %v437_v43 }
 0x133   : > { %v666_v52 = vpop.f32.mrf.mxu0  ;;  %v706_v53 = vpop.f32.mrf.mxu1 }
 0x134   : > { %758 = vst [vmem:[#allocation2 + $0xb8] sm:$0xff] %v726_v50  ;;  %774 = vst [vmem:[#allocation2 + $0x28] sm:$0xff] %v742_v51  ;;  %v727_v56 = vadd.f32 %v666_v52, %v422_v48  ;;  %v743_v57 = vadd.f32 %v706_v53, %v438_v49 }
 0x135   : > { %v668_v58 = vpop.f32.mrf.mxu0  ;;  %v708_v59 = vpop.f32.mrf.mxu1 }
 0x136   : > { %759 = vst [vmem:[#allocation2 + $0x60] sm:$0xff] %v727_v56  ;;  %775 = vst [vmem:[#allocation2 + $0xa0] sm:$0xff] %v743_v57  ;;  %v728_v62 = vadd.f32 %v668_v58, %v423_v54  ;;  %v744_v63 = vadd.f32 %v708_v59, %v439_v55 }
 0x137   : > { %v670_v0 = vpop.f32.mrf.mxu0  ;;  %v710_v1 = vpop.f32.mrf.mxu1 }
 0x138   : > { %760 = vst [vmem:[#allocation2 + $0xf0] sm:$0xff] %v728_v62  ;;  %776 = vst [vmem:[#allocation2 + $0xf8] sm:$0xff] %v744_v63  ;;  %v729_v4 = vadd.f32 %v670_v0, %v424_v60  ;;  %v745_v5 = vadd.f32 %v710_v1, %v440_v61  ;;  %782 = sbr.rel (%p1049_p11) target bundleno = 343 (0x157), region = 81 }
 0x139   : > { %v672_v6 = vpop.f32.mrf.mxu0  ;;  %v712_v7 = vpop.f32.mrf.mxu1 }
 0x13a   : > { %761 = vst [vmem:[#allocation2 + $0x8] sm:$0xff] %v729_v4  ;;  %777 = vst [vmem:[#allocation2 + $0x20] sm:$0xff] %v745_v5  ;;  %v730_v8 = vadd.f32 %v672_v6, %v425_v2  ;;  %v746_v9 = vadd.f32 %v712_v7, %v441_v3 }
 0x13c   : > { %762 = vst [vmem:[#allocation2 + $0x78] sm:$0xff] %v730_v8  ;;  %778 = vst [vmem:[#allocation2 + $0x98] sm:$0xff] %v746_v9 }
 0x13d   : > { %v817_v10 = vlaneseq  ;;  %v815_v11 = vld [vmem:[%s1465_s2] sm:$0x3]  ;;  %v783_v13 = vld [vmem:[#allocation2 + $0xb0] sm:$0xff]  ;;  %v785_v15 = vld [vmem:[#allocation2 + $0xd8] sm:$0xff] }
 0x13e   : > { %v784_v14 = vld [vmem:[#allocation2] sm:$0xff]  ;;  %v786_v16 = vld [vmem:[#allocation2 + $0x18] sm:$0xff]  ;;  %v787_v19 = vld [vmem:[#allocation2 + $0x50] sm:$0xff] }
 0x13f   : > { %v818_v12 = vshrl.u32 %v817_v10, 7  ;;  %v788_v20 = vld [vmem:[#allocation2 + $0x68] sm:$0xff]  ;;  %v789_v21 = vld [vmem:[#allocation2 + $0x30] sm:$0xff]  ;;  %v791_v23 = vld [vmem:[#allocation2 + $0x80] sm:$0xff] }
 0x140   : > { %v790_v22 = vld [vmem:[#allocation2 + $0x48] sm:$0xff]  ;;  %v794_v28 = vld [vmem:[#allocation2 + $0xb8] sm:$0xff]  ;;  %v795_v29 = vld [vmem:[#allocation2 + $0x60] sm:$0xff] }
 0x141   : > { %v819_v17 = vsub.s32 0, %v818_v12  ;;  %v823_v18 = vsub.s32 1, %v818_v12  ;;  %v792_v24 = vld [vmem:[#allocation2 + $0x88] sm:$0xff]  ;;  %v796_v30 = vld [vmem:[#allocation2 + $0xf0] sm:$0xff]  ;;  %v799_v33 = vld [vmem:[#allocation2 + $0x38] sm:$0xff] }
 0x142   : > { %v793_v25 = vld [vmem:[#allocation2 + $0xe8] sm:$0xff]  ;;  %v800_v38 = vld [vmem:[#allocation2 + $0x58] sm:$0xff]  ;;  %v801_v39 = vld [vmem:[#allocation2 + $0x40] sm:$0xff] }
 0x143   : > { %v1316_v26 = vrot.slane %v815_v11, %v819_v17  ;;  %v1318_v27 = vrot.slane %v815_v11, %v823_v18  ;;  %v797_v31 = vld [vmem:[#allocation2 + $0x8] sm:$0xff]  ;;  %v798_v32 = vld [vmem:[#allocation2 + $0x78] sm:$0xff]  ;;  %v803_v45 = vld [vmem:[#allocation2 + $0xe0] sm:$0xff] }
 0x144   : > { %v802_v40 = vld [vmem:[#allocation2 + $0xc8] sm:$0xff]  ;;  %v804_v46 = vld [vmem:[#allocation2 + $0x90] sm:$0xff]  ;;  %v806_v52 = vld [vmem:[#allocation2 + $0xc0] sm:$0xff] }
 0x145   : > { %v827_v34 = vadd.f32 %v1316_v26, %v783_v13  ;;  %v828_v35 = vadd.f32 %v1318_v27, %v784_v14  ;;  %v829_v36 = vadd.f32 %v1316_v26, %v785_v15  ;;  %v830_v37 = vadd.f32 %v1318_v27, %v786_v16  ;;  %v805_v47 = vld [vmem:[#allocation2 + $0x70] sm:$0xff]  ;;  %v807_v53 = vld [vmem:[#allocation2 + $0xa8] sm:$0xff]  ;;  %v811_v61 = vld [vmem:[#allocation2 + $0xa0] sm:$0xff] }
 0x146   : > { %v831_v41 = vadd.f32 %v1316_v26, %v787_v19  ;;  %v832_v42 = vadd.f32 %v1318_v27, %v788_v20  ;;  %v833_v43 = vadd.f32 %v1316_v26, %v789_v21  ;;  %v834_v44 = vadd.f32 %v1318_v27, %v790_v22  ;;  %v808_v54 = vld [vmem:[#allocation2 + $0xd0] sm:$0xff]  ;;  %v810_v60 = vld [vmem:[#allocation2 + $0x28] sm:$0xff]  ;;  %v812_v2 = vld [vmem:[#allocation2 + $0xf8] sm:$0xff] }
 0x147   : > { %859 = vst [vmem:[%s1466_s3] sm:$0xff] %v827_v34  ;;  %860 = vst [vmem:[%s1466_s3 + $0x8] sm:$0xff] %v828_v35  ;;  %v835_v48 = vadd.f32 %v1316_v26, %v791_v23  ;;  %v836_v49 = vadd.f32 %v1318_v27, %v792_v24  ;;  %v837_v50 = vadd.f32 %v1316_v26, %v793_v25  ;;  %v809_v59 = vld [vmem:[#allocation2 + $0x10] sm:$0xff]  ;;  %v813_v3 = vld [vmem:[#allocation2 + $0x20] sm:$0xff] }
 0x148   : > { %861 = vst [vmem:[%s1466_s3 + $0x10] sm:$0xff] %v829_v36  ;;  %862 = vst [vmem:[%s1466_s3 + $0x18] sm:$0xff] %v830_v37  ;;  %v838_v51 = vadd.f32 %v1318_v27, %v794_v28  ;;  %v839_v55 = vadd.f32 %v1316_v26, %v795_v29  ;;  %v840_v56 = vadd.f32 %v1318_v27, %v796_v30  ;;  %v814_v4 = vld [vmem:[#allocation2 + $0x98] sm:$0xff] }
 0x149   : > { %863 = vst [vmem:[%s1466_s3 + $0x20] sm:$0xff] %v831_v41  ;;  %864 = vst [vmem:[%s1466_s3 + $0x28] sm:$0xff] %v832_v42  ;;  %v841_v57 = vadd.f32 %v1316_v26, %v797_v31  ;;  %v842_v58 = vadd.f32 %v1318_v27, %v798_v32  ;;  %v843_v62 = vadd.f32 %v1316_v26, %v799_v33 }
 0x14a   : > { %865 = vst [vmem:[%s1466_s3 + $0x30] sm:$0xff] %v833_v43  ;;  %866 = vst [vmem:[%s1466_s3 + $0x38] sm:$0xff] %v834_v44  ;;  %v844_v63 = vadd.f32 %v1318_v27, %v800_v38  ;;  %v845_v0 = vadd.f32 %v1316_v26, %v801_v39  ;;  %v846_v1 = vadd.f32 %v1318_v27, %v802_v40 }
 0x14b   : > { %867 = vst [vmem:[%s1466_s3 + $0x40] sm:$0xff] %v835_v48  ;;  %868 = vst [vmem:[%s1466_s3 + $0x48] sm:$0xff] %v836_v49  ;;  %v847_v5 = vadd.f32 %v1316_v26, %v803_v45  ;;  %v848_v6 = vadd.f32 %v1318_v27, %v804_v46  ;;  %v849_v7 = vadd.f32 %v1316_v26, %v805_v47 }
 0x14c   : > { %869 = vst [vmem:[%s1466_s3 + $0x50] sm:$0xff] %v837_v50  ;;  %870 = vst [vmem:[%s1466_s3 + $0x58] sm:$0xff] %v838_v51  ;;  %v850_v8 = vadd.f32 %v1318_v27, %v806_v52  ;;  %v851_v9 = vadd.f32 %v1316_v26, %v807_v53  ;;  %v852_v10 = vadd.f32 %v1318_v27, %v808_v54 }
 0x14d   : > { %871 = vst [vmem:[%s1466_s3 + $0x60] sm:$0xff] %v839_v55  ;;  %872 = vst [vmem:[%s1466_s3 + $0x68] sm:$0xff] %v840_v56  ;;  %v853_v11 = vadd.f32 %v1316_v26, %v809_v59  ;;  %v854_v12 = vadd.f32 %v1318_v27, %v810_v60  ;;  %v855_v13 = vadd.f32 %v1316_v26, %v811_v61 }
 0x14e   : > { %873 = vst [vmem:[%s1466_s3 + $0x70] sm:$0xff] %v841_v57  ;;  %874 = vst [vmem:[%s1466_s3 + $0x78] sm:$0xff] %v842_v58  ;;  %v856_v14 = vadd.f32 %v1318_v27, %v812_v2  ;;  %v857_v15 = vadd.f32 %v1316_v26, %v813_v3  ;;  %v858_v16 = vadd.f32 %v1318_v27, %v814_v4 }
 0x14f   : > { %875 = vst [vmem:[%s1466_s3 + $0x80] sm:$0xff] %v843_v62  ;;  %876 = vst [vmem:[%s1466_s3 + $0x88] sm:$0xff] %v844_v63 }
 0x150   : > { %877 = vst [vmem:[%s1466_s3 + $0x90] sm:$0xff] %v845_v0  ;;  %878 = vst [vmem:[%s1466_s3 + $0x98] sm:$0xff] %v846_v1 }
 0x151   : > { %879 = vst [vmem:[%s1466_s3 + $0xa0] sm:$0xff] %v847_v5  ;;  %880 = vst [vmem:[%s1466_s3 + $0xa8] sm:$0xff] %v848_v6 }
 0x152   : > { %881 = vst [vmem:[%s1466_s3 + $0xb0] sm:$0xff] %v849_v7  ;;  %882 = vst [vmem:[%s1466_s3 + $0xb8] sm:$0xff] %v850_v8 }
 0x153   : > { %883 = vst [vmem:[%s1466_s3 + $0xc0] sm:$0xff] %v851_v9  ;;  %884 = vst [vmem:[%s1466_s3 + $0xc8] sm:$0xff] %v852_v10 }
 0x154   : > { %885 = vst [vmem:[%s1466_s3 + $0xd0] sm:$0xff] %v853_v11  ;;  %886 = vst [vmem:[%s1466_s3 + $0xd8] sm:$0xff] %v854_v12 }
 0x155   : > { %887 = vst [vmem:[%s1466_s3 + $0xe0] sm:$0xff] %v855_v13  ;;  %888 = vst [vmem:[%s1466_s3 + $0xe8] sm:$0xff] %v856_v14 }
 0x156   : > { %889 = vst [vmem:[%s1466_s3 + $0xf0] sm:$0xff] %v857_v15  ;;  %890 = vst [vmem:[%s1466_s3 + $0xf8] sm:$0xff] %v858_v16 }
 0x157 PF: > { %s13_s16 = sadd.s32 1, %s1183_s16   ;;  %s1467_s12 = smov %s1171_s13 }
 0x158   : > { %p10_p12 = scmp.ge.s32.totalorder %s13_s16, 11   ;;  %s1468_s13 = smov %s1242_s20 }
 0x159   : > { %s1469_s14 = smov %s1179_s15  ;;  %s1470_s15 = smov %s1472_s17 }
 0x15a   :  { %12 = sbr.rel (!%p10_p12) target bundleno = 3 (0x3), region = 122 }

// kernel: generator_forward.38
= control target key start
LH: loop header
LB: loop body
LE: loop exit
PB: predicated region body
PF: predicated region fallthrough
CT: control target
= control target key end

     0   :  { %s547_s12 = smov 0   ;;  %s549_s13 = smov 0   ;;  %s593_s0 = inlined_call_operand.vmem [shape: f32[2,16,256], index: 0, kind: input, shape index: {}]   ;;  %s594_s1 = inlined_call_operand.vmem [shape: f32[1,256], index: 1, kind: input, shape index: {}]   ;;  %s595_s2 = inlined_call_operand.vmem [shape: f32[1,256], index: 2, kind: input, shape index: {}]   ;;  %s596_s3 = inlined_call_operand.vmem [shape: f32[2,16,256], index: 3, kind: output, shape index: {}]  }
   0x1   :  { %s551_s14 = smov 0  }
   0x2 LB: > { %s25_s15 = sadd.s32 1, %s521_s13  ;;  %p466_p0 = scmp.ge.s32.totalorder %s525_s14, 1  ;;  %s525_s14 = sphi %s551_s14, %s13_s14   ;;  %s521_s13 = sphi %s549_s13, %s598_s13   ;;  %s517_s12 = sphi %s547_s12, %s597_s12  }
   0x3   : > { %p27_p1 = scmp.ge.s32.totalorder %s25_s15, 2  ;;  %p178_p2 = scmp.lt.s32.totalorder %s525_s14, 3 }
   0x5   : > { %s600_s15 = smov (%p27_p1, %s25_s15), 0  ;;  %p179_p3 = pnand %p466_p0, %p178_p2 }
   0x6   : > { %p219_p4 = scmp.lt.s32.totalorder (!%p179_p3), %s517_s12, 1 }
   0x7   : > { %182 = sbr.rel (%p179_p3) target bundleno = 79 (0x4f), region = 32 }
   0xc   : > { %s602_s12 = smov (!%p219_p4, %s517_s12), 1  ;;  %v303_v46 = vlaneseq  ;;  %v301_v49 = vld [vmem:[%s594_s1] sm:$0x3] }
   0xd   : > { %s473_s16 = sshll.u32 %s602_s12, 5  ;;  %v317_v51 = vld [vmem:[%s595_s2] sm:$0x3] }
   0xe   : > { %s226_s19 = scalar_lea.vmem %s593_s0, %s473_s16  ;;  %v304_v47 = vshrl.u32 %v303_v46, 7  ;;  %s246_s26 = scalar_lea.vmem %s596_s3, %s473_s16 }
   0xf   : > { %v248_v0 = vld [vmem:[%s226_s19] sm:$0xff]  ;;  %v249_v1 = vld [vmem:[%s226_s19 + $0x8] sm:$0xff]  ;;  %v250_v2 = vld [vmem:[%s226_s19 + $0x10] sm:$0xff] }
  0x10   : > { %v251_v3 = vld [vmem:[%s226_s19 + $0x18] sm:$0xff]  ;;  %v252_v4 = vadd.f32 %v250_v2, %v248_v0  ;;  %v305_v48 = vsub.s32 0, %v304_v47  ;;  %v309_v50 = vsub.s32 1, %v304_v47 }
  0x11   : > { %v259_v5 = vadd.f32 %v251_v3, %v249_v1 }
  0x12   : > { %v253_v6 = vrot.slane %v252_v4, 4  ;;  %v306_v52 = vrot.slane %v301_v49, %v305_v48  ;;  %v310_v54 = vrot.slane %v301_v49, %v309_v50  ;;  %v322_v57 = vrot.slane %v317_v51, %v305_v48 }
  0x13   : > { %v260_v7 = vrot.slane %v259_v5, 4  ;;  %v326_v60 = vrot.slane %v317_v51, %v309_v50 }
  0x14   : > { %v254_v8 = vadd.f32 %v253_v6, %v252_v4 }
  0x15   : > { %v261_v9 = vadd.f32 %v260_v7, %v259_v5 }
  0x16   : > { %v255_v10 = vrot.slane %v254_v8, 2 }
  0x17   : > { %v262_v11 = vrot.slane %v261_v9, 2 }
  0x18   : > { %v256_v12 = vadd.f32 %v255_v10, %v254_v8 }
  0x19   : > { %v263_v13 = vadd.f32 %v262_v11, %v261_v9 }
  0x1a   : > { %v257_v14 = vrot.slane %v256_v12, 1 }
  0x1b   : > { %v264_v15 = vrot.slane %v263_v13, 1 }
  0x1c   : > { %v258_v16 = vadd.f32 %v257_v14, %v256_v12 }
  0x1d   : > { %v265_v17 = vadd.f32 %v264_v15, %v263_v13 }
  0x1e   : > { %v267_v18 = vmul.f32 0.0625, %v258_v16 }
  0x1f   : > { %v268_v19 = vmul.f32 0.0625, %v265_v17 }
  0x20   : > { %v269_v20 = vsub.f32 %v248_v0, %v267_v18  ;;  %v271_v21 = vsub.f32 %v250_v2, %v267_v18 }
  0x21   : > { %v270_v22 = vsub.f32 %v249_v1, %v268_v19  ;;  %v272_v23 = vsub.f32 %v251_v3, %v268_v19 }
  0x22   : > { %v273_v24 = vmul.f32 %v269_v20, %v269_v20  ;;  %v275_v25 = vmul.f32 %v271_v21, %v271_v21 }
  0x23   : > { %v274_v26 = vmul.f32 %v270_v22, %v270_v22  ;;  %v276_v27 = vmul.f32 %v272_v23, %v272_v23 }
  0x24   : > { %v277_v28 = vadd.f32 %v275_v25, %v273_v24 }
  0x25   : > { %v284_v29 = vadd.f32 %v276_v27, %v274_v26 }
  0x26   : > { %v278_v30 = vrot.slane %v277_v28, 4 }
  0x27   : > { %v285_v31 = vrot.slane %v284_v29, 4 }
  0x28   : > { %v279_v32 = vadd.f32 %v278_v30, %v277_v28 }
  0x29   : > { %v286_v33 = vadd.f32 %v285_v31, %v284_v29 }
  0x2a   : > { %v280_v34 = vrot.slane %v279_v32, 2 }
  0x2b   : > { %v287_v35 = vrot.slane %v286_v33, 2 }
  0x2c   : > { %v281_v36 = vadd.f32 %v280_v34, %v279_v32 }
  0x2d   : > { %v288_v37 = vadd.f32 %v287_v35, %v286_v33 }
  0x2e   : > { %v282_v38 = vrot.slane %v281_v36, 1 }
  0x2f   : > { %v289_v39 = vrot.slane %v288_v37, 1 }
  0x30   : > { %v283_v40 = vadd.f32 %v282_v38, %v281_v36 }
  0x31   : > { %v290_v41 = vadd.f32 %v289_v39, %v288_v37 }
  0x32   : > { %v291_v42 = vmul.f32 0.0625, %v283_v40 }
  0x33   : > { %v292_v43 = vmul.f32 0.0625, %v290_v41 }
  0x34   : > { %v293_v44 = vadd.f32 1e-05, %v291_v42 }
  0x35   : > { %v294_v45 = vadd.f32 1e-05, %v292_v43 }
  0x36   : > { %499 = vrsqrt.f32 %v293_v44 }
  0x37   : > { %501 = vrsqrt.f32 %v294_v45 }
  0x43   : > { %v500_v53 = vpop.eup %499 }
  0x44   : > { %v502_v55 = vpop.eup %501  ;;  %v297_v56 = vmul.f32 %v500_v53, %v269_v20  ;;  %v299_v58 = vmul.f32 %v500_v53, %v271_v21 }
  0x45   : > { %v298_v59 = vmul.f32 %v502_v55, %v270_v22  ;;  %v300_v61 = vmul.f32 %v502_v55, %v272_v23 }
  0x46   : > { %v313_v62 = vmul.f32 %v306_v52, %v297_v56  ;;  %v315_v63 = vmul.f32 %v306_v52, %v299_v58 }
  0x47   : > { %v314_v0 = vmul.f32 %v310_v54, %v298_v59  ;;  %v316_v1 = vmul.f32 %v310_v54, %v300_v61 }
  0x48   : > { %v329_v2 = vadd.f32 %v322_v57, %v313_v62  ;;  %v331_v3 = vadd.f32 %v322_v57, %v315_v63 }
  0x49   : > { %v330_v4 = vadd.f32 %v326_v60, %v314_v0  ;;  %v332_v5 = vadd.f32 %v326_v60, %v316_v1 }
  0x4a   : > { %vm333_vm0 = vcmp.ge.f32.partialorder %v329_v2, 0.0  ;;  %v337_v6 = vmul.f32 0.2, %v329_v2  ;;  %vm335_vm1 = vcmp.ge.f32.partialorder %v331_v3, 0.0  ;;  %v339_v7 = vmul.f32 0.2, %v331_v3 }
  0x4b   : > { %vm334_vm2 = vcmp.ge.f32.partialorder %v330_v4, 0.0  ;;  %v338_v8 = vmul.f32 0.2, %v330_v4  ;;  %vm336_vm3 = vcmp.ge.f32.partialorder %v332_v5, 0.0  ;;  %v340_v9 = vmul.f32 0.2, %v332_v5 }
  0x4c   : > { %v341_v10 = vsel %vm333_vm0, %v329_v2, %v337_v6  ;;  %v343_v11 = vsel %vm335_vm1, %v331_v3, %v339_v7 }
  0x4d   : > { %345 = vst [vmem:[%s246_s26] sm:$0xff] %v341_v10  ;;  %v342_v12 = vsel %vm334_vm2, %v330_v4, %v338_v8  ;;  %347 = vst [vmem:[%s246_s26 + $0x10] sm:$0xff] %v343_v11  ;;  %v344_v13 = vsel %vm336_vm3, %v332_v5, %v340_v9 }
  0x4e   : > { %346 = vst [vmem:[%s246_s26 + $0x8] sm:$0xff] %v342_v12  ;;  %348 = vst [vmem:[%s246_s26 + $0x18] sm:$0xff] %v344_v13 }
  0x4f PF: > { %s13_s14 = sadd.s32 1, %s525_s14   ;;  %s597_s12 = smov %s521_s13 }
  0x50   : > { %p10_p5 = scmp.ge.s32.totalorder %s13_s14, 4   ;;  %s598_s13 = smov %s600_s15 }
  0x52   :  { %12 = sbr.rel (!%p10_p5) target bundleno = 2 (0x2), region = 68 }

// kernel: generator_forward.52
= control target key start
LH: loop header
LB: loop body
LE: loop exit
PB: predicated region body
PF: predicated region fallthrough
CT: control target
= control target key end

     0   :  { %s134_s0 = inlined_call_operand.vmem [shape: f32[32,256], index: 0, kind: input, shape index: {}]   ;;  %s135_s1 = inlined_call_operand.vmem [shape: f32[32,256], index: 1, kind: input, shape index: {}]   ;;  %s136_s2 = inlined_call_operand.vmem [shape: f32[32,256], index: 2, kind: output, shape index: {}]  }
   0x1   :  { %v11_v0 = vld [vmem:[%s134_s0] sm:$0xff]  ;;  %v12_v2 = vld [vmem:[%s134_s0 + $0x8] sm:$0xff]  ;;  %v13_v5 = vld [vmem:[%s134_s0 + $0x10] sm:$0xff] }
   0x2   :  { %v19_v1 = vld [vmem:[%s135_s1] sm:$0xff]  ;;  %v20_v4 = vld [vmem:[%s135_s1 + $0x8] sm:$0xff]  ;;  %v21_v6 = vld [vmem:[%s135_s1 + $0x10] sm:$0xff] }
   0x3   :  { %v27_v3 = vadd.f32 %v19_v1, %v11_v0  ;;  %v28_v7 = vadd.f32 %v20_v4, %v12_v2  ;;  %v29_v8 = vadd.f32 %v21_v6, %v13_v5  ;;  %v14_v9 = vld [vmem:[%s134_s0 + $0x18] sm:$0xff]  ;;  %v15_v11 = vld [vmem:[%s134_s0 + $0x20] sm:$0xff]  ;;  %v16_v14 = vld [vmem:[%s134_s0 + $0x28] sm:$0xff] }
   0x4   :  { %v22_v10 = vld [vmem:[%s135_s1 + $0x18] sm:$0xff]  ;;  %v23_v13 = vld [vmem:[%s135_s1 + $0x20] sm:$0xff]  ;;  %v24_v15 = vld [vmem:[%s135_s1 + $0x28] sm:$0xff] }
   0x5   :  { %35 = vst [vmem:[%s136_s2] sm:$0xff] %v27_v3  ;;  %v30_v12 = vadd.f32 %v22_v10, %v14_v9  ;;  %36 = vst [vmem:[%s136_s2 + $0x8] sm:$0xff] %v28_v7  ;;  %v31_v16 = vadd.f32 %v23_v13, %v15_v11  ;;  %v32_v17 = vadd.f32 %v24_v15, %v16_v14  ;;  %v17_v18 = vld [vmem:[%s134_s0 + $0x30] sm:$0xff]  ;;  %v18_v20 = vld [vmem:[%s134_s0 + $0x38] sm:$0xff] }
   0x6   :  { %37 = vst [vmem:[%s136_s2 + $0x10] sm:$0xff] %v29_v8  ;;  %v25_v19 = vld [vmem:[%s135_s1 + $0x30] sm:$0xff]  ;;  %v26_v22 = vld [vmem:[%s135_s1 + $0x38] sm:$0xff] }
   0x7   :  { %38 = vst [vmem:[%s136_s2 + $0x18] sm:$0xff] %v30_v12  ;;  %v33_v21 = vadd.f32 %v25_v19, %v17_v18  ;;  %39 = vst [vmem:[%s136_s2 + $0x20] sm:$0xff] %v31_v16  ;;  %v34_v23 = vadd.f32 %v26_v22, %v18_v20 }
   0x8   :  { %40 = vst [vmem:[%s136_s2 + $0x28] sm:$0xff] %v32_v17 }
   0x9   :  { %41 = vst [vmem:[%s136_s2 + $0x30] sm:$0xff] %v33_v21  ;;  %42 = vst [vmem:[%s136_s2 + $0x38] sm:$0xff] %v34_v23 }

// kernel: generator_forward.55
= control target key start
LH: loop header
LB: loop body
LE: loop exit
PB: predicated region body
PF: predicated region fallthrough
CT: control target
= control target key end

     0   :  { %v584_v48 = vlaneseq  ;;  %s1113_s1 = inlined_call_operand.vmem [shape: bf16[256,256], index: 1, kind: input, shape index: {}]   ;;  %s1114_s0 = inlined_call_operand.vmem [shape: bf16[128,256], index: 0, kind: input, shape index: {}]   ;;  %s1115_s2 = inlined_call_operand.vmem [shape: f32[1,256], index: 2, kind: input, shape index: {}]   ;;  %s1116_s3 = inlined_call_operand.vmem [shape: f32[128,256], index: 3, kind: output, shape index: {}]  }
   0x1   :  { %v742_v0 = vld [vmem:[%s1113_s1 + $0x74] ss:$8 sps:$4 sm:$0xff]   ;;  %v744_v1 = vld [vmem:[%s1113_s1 + $0x70] ss:$8 sps:$4 sm:$0xff]   ;;  %v745_v2 = vld [vmem:[%s1113_s1 + $0x64] ss:$8 sps:$4 sm:$0xff]  }
   0x2   :  { %370 = vmatprep.subr.bf16.mxu0 %v742_v0  ;;  %710 = vmatprep.subr.bf16.mxu1 %v742_v0  ;;  %v747_v3 = vld [vmem:[%s1113_s1 + $0x60] ss:$8 sps:$4 sm:$0xff]   ;;  %v748_v4 = vld [vmem:[%s1113_s1 + $0x54] ss:$8 sps:$4 sm:$0xff]   ;;  %v750_v5 = vld [vmem:[%s1113_s1 + $0x50] ss:$8 sps:$4 sm:$0xff]  }
   0x3   :  { %371 = vmatpush1.bf16.msra.mxu0 %v744_v1  ;;  %726 = vmatpush1.bf16.msra.mxu1 %v744_v1  ;;  %v751_v6 = vld [vmem:[%s1113_s1 + $0x44] ss:$8 sps:$4 sm:$0xff]   ;;  %v753_v7 = vld [vmem:[%s1113_s1 + $0x40] ss:$8 sps:$4 sm:$0xff]   ;;  %v754_v8 = vld [vmem:[%s1113_s1 + $0x34] ss:$8 sps:$4 sm:$0xff]  }
   0x4   :  { %372 = vmatprep.subr.bf16.mxu0 %v745_v2  ;;  %711 = vmatprep.subr.bf16.mxu1 %v745_v2  ;;  %v756_v9 = vld [vmem:[%s1113_s1 + $0x30] ss:$8 sps:$4 sm:$0xff]   ;;  %v757_v10 = vld [vmem:[%s1113_s1 + $0x24] ss:$8 sps:$4 sm:$0xff]   ;;  %v759_v11 = vld [vmem:[%s1113_s1 + $0x20] ss:$8 sps:$4 sm:$0xff]  }
   0x5   :  { %v760_v12 = vld [vmem:[%s1113_s1 + $0x14] ss:$8 sps:$4 sm:$0xff]   ;;  %v792_v13 = vld [vmem:[%s1114_s0 + $0x4] ss:$8 sps:$4 sm:$0xff]   ;;  %v762_v14 = vld [vmem:[%s1113_s1 + $0x10] ss:$8 sps:$4 sm:$0xff]  }
   0x6   :  { %v795_v15 = vld [vmem:[%s1114_s0 + $0x44] ss:$8 sps:$4 sm:$0xff]   ;;  %402 = vmatprep.mubr.bf16.mxu0 %v792_v13  ;;  %v765_v17 = vld [vmem:[%s1113_s1] ss:$8 sps:$4 sm:$0xff]   ;;  %v766_v18 = vld [vmem:[%s1113_s1 + $0xf4] ss:$8 sps:$4 sm:$0xff]  }
   0x7   :  { %373 = vmatpush1.bf16.msra.mxu0 %v747_v3  ;;  %727 = vmatpush1.bf16.msra.mxu1 %v747_v3  ;;  %v763_v16 = vld [vmem:[%s1113_s1 + $0x4] ss:$8 sps:$4 sm:$0xff]   ;;  %v768_v19 = vld [vmem:[%s1113_s1 + $0xf0] ss:$8 sps:$4 sm:$0xff]   ;;  %v771_v21 = vld [vmem:[%s1113_s1 + $0xe0] ss:$8 sps:$4 sm:$0xff]  }
   0x8   :  { %374 = vmatprep.subr.bf16.mxu0 %v748_v4  ;;  %712 = vmatprep.subr.bf16.mxu1 %v748_v4  ;;  %v769_v20 = vld [vmem:[%s1113_s1 + $0xe4] ss:$8 sps:$4 sm:$0xff]   ;;  %v772_v22 = vld [vmem:[%s1113_s1 + $0xd4] ss:$8 sps:$4 sm:$0xff]   ;;  %v774_v23 = vld [vmem:[%s1113_s1 + $0xd0] ss:$8 sps:$4 sm:$0xff]  }
   0x9   :  { %442 = vmatprep.mubr.bf16.mxu1 %v795_v15  ;;  %v775_v24 = vld [vmem:[%s1113_s1 + $0xc4] ss:$8 sps:$4 sm:$0xff]   ;;  %v777_v25 = vld [vmem:[%s1113_s1 + $0xc0] ss:$8 sps:$4 sm:$0xff]   ;;  %v778_v26 = vld [vmem:[%s1113_s1 + $0xb4] ss:$8 sps:$4 sm:$0xff]  }
   0xa   :  { %v780_v27 = vld [vmem:[%s1113_s1 + $0xb0] ss:$8 sps:$4 sm:$0xff]   ;;  %v781_v28 = vld [vmem:[%s1113_s1 + $0xa4] ss:$8 sps:$4 sm:$0xff]   ;;  %v783_v29 = vld [vmem:[%s1113_s1 + $0xa0] ss:$8 sps:$4 sm:$0xff]  }
   0xb   :  { %375 = vmatpush1.bf16.msra.mxu0 %v750_v5  ;;  %728 = vmatpush1.bf16.msra.mxu1 %v750_v5  ;;  %v784_v30 = vld [vmem:[%s1113_s1 + $0x94] ss:$8 sps:$4 sm:$0xff]   ;;  %v786_v31 = vld [vmem:[%s1113_s1 + $0x90] ss:$8 sps:$4 sm:$0xff]   ;;  %v787_v32 = vld [vmem:[%s1113_s1 + $0x84] ss:$8 sps:$4 sm:$0xff]  }
   0xc   :  { %376 = vmatprep.subr.bf16.mxu0 %v751_v6  ;;  %713 = vmatprep.subr.bf16.mxu1 %v751_v6  ;;  %v789_v33 = vld [vmem:[%s1113_s1 + $0x80] ss:$8 sps:$4 sm:$0xff]   ;;  %v796_v36 = vld [vmem:[%s1114_s0 + $0x14] ss:$8 sps:$4 sm:$0xff]   ;;  %v800_v38 = vld [vmem:[%s1114_s0 + $0x10] ss:$8 sps:$4 sm:$0xff]  }
   0xd   :  { %v790_v34 = vld [vmem:[%s1114_s0] ss:$8 sps:$4 sm:$0xff]   ;;  %v798_v37 = vld [vmem:[%s1114_s0 + $0x54] ss:$8 sps:$4 sm:$0xff]   ;;  %v801_v39 = vld [vmem:[%s1114_s0 + $0x50] ss:$8 sps:$4 sm:$0xff]  }
   0xe   :  { %v793_v35 = vld [vmem:[%s1114_s0 + $0x40] ss:$8 sps:$4 sm:$0xff]   ;;  %v802_v40 = vld [vmem:[%s1114_s0 + $0x24] ss:$8 sps:$4 sm:$0xff]   ;;  %v808_v44 = vld [vmem:[%s1114_s0 + $0x34] ss:$8 sps:$4 sm:$0xff]  }
   0xf   :  { %377 = vmatpush1.bf16.msra.mxu0 %v753_v7  ;;  %729 = vmatpush1.bf16.msra.mxu1 %v753_v7  ;;  %v804_v41 = vld [vmem:[%s1114_s0 + $0x64] ss:$8 sps:$4 sm:$0xff]   ;;  %v806_v42 = vld [vmem:[%s1114_s0 + $0x20] ss:$8 sps:$4 sm:$0xff]   ;;  %v810_v45 = vld [vmem:[%s1114_s0 + $0x74] ss:$8 sps:$4 sm:$0xff]  }
  0x10   :  { %378 = vmatprep.subr.bf16.mxu0 %v754_v8  ;;  %714 = vmatprep.subr.bf16.mxu1 %v754_v8  ;;  %v807_v43 = vld [vmem:[%s1114_s0 + $0x60] ss:$8 sps:$4 sm:$0xff]   ;;  %v812_v46 = vld [vmem:[%s1114_s0 + $0x30] ss:$8 sps:$4 sm:$0xff]   ;;  %v585_v49 = vshrl.u32 %v584_v48, 7 }
  0x11   :  { %v813_v47 = vld [vmem:[%s1114_s0 + $0x70] ss:$8 sps:$4 sm:$0xff]   ;;  %v582_v51 = vld [vmem:[%s1115_s2] sm:$0x3] }
  0x12   :  { %v586_v50 = vsub.s32 0, %v585_v49  ;;  %v590_v52 = vsub.s32 1, %v585_v49 }
  0x13   :  { %379 = vmatpush1.bf16.msra.mxu0 %v756_v9  ;;  %730 = vmatpush1.bf16.msra.mxu1 %v756_v9 }
  0x14   :  { %380 = vmatprep.subr.bf16.mxu0 %v757_v10  ;;  %715 = vmatprep.subr.bf16.mxu1 %v757_v10  ;;  %v981_v53 = vrot.slane %v582_v51, %v586_v50  ;;  %v983_v54 = vrot.slane %v582_v51, %v590_v52 }
  0x17   :  { %381 = vmatpush1.bf16.msra.mxu0 %v759_v11  ;;  %731 = vmatpush1.bf16.msra.mxu1 %v759_v11 }
  0x18   :  { %382 = vmatprep.subr.bf16.mxu0 %v760_v12  ;;  %716 = vmatprep.subr.bf16.mxu1 %v760_v12 }
  0x1b   :  { %383 = vmatpush1.bf16.msra.mxu0 %v762_v14  ;;  %732 = vmatpush1.bf16.msra.mxu1 %v762_v14 }
  0x1c   :  { %384 = vmatprep.subr.bf16.mxu0 %v763_v16  ;;  %717 = vmatprep.subr.bf16.mxu1 %v763_v16 }
  0x1f   :  { %385 = vmatpush1.bf16.msra.mxu0 %v765_v17  ;;  %733 = vmatpush1.bf16.msra.mxu1 %v765_v17 }
  0x20   :  { %386 = vmatprep.subr.bf16.mxu0 %v766_v18  ;;  %718 = vmatprep.subr.bf16.mxu1 %v766_v18 }
  0x23   :  { %387 = vmatpush2.bf16.msra.mxu0 %v768_v19  ;;  %734 = vmatpush2.bf16.msra.mxu1 %v768_v19 }
  0x24   :  { %388 = vmatprep.subr.bf16.mxu0 %v769_v20  ;;  %719 = vmatprep.subr.bf16.mxu1 %v769_v20 }
  0x27   :  { %389 = vmatpush2.bf16.msra.mxu0 %v771_v21  ;;  %735 = vmatpush2.bf16.msra.mxu1 %v771_v21 }
  0x28   :  { %390 = vmatprep.subr.bf16.mxu0 %v772_v22  ;;  %720 = vmatprep.subr.bf16.mxu1 %v772_v22 }
  0x2b   :  { %391 = vmatpush2.bf16.msra.mxu0 %v774_v23  ;;  %736 = vmatpush2.bf16.msra.mxu1 %v774_v23 }
  0x2c   :  { %392 = vmatprep.subr.bf16.mxu0 %v775_v24  ;;  %721 = vmatprep.subr.bf16.mxu1 %v775_v24 }
  0x2f   :  { %393 = vmatpush2.bf16.msra.mxu0 %v777_v25  ;;  %737 = vmatpush2.bf16.msra.mxu1 %v777_v25 }
  0x30   :  { %394 = vmatprep.subr.bf16.mxu0 %v778_v26  ;;  %722 = vmatprep.subr.bf16.mxu1 %v778_v26 }
  0x33   :  { %395 = vmatpush2.bf16.msra.mxu0 %v780_v27  ;;  %738 = vmatpush2.bf16.msra.mxu1 %v780_v27 }
  0x34   :  { %396 = vmatprep.subr.bf16.mxu0 %v781_v28  ;;  %723 = vmatprep.subr.bf16.mxu1 %v781_v28 }
  0x37   :  { %397 = vmatpush2.bf16.msra.mxu0 %v783_v29  ;;  %739 = vmatpush2.bf16.msra.mxu1 %v783_v29 }
  0x38   :  { %398 = vmatprep.subr.bf16.mxu0 %v784_v30  ;;  %724 = vmatprep.subr.bf16.mxu1 %v784_v30 }
  0x3b   :  { %399 = vmatpush2.bf16.msra.mxu0 %v786_v31  ;;  %740 = vmatpush2.bf16.msra.mxu1 %v786_v31 }
  0x3c   :  { %400 = vmatprep.subr.bf16.mxu0 %v787_v32  ;;  %725 = vmatprep.subr.bf16.mxu1 %v787_v32 }
  0x3f   :  { %401 = vmatpush2.bf16.msra.mxu0 %v789_v33  ;;  %741 = vmatpush2.bf16.msra.mxu1 %v789_v33 }
  0x42   :  { %403 = vmatmul.mubr.bf16.vlgmr.msra.gmra.mxu0 %v790_v34  ;;  %443 = vmatmul.mubr.bf16.vlgmr.msra.gmra.mxu1 %v793_v35 }
  0x43   :  { %412 = vmatprep.mubr.bf16.mxu0 %v796_v36  ;;  %452 = vmatprep.mubr.bf16.mxu1 %v798_v37 }
  0x4a   :  { %413 = vmatmul.mubr.bf16.gmra.mxu0 %v800_v38  ;;  %453 = vmatmul.mubr.bf16.gmra.mxu1 %v801_v39 }
  0x4b   :  { %422 = vmatprep.mubr.bf16.mxu0 %v802_v40  ;;  %462 = vmatprep.mubr.bf16.mxu1 %v804_v41 }
  0x52   :  { %423 = vmatmul.mubr.bf16.gmra.mxu0 %v806_v42  ;;  %463 = vmatmul.mubr.bf16.gmra.mxu1 %v807_v43 }
  0x53   :  { %432 = vmatprep.mubr.bf16.mxu0 %v808_v44  ;;  %472 = vmatprep.mubr.bf16.mxu1 %v810_v45 }
  0x5a   :  { %433 = vmatmul.mubr.bf16.gmra.mxu0 %v812_v46  ;;  %473 = vmatmul.mubr.bf16.gmra.mxu1 %v813_v47 }
 0x102   :  { %v404_v55 = vpop.f32.mrf.mxu0  ;;  %v444_v56 = vpop.f32.mrf.mxu1 }
 0x103   :  { %v594_v57 = vadd.f32 %v981_v53, %v404_v55  ;;  %v610_v58 = vadd.f32 %v981_v53, %v444_v56 }
 0x104   :  { %v406_v59 = vpop.f32.mrf.mxu0  ;;  %v446_v60 = vpop.f32.mrf.mxu1 }
 0x105   :  { %626 = vst [vmem:[%s1116_s3] sm:$0xff] %v594_v57  ;;  %642 = vst [vmem:[%s1116_s3 + $0x80] sm:$0xff] %v610_v58  ;;  %v595_v61 = vadd.f32 %v983_v54, %v406_v59  ;;  %v611_v62 = vadd.f32 %v983_v54, %v446_v60 }
 0x106   :  { %v408_v63 = vpop.f32.mrf.mxu0  ;;  %v448_v0 = vpop.f32.mrf.mxu1 }
 0x107   :  { %627 = vst [vmem:[%s1116_s3 + $0x8] sm:$0xff] %v595_v61  ;;  %643 = vst [vmem:[%s1116_s3 + $0x88] sm:$0xff] %v611_v62  ;;  %v596_v1 = vadd.f32 %v981_v53, %v408_v63  ;;  %v612_v2 = vadd.f32 %v981_v53, %v448_v0 }
 0x108   :  { %v410_v3 = vpop.f32.mrf.mxu0  ;;  %v450_v4 = vpop.f32.mrf.mxu1 }
 0x109   :  { %628 = vst [vmem:[%s1116_s3 + $0x10] sm:$0xff] %v596_v1  ;;  %644 = vst [vmem:[%s1116_s3 + $0x90] sm:$0xff] %v612_v2  ;;  %v597_v5 = vadd.f32 %v983_v54, %v410_v3  ;;  %v613_v6 = vadd.f32 %v983_v54, %v450_v4 }
 0x10a   :  { %v414_v7 = vpop.f32.mrf.mxu0  ;;  %v454_v8 = vpop.f32.mrf.mxu1 }
 0x10b   :  { %629 = vst [vmem:[%s1116_s3 + $0x18] sm:$0xff] %v597_v5  ;;  %645 = vst [vmem:[%s1116_s3 + $0x98] sm:$0xff] %v613_v6  ;;  %v598_v9 = vadd.f32 %v981_v53, %v414_v7  ;;  %v614_v10 = vadd.f32 %v981_v53, %v454_v8 }
 0x10c   :  { %v416_v11 = vpop.f32.mrf.mxu0  ;;  %v456_v12 = vpop.f32.mrf.mxu1 }
 0x10d   :  { %630 = vst [vmem:[%s1116_s3 + $0x20] sm:$0xff] %v598_v9  ;;  %646 = vst [vmem:[%s1116_s3 + $0xa0] sm:$0xff] %v614_v10  ;;  %v599_v13 = vadd.f32 %v983_v54, %v416_v11  ;;  %v615_v14 = vadd.f32 %v983_v54, %v456_v12 }
 0x10e   :  { %v418_v15 = vpop.f32.mrf.mxu0  ;;  %v458_v16 = vpop.f32.mrf.mxu1 }
 0x10f   :  { %631 = vst [vmem:[%s1116_s3 + $0x28] sm:$0xff] %v599_v13  ;;  %647 = vst [vmem:[%s1116_s3 + $0xa8] sm:$0xff] %v615_v14  ;;  %v600_v17 = vadd.f32 %v981_v53, %v418_v15  ;;  %v616_v18 = vadd.f32 %v981_v53, %v458_v16 }
 0x110   :  { %v420_v19 = vpop.f32.mrf.mxu0  ;;  %v460_v20 = vpop.f32.mrf.mxu1 }
 0x111   :  { %632 = vst [vmem:[%s1116_s3 + $0x30] sm:$0xff] %v600_v17  ;;  %648 = vst [vmem:[%s1116_s3 + $0xb0] sm:$0xff] %v616_v18  ;;  %v601_v21 = vadd.f32 %v983_v54, %v420_v19  ;;  %v617_v22 = vadd.f32 %v983_v54, %v460_v20 }
 0x112   :  { %v424_v23 = vpop.f32.mrf.mxu0  ;;  %v464_v24 = vpop.f32.mrf.mxu1 }
 0x113   :  { %633 = vst [vmem:[%s1116_s3 + $0x38] sm:$0xff] %v601_v21  ;;  %649 = vst [vmem:[%s1116_s3 + $0xb8] sm:$0xff] %v617_v22  ;;  %v602_v25 = vadd.f32 %v981_v53, %v424_v23  ;;  %v618_v26 = vadd.f32 %v981_v53, %v464_v24 }
 0x114   :  { %v426_v27 = vpop.f32.mrf.mxu0  ;;  %v466_v28 = vpop.f32.mrf.mxu1 }
 0x115   :  { %634 = vst [vmem:[%s1116_s3 + $0x40] sm:$0xff] %v602_v25  ;;  %650 = vst [vmem:[%s1116_s3 + $0xc0] sm:$0xff] %v618_v26  ;;  %v603_v29 = vadd.f32 %v983_v54, %v426_v27  ;;  %v619_v30 = vadd.f32 %v983_v54, %v466_v28 }
 0x116   :  { %v428_v31 = vpop.f32.mrf.mxu0  ;;  %v468_v32 = vpop.f32.mrf.mxu1 }
 0x117   :  { %635 = vst [vmem:[%s1116_s3 + $0x48] sm:$0xff] %v603_v29  ;;  %651 = vst [vmem:[%s1116_s3 + $0xc8] sm:$0xff] %v619_v30  ;;  %v604_v33 = vadd.f32 %v981_v53, %v428_v31  ;;  %v620_v34 = vadd.f32 %v981_v53, %v468_v32 }
 0x118   :  { %v430_v35 = vpop.f32.mrf.mxu0  ;;  %v470_v36 = vpop.f32.mrf.mxu1 }
 0x119   :  { %636 = vst [vmem:[%s1116_s3 + $0x50] sm:$0xff] %v604_v33  ;;  %652 = vst [vmem:[%s1116_s3 + $0xd0] sm:$0xff] %v620_v34  ;;  %v605_v37 = vadd.f32 %v983_v54, %v430_v35  ;;  %v621_v38 = vadd.f32 %v983_v54, %v470_v36 }
 0x11a   :  { %v434_v39 = vpop.f32.mrf.mxu0  ;;  %v474_v40 = vpop.f32.mrf.mxu1 }
 0x11b   :  { %637 = vst [vmem:[%s1116_s3 + $0x58] sm:$0xff] %v605_v37  ;;  %653 = vst [vmem:[%s1116_s3 + $0xd8] sm:$0xff] %v621_v38  ;;  %v606_v41 = vadd.f32 %v981_v53, %v434_v39  ;;  %v622_v42 = vadd.f32 %v981_v53, %v474_v40 }
 0x11c   :  { %v436_v43 = vpop.f32.mrf.mxu0  ;;  %v476_v44 = vpop.f32.mrf.mxu1 }
 0x11d   :  { %638 = vst [vmem:[%s1116_s3 + $0x60] sm:$0xff] %v606_v41  ;;  %654 = vst [vmem:[%s1116_s3 + $0xe0] sm:$0xff] %v622_v42  ;;  %v607_v45 = vadd.f32 %v983_v54, %v436_v43  ;;  %v623_v46 = vadd.f32 %v983_v54, %v476_v44 }
 0x11e   :  { %v438_v47 = vpop.f32.mrf.mxu0  ;;  %v478_v48 = vpop.f32.mrf.mxu1 }
 0x11f   :  { %639 = vst [vmem:[%s1116_s3 + $0x68] sm:$0xff] %v607_v45  ;;  %655 = vst [vmem:[%s1116_s3 + $0xe8] sm:$0xff] %v623_v46  ;;  %v608_v49 = vadd.f32 %v981_v53, %v438_v47  ;;  %v624_v50 = vadd.f32 %v981_v53, %v478_v48 }
 0x120   :  { %v440_v51 = vpop.f32.mrf.mxu0  ;;  %v480_v52 = vpop.f32.mrf.mxu1 }
 0x121   :  { %640 = vst [vmem:[%s1116_s3 + $0x70] sm:$0xff] %v608_v49  ;;  %656 = vst [vmem:[%s1116_s3 + $0xf0] sm:$0xff] %v624_v50  ;;  %v609_v55 = vadd.f32 %v983_v54, %v440_v51  ;;  %v625_v56 = vadd.f32 %v983_v54, %v480_v52 }
 0x123   :  { %641 = vst [vmem:[%s1116_s3 + $0x78] sm:$0xff] %v609_v55  ;;  %657 = vst [vmem:[%s1116_s3 + $0xf8] sm:$0xff] %v625_v56 }

// kernel: generator_forward.56
= control target key start
LH: loop header
LB: loop body
LE: loop exit
PB: predicated region body
PF: predicated region fallthrough
CT: control target
= control target key end

     0   :  { %s845_s20 = smov 0   ;;  %s847_s21 = smov 0   ;;  %s905_s0 = inlined_call_operand.<no memory space> [shape: f32[1], index: 0, kind: input, shape index: {}]   ;;  %s906_s1 = inlined_call_operand.vmem [shape: bf16[2,16,32], index: 1, kind: input, shape index: {}]   ;;  %s907_s2 = inlined_call_operand.vmem [shape: bf16[2,16,32], index: 2, kind: input, shape index: {}]   ;;  %s908_s3 = inlined_call_operand.vmem [shape: bf16[2,16,256], index: 3, kind: input, shape index: {}]   ;;  %s909_s4 = inlined_call_operand.vmem [shape: f32[2,16,256], index: 4, kind: input, shape index: {}]   ;;  %s910_s5 = inlined_call_operand.vmem [shape: f32[2,16,256], index: 5, kind: output, shape index: {}]  }
   0x1   :  { %10 = sst [smem:[#allocation5]] %s905_s0  ;;  %s849_s22 = smov 0  }
   0x2 LB: > { %s28_s0 = sadd.s32 1, %s802_s21  ;;  %p705_p0 = scmp.ge.s32.totalorder %s806_s22, 1  ;;  %s806_s22 = sphi %s849_s22, %s16_s22   ;;  %s802_s21 = sphi %s847_s21, %s912_s21   ;;  %s798_s20 = sphi %s845_s20, %s911_s20  }
   0x3   : > { %p30_p1 = scmp.ge.s32.totalorder %s28_s0, 2  ;;  %p245_p2 = scmp.lt.s32.totalorder %s806_s22, 3 }
   0x5   : > { %s914_s0 = smov (%p30_p1, %s28_s0), 0  ;;  %p246_p3 = pnand %p705_p0, %p245_p2 }
   0x6   : > { %p297_p4 = scmp.lt.s32.totalorder (!%p246_p3), %s798_s20, 1  ;;  %s551_s9 = sld [smem:[#allocation5]] (!%p246_p3) }
   0x7   : > { %249 = sbr.rel (%p246_p3) target bundleno = 798 (0x31e), region = 40 }
   0xc   : > { %vm338_vm0 = vcmask 7168   ;;  %v808_v0 = vmov 0.0   ;;  %vm809_vm1 = vmmov 0   ;;  %s916_s20 = smov (!%p297_p4, %s798_s20), 1  ;;  %vm363_vm2 = vcmask 261120  }
   0xd   : > { %341 = vst.msk [vmem:[#allocation3] sm:$0xff] %vm338_vm0, %v808_v0  ;;  %342 = vst.msk [vmem:[#allocation3 + $0x8] sm:$0xff] %vm338_vm0, %v808_v0  ;;  %731 = vmatprep.subr.bf16.mxu0 %v808_v0  ;;  %733 = vmatprep.mubr.msk.bf16.mxu0 %vm809_vm1, %v808_v0  ;;  %s724_s23 = sshll.u32 %s916_s20, 3  ;;  %v810_v4 = vmov -inf   ;;  %vm413_vm3 = vcmask 130048   ;;  %v811_v11 = vmov 0   ;;  %v570_v58 = vstv %s551_s9 }
   0xe   : > { %s301_s26 = scalar_lea.vmem %s906_s1, %s724_s23  ;;  %s310_s29 = scalar_lea.vmem %s907_s2, %s724_s23  ;;  %339 = vst.msk [vmem:[#allocation2] sm:$0xff] %vm338_vm0, %v810_v4  ;;  %340 = vst.msk [vmem:[#allocation2 + $0x8] sm:$0xff] %vm338_vm0, %v810_v4  ;;  %765 = vset.pattern.permute.xlu1 %v811_v11  ;;  %523 = vmatprep.mubr.bf16.mxu1 %v811_v11 }
   0xf   : > { %v767_v1 = vld [vmem:[%s310_s29] sm:$0xff]   ;;  %766 = vset.pattern.permute.xlu0 %v811_v11  ;;  %s726_s30 = sshll.u32 %s916_s20, 4  ;;  %s727_s10 = sshll.u32 %s916_s20, 5 }
  0x10   : > { %v368_v2 = vsel %vm363_vm2, %v767_v1, 0  ;;  %v768_v3 = vld [vmem:[%s301_s26] sm:$0xff]   ;;  %s321_s8 = scalar_lea.vmem %s908_s3, %s726_s30  ;;  %s327_s13 = scalar_lea.vmem %s909_s4, %s727_s10 }
  0x11   : > { %732 = vmatpush3.bf16.xpose.msra.mxu0 %v368_v2  ;;  %v769_v20 = vld [vmem:[%s321_s8 + $0x4] ss:$8 sps:$4 sm:$0xff]   ;;  %v771_v21 = vld [vmem:[%s321_s8] ss:$8 sps:$4 sm:$0xff]   ;;  %s332_s16 = scalar_lea.vmem %s910_s5, %s727_s10  ;;  %v578_v11 = vld [vmem:[%s327_s13 + $0x18] sm:$0xff] }
  0x12   : > { %505 = vmatprep.subr.bf16.mxu1 %v769_v20  ;;  %v575_v63 = vld [vmem:[%s327_s13] sm:$0xff]  ;;  %v576_v0 = vld [vmem:[%s327_s13 + $0x8] sm:$0xff] }
  0x13   : > { %506 = vmatpush1.bf16.msra.mxu1 %v771_v21 }
  0x14   : > { %v444_v37 = vld [vmem:[#allocation3] sm:$0xff]  ;;  %v445_v40 = vld [vmem:[#allocation3 + $0x8] sm:$0xff] }
  0x15   : > { %v411_v12 = vld [vmem:[#allocation2] sm:$0xff]  ;;  %v412_v15 = vld [vmem:[#allocation2 + $0x8] sm:$0xff] }
  0x18   : > { %734 = vmatmul.mubr.msk.bf16.vlgmr.msra.gmra.mxu0 %vm363_vm2, %v768_v3 }
  0xd8   : > { %v404_v5 = vpop.f32.mrf.mxu0 }
  0xd9   : > { %v414_v6 = vsel %vm413_vm3, %v404_v5, -inf }
  0xda   : > { %415 = vmax.xlane.f32.xlu0 %v414_v6  ;;  %v735_v7 = vpop.f32.mrf.mxu0 }
  0xdc   : > { %v407_v8 = vpop.f32.mrf.mxu0 }
  0xdd   : > { %v417_v9 = vsel %vm413_vm3, %v407_v8, -inf }
  0xde   : > { %418 = vmax.xlane.f32.xlu0 %v417_v9  ;;  %v736_v10 = vpop.f32.mrf.mxu0 }
  0xdf   : > { %v577_v10 = vld [vmem:[%s327_s13 + $0x10] sm:$0xff] }
 0x163   : > { %v416_v13 = vpop.xlane.xlu0 %415 }
 0x164   : > { %v420_v14 = vmax.f32 %v411_v12, %v416_v13 }
 0x166   : > { %v422_v16 = vsub.f32 %v411_v12, %v420_v14  ;;  %542 = vst.msk [vmem:[#allocation2] sm:$0xff] %vm338_vm0, %v420_v14  ;;  %430 = vperm.xlu1 %765, %v420_v14  }
 0x167   : > { %v419_v17 = vpop.xlane.xlu0 %418 }
 0x168   : > { %v421_v18 = vmax.f32 %v412_v15, %v419_v17  ;;  %v424_v34 = vmul.f32 1.442695, %v422_v16 }
 0x16a   : > { %v423_v19 = vsub.f32 %v412_v15, %v421_v18  ;;  %543 = vst.msk [vmem:[#allocation2 + $0x8] sm:$0xff] %vm338_vm0, %v421_v18  ;;  %435 = vperm.xlu1 %765, %v421_v18  }
 0x16c   : > { %v426_v31 = vmul.f32 1.442695, %v423_v19 }
 0x1e1   : > { %v431_v22 = vpop.permute.xlu1 %430 }
 0x1e2   : > { %v438_v23 = vsub.f32 %v404_v5, %v431_v22 }
 0x1e4   : > { %v440_v24 = vmul.f32 1.442695, %v438_v23 }
 0x1e5   : > { %v436_v25 = vpop.permute.xlu1 %435 }
 0x1e6   : > { %772 = vpow2.f32 %v440_v24  ;;  %v439_v26 = vsub.f32 %v407_v8, %v436_v25 }
 0x1e8   : > { %v442_v27 = vmul.f32 1.442695, %v439_v26 }
 0x1ea   : > { %774 = vpow2.f32 %v442_v27 }
 0x1eb   : > { %776 = vpow2.f32 %v426_v31 }
 0x1ec   : > { %778 = vpow2.f32 %v424_v34 }
 0x1f3   : > { %v773_v28 = vpop.eup %772 }
 0x1f4   : > { %v448_v29 = vsel %vm413_vm3, %v773_v28, 0.0 }
 0x1f5   : > { %449 = vadd.xlane.f32.xlu0 %v448_v29 }
 0x1f7   : > { %v775_v30 = vpop.eup %774 }
 0x1f8   : > { %v451_v32 = vsel %vm413_vm3, %v775_v30, 0.0  ;;  %v477_v33 = vpack.c.bf16 %v775_v30, %v773_v28  ;;  %v777_v35 = vpop.eup %776 }
 0x1f9   : > { %452 = vadd.xlane.f32.xlu1 %v451_v32  ;;  %v779_v36 = vpop.eup %778  ;;  %v447_v42 = vmul.f32 %v777_v35, %v445_v40 }
 0x1fa   : > { %721 = vmatmul.mubr.msk.bf16.vlgmr.msra.gmra.mxu1 %vm413_vm3, %v477_v33  ;;  %v446_v38 = vmul.f32 %v779_v36, %v444_v37 }
 0x20a   : > { %470 = vperm.xlu1 %765, %v777_v35  }
 0x20b   : > { %465 = vperm.xlu0 %766, %v779_v36  }
 0x27e   : > { %v450_v39 = vpop.xlane.xlu0 %449 }
 0x27f   : > { %v454_v41 = vadd.f32 %v450_v39, %v446_v38 }
 0x281   : > { %457 = vst.msk [vmem:[#allocation3] sm:$0xff] %vm338_vm0, %v454_v41 }
 0x282   : > { %v453_v43 = vpop.xlane.xlu1 %452 }
 0x283   : > { %v455_v44 = vadd.f32 %v453_v43, %v447_v42 }
 0x285   : > { %458 = vst.msk [vmem:[#allocation3 + $0x8] sm:$0xff] %vm338_vm0, %v455_v44 }
 0x286   : > { %v466_v51 = vpop.permute.xlu0 %465  ;;  %v471_v54 = vpop.permute.xlu1 %470 }
 0x287   : > { %v473_v53 = vmul.f32 0.0, %v466_v51  ;;  %v475_v60 = vmul.f32 0.0, %v471_v54 }
 0x288   : > { %v547_v45 = vld [vmem:[#allocation3] sm:$0xff] }
 0x289   : > { %780 = vrcp.f32 %v547_v45 }
 0x28c   : > { %v548_v46 = vld [vmem:[#allocation3 + $0x8] sm:$0xff] }
 0x28d   : > { %782 = vrcp.f32 %v548_v46 }
 0x296   : > { %v781_v47 = vpop.eup %780 }
 0x297   : > { %558 = vperm.xlu0 %766, %v781_v47  }
 0x29a   : > { %v783_v48 = vpop.eup %782 }
 0x29b   : > { %563 = vperm.xlu0 %766, %v783_v48  }
 0x2ba   : > { %v525_v49 = vpop.f32.mrf.mxu1 }
 0x2bb   : > { %v534_v55 = vadd.f32 %v525_v49, %v473_v53 }
 0x2bc   : > { %v527_v50 = vpop.f32.mrf.mxu1 }
 0x2bd   : > { %v535_v56 = vadd.f32 %v527_v50, %v473_v53 }
 0x2be   : > { %v529_v52 = vpop.f32.mrf.mxu1 }
 0x2bf   : > { %v536_v1 = vadd.f32 %v529_v52, %v475_v60 }
 0x2c0   : > { %v531_v57 = vpop.f32.mrf.mxu1 }
 0x2c1   : > { %v537_v2 = vadd.f32 %v531_v57, %v475_v60 }
 0x312   : > { %v559_v59 = vpop.permute.xlu0 %558 }
 0x313   : > { %v566_v61 = vmul.f32 %v559_v59, %v534_v55  ;;  %v567_v62 = vmul.f32 %v559_v59, %v535_v56 }
 0x315   : > { %v571_v3 = vmul.f32 %v570_v58, %v566_v61  ;;  %v572_v4 = vmul.f32 %v570_v58, %v567_v62 }
 0x316   : > { %v564_v5 = vpop.permute.xlu0 %563 }
 0x317   : > { %v579_v6 = vadd.f32 %v575_v63, %v571_v3  ;;  %v580_v7 = vadd.f32 %v576_v0, %v572_v4  ;;  %v568_v8 = vmul.f32 %v564_v5, %v536_v1  ;;  %v569_v9 = vmul.f32 %v564_v5, %v537_v2 }
 0x319   : > { %583 = vst [vmem:[%s332_s16] sm:$0xff] %v579_v6  ;;  %584 = vst [vmem:[%s332_s16 + $0x8] sm:$0xff] %v580_v7  ;;  %v573_v12 = vmul.f32 %v570_v58, %v568_v8  ;;  %v574_v13 = vmul.f32 %v570_v58, %v569_v9 }
 0x31b   : > { %v581_v14 = vadd.f32 %v577_v10, %v573_v12  ;;  %v582_v15 = vadd.f32 %v578_v11, %v574_v13 }
 0x31d   : > { %585 = vst [vmem:[%s332_s16 + $0x10] sm:$0xff] %v581_v14  ;;  %586 = vst [vmem:[%s332_s16 + $0x18] sm:$0xff] %v582_v15 }
 0x31e PF: > { %s16_s22 = sadd.s32 1, %s806_s22   ;;  %s911_s20 = smov %s802_s21 }
 0x31f   : > { %p13_p5 = scmp.ge.s32.totalorder %s16_s22, 4   ;;  %s912_s21 = smov %s914_s0 }
 0x321   :  { %15 = sbr.rel (!%p13_p5) target bundleno = 2 (0x2), region = 87 }

// kernel: generator_forward.53
= control target key start
LH: loop header
LB: loop body
LE: loop exit
PB: predicated region body
PF: predicated region fallthrough
CT: control target
= control target key end

     0   :  { %s804_s1 = inlined_call_operand.vmem [shape: bf16[256,128], index: 1, kind: input, shape index: {}]   ;;  %s805_s0 = inlined_call_operand.vmem [shape: bf16[128,256], index: 0, kind: input, shape index: {}]   ;;  %s806_s2 = inlined_call_operand.vmem [shape: f32[1,128], index: 2, kind: input, shape index: {}]   ;;  %s807_s3 = inlined_call_operand.vmem [shape: f32[128,128], index: 3, kind: output, shape index: {}]  }
   0x1   :  { %v579_v0 = vld [vmem:[%s804_s1 + $0x78] sm:$0xff]   ;;  %v581_v2 = vld [vmem:[%s804_s1 + $0x70] sm:$0xff]   ;;  %v583_v4 = vld [vmem:[%s804_s1 + $0x68] sm:$0xff]  }
   0x2   :  { %v580_v1 = vld [vmem:[%s804_s1 + $0x38] sm:$0xff]   ;;  %499 = vmatprep.subr.bf16.mxu0 %v579_v0  ;;  %563 = vmatprep.subr.bf16.mxu1 %v579_v0  ;;  %v582_v3 = vld [vmem:[%s804_s1 + $0x30] sm:$0xff]   ;;  %v584_v5 = vld [vmem:[%s804_s1 + $0x28] sm:$0xff]  }
   0x3   :  { %500 = vmatpush3.bf16.msra.mxu0 %v580_v1  ;;  %571 = vmatpush3.bf16.msra.mxu1 %v580_v1  ;;  %v585_v6 = vld [vmem:[%s804_s1 + $0x60] sm:$0xff]   ;;  %v587_v8 = vld [vmem:[%s804_s1 + $0x58] sm:$0xff]   ;;  %v589_v10 = vld [vmem:[%s804_s1 + $0x50] sm:$0xff]  }
   0x4   :  { %501 = vmatprep.subr.bf16.mxu0 %v581_v2  ;;  %564 = vmatprep.subr.bf16.mxu1 %v581_v2  ;;  %v586_v7 = vld [vmem:[%s804_s1 + $0x20] sm:$0xff]   ;;  %v588_v9 = vld [vmem:[%s804_s1 + $0x18] sm:$0xff]   ;;  %v590_v13 = vld [vmem:[%s804_s1 + $0x10] sm:$0xff]  }
   0x5   :  { %v597_v11 = vld [vmem:[%s805_s0 + $0x4] ss:$8 sps:$4 sm:$0xff]   ;;  %v595_v18 = vld [vmem:[%s805_s0] ss:$8 sps:$4 sm:$0xff]   ;;  %v601_v20 = vld [vmem:[%s805_s0 + $0x14] ss:$8 sps:$4 sm:$0xff]  }
   0x6   :  { %v600_v12 = vld [vmem:[%s805_s0 + $0x44] ss:$8 sps:$4 sm:$0xff]   ;;  %307 = vmatprep.mubr.bf16.mxu0 %v597_v11  ;;  %v598_v19 = vld [vmem:[%s805_s0 + $0x40] ss:$8 sps:$4 sm:$0xff]   ;;  %v603_v21 = vld [vmem:[%s805_s0 + $0x54] ss:$8 sps:$4 sm:$0xff]  }
   0x7   :  { %502 = vmatpush3.bf16.msra.mxu0 %v582_v3  ;;  %572 = vmatpush3.bf16.msra.mxu1 %v582_v3  ;;  %v591_v14 = vld [vmem:[%s804_s1 + $0x48] sm:$0xff]   ;;  %v593_v16 = vld [vmem:[%s804_s1 + $0x40] sm:$0xff]   ;;  %v605_v22 = vld [vmem:[%s805_s0 + $0x10] ss:$8 sps:$4 sm:$0xff]  }
   0x8   :  { %503 = vmatprep.subr.bf16.mxu0 %v583_v4  ;;  %565 = vmatprep.subr.bf16.mxu1 %v583_v4  ;;  %v592_v15 = vld [vmem:[%s804_s1 + $0x8] sm:$0xff]   ;;  %v594_v17 = vld [vmem:[%s804_s1] sm:$0xff]   ;;  %v606_v23 = vld [vmem:[%s805_s0 + $0x50] ss:$8 sps:$4 sm:$0xff]  }
   0x9   :  { %339 = vmatprep.mubr.bf16.mxu1 %v600_v12  ;;  %v607_v24 = vld [vmem:[%s805_s0 + $0x24] ss:$8 sps:$4 sm:$0xff]   ;;  %v611_v26 = vld [vmem:[%s805_s0 + $0x20] ss:$8 sps:$4 sm:$0xff]   ;;  %v613_v28 = vld [vmem:[%s805_s0 + $0x34] ss:$8 sps:$4 sm:$0xff]  }
   0xa   :  { %v609_v25 = vld [vmem:[%s805_s0 + $0x64] ss:$8 sps:$4 sm:$0xff]   ;;  %v612_v27 = vld [vmem:[%s805_s0 + $0x60] ss:$8 sps:$4 sm:$0xff]   ;;  %v615_v29 = vld [vmem:[%s805_s0 + $0x74] ss:$8 sps:$4 sm:$0xff]  }
   0xb   :  { %504 = vmatpush3.bf16.msra.mxu0 %v584_v5  ;;  %573 = vmatpush3.bf16.msra.mxu1 %v584_v5  ;;  %v617_v30 = vld [vmem:[%s805_s0 + $0x30] ss:$8 sps:$4 sm:$0xff]   ;;  %v738_v35 = vld [vmem:[%s806_s2] ss:$0 sm:$0xff] }
   0xc   :  { %505 = vmatprep.subr.bf16.mxu0 %v585_v6  ;;  %566 = vmatprep.subr.bf16.mxu1 %v585_v6  ;;  %v618_v31 = vld [vmem:[%s805_s0 + $0x70] ss:$8 sps:$4 sm:$0xff]  }
   0xf   :  { %506 = vmatpush3.bf16.msra.mxu0 %v586_v7  ;;  %574 = vmatpush3.bf16.msra.mxu1 %v586_v7 }
  0x10   :  { %507 = vmatprep.subr.bf16.mxu0 %v587_v8  ;;  %567 = vmatprep.subr.bf16.mxu1 %v587_v8 }
  0x13   :  { %508 = vmatpush3.bf16.msra.mxu0 %v588_v9  ;;  %575 = vmatpush3.bf16.msra.mxu1 %v588_v9 }
  0x14   :  { %509 = vmatprep.subr.bf16.mxu0 %v589_v10  ;;  %568 = vmatprep.subr.bf16.mxu1 %v589_v10 }
  0x17   :  { %510 = vmatpush3.bf16.msra.mxu0 %v590_v13  ;;  %576 = vmatpush3.bf16.msra.mxu1 %v590_v13 }
  0x18   :  { %511 = vmatprep.subr.bf16.mxu0 %v591_v14  ;;  %569 = vmatprep.subr.bf16.mxu1 %v591_v14 }
  0x1b   :  { %512 = vmatpush3.bf16.msra.mxu0 %v592_v15  ;;  %577 = vmatpush3.bf16.msra.mxu1 %v592_v15 }
  0x1c   :  { %513 = vmatprep.subr.bf16.mxu0 %v593_v16  ;;  %570 = vmatprep.subr.bf16.mxu1 %v593_v16 }
  0x1f   :  { %514 = vmatpush3.bf16.msra.mxu0 %v594_v17  ;;  %578 = vmatpush3.bf16.msra.mxu1 %v594_v17 }
  0x22   :  { %308 = vmatmul.mubr.bf16.vlgmr.msra.gmra.mxu0 %v595_v18  ;;  %340 = vmatmul.mubr.bf16.vlgmr.msra.gmra.mxu1 %v598_v19 }
  0x23   :  { %315 = vmatprep.mubr.bf16.mxu0 %v601_v20  ;;  %347 = vmatprep.mubr.bf16.mxu1 %v603_v21 }
  0x2a   :  { %316 = vmatmul.mubr.bf16.gmra.mxu0 %v605_v22  ;;  %348 = vmatmul.mubr.bf16.gmra.mxu1 %v606_v23 }
  0x2b   :  { %323 = vmatprep.mubr.bf16.mxu0 %v607_v24  ;;  %355 = vmatprep.mubr.bf16.mxu1 %v609_v25 }
  0x32   :  { %324 = vmatmul.mubr.bf16.gmra.mxu0 %v611_v26  ;;  %356 = vmatmul.mubr.bf16.gmra.mxu1 %v612_v27 }
  0x33   :  { %331 = vmatprep.mubr.bf16.mxu0 %v613_v28  ;;  %363 = vmatprep.mubr.bf16.mxu1 %v615_v29 }
  0x3a   :  { %332 = vmatmul.mubr.bf16.gmra.mxu0 %v617_v30  ;;  %364 = vmatmul.mubr.bf16.gmra.mxu1 %v618_v31 }
  0xe2   :  { %v515_v32 = vpop.f32.mrf.mxu0  ;;  %v539_v33 = vpop.f32.mrf.mxu1 }
  0xe4   :  { %v516_v34 = vpop.f32.mrf.mxu0  ;;  %v540_v36 = vpop.f32.mrf.mxu1 }
  0xe5   :  { %v517_v37 = vadd.f32 %v516_v34, %v515_v32  ;;  %v541_v38 = vadd.f32 %v540_v36, %v539_v33 }
  0xe6   :  { %v518_v39 = vpop.f32.mrf.mxu0  ;;  %v542_v40 = vpop.f32.mrf.mxu1 }
  0xe7   :  { %v430_v41 = vadd.f32 %v517_v37, %v738_v35  ;;  %v438_v42 = vadd.f32 %v541_v38, %v738_v35 }
  0xe8   :  { %v519_v43 = vpop.f32.mrf.mxu0  ;;  %v543_v44 = vpop.f32.mrf.mxu1 }
  0xe9   :  { %446 = vst [vmem:[%s807_s3] sm:$0xff] %v430_v41  ;;  %454 = vst [vmem:[%s807_s3 + $0x40] sm:$0xff] %v438_v42  ;;  %v520_v45 = vadd.f32 %v519_v43, %v518_v39  ;;  %v544_v46 = vadd.f32 %v543_v44, %v542_v40 }
  0xea   :  { %v521_v47 = vpop.f32.mrf.mxu0  ;;  %v545_v48 = vpop.f32.mrf.mxu1 }
  0xeb   :  { %v431_v49 = vadd.f32 %v520_v45, %v738_v35  ;;  %v439_v50 = vadd.f32 %v544_v46, %v738_v35 }
  0xec   :  { %v522_v51 = vpop.f32.mrf.mxu0  ;;  %v546_v52 = vpop.f32.mrf.mxu1 }
  0xed   :  { %447 = vst [vmem:[%s807_s3 + $0x8] sm:$0xff] %v431_v49  ;;  %455 = vst [vmem:[%s807_s3 + $0x48] sm:$0xff] %v439_v50  ;;  %v523_v53 = vadd.f32 %v522_v51, %v521_v47  ;;  %v547_v54 = vadd.f32 %v546_v52, %v545_v48 }
  0xee   :  { %v524_v55 = vpop.f32.mrf.mxu0  ;;  %v548_v56 = vpop.f32.mrf.mxu1 }
  0xef   :  { %v432_v57 = vadd.f32 %v523_v53, %v738_v35  ;;  %v440_v58 = vadd.f32 %v547_v54, %v738_v35 }
  0xf0   :  { %v525_v59 = vpop.f32.mrf.mxu0  ;;  %v549_v60 = vpop.f32.mrf.mxu1 }
  0xf1   :  { %448 = vst [vmem:[%s807_s3 + $0x10] sm:$0xff] %v432_v57  ;;  %456 = vst [vmem:[%s807_s3 + $0x50] sm:$0xff] %v440_v58  ;;  %v526_v61 = vadd.f32 %v525_v59, %v524_v55  ;;  %v550_v62 = vadd.f32 %v549_v60, %v548_v56 }
  0xf2   :  { %v527_v63 = vpop.f32.mrf.mxu0  ;;  %v551_v0 = vpop.f32.mrf.mxu1 }
  0xf3   :  { %v433_v1 = vadd.f32 %v526_v61, %v738_v35  ;;  %v441_v2 = vadd.f32 %v550_v62, %v738_v35 }
  0xf4   :  { %v528_v3 = vpop.f32.mrf.mxu0  ;;  %v552_v4 = vpop.f32.mrf.mxu1 }
  0xf5   :  { %449 = vst [vmem:[%s807_s3 + $0x18] sm:$0xff] %v433_v1  ;;  %457 = vst [vmem:[%s807_s3 + $0x58] sm:$0xff] %v441_v2  ;;  %v529_v5 = vadd.f32 %v528_v3, %v527_v63  ;;  %v553_v6 = vadd.f32 %v552_v4, %v551_v0 }
  0xf6   :  { %v530_v7 = vpop.f32.mrf.mxu0  ;;  %v554_v8 = vpop.f32.mrf.mxu1 }
  0xf7   :  { %v434_v9 = vadd.f32 %v529_v5, %v738_v35  ;;  %v442_v10 = vadd.f32 %v553_v6, %v738_v35 }
  0xf8   :  { %v531_v11 = vpop.f32.mrf.mxu0  ;;  %v555_v12 = vpop.f32.mrf.mxu1 }
  0xf9   :  { %450 = vst [vmem:[%s807_s3 + $0x20] sm:$0xff] %v434_v9  ;;  %458 = vst [vmem:[%s807_s3 + $0x60] sm:$0xff] %v442_v10  ;;  %v532_v13 = vadd.f32 %v531_v11, %v530_v7  ;;  %v556_v14 = vadd.f32 %v555_v12, %v554_v8 }
  0xfa   :  { %v533_v15 = vpop.f32.mrf.mxu0  ;;  %v557_v16 = vpop.f32.mrf.mxu1 }
  0xfb   :  { %v435_v17 = vadd.f32 %v532_v13, %v738_v35  ;;  %v443_v18 = vadd.f32 %v556_v14, %v738_v35 }
  0xfc   :  { %v534_v19 = vpop.f32.mrf.mxu0  ;;  %v558_v20 = vpop.f32.mrf.mxu1 }
  0xfd   :  { %451 = vst [vmem:[%s807_s3 + $0x28] sm:$0xff] %v435_v17  ;;  %459 = vst [vmem:[%s807_s3 + $0x68] sm:$0xff] %v443_v18  ;;  %v535_v21 = vadd.f32 %v534_v19, %v533_v15  ;;  %v559_v22 = vadd.f32 %v558_v20, %v557_v16 }
  0xfe   :  { %v536_v23 = vpop.f32.mrf.mxu0  ;;  %v560_v24 = vpop.f32.mrf.mxu1 }
  0xff   :  { %v436_v25 = vadd.f32 %v535_v21, %v738_v35  ;;  %v444_v26 = vadd.f32 %v559_v22, %v738_v35 }
 0x100   :  { %v537_v27 = vpop.f32.mrf.mxu0  ;;  %v561_v28 = vpop.f32.mrf.mxu1 }
 0x101   :  { %452 = vst [vmem:[%s807_s3 + $0x30] sm:$0xff] %v436_v25  ;;  %460 = vst [vmem:[%s807_s3 + $0x70] sm:$0xff] %v444_v26  ;;  %v538_v29 = vadd.f32 %v537_v27, %v536_v23  ;;  %v562_v30 = vadd.f32 %v561_v28, %v560_v24 }
 0x103   :  { %v437_v31 = vadd.f32 %v538_v29, %v738_v35  ;;  %v445_v32 = vadd.f32 %v562_v30, %v738_v35 }
 0x105   :  { %453 = vst [vmem:[%s807_s3 + $0x38] sm:$0xff] %v437_v31  ;;  %461 = vst [vmem:[%s807_s3 + $0x78] sm:$0xff] %v445_v32 }

// kernel: generator_forward.44
= control target key start
LH: loop header
LB: loop body
LE: loop exit
PB: predicated region body
PF: predicated region fallthrough
CT: control target
= control target key end

     0   :  { %s1409_s12 = smov 0   ;;  %s1411_s13 = smov 0   ;;  %s1681_s0 = inlined_call_operand.vmem [shape: bf16[128,2304], index: 0, kind: input, shape index: {}]   ;;  %s1682_s1 = inlined_call_operand.vmem [shape: bf16[2304,256], index: 1, kind: input, shape index: {}]   ;;  %s1683_s2 = inlined_call_operand.vmem [shape: f32[1,256], index: 2, kind: input, shape index: {}]   ;;  %s1684_s3 = inlined_call_operand.vmem [shape: f32[128,256], index: 3, kind: output, shape index: {}]  }
   0x1   :  { %s1413_s14 = smov 0   ;;  %s1415_s15 = smov 0  }
   0x2   :  { %s1417_s16 = smov 0  }
   0x3 LB: > { %s25_s17 = sadd.s32 1, %s1382_s15  ;;  %p48_p1 = scmp.ne.s32.totalorder %s1374_s13, %s1370_s12  ;;  %s1386_s16 = sphi %s1417_s16, %s13_s16   ;;  %s1382_s15 = sphi %s1415_s15, %s1688_s15   ;;  %s1378_s14 = sphi %s1413_s14, %s1687_s14   ;;  %s1374_s13 = sphi %s1411_s13, %s1686_s13   ;;  %s1370_s12 = sphi %s1409_s12, %s1685_s12  }
   0x4   : > { %p26_p0 = scmp.ge.s32.totalorder %s25_s17, 9  ;;  %p49_p2 = scmp.eq.s32.totalorder %s1386_s16, 0 }
   0x5   : > { %s41_s19 = sadd.s32 1, %s1374_s13  ;;  %p1138_p5 = scmp.ge.s32.totalorder %s1386_s16, 9 }
   0x6   : > { %s1690_s17 = smov (%p26_p0, %s25_s17), 0  ;;  %p50_p3 = por %p49_p2, %p48_p1 }
   0x7   : > { %s37_s18 = ssub.s32 %s1382_s15, %s1690_s17  ;;  %164 = sbr.rel (%p1138_p5) target bundleno = 24 (0x18), region = 20 }
   0x8   : > { %p39_p4 = scmp.eq.s32.totalorder %s37_s18, 0 }
   0xa   : > { %s1444_s20 = scalar_select %p39_p4, %s1374_s13, %s41_s19  }
   0xc   : > { %167 = sbr.rel (!%p50_p3) target bundleno = 24 (0x18), region = 24  ;;  %s169_s21 = sand.u32 (%p50_p3), 1, %s1374_s13  }
   0xd   : > { %s1201_s22 = sshll.u32 (%p50_p3), %s1382_s15, 3  ;;  %s1139_s23 = sshll.u32 (%p50_p3), %s169_s21, 7 }
   0xe   : > { %s1452_s26 = scalar_lea.vmem (%p50_p3), %s1681_s0, %s1201_s22  ;;  %s171_s27 = scalar_lea.vmem (%p50_p3), [#allocation3], %s1139_s23 }
   0xf   : > { %v236_v0 = vld [vmem:[%s1452_s26] sm:$0xff] (%p50_p3)  ;;  %v238_v1 = vld [vmem:[%s1452_s26 + $0x48] sm:$0xff] (%p50_p3)  ;;  %v240_v2 = vld [vmem:[%s1452_s26 + $0x90] sm:$0xff] (%p50_p3) }
  0x10   : > { %237 = vst [vmem:[%s171_s27] sm:$0xff] (%p50_p3), %v236_v0  ;;  %239 = vst [vmem:[%s171_s27 + $0x8] sm:$0xff] (%p50_p3), %v238_v1  ;;  %v242_v3 = vld [vmem:[%s1452_s26 + $0xd8] sm:$0xff] (%p50_p3)  ;;  %v244_v4 = vld [vmem:[%s1452_s26 + $0x120] sm:$0xff] (%p50_p3) }
  0x11   : > { %241 = vst [vmem:[%s171_s27 + $0x10] sm:$0xff] %v240_v2  ;;  %v246_v5 = vld [vmem:[%s1452_s26 + $0x168] sm:$0xff]  ;;  %243 = vst [vmem:[%s171_s27 + $0x18] sm:$0xff] %v242_v3  ;;  %v248_v6 = vld [vmem:[%s1452_s26 + $0x1b0] sm:$0xff] }
  0x12   : > { %245 = vst [vmem:[%s171_s27 + $0x20] sm:$0xff] %v244_v4  ;;  %247 = vst [vmem:[%s171_s27 + $0x28] sm:$0xff] %v246_v5  ;;  %v250_v7 = vld [vmem:[%s1452_s26 + $0x1f8] sm:$0xff]  ;;  %v252_v8 = vld [vmem:[%s1452_s26 + $0x240] sm:$0xff] }
  0x13   : > { %249 = vst [vmem:[%s171_s27 + $0x30] sm:$0xff] %v248_v6  ;;  %251 = vst [vmem:[%s171_s27 + $0x38] sm:$0xff] %v250_v7  ;;  %v254_v9 = vld [vmem:[%s1452_s26 + $0x288] sm:$0xff]  ;;  %v256_v10 = vld [vmem:[%s1452_s26 + $0x2d0] sm:$0xff] }
  0x14   : > { %253 = vst [vmem:[%s171_s27 + $0x40] sm:$0xff] %v252_v8  ;;  %v258_v11 = vld [vmem:[%s1452_s26 + $0x318] sm:$0xff]  ;;  %255 = vst [vmem:[%s171_s27 + $0x48] sm:$0xff] %v254_v9  ;;  %v260_v12 = vld [vmem:[%s1452_s26 + $0x360] sm:$0xff] }
  0x15   : > { %257 = vst [vmem:[%s171_s27 + $0x50] sm:$0xff] %v256_v10  ;;  %259 = vst [vmem:[%s171_s27 + $0x58] sm:$0xff] %v258_v11  ;;  %v262_v13 = vld [vmem:[%s1452_s26 + $0x3a8] sm:$0xff]  ;;  %v264_v14 = vld [vmem:[%s1452_s26 + $0x3f0] sm:$0xff] }
  0x16   : > { %261 = vst [vmem:[%s171_s27 + $0x60] sm:$0xff] %v260_v12  ;;  %263 = vst [vmem:[%s171_s27 + $0x68] sm:$0xff] %v262_v13  ;;  %v266_v15 = vld [vmem:[%s1452_s26 + $0x438] sm:$0xff] }
  0x17   : > { %265 = vst [vmem:[%s171_s27 + $0x70] sm:$0xff] %v264_v14  ;;  %267 = vst [vmem:[%s171_s27 + $0x78] sm:$0xff] %v266_v15 }
  0x18 PF: > { %p1142_p6 = scmp.ge.s32.totalorder %s1386_s16, 1  ;;  %p287_p7 = scmp.lt.s32.totalorder %s1386_s16, 10 }
  0x1a   : > { %p288_p8 = pnand %p1142_p6, %p287_p7 }
  0x1b   : > { %s294_s28 = sand.u32 (!%p288_p8), 1, %s1370_s12   ;;  %s1144_s29 = sshll.u32 (!%p288_p8), %s1378_s14, 5 }
  0x1c   : > { %291 = sbr.rel (%p288_p8) target bundleno = 372 (0x174), region = 66  ;;  %s1143_s30 = sshll.u32 (!%p288_p8), %s294_s28, 7 }
  0x1d   : > { %p340_p9 = scmp.lt.s32.totalorder (!%p288_p8), %s1144_s29, 287  ;;  %s1479_s8 = scalar_lea.vmem (!%p288_p8), [#allocation3], %s1143_s30 }
  0x1e   : > { %p1147_p10 = scmp.ne.s32.totalorder (!%p288_p8), %s1378_s14, 0 }
  0x21   : > { %s1692_s29 = smov (!%p340_p9, %s1144_s29), 287  ;;  %370 = sbr.rel (%p1147_p10) target bundleno = 55 (0x37), region = 74 }
  0x22   : > { %s1202_s4 = sshll.u32 %s1692_s29, 3 }
  0x23   : > { %s1477_s7 = scalar_lea.vmem %s1682_s1, %s1202_s4 }
  0x26   : > { %v1388_v16 = vmov 0.0  }
  0x27   : > { %371 = vst [vmem:[#allocation2 + $0xb0] sm:$0xff] %v1388_v16  ;;  %372 = vst [vmem:[#allocation2] sm:$0xff] %v1388_v16 }
  0x28   : > { %373 = vst [vmem:[#allocation2 + $0xd8] sm:$0xff] %v1388_v16  ;;  %374 = vst [vmem:[#allocation2 + $0x18] sm:$0xff] %v1388_v16 }
  0x29   : > { %375 = vst [vmem:[#allocation2 + $0x50] sm:$0xff] %v1388_v16  ;;  %376 = vst [vmem:[#allocation2 + $0x68] sm:$0xff] %v1388_v16 }
  0x2a   : > { %377 = vst [vmem:[#allocation2 + $0x30] sm:$0xff] %v1388_v16  ;;  %378 = vst [vmem:[#allocation2 + $0x48] sm:$0xff] %v1388_v16 }
  0x2b   : > { %379 = vst [vmem:[#allocation2 + $0x80] sm:$0xff] %v1388_v16  ;;  %380 = vst [vmem:[#allocation2 + $0x88] sm:$0xff] %v1388_v16 }
  0x2c   : > { %381 = vst [vmem:[#allocation2 + $0xe8] sm:$0xff] %v1388_v16  ;;  %382 = vst [vmem:[#allocation2 + $0xb8] sm:$0xff] %v1388_v16 }
  0x2d   : > { %383 = vst [vmem:[#allocation2 + $0x60] sm:$0xff] %v1388_v16  ;;  %384 = vst [vmem:[#allocation2 + $0xf0] sm:$0xff] %v1388_v16 }
  0x2e   : > { %385 = vst [vmem:[#allocation2 + $0x8] sm:$0xff] %v1388_v16  ;;  %386 = vst [vmem:[#allocation2 + $0x78] sm:$0xff] %v1388_v16 }
  0x2f   : > { %387 = vst [vmem:[#allocation2 + $0x38] sm:$0xff] %v1388_v16  ;;  %388 = vst [vmem:[#allocation2 + $0x58] sm:$0xff] %v1388_v16 }
  0x30   : > { %389 = vst [vmem:[#allocation2 + $0x40] sm:$0xff] %v1388_v16  ;;  %390 = vst [vmem:[#allocation2 + $0xc8] sm:$0xff] %v1388_v16 }
  0x31   : > { %391 = vst [vmem:[#allocation2 + $0xe0] sm:$0xff] %v1388_v16  ;;  %392 = vst [vmem:[#allocation2 + $0x90] sm:$0xff] %v1388_v16 }
  0x32   : > { %393 = vst [vmem:[#allocation2 + $0x70] sm:$0xff] %v1388_v16  ;;  %394 = vst [vmem:[#allocation2 + $0xc0] sm:$0xff] %v1388_v16 }
  0x33   : > { %395 = vst [vmem:[#allocation2 + $0xa8] sm:$0xff] %v1388_v16  ;;  %396 = vst [vmem:[#allocation2 + $0xd0] sm:$0xff] %v1388_v16 }
  0x34   : > { %397 = vst [vmem:[#allocation2 + $0x10] sm:$0xff] %v1388_v16  ;;  %398 = vst [vmem:[#allocation2 + $0x28] sm:$0xff] %v1388_v16 }
  0x35   : > { %399 = vst [vmem:[#allocation2 + $0xa0] sm:$0xff] %v1388_v16  ;;  %400 = vst [vmem:[#allocation2 + $0xf8] sm:$0xff] %v1388_v16 }
  0x36   : > { %401 = vst [vmem:[#allocation2 + $0x20] sm:$0xff] %v1388_v16  ;;  %402 = vst [vmem:[#allocation2 + $0x98] sm:$0xff] %v1388_v16 }
  0x37 PF: > { %v1276_v17 = vld [vmem:[%s1477_s7 + $0x74] ss:$8 sps:$4 sm:$0xff]   ;;  %v1278_v18 = vld [vmem:[%s1477_s7 + $0x70] ss:$8 sps:$4 sm:$0xff]   ;;  %v1279_v19 = vld [vmem:[%s1477_s7 + $0x64] ss:$8 sps:$4 sm:$0xff]  }
  0x38   : > { %723 = vmatprep.subr.bf16.mxu0 %v1276_v17  ;;  %1203 = vmatprep.subr.bf16.mxu1 %v1276_v17  ;;  %v1281_v20 = vld [vmem:[%s1477_s7 + $0x60] ss:$8 sps:$4 sm:$0xff]   ;;  %v1282_v21 = vld [vmem:[%s1477_s7 + $0x54] ss:$8 sps:$4 sm:$0xff]   ;;  %v1284_v22 = vld [vmem:[%s1477_s7 + $0x50] ss:$8 sps:$4 sm:$0xff]  }
  0x39   : > { %724 = vmatpush1.bf16.msra.mxu0 %v1278_v18  ;;  %1219 = vmatpush1.bf16.msra.mxu1 %v1278_v18  ;;  %v1285_v23 = vld [vmem:[%s1477_s7 + $0x44] ss:$8 sps:$4 sm:$0xff]   ;;  %v1287_v24 = vld [vmem:[%s1477_s7 + $0x40] ss:$8 sps:$4 sm:$0xff]   ;;  %v1288_v25 = vld [vmem:[%s1477_s7 + $0x34] ss:$8 sps:$4 sm:$0xff]  }
  0x3a   : > { %725 = vmatprep.subr.bf16.mxu0 %v1279_v19  ;;  %1204 = vmatprep.subr.bf16.mxu1 %v1279_v19  ;;  %v1290_v26 = vld [vmem:[%s1477_s7 + $0x30] ss:$8 sps:$4 sm:$0xff]   ;;  %v1291_v27 = vld [vmem:[%s1477_s7 + $0x24] ss:$8 sps:$4 sm:$0xff]   ;;  %v1293_v28 = vld [vmem:[%s1477_s7 + $0x20] ss:$8 sps:$4 sm:$0xff]  }
  0x3b   : > { %v1294_v29 = vld [vmem:[%s1477_s7 + $0x14] ss:$8 sps:$4 sm:$0xff]   ;;  %v1326_v30 = vld [vmem:[%s1479_s8 + $0x4] ss:$8 sps:$4 sm:$0xff]   ;;  %v1296_v31 = vld [vmem:[%s1477_s7 + $0x10] ss:$8 sps:$4 sm:$0xff]  }
  0x3c   : > { %v1329_v32 = vld [vmem:[%s1479_s8 + $0x44] ss:$8 sps:$4 sm:$0xff]   ;;  %755 = vmatprep.mubr.bf16.mxu0 %v1326_v30  ;;  %v1299_v34 = vld [vmem:[%s1477_s7] ss:$8 sps:$4 sm:$0xff]   ;;  %v1300_v35 = vld [vmem:[%s1477_s7 + $0xf4] ss:$8 sps:$4 sm:$0xff]  }
  0x3d   : > { %726 = vmatpush1.bf16.msra.mxu0 %v1281_v20  ;;  %1220 = vmatpush1.bf16.msra.mxu1 %v1281_v20  ;;  %v1297_v33 = vld [vmem:[%s1477_s7 + $0x4] ss:$8 sps:$4 sm:$0xff]   ;;  %v1302_v36 = vld [vmem:[%s1477_s7 + $0xf0] ss:$8 sps:$4 sm:$0xff]   ;;  %v1305_v38 = vld [vmem:[%s1477_s7 + $0xe0] ss:$8 sps:$4 sm:$0xff]  }
  0x3e   : > { %727 = vmatprep.subr.bf16.mxu0 %v1282_v21  ;;  %1205 = vmatprep.subr.bf16.mxu1 %v1282_v21  ;;  %v1303_v37 = vld [vmem:[%s1477_s7 + $0xe4] ss:$8 sps:$4 sm:$0xff]   ;;  %v1306_v39 = vld [vmem:[%s1477_s7 + $0xd4] ss:$8 sps:$4 sm:$0xff]   ;;  %v1308_v40 = vld [vmem:[%s1477_s7 + $0xd0] ss:$8 sps:$4 sm:$0xff]  }
  0x3f   : > { %795 = vmatprep.mubr.bf16.mxu1 %v1329_v32  ;;  %v1309_v41 = vld [vmem:[%s1477_s7 + $0xc4] ss:$8 sps:$4 sm:$0xff]   ;;  %v1311_v42 = vld [vmem:[%s1477_s7 + $0xc0] ss:$8 sps:$4 sm:$0xff]   ;;  %v1312_v43 = vld [vmem:[%s1477_s7 + $0xb4] ss:$8 sps:$4 sm:$0xff]  }
  0x40   : > { %v1314_v44 = vld [vmem:[%s1477_s7 + $0xb0] ss:$8 sps:$4 sm:$0xff]   ;;  %v1315_v45 = vld [vmem:[%s1477_s7 + $0xa4] ss:$8 sps:$4 sm:$0xff]   ;;  %v1317_v46 = vld [vmem:[%s1477_s7 + $0xa0] ss:$8 sps:$4 sm:$0xff]  }
  0x41   : > { %728 = vmatpush1.bf16.msra.mxu0 %v1284_v22  ;;  %1221 = vmatpush1.bf16.msra.mxu1 %v1284_v22  ;;  %v1318_v47 = vld [vmem:[%s1477_s7 + $0x94] ss:$8 sps:$4 sm:$0xff]   ;;  %v1320_v48 = vld [vmem:[%s1477_s7 + $0x90] ss:$8 sps:$4 sm:$0xff]   ;;  %v1321_v49 = vld [vmem:[%s1477_s7 + $0x84] ss:$8 sps:$4 sm:$0xff]  }
  0x42   : > { %729 = vmatprep.subr.bf16.mxu0 %v1285_v23  ;;  %1206 = vmatprep.subr.bf16.mxu1 %v1285_v23  ;;  %v1323_v50 = vld [vmem:[%s1477_s7 + $0x80] ss:$8 sps:$4 sm:$0xff]   ;;  %v1330_v53 = vld [vmem:[%s1479_s8 + $0x14] ss:$8 sps:$4 sm:$0xff]   ;;  %v1334_v55 = vld [vmem:[%s1479_s8 + $0x10] ss:$8 sps:$4 sm:$0xff]  }
  0x43   : > { %v1324_v51 = vld [vmem:[%s1479_s8] ss:$8 sps:$4 sm:$0xff]   ;;  %v1332_v54 = vld [vmem:[%s1479_s8 + $0x54] ss:$8 sps:$4 sm:$0xff]   ;;  %v1335_v56 = vld [vmem:[%s1479_s8 + $0x50] ss:$8 sps:$4 sm:$0xff]  }
  0x44   : > { %v1327_v52 = vld [vmem:[%s1479_s8 + $0x40] ss:$8 sps:$4 sm:$0xff]   ;;  %v1336_v57 = vld [vmem:[%s1479_s8 + $0x24] ss:$8 sps:$4 sm:$0xff]   ;;  %v1342_v61 = vld [vmem:[%s1479_s8 + $0x34] ss:$8 sps:$4 sm:$0xff]  }
  0x45   : > { %730 = vmatpush1.bf16.msra.mxu0 %v1287_v24  ;;  %1222 = vmatpush1.bf16.msra.mxu1 %v1287_v24  ;;  %v1338_v58 = vld [vmem:[%s1479_s8 + $0x64] ss:$8 sps:$4 sm:$0xff]   ;;  %v1340_v59 = vld [vmem:[%s1479_s8 + $0x20] ss:$8 sps:$4 sm:$0xff]   ;;  %v1344_v62 = vld [vmem:[%s1479_s8 + $0x74] ss:$8 sps:$4 sm:$0xff]  }
  0x46   : > { %731 = vmatprep.subr.bf16.mxu0 %v1288_v25  ;;  %1207 = vmatprep.subr.bf16.mxu1 %v1288_v25  ;;  %v1341_v60 = vld [vmem:[%s1479_s8 + $0x60] ss:$8 sps:$4 sm:$0xff]   ;;  %v1346_v63 = vld [vmem:[%s1479_s8 + $0x30] ss:$8 sps:$4 sm:$0xff]   ;;  %p1196_p11 = scmp.ne.s32.totalorder %s1378_s14, 8 }
  0x47   : > { %v1347_v0 = vld [vmem:[%s1479_s8 + $0x70] ss:$8 sps:$4 sm:$0xff]   ;;  %v404_v5 = vld [vmem:[#allocation2] sm:$0xff]  ;;  %v422_v18 = vld [vmem:[#allocation2 + $0xc8] sm:$0xff] }
  0x48   : > { %v403_v1 = vld [vmem:[#allocation2 + $0xb0] sm:$0xff]  ;;  %v419_v2 = vld [vmem:[#allocation2 + $0x38] sm:$0xff]  ;;  %v421_v12 = vld [vmem:[#allocation2 + $0x40] sm:$0xff] }
  0x49   : > { %732 = vmatpush1.bf16.msra.mxu0 %v1290_v26  ;;  %1223 = vmatpush1.bf16.msra.mxu1 %v1290_v26  ;;  %v420_v6 = vld [vmem:[#allocation2 + $0x58] sm:$0xff]  ;;  %v407_v23 = vld [vmem:[#allocation2 + $0x50] sm:$0xff]  ;;  %v423_v24 = vld [vmem:[#allocation2 + $0xe0] sm:$0xff] }
  0x4a   : > { %733 = vmatprep.subr.bf16.mxu0 %v1291_v27  ;;  %1208 = vmatprep.subr.bf16.mxu1 %v1291_v27  ;;  %v405_v11 = vld [vmem:[#allocation2 + $0xd8] sm:$0xff]  ;;  %v424_v30 = vld [vmem:[#allocation2 + $0x90] sm:$0xff] }
  0x4b   : > { %v406_v17 = vld [vmem:[#allocation2 + $0x18] sm:$0xff] }
  0x4d   : > { %734 = vmatpush1.bf16.msra.mxu0 %v1293_v28  ;;  %1224 = vmatpush1.bf16.msra.mxu1 %v1293_v28 }
  0x4e   : > { %735 = vmatprep.subr.bf16.mxu0 %v1294_v29  ;;  %1209 = vmatprep.subr.bf16.mxu1 %v1294_v29  ;;  %v408_v29 = vld [vmem:[#allocation2 + $0x68] sm:$0xff] }
  0x51   : > { %736 = vmatpush1.bf16.msra.mxu0 %v1296_v31  ;;  %1225 = vmatpush1.bf16.msra.mxu1 %v1296_v31 }
  0x52   : > { %737 = vmatprep.subr.bf16.mxu0 %v1297_v33  ;;  %1210 = vmatprep.subr.bf16.mxu1 %v1297_v33 }
  0x55   : > { %738 = vmatpush1.bf16.msra.mxu0 %v1299_v34  ;;  %1226 = vmatpush1.bf16.msra.mxu1 %v1299_v34 }
  0x56   : > { %739 = vmatprep.subr.bf16.mxu0 %v1300_v35  ;;  %1211 = vmatprep.subr.bf16.mxu1 %v1300_v35  ;;  %v409_v35 = vld [vmem:[#allocation2 + $0x30] sm:$0xff] }
  0x59   : > { %740 = vmatpush2.bf16.msra.mxu0 %v1302_v36  ;;  %1227 = vmatpush2.bf16.msra.mxu1 %v1302_v36  ;;  %v425_v36 = vld [vmem:[#allocation2 + $0x70] sm:$0xff] }
  0x5a   : > { %741 = vmatprep.subr.bf16.mxu0 %v1303_v37  ;;  %1212 = vmatprep.subr.bf16.mxu1 %v1303_v37 }
  0x5d   : > { %742 = vmatpush2.bf16.msra.mxu0 %v1305_v38  ;;  %1228 = vmatpush2.bf16.msra.mxu1 %v1305_v38 }
  0x5e   : > { %743 = vmatprep.subr.bf16.mxu0 %v1306_v39  ;;  %1213 = vmatprep.subr.bf16.mxu1 %v1306_v39 }
  0x61   : > { %744 = vmatpush2.bf16.msra.mxu0 %v1308_v40  ;;  %1229 = vmatpush2.bf16.msra.mxu1 %v1308_v40 }
  0x62   : > { %745 = vmatprep.subr.bf16.mxu0 %v1309_v41  ;;  %1214 = vmatprep.subr.bf16.mxu1 %v1309_v41  ;;  %v410_v41 = vld [vmem:[#allocation2 + $0x48] sm:$0xff] }
  0x65   : > { %746 = vmatpush2.bf16.msra.mxu0 %v1311_v42  ;;  %1230 = vmatpush2.bf16.msra.mxu1 %v1311_v42  ;;  %v426_v42 = vld [vmem:[#allocation2 + $0xc0] sm:$0xff] }
  0x66   : > { %747 = vmatprep.subr.bf16.mxu0 %v1312_v43  ;;  %1215 = vmatprep.subr.bf16.mxu1 %v1312_v43 }
  0x69   : > { %748 = vmatpush2.bf16.msra.mxu0 %v1314_v44  ;;  %1231 = vmatpush2.bf16.msra.mxu1 %v1314_v44 }
  0x6a   : > { %749 = vmatprep.subr.bf16.mxu0 %v1315_v45  ;;  %1216 = vmatprep.subr.bf16.mxu1 %v1315_v45 }
  0x6d   : > { %750 = vmatpush2.bf16.msra.mxu0 %v1317_v46  ;;  %1232 = vmatpush2.bf16.msra.mxu1 %v1317_v46 }
  0x6e   : > { %751 = vmatprep.subr.bf16.mxu0 %v1318_v47  ;;  %1217 = vmatprep.subr.bf16.mxu1 %v1318_v47  ;;  %v411_v47 = vld [vmem:[#allocation2 + $0x80] sm:$0xff] }
  0x71   : > { %752 = vmatpush2.bf16.msra.mxu0 %v1320_v48  ;;  %1233 = vmatpush2.bf16.msra.mxu1 %v1320_v48  ;;  %v427_v48 = vld [vmem:[#allocation2 + $0xa8] sm:$0xff] }
  0x72   : > { %753 = vmatprep.subr.bf16.mxu0 %v1321_v49  ;;  %1218 = vmatprep.subr.bf16.mxu1 %v1321_v49 }
  0x75   : > { %754 = vmatpush2.bf16.msra.mxu0 %v1323_v50  ;;  %1234 = vmatpush2.bf16.msra.mxu1 %v1323_v50 }
  0x78   : > { %756 = vmatmul.mubr.bf16.vlgmr.msra.gmra.mxu0 %v1324_v51  ;;  %796 = vmatmul.mubr.bf16.vlgmr.msra.gmra.mxu1 %v1327_v52 }
  0x79   : > { %765 = vmatprep.mubr.bf16.mxu0 %v1330_v53  ;;  %805 = vmatprep.mubr.bf16.mxu1 %v1332_v54  ;;  %v412_v53 = vld [vmem:[#allocation2 + $0x88] sm:$0xff]  ;;  %v428_v54 = vld [vmem:[#allocation2 + $0xd0] sm:$0xff] }
  0x80   : > { %766 = vmatmul.mubr.bf16.gmra.mxu0 %v1334_v55  ;;  %806 = vmatmul.mubr.bf16.gmra.mxu1 %v1335_v56 }
  0x81   : > { %775 = vmatprep.mubr.bf16.mxu0 %v1336_v57  ;;  %815 = vmatprep.mubr.bf16.mxu1 %v1338_v58 }
  0x88   : > { %776 = vmatmul.mubr.bf16.gmra.mxu0 %v1340_v59  ;;  %816 = vmatmul.mubr.bf16.gmra.mxu1 %v1341_v60  ;;  %v413_v59 = vld [vmem:[#allocation2 + $0xe8] sm:$0xff]  ;;  %v429_v60 = vld [vmem:[#allocation2 + $0x10] sm:$0xff] }
  0x89   : > { %785 = vmatprep.mubr.bf16.mxu0 %v1342_v61  ;;  %825 = vmatprep.mubr.bf16.mxu1 %v1344_v62 }
  0x90   : > { %786 = vmatmul.mubr.bf16.gmra.mxu0 %v1346_v63  ;;  %826 = vmatmul.mubr.bf16.gmra.mxu1 %v1347_v0 }
 0x138   : > { %v757_v3 = vpop.f32.mrf.mxu0  ;;  %v797_v4 = vpop.f32.mrf.mxu1 }
 0x139   : > { %v836_v7 = vadd.f32 %v757_v3, %v403_v1  ;;  %v852_v8 = vadd.f32 %v797_v4, %v419_v2  ;;  %v414_v1 = vld [vmem:[#allocation2 + $0xb8] sm:$0xff]  ;;  %v430_v2 = vld [vmem:[#allocation2 + $0x28] sm:$0xff] }
 0x13a   : > { %v759_v9 = vpop.f32.mrf.mxu0  ;;  %v799_v10 = vpop.f32.mrf.mxu1 }
 0x13b   : > { %868 = vst [vmem:[#allocation2 + $0xb0] sm:$0xff] %v836_v7  ;;  %884 = vst [vmem:[#allocation2 + $0x38] sm:$0xff] %v852_v8  ;;  %v837_v13 = vadd.f32 %v759_v9, %v404_v5  ;;  %v853_v14 = vadd.f32 %v799_v10, %v420_v6  ;;  %v415_v7 = vld [vmem:[#allocation2 + $0x60] sm:$0xff] }
 0x13c   : > { %v761_v15 = vpop.f32.mrf.mxu0  ;;  %v801_v16 = vpop.f32.mrf.mxu1  ;;  %v431_v8 = vld [vmem:[#allocation2 + $0xa0] sm:$0xff] }
 0x13d   : > { %869 = vst [vmem:[#allocation2] sm:$0xff] %v837_v13  ;;  %885 = vst [vmem:[#allocation2 + $0x58] sm:$0xff] %v853_v14  ;;  %v838_v19 = vadd.f32 %v761_v15, %v405_v11  ;;  %v854_v20 = vadd.f32 %v801_v16, %v421_v12  ;;  %v416_v13 = vld [vmem:[#allocation2 + $0xf0] sm:$0xff]  ;;  %v432_v14 = vld [vmem:[#allocation2 + $0xf8] sm:$0xff] }
 0x13e   : > { %v763_v21 = vpop.f32.mrf.mxu0  ;;  %v803_v22 = vpop.f32.mrf.mxu1 }
 0x13f   : > { %870 = vst [vmem:[#allocation2 + $0xd8] sm:$0xff] %v838_v19  ;;  %886 = vst [vmem:[#allocation2 + $0x40] sm:$0xff] %v854_v20  ;;  %v839_v25 = vadd.f32 %v763_v21, %v406_v17  ;;  %v855_v26 = vadd.f32 %v803_v22, %v422_v18  ;;  %v417_v19 = vld [vmem:[#allocation2 + $0x8] sm:$0xff]  ;;  %v433_v20 = vld [vmem:[#allocation2 + $0x20] sm:$0xff] }
 0x140   : > { %v767_v27 = vpop.f32.mrf.mxu0  ;;  %v807_v28 = vpop.f32.mrf.mxu1 }
 0x141   : > { %871 = vst [vmem:[#allocation2 + $0x18] sm:$0xff] %v839_v25  ;;  %887 = vst [vmem:[#allocation2 + $0xc8] sm:$0xff] %v855_v26  ;;  %v840_v31 = vadd.f32 %v767_v27, %v407_v23  ;;  %v856_v32 = vadd.f32 %v807_v28, %v423_v24  ;;  %v418_v25 = vld [vmem:[#allocation2 + $0x78] sm:$0xff] }
 0x142   : > { %v769_v33 = vpop.f32.mrf.mxu0  ;;  %v809_v34 = vpop.f32.mrf.mxu1  ;;  %v434_v26 = vld [vmem:[#allocation2 + $0x98] sm:$0xff] }
 0x143   : > { %872 = vst [vmem:[#allocation2 + $0x50] sm:$0xff] %v840_v31  ;;  %888 = vst [vmem:[#allocation2 + $0xe0] sm:$0xff] %v856_v32  ;;  %v841_v37 = vadd.f32 %v769_v33, %v408_v29  ;;  %v857_v38 = vadd.f32 %v809_v34, %v424_v30 }
 0x144   : > { %v771_v39 = vpop.f32.mrf.mxu0  ;;  %v811_v40 = vpop.f32.mrf.mxu1 }
 0x145   : > { %873 = vst [vmem:[#allocation2 + $0x68] sm:$0xff] %v841_v37  ;;  %889 = vst [vmem:[#allocation2 + $0x90] sm:$0xff] %v857_v38  ;;  %v842_v43 = vadd.f32 %v771_v39, %v409_v35  ;;  %v858_v44 = vadd.f32 %v811_v40, %v425_v36 }
 0x146   : > { %v773_v45 = vpop.f32.mrf.mxu0  ;;  %v813_v46 = vpop.f32.mrf.mxu1 }
 0x147   : > { %874 = vst [vmem:[#allocation2 + $0x30] sm:$0xff] %v842_v43  ;;  %890 = vst [vmem:[#allocation2 + $0x70] sm:$0xff] %v858_v44  ;;  %v843_v49 = vadd.f32 %v773_v45, %v410_v41  ;;  %v859_v50 = vadd.f32 %v813_v46, %v426_v42 }
 0x148   : > { %v777_v51 = vpop.f32.mrf.mxu0  ;;  %v817_v52 = vpop.f32.mrf.mxu1 }
 0x149   : > { %875 = vst [vmem:[#allocation2 + $0x48] sm:$0xff] %v843_v49  ;;  %891 = vst [vmem:[#allocation2 + $0xc0] sm:$0xff] %v859_v50  ;;  %v844_v55 = vadd.f32 %v777_v51, %v411_v47  ;;  %v860_v56 = vadd.f32 %v817_v52, %v427_v48 }
 0x14a   : > { %v779_v57 = vpop.f32.mrf.mxu0  ;;  %v819_v58 = vpop.f32.mrf.mxu1 }
 0x14b   : > { %876 = vst [vmem:[#allocation2 + $0x80] sm:$0xff] %v844_v55  ;;  %892 = vst [vmem:[#allocation2 + $0xa8] sm:$0xff] %v860_v56  ;;  %v845_v61 = vadd.f32 %v779_v57, %v412_v53  ;;  %v861_v62 = vadd.f32 %v819_v58, %v428_v54 }
 0x14c   : > { %v781_v63 = vpop.f32.mrf.mxu0  ;;  %v821_v0 = vpop.f32.mrf.mxu1 }
 0x14d   : > { %877 = vst [vmem:[#allocation2 + $0x88] sm:$0xff] %v845_v61  ;;  %893 = vst [vmem:[#allocation2 + $0xd0] sm:$0xff] %v861_v62  ;;  %v846_v3 = vadd.f32 %v781_v63, %v413_v59  ;;  %v862_v4 = vadd.f32 %v821_v0, %v429_v60 }
 0x14e   : > { %v783_v5 = vpop.f32.mrf.mxu0  ;;  %v823_v6 = vpop.f32.mrf.mxu1 }
 0x14f   : > { %878 = vst [vmem:[#allocation2 + $0xe8] sm:$0xff] %v846_v3  ;;  %894 = vst [vmem:[#allocation2 + $0x10] sm:$0xff] %v862_v4  ;;  %v847_v9 = vadd.f32 %v783_v5, %v414_v1  ;;  %v863_v10 = vadd.f32 %v823_v6, %v430_v2 }
 0x150   : > { %v787_v11 = vpop.f32.mrf.mxu0  ;;  %v827_v12 = vpop.f32.mrf.mxu1 }
 0x151   : > { %879 = vst [vmem:[#allocation2 + $0xb8] sm:$0xff] %v847_v9  ;;  %895 = vst [vmem:[#allocation2 + $0x28] sm:$0xff] %v863_v10  ;;  %v848_v15 = vadd.f32 %v787_v11, %v415_v7  ;;  %v864_v16 = vadd.f32 %v827_v12, %v431_v8 }
 0x152   : > { %v789_v17 = vpop.f32.mrf.mxu0  ;;  %v829_v18 = vpop.f32.mrf.mxu1 }
 0x153   : > { %880 = vst [vmem:[#allocation2 + $0x60] sm:$0xff] %v848_v15  ;;  %896 = vst [vmem:[#allocation2 + $0xa0] sm:$0xff] %v864_v16  ;;  %v849_v21 = vadd.f32 %v789_v17, %v416_v13  ;;  %v865_v22 = vadd.f32 %v829_v18, %v432_v14 }
 0x154   : > { %v791_v23 = vpop.f32.mrf.mxu0  ;;  %v831_v24 = vpop.f32.mrf.mxu1 }
 0x155   : > { %881 = vst [vmem:[#allocation2 + $0xf0] sm:$0xff] %v849_v21  ;;  %897 = vst [vmem:[#allocation2 + $0xf8] sm:$0xff] %v865_v22  ;;  %v850_v27 = vadd.f32 %v791_v23, %v417_v19  ;;  %v866_v28 = vadd.f32 %v831_v24, %v433_v20  ;;  %903 = sbr.rel (%p1196_p11) target bundleno = 372 (0x174), region = 78 }
 0x156   : > { %v793_v29 = vpop.f32.mrf.mxu0  ;;  %v833_v30 = vpop.f32.mrf.mxu1 }
 0x157   : > { %882 = vst [vmem:[#allocation2 + $0x8] sm:$0xff] %v850_v27  ;;  %898 = vst [vmem:[#allocation2 + $0x20] sm:$0xff] %v866_v28  ;;  %v851_v31 = vadd.f32 %v793_v29, %v418_v25  ;;  %v867_v32 = vadd.f32 %v833_v30, %v434_v26 }
 0x159   : > { %883 = vst [vmem:[#allocation2 + $0x78] sm:$0xff] %v851_v31  ;;  %899 = vst [vmem:[#allocation2 + $0x98] sm:$0xff] %v867_v32 }
 0x15a   : > { %v938_v33 = vlaneseq  ;;  %v936_v34 = vld [vmem:[%s1683_s2] sm:$0x3]  ;;  %v904_v36 = vld [vmem:[#allocation2 + $0xb0] sm:$0xff]  ;;  %v906_v38 = vld [vmem:[#allocation2 + $0xd8] sm:$0xff] }
 0x15b   : > { %v905_v37 = vld [vmem:[#allocation2] sm:$0xff]  ;;  %v907_v39 = vld [vmem:[#allocation2 + $0x18] sm:$0xff]  ;;  %v908_v42 = vld [vmem:[#allocation2 + $0x50] sm:$0xff] }
 0x15c   : > { %v939_v35 = vshrl.u32 %v938_v33, 7  ;;  %v909_v43 = vld [vmem:[#allocation2 + $0x68] sm:$0xff]  ;;  %v910_v44 = vld [vmem:[#allocation2 + $0x30] sm:$0xff]  ;;  %v912_v46 = vld [vmem:[#allocation2 + $0x80] sm:$0xff] }
 0x15d   : > { %v911_v45 = vld [vmem:[#allocation2 + $0x48] sm:$0xff]  ;;  %v915_v51 = vld [vmem:[#allocation2 + $0xb8] sm:$0xff]  ;;  %v916_v52 = vld [vmem:[#allocation2 + $0x60] sm:$0xff] }
 0x15e   : > { %v940_v40 = vsub.s32 0, %v939_v35  ;;  %v944_v41 = vsub.s32 1, %v939_v35  ;;  %v913_v47 = vld [vmem:[#allocation2 + $0x88] sm:$0xff]  ;;  %v917_v53 = vld [vmem:[#allocation2 + $0xf0] sm:$0xff]  ;;  %v920_v56 = vld [vmem:[#allocation2 + $0x38] sm:$0xff] }
 0x15f   : > { %v914_v48 = vld [vmem:[#allocation2 + $0xe8] sm:$0xff]  ;;  %v921_v61 = vld [vmem:[#allocation2 + $0x58] sm:$0xff]  ;;  %v922_v62 = vld [vmem:[#allocation2 + $0x40] sm:$0xff] }
 0x160   : > { %v1534_v49 = vrot.slane %v936_v34, %v940_v40  ;;  %v1536_v50 = vrot.slane %v936_v34, %v944_v41  ;;  %v918_v54 = vld [vmem:[#allocation2 + $0x8] sm:$0xff]  ;;  %v919_v55 = vld [vmem:[#allocation2 + $0x78] sm:$0xff]  ;;  %v924_v4 = vld [vmem:[#allocation2 + $0xe0] sm:$0xff] }
 0x161   : > { %v923_v63 = vld [vmem:[#allocation2 + $0xc8] sm:$0xff]  ;;  %v925_v5 = vld [vmem:[#allocation2 + $0x90] sm:$0xff]  ;;  %v927_v11 = vld [vmem:[#allocation2 + $0xc0] sm:$0xff] }
 0x162   : > { %v948_v57 = vadd.f32 %v1534_v49, %v904_v36  ;;  %v949_v58 = vadd.f32 %v1536_v50, %v905_v37  ;;  %v950_v59 = vadd.f32 %v1534_v49, %v906_v38  ;;  %v951_v60 = vadd.f32 %v1536_v50, %v907_v39  ;;  %v926_v6 = vld [vmem:[#allocation2 + $0x70] sm:$0xff]  ;;  %v928_v12 = vld [vmem:[#allocation2 + $0xa8] sm:$0xff]  ;;  %v932_v20 = vld [vmem:[#allocation2 + $0xa0] sm:$0xff] }
 0x163   : > { %v952_v0 = vadd.f32 %v1534_v49, %v908_v42  ;;  %v953_v1 = vadd.f32 %v1536_v50, %v909_v43  ;;  %v954_v2 = vadd.f32 %v1534_v49, %v910_v44  ;;  %v955_v3 = vadd.f32 %v1536_v50, %v911_v45  ;;  %v929_v13 = vld [vmem:[#allocation2 + $0xd0] sm:$0xff]  ;;  %v931_v19 = vld [vmem:[#allocation2 + $0x28] sm:$0xff]  ;;  %v933_v25 = vld [vmem:[#allocation2 + $0xf8] sm:$0xff] }
 0x164   : > { %980 = vst [vmem:[%s1684_s3] sm:$0xff] %v948_v57  ;;  %981 = vst [vmem:[%s1684_s3 + $0x8] sm:$0xff] %v949_v58  ;;  %v956_v7 = vadd.f32 %v1534_v49, %v912_v46  ;;  %v957_v8 = vadd.f32 %v1536_v50, %v913_v47  ;;  %v958_v9 = vadd.f32 %v1534_v49, %v914_v48  ;;  %v930_v18 = vld [vmem:[#allocation2 + $0x10] sm:$0xff]  ;;  %v934_v26 = vld [vmem:[#allocation2 + $0x20] sm:$0xff] }
 0x165   : > { %982 = vst [vmem:[%s1684_s3 + $0x10] sm:$0xff] %v950_v59  ;;  %983 = vst [vmem:[%s1684_s3 + $0x18] sm:$0xff] %v951_v60  ;;  %v959_v10 = vadd.f32 %v1536_v50, %v915_v51  ;;  %v960_v14 = vadd.f32 %v1534_v49, %v916_v52  ;;  %v961_v15 = vadd.f32 %v1536_v50, %v917_v53  ;;  %v935_v27 = vld [vmem:[#allocation2 + $0x98] sm:$0xff] }
 0x166   : > { %984 = vst [vmem:[%s1684_s3 + $0x20] sm:$0xff] %v952_v0  ;;  %985 = vst [vmem:[%s1684_s3 + $0x28] sm:$0xff] %v953_v1  ;;  %v962_v16 = vadd.f32 %v1534_v49, %v918_v54  ;;  %v963_v17 = vadd.f32 %v1536_v50, %v919_v55  ;;  %v964_v21 = vadd.f32 %v1534_v49, %v920_v56 }
 0x167   : > { %986 = vst [vmem:[%s1684_s3 + $0x30] sm:$0xff] %v954_v2  ;;  %987 = vst [vmem:[%s1684_s3 + $0x38] sm:$0xff] %v955_v3  ;;  %v965_v22 = vadd.f32 %v1536_v50, %v921_v61  ;;  %v966_v23 = vadd.f32 %v1534_v49, %v922_v62  ;;  %v967_v24 = vadd.f32 %v1536_v50, %v923_v63 }
 0x168   : > { %988 = vst [vmem:[%s1684_s3 + $0x40] sm:$0xff] %v956_v7  ;;  %989 = vst [vmem:[%s1684_s3 + $0x48] sm:$0xff] %v957_v8  ;;  %v968_v28 = vadd.f32 %v1534_v49, %v924_v4  ;;  %v969_v29 = vadd.f32 %v1536_v50, %v925_v5  ;;  %v970_v30 = vadd.f32 %v1534_v49, %v926_v6 }
 0x169   : > { %990 = vst [vmem:[%s1684_s3 + $0x50] sm:$0xff] %v958_v9  ;;  %991 = vst [vmem:[%s1684_s3 + $0x58] sm:$0xff] %v959_v10  ;;  %v971_v31 = vadd.f32 %v1536_v50, %v927_v11  ;;  %v972_v32 = vadd.f32 %v1534_v49, %v928_v12  ;;  %v973_v33 = vadd.f32 %v1536_v50, %v929_v13 }
 0x16a   : > { %992 = vst [vmem:[%s1684_s3 + $0x60] sm:$0xff] %v960_v14  ;;  %993 = vst [vmem:[%s1684_s3 + $0x68] sm:$0xff] %v961_v15  ;;  %v974_v34 = vadd.f32 %v1534_v49, %v930_v18  ;;  %v975_v35 = vadd.f32 %v1536_v50, %v931_v19  ;;  %v976_v36 = vadd.f32 %v1534_v49, %v932_v20 }
 0x16b   : > { %994 = vst [vmem:[%s1684_s3 + $0x70] sm:$0xff] %v962_v16  ;;  %995 = vst [vmem:[%s1684_s3 + $0x78] sm:$0xff] %v963_v17  ;;  %v977_v37 = vadd.f32 %v1536_v50, %v933_v25  ;;  %v978_v38 = vadd.f32 %v1534_v49, %v934_v26  ;;  %v979_v39 = vadd.f32 %v1536_v50, %v935_v27 }
 0x16c   : > { %996 = vst [vmem:[%s1684_s3 + $0x80] sm:$0xff] %v964_v21  ;;  %997 = vst [vmem:[%s1684_s3 + $0x88] sm:$0xff] %v965_v22 }
 0x16d   : > { %998 = vst [vmem:[%s1684_s3 + $0x90] sm:$0xff] %v966_v23  ;;  %999 = vst [vmem:[%s1684_s3 + $0x98] sm:$0xff] %v967_v24 }
 0x16e   : > { %1000 = vst [vmem:[%s1684_s3 + $0xa0] sm:$0xff] %v968_v28  ;;  %1001 = vst [vmem:[%s1684_s3 + $0xa8] sm:$0xff] %v969_v29 }
 0x16f   : > { %1002 = vst [vmem:[%s1684_s3 + $0xb0] sm:$0xff] %v970_v30  ;;  %1003 = vst [vmem:[%s1684_s3 + $0xb8] sm:$0xff] %v971_v31 }
 0x170   : > { %1004 = vst [vmem:[%s1684_s3 + $0xc0] sm:$0xff] %v972_v32  ;;  %1005 = vst [vmem:[%s1684_s3 + $0xc8] sm:$0xff] %v973_v33 }
 0x171   : > { %1006 = vst [vmem:[%s1684_s3 + $0xd0] sm:$0xff] %v974_v34  ;;  %1007 = vst [vmem:[%s1684_s3 + $0xd8] sm:$0xff] %v975_v35 }
 0x172   : > { %1008 = vst [vmem:[%s1684_s3 + $0xe0] sm:$0xff] %v976_v36  ;;  %1009 = vst [vmem:[%s1684_s3 + $0xe8] sm:$0xff] %v977_v37 }
 0x173   : > { %1010 = vst [vmem:[%s1684_s3 + $0xf0] sm:$0xff] %v978_v38  ;;  %1011 = vst [vmem:[%s1684_s3 + $0xf8] sm:$0xff] %v979_v39 }
 0x174 PF: > { %s13_s16 = sadd.s32 1, %s1386_s16   ;;  %s1685_s12 = smov %s1374_s13 }
 0x175   : > { %p10_p12 = scmp.ge.s32.totalorder %s13_s16, 11   ;;  %s1686_s13 = smov %s1444_s20 }
 0x176   : > { %s1687_s14 = smov %s1382_s15  ;;  %s1688_s15 = smov %s1690_s17 }
 0x177   :  { %12 = sbr.rel (!%p10_p12) target bundleno = 3 (0x3), region = 119 }

// kernel: generator_forward.47
= control target key start
LH: loop header
LB: loop body
LE: loop exit
PB: predicated region body
PF: predicated region fallthrough
CT: control target
= control target key end

     0   :  { %s632_s15 = smov 0   ;;  %s634_s16 = smov 0   ;;  %s679_s0 = inlined_call_operand.vmem [shape: f32[2,16,256], index: 0, kind: input, shape index: {}]   ;;  %s680_s1 = inlined_call_operand.vmem [shape: f32[1,256], index: 1, kind: input, shape index: {}]   ;;  %s681_s2 = inlined_call_operand.vmem [shape: f32[1,256], index: 2, kind: input, shape index: {}]   ;;  %s682_s3 = inlined_call_operand.vmem [shape: f32[2,16,256], index: 3, kind: input, shape index: {}]   ;;  %s683_s4 = inlined_call_operand.vmem [shape: f32[2,16,256], index: 4, kind: output, shape index: {}]  }
   0x1   :  { %s636_s17 = smov 0  }
   0x2 LB: > { %s26_s18 = sadd.s32 1, %s601_s16  ;;  %p543_p0 = scmp.ge.s32.totalorder %s605_s17, 1  ;;  %s605_s17 = sphi %s636_s17, %s14_s17   ;;  %s601_s16 = sphi %s634_s16, %s685_s16   ;;  %s597_s15 = sphi %s632_s15, %s684_s15  }
   0x3   : > { %p28_p1 = scmp.ge.s32.totalorder %s26_s18, 2  ;;  %p220_p2 = scmp.lt.s32.totalorder %s605_s17, 3 }
   0x5   : > { %s687_s18 = smov (%p28_p1, %s26_s18), 0  ;;  %p221_p3 = pnand %p543_p0, %p220_p2 }
   0x6   : > { %p272_p4 = scmp.lt.s32.totalorder (!%p221_p3), %s597_s15, 1 }
   0x7   : > { %224 = sbr.rel (%p221_p3) target bundleno = 78 (0x4e), region = 36 }
   0xc   : > { %s689_s15 = smov (!%p272_p4, %s597_s15), 1  ;;  %v366_v46 = vlaneseq  ;;  %v364_v49 = vld [vmem:[%s680_s1] sm:$0x3] }
   0xd   : > { %s650_s19 = sshll.u32 %s689_s15, 5  ;;  %v380_v51 = vld [vmem:[%s681_s2] sm:$0x3] }
   0xe   : > { %s279_s22 = scalar_lea.vmem %s679_s0, %s650_s19  ;;  %v367_v47 = vshrl.u32 %v366_v46, 7  ;;  %s299_s29 = scalar_lea.vmem %s682_s3, %s650_s19 }
   0xf   : > { %v311_v0 = vld [vmem:[%s279_s22] sm:$0xff]  ;;  %v313_v1 = vld [vmem:[%s279_s22 + $0x10] sm:$0xff]  ;;  %v314_v2 = vld [vmem:[%s279_s22 + $0x18] sm:$0xff]  ;;  %s309_s6 = scalar_lea.vmem %s683_s4, %s650_s19 }
  0x10   : > { %v315_v3 = vadd.f32 %v313_v1, %v311_v0  ;;  %v312_v4 = vld [vmem:[%s279_s22 + $0x8] sm:$0xff]  ;;  %v368_v48 = vsub.s32 0, %v367_v47  ;;  %v372_v50 = vsub.s32 1, %v367_v47 }
  0x11   : > { %v322_v5 = vadd.f32 %v314_v2, %v312_v4 }
  0x12   : > { %v316_v6 = vrot.slane %v315_v3, 4  ;;  %v369_v52 = vrot.slane %v364_v49, %v368_v48  ;;  %v373_v54 = vrot.slane %v364_v49, %v372_v50  ;;  %v385_v57 = vrot.slane %v380_v51, %v368_v48 }
  0x13   : > { %v323_v7 = vrot.slane %v322_v5, 4  ;;  %v389_v60 = vrot.slane %v380_v51, %v372_v50 }
  0x14   : > { %v317_v8 = vadd.f32 %v316_v6, %v315_v3 }
  0x15   : > { %v324_v9 = vadd.f32 %v323_v7, %v322_v5  ;;  %v397_v5 = vld [vmem:[%s299_s29 + $0x8] sm:$0xff]  ;;  %v399_v7 = vld [vmem:[%s299_s29 + $0x18] sm:$0xff] }
  0x16   : > { %v318_v10 = vrot.slane %v317_v8, 2 }
  0x17   : > { %v325_v11 = vrot.slane %v324_v9, 2 }
  0x18   : > { %v319_v12 = vadd.f32 %v318_v10, %v317_v8 }
  0x19   : > { %v326_v13 = vadd.f32 %v325_v11, %v324_v9 }
  0x1a   : > { %v320_v14 = vrot.slane %v319_v12, 1 }
  0x1b   : > { %v327_v15 = vrot.slane %v326_v13, 1 }
  0x1c   : > { %v321_v16 = vadd.f32 %v320_v14, %v319_v12 }
  0x1d   : > { %v328_v17 = vadd.f32 %v327_v15, %v326_v13 }
  0x1e   : > { %v330_v18 = vmul.f32 0.0625, %v321_v16 }
  0x1f   : > { %v331_v19 = vmul.f32 0.0625, %v328_v17 }
  0x20   : > { %v332_v20 = vsub.f32 %v311_v0, %v330_v18  ;;  %v334_v21 = vsub.f32 %v313_v1, %v330_v18  ;;  %v396_v0 = vld [vmem:[%s299_s29] sm:$0xff] }
  0x21   : > { %v333_v22 = vsub.f32 %v312_v4, %v331_v19  ;;  %v335_v23 = vsub.f32 %v314_v2, %v331_v19  ;;  %v398_v2 = vld [vmem:[%s299_s29 + $0x10] sm:$0xff] }
  0x22   : > { %v336_v24 = vmul.f32 %v332_v20, %v332_v20  ;;  %v338_v25 = vmul.f32 %v334_v21, %v334_v21 }
  0x23   : > { %v337_v26 = vmul.f32 %v333_v22, %v333_v22  ;;  %v339_v27 = vmul.f32 %v335_v23, %v335_v23 }
  0x24   : > { %v340_v28 = vadd.f32 %v338_v25, %v336_v24 }
  0x25   : > { %v347_v29 = vadd.f32 %v339_v27, %v337_v26 }
  0x26   : > { %v341_v30 = vrot.slane %v340_v28, 4 }
  0x27   : > { %v348_v31 = vrot.slane %v347_v29, 4 }
  0x28   : > { %v342_v32 = vadd.f32 %v341_v30, %v340_v28 }
  0x29   : > { %v349_v33 = vadd.f32 %v348_v31, %v347_v29 }
  0x2a   : > { %v343_v34 = vrot.slane %v342_v32, 2 }
  0x2b   : > { %v350_v35 = vrot.slane %v349_v33, 2 }
  0x2c   : > { %v344_v36 = vadd.f32 %v343_v34, %v342_v32 }
  0x2d   : > { %v351_v37 = vadd.f32 %v350_v35, %v349_v33 }
  0x2e   : > { %v345_v38 = vrot.slane %v344_v36, 1 }
  0x2f   : > { %v352_v39 = vrot.slane %v351_v37, 1 }
  0x30   : > { %v346_v40 = vadd.f32 %v345_v38, %v344_v36 }
  0x31   : > { %v353_v41 = vadd.f32 %v352_v39, %v351_v37 }
  0x32   : > { %v354_v42 = vmul.f32 0.0625, %v346_v40 }
  0x33   : > { %v355_v43 = vmul.f32 0.0625, %v353_v41 }
  0x34   : > { %v356_v44 = vadd.f32 1e-05, %v354_v42 }
  0x35   : > { %v357_v45 = vadd.f32 1e-05, %v355_v43 }
  0x36   : > { %579 = vrsqrt.f32 %v356_v44 }
  0x37   : > { %581 = vrsqrt.f32 %v357_v45 }
  0x43   : > { %v580_v53 = vpop.eup %579 }
  0x44   : > { %v582_v55 = vpop.eup %581  ;;  %v360_v56 = vmul.f32 %v580_v53, %v332_v20  ;;  %v362_v58 = vmul.f32 %v580_v53, %v334_v21 }
  0x45   : > { %v361_v59 = vmul.f32 %v582_v55, %v333_v22  ;;  %v363_v61 = vmul.f32 %v582_v55, %v335_v23 }
  0x46   : > { %v376_v62 = vmul.f32 %v369_v52, %v360_v56  ;;  %v378_v63 = vmul.f32 %v369_v52, %v362_v58 }
  0x47   : > { %v377_v1 = vmul.f32 %v373_v54, %v361_v59  ;;  %v379_v3 = vmul.f32 %v373_v54, %v363_v61 }
  0x48   : > { %v392_v4 = vadd.f32 %v385_v57, %v376_v62  ;;  %v394_v6 = vadd.f32 %v385_v57, %v378_v63 }
  0x49   : > { %v393_v8 = vadd.f32 %v389_v60, %v377_v1  ;;  %v395_v9 = vadd.f32 %v389_v60, %v379_v3 }
  0x4a   : > { %v400_v10 = vadd.f32 %v396_v0, %v392_v4  ;;  %v402_v11 = vadd.f32 %v398_v2, %v394_v6 }
  0x4b   : > { %v401_v12 = vadd.f32 %v397_v5, %v393_v8  ;;  %v403_v13 = vadd.f32 %v399_v7, %v395_v9 }
  0x4c   : > { %404 = vst [vmem:[%s309_s6] sm:$0xff] %v400_v10  ;;  %406 = vst [vmem:[%s309_s6 + $0x10] sm:$0xff] %v402_v11 }
  0x4d   : > { %405 = vst [vmem:[%s309_s6 + $0x8] sm:$0xff] %v401_v12  ;;  %407 = vst [vmem:[%s309_s6 + $0x18] sm:$0xff] %v403_v13 }
  0x4e PF: > { %s14_s17 = sadd.s32 1, %s605_s17   ;;  %s684_s15 = smov %s601_s16 }
  0x4f   : > { %p11_p5 = scmp.ge.s32.totalorder %s14_s17, 4   ;;  %s685_s16 = smov %s687_s18 }
  0x51   :  { %13 = sbr.rel (!%p11_p5) target bundleno = 2 (0x2), region = 75 }

// kernel: generator_forward.58
= control target key start
LH: loop header
LB: loop body
LE: loop exit
PB: predicated region body
PF: predicated region fallthrough
CT: control target
= control target key end

     0   :  { %s1182_s12 = smov 0   ;;  %s1184_s13 = smov 0   ;;  %s1354_s0 = inlined_call_operand.vmem [shape: bf16[128,2304], index: 0, kind: input, shape index: {}]   ;;  %s1355_s1 = inlined_call_operand.vmem [shape: bf16[2304,128], index: 1, kind: input, shape index: {}]   ;;  %s1356_s2 = inlined_call_operand.vmem [shape: f32[1,128], index: 2, kind: input, shape index: {}]   ;;  %s1357_s3 = inlined_call_operand.vmem [shape: f32[128,128], index: 3, kind: output, shape index: {}]  }
   0x1   :  { %s1186_s14 = smov 0   ;;  %s1188_s15 = smov 0  }
   0x2   :  { %s1190_s16 = smov 0  }
   0x3 LB: > { %s25_s17 = sadd.s32 1, %s1155_s15  ;;  %p48_p1 = scmp.ne.s32.totalorder %s1147_s13, %s1143_s12  ;;  %s1159_s16 = sphi %s1190_s16, %s13_s16   ;;  %s1155_s15 = sphi %s1188_s15, %s1361_s15   ;;  %s1151_s14 = sphi %s1186_s14, %s1360_s14   ;;  %s1147_s13 = sphi %s1184_s13, %s1359_s13   ;;  %s1143_s12 = sphi %s1182_s12, %s1358_s12  }
   0x4   : > { %p26_p0 = scmp.ge.s32.totalorder %s25_s17, 9  ;;  %p49_p2 = scmp.eq.s32.totalorder %s1159_s16, 0 }
   0x5   : > { %s41_s19 = sadd.s32 1, %s1147_s13  ;;  %p912_p5 = scmp.ge.s32.totalorder %s1159_s16, 9 }
   0x6   : > { %s1363_s17 = smov (%p26_p0, %s25_s17), 0  ;;  %p50_p3 = por %p49_p2, %p48_p1 }
   0x7   : > { %s37_s18 = ssub.s32 %s1155_s15, %s1363_s17  ;;  %162 = sbr.rel (%p912_p5) target bundleno = 24 (0x18), region = 20 }
   0x8   : > { %p39_p4 = scmp.eq.s32.totalorder %s37_s18, 0 }
   0xa   : > { %s1217_s20 = scalar_select %p39_p4, %s1147_s13, %s41_s19  }
   0xc   : > { %165 = sbr.rel (!%p50_p3) target bundleno = 24 (0x18), region = 24  ;;  %s167_s21 = sand.u32 (%p50_p3), 1, %s1147_s13  }
   0xd   : > { %s959_s22 = sshll.u32 (%p50_p3), %s1155_s15, 3  ;;  %s913_s23 = sshll.u32 (%p50_p3), %s167_s21, 7 }
   0xe   : > { %s1225_s26 = scalar_lea.vmem (%p50_p3), %s1354_s0, %s959_s22  ;;  %s169_s27 = scalar_lea.vmem (%p50_p3), [#allocation3], %s913_s23 }
   0xf   : > { %v234_v0 = vld [vmem:[%s1225_s26] sm:$0xff] (%p50_p3)  ;;  %v236_v1 = vld [vmem:[%s1225_s26 + $0x48] sm:$0xff] (%p50_p3)  ;;  %v238_v2 = vld [vmem:[%s1225_s26 + $0x90] sm:$0xff] (%p50_p3) }
  0x10   : > { %235 = vst [vmem:[%s169_s27] sm:$0xff] (%p50_p3), %v234_v0  ;;  %237 = vst [vmem:[%s169_s27 + $0x8] sm:$0xff] (%p50_p3), %v236_v1  ;;  %v240_v3 = vld [vmem:[%s1225_s26 + $0xd8] sm:$0xff] (%p50_p3)  ;;  %v242_v4 = vld [vmem:[%s1225_s26 + $0x120] sm:$0xff] (%p50_p3) }
  0x11   : > { %239 = vst [vmem:[%s169_s27 + $0x10] sm:$0xff] %v238_v2  ;;  %v244_v5 = vld [vmem:[%s1225_s26 + $0x168] sm:$0xff]  ;;  %241 = vst [vmem:[%s169_s27 + $0x18] sm:$0xff] %v240_v3  ;;  %v246_v6 = vld [vmem:[%s1225_s26 + $0x1b0] sm:$0xff] }
  0x12   : > { %243 = vst [vmem:[%s169_s27 + $0x20] sm:$0xff] %v242_v4  ;;  %245 = vst [vmem:[%s169_s27 + $0x28] sm:$0xff] %v244_v5  ;;  %v248_v7 = vld [vmem:[%s1225_s26 + $0x1f8] sm:$0xff]  ;;  %v250_v8 = vld [vmem:[%s1225_s26 + $0x240] sm:$0xff] }
  0x13   : > { %247 = vst [vmem:[%s169_s27 + $0x30] sm:$0xff] %v246_v6  ;;  %249 = vst [vmem:[%s169_s27 + $0x38] sm:$0xff] %v248_v7  ;;  %v252_v9 = vld [vmem:[%s1225_s26 + $0x288] sm:$0xff]  ;;  %v254_v10 = vld [vmem:[%s1225_s26 + $0x2d0] sm:$0xff] }
  0x14   : > { %251 = vst [vmem:[%s169_s27 + $0x40] sm:$0xff] %v250_v8  ;;  %v256_v11 = vld [vmem:[%s1225_s26 + $0x318] sm:$0xff]  ;;  %253 = vst [vmem:[%s169_s27 + $0x48] sm:$0xff] %v252_v9  ;;  %v258_v12 = vld [vmem:[%s1225_s26 + $0x360] sm:$0xff] }
  0x15   : > { %255 = vst [vmem:[%s169_s27 + $0x50] sm:$0xff] %v254_v10  ;;  %257 = vst [vmem:[%s169_s27 + $0x58] sm:$0xff] %v256_v11  ;;  %v260_v13 = vld [vmem:[%s1225_s26 + $0x3a8] sm:$0xff]  ;;  %v262_v14 = vld [vmem:[%s1225_s26 + $0x3f0] sm:$0xff] }
  0x16   : > { %259 = vst [vmem:[%s169_s27 + $0x60] sm:$0xff] %v258_v12  ;;  %261 = vst [vmem:[%s169_s27 + $0x68] sm:$0xff] %v260_v13  ;;  %v264_v15 = vld [vmem:[%s1225_s26 + $0x438] sm:$0xff] }
  0x17   : > { %263 = vst [vmem:[%s169_s27 + $0x70] sm:$0xff] %v262_v14  ;;  %265 = vst [vmem:[%s169_s27 + $0x78] sm:$0xff] %v264_v15 }
  0x18 PF: > { %p916_p6 = scmp.ge.s32.totalorder %s1159_s16, 1  ;;  %p282_p7 = scmp.lt.s32.totalorder %s1159_s16, 10 }
  0x1a   : > { %p283_p8 = pnand %p916_p6, %p282_p7 }
  0x1b   : > { %s289_s28 = sand.u32 (!%p283_p8), 1, %s1143_s12   ;;  %s918_s29 = sshll.u32 (!%p283_p8), %s1151_s14, 5 }
  0x1c   : > { %286 = sbr.rel (%p283_p8) target bundleno = 319 (0x13f), region = 66  ;;  %s917_s30 = sshll.u32 (!%p283_p8), %s289_s28, 7 }
  0x1d   : > { %p329_p9 = scmp.lt.s32.totalorder (!%p283_p8), %s918_s29, 287  ;;  %s1252_s8 = scalar_lea.vmem (!%p283_p8), [#allocation3], %s917_s30 }
  0x1e   : > { %p920_p10 = scmp.ne.s32.totalorder (!%p283_p8), %s1151_s14, 0 }
  0x21   : > { %s1365_s29 = smov (!%p329_p9, %s918_s29), 287  ;;  %353 = sbr.rel (%p920_p10) target bundleno = 47 (0x2f), region = 74 }
  0x22   : > { %s919_s4 = sshll.u32 %s1365_s29, 2 }
  0x23   : > { %s1250_s7 = scalar_lea.vmem %s1355_s1, %s919_s4 }
  0x26   : > { %v1161_v16 = vmov 0.0  }
  0x27   : > { %354 = vst [vmem:[#allocation2 + $0x30] sm:$0xff] %v1161_v16  ;;  %355 = vst [vmem:[#allocation2] sm:$0xff] %v1161_v16 }
  0x28   : > { %356 = vst [vmem:[#allocation2 + $0x58] sm:$0xff] %v1161_v16  ;;  %357 = vst [vmem:[#allocation2 + $0x18] sm:$0xff] %v1161_v16 }
  0x29   : > { %358 = vst [vmem:[#allocation2 + $0x50] sm:$0xff] %v1161_v16  ;;  %359 = vst [vmem:[#allocation2 + $0x68] sm:$0xff] %v1161_v16 }
  0x2a   : > { %360 = vst [vmem:[#allocation2 + $0x8] sm:$0xff] %v1161_v16  ;;  %361 = vst [vmem:[#allocation2 + $0x48] sm:$0xff] %v1161_v16 }
  0x2b   : > { %362 = vst [vmem:[#allocation2 + $0x40] sm:$0xff] %v1161_v16  ;;  %363 = vst [vmem:[#allocation2 + $0x20] sm:$0xff] %v1161_v16 }
  0x2c   : > { %364 = vst [vmem:[#allocation2 + $0x10] sm:$0xff] %v1161_v16  ;;  %365 = vst [vmem:[#allocation2 + $0x38] sm:$0xff] %v1161_v16 }
  0x2d   : > { %366 = vst [vmem:[#allocation2 + $0x60] sm:$0xff] %v1161_v16  ;;  %367 = vst [vmem:[#allocation2 + $0x70] sm:$0xff] %v1161_v16 }
  0x2e   : > { %368 = vst [vmem:[#allocation2 + $0x78] sm:$0xff] %v1161_v16  ;;  %369 = vst [vmem:[#allocation2 + $0x28] sm:$0xff] %v1161_v16 }
  0x2f PF: > { %v1081_v17 = vld [vmem:[%s1250_s7 + $0x78] sm:$0xff]   ;;  %v1083_v19 = vld [vmem:[%s1250_s7 + $0x70] sm:$0xff]   ;;  %v1085_v21 = vld [vmem:[%s1250_s7 + $0x68] sm:$0xff]   ;;  %p953_p11 = scmp.ne.s32.totalorder %s1151_s14, 8 }
  0x30   : > { %v1082_v18 = vld [vmem:[%s1250_s7 + $0x38] sm:$0xff]   ;;  %960 = vmatprep.subr.bf16.mxu0 %v1081_v17  ;;  %1024 = vmatprep.subr.bf16.mxu1 %v1081_v17  ;;  %v1084_v20 = vld [vmem:[%s1250_s7 + $0x30] sm:$0xff]   ;;  %v1086_v22 = vld [vmem:[%s1250_s7 + $0x28] sm:$0xff]  }
  0x31   : > { %961 = vmatpush3.bf16.msra.mxu0 %v1082_v18  ;;  %1032 = vmatpush3.bf16.msra.mxu1 %v1082_v18  ;;  %v1087_v23 = vld [vmem:[%s1250_s7 + $0x60] sm:$0xff]   ;;  %v1089_v25 = vld [vmem:[%s1250_s7 + $0x58] sm:$0xff]   ;;  %v1091_v27 = vld [vmem:[%s1250_s7 + $0x50] sm:$0xff]  }
  0x32   : > { %962 = vmatprep.subr.bf16.mxu0 %v1083_v19  ;;  %1025 = vmatprep.subr.bf16.mxu1 %v1083_v19  ;;  %v1088_v24 = vld [vmem:[%s1250_s7 + $0x20] sm:$0xff]   ;;  %v1090_v26 = vld [vmem:[%s1250_s7 + $0x18] sm:$0xff]   ;;  %v1092_v30 = vld [vmem:[%s1250_s7 + $0x10] sm:$0xff]  }
  0x33   : > { %v1099_v28 = vld [vmem:[%s1252_s8 + $0x4] ss:$8 sps:$4 sm:$0xff]   ;;  %v1097_v35 = vld [vmem:[%s1252_s8] ss:$8 sps:$4 sm:$0xff]   ;;  %v1103_v37 = vld [vmem:[%s1252_s8 + $0x14] ss:$8 sps:$4 sm:$0xff]  }
  0x34   : > { %v1102_v29 = vld [vmem:[%s1252_s8 + $0x44] ss:$8 sps:$4 sm:$0xff]   ;;  %642 = vmatprep.mubr.bf16.mxu0 %v1099_v28  ;;  %v1100_v36 = vld [vmem:[%s1252_s8 + $0x40] ss:$8 sps:$4 sm:$0xff]   ;;  %v1105_v38 = vld [vmem:[%s1252_s8 + $0x54] ss:$8 sps:$4 sm:$0xff]  }
  0x35   : > { %963 = vmatpush3.bf16.msra.mxu0 %v1084_v20  ;;  %1033 = vmatpush3.bf16.msra.mxu1 %v1084_v20  ;;  %v1093_v31 = vld [vmem:[%s1250_s7 + $0x48] sm:$0xff]   ;;  %v1095_v33 = vld [vmem:[%s1250_s7 + $0x40] sm:$0xff]   ;;  %v1107_v39 = vld [vmem:[%s1252_s8 + $0x10] ss:$8 sps:$4 sm:$0xff]  }
  0x36   : > { %964 = vmatprep.subr.bf16.mxu0 %v1085_v21  ;;  %1026 = vmatprep.subr.bf16.mxu1 %v1085_v21  ;;  %v1094_v32 = vld [vmem:[%s1250_s7 + $0x8] sm:$0xff]   ;;  %v1096_v34 = vld [vmem:[%s1250_s7] sm:$0xff]   ;;  %v1108_v40 = vld [vmem:[%s1252_s8 + $0x50] ss:$8 sps:$4 sm:$0xff]  }
  0x37   : > { %674 = vmatprep.mubr.bf16.mxu1 %v1102_v29  ;;  %v1109_v41 = vld [vmem:[%s1252_s8 + $0x24] ss:$8 sps:$4 sm:$0xff]   ;;  %v1113_v43 = vld [vmem:[%s1252_s8 + $0x20] ss:$8 sps:$4 sm:$0xff]   ;;  %v1115_v45 = vld [vmem:[%s1252_s8 + $0x34] ss:$8 sps:$4 sm:$0xff]  }
  0x38   : > { %v1111_v42 = vld [vmem:[%s1252_s8 + $0x64] ss:$8 sps:$4 sm:$0xff]   ;;  %v1114_v44 = vld [vmem:[%s1252_s8 + $0x60] ss:$8 sps:$4 sm:$0xff]   ;;  %v1117_v46 = vld [vmem:[%s1252_s8 + $0x74] ss:$8 sps:$4 sm:$0xff]  }
  0x39   : > { %965 = vmatpush3.bf16.msra.mxu0 %v1086_v22  ;;  %1034 = vmatpush3.bf16.msra.mxu1 %v1086_v22  ;;  %v1119_v47 = vld [vmem:[%s1252_s8 + $0x30] ss:$8 sps:$4 sm:$0xff]   ;;  %v378_v53 = vld [vmem:[#allocation2 + $0x40] sm:$0xff] }
  0x3a   : > { %966 = vmatprep.subr.bf16.mxu0 %v1087_v23  ;;  %1027 = vmatprep.subr.bf16.mxu1 %v1087_v23  ;;  %v1120_v48 = vld [vmem:[%s1252_s8 + $0x70] ss:$8 sps:$4 sm:$0xff]   ;;  %v371_v61 = vld [vmem:[#allocation2] sm:$0xff] }
  0x3b   : > { %v370_v51 = vld [vmem:[#allocation2 + $0x30] sm:$0xff]  ;;  %v379_v63 = vld [vmem:[#allocation2 + $0x20] sm:$0xff]  ;;  %v372_v7 = vld [vmem:[#allocation2 + $0x58] sm:$0xff] }
  0x3c   : > { %v380_v9 = vld [vmem:[#allocation2 + $0x10] sm:$0xff]  ;;  %v373_v17 = vld [vmem:[#allocation2 + $0x18] sm:$0xff]  ;;  %v382_v29 = vld [vmem:[#allocation2 + $0x60] sm:$0xff] }
  0x3d   : > { %967 = vmatpush3.bf16.msra.mxu0 %v1088_v24  ;;  %1035 = vmatpush3.bf16.msra.mxu1 %v1088_v24  ;;  %v381_v19 = vld [vmem:[#allocation2 + $0x38] sm:$0xff] }
  0x3e   : > { %968 = vmatprep.subr.bf16.mxu0 %v1089_v25  ;;  %1028 = vmatprep.subr.bf16.mxu1 %v1089_v25 }
  0x41   : > { %969 = vmatpush3.bf16.msra.mxu0 %v1090_v26  ;;  %1036 = vmatpush3.bf16.msra.mxu1 %v1090_v26 }
  0x42   : > { %970 = vmatprep.subr.bf16.mxu0 %v1091_v27  ;;  %1029 = vmatprep.subr.bf16.mxu1 %v1091_v27  ;;  %v374_v27 = vld [vmem:[#allocation2 + $0x50] sm:$0xff] }
  0x45   : > { %971 = vmatpush3.bf16.msra.mxu0 %v1092_v30  ;;  %1037 = vmatpush3.bf16.msra.mxu1 %v1092_v30 }
  0x46   : > { %972 = vmatprep.subr.bf16.mxu0 %v1093_v31  ;;  %1030 = vmatprep.subr.bf16.mxu1 %v1093_v31 }
  0x49   : > { %973 = vmatpush3.bf16.msra.mxu0 %v1094_v32  ;;  %1038 = vmatpush3.bf16.msra.mxu1 %v1094_v32 }
  0x4a   : > { %974 = vmatprep.subr.bf16.mxu0 %v1095_v33  ;;  %1031 = vmatprep.subr.bf16.mxu1 %v1095_v33 }
  0x4d   : > { %975 = vmatpush3.bf16.msra.mxu0 %v1096_v34  ;;  %1039 = vmatpush3.bf16.msra.mxu1 %v1096_v34 }
  0x50   : > { %643 = vmatmul.mubr.bf16.vlgmr.msra.gmra.mxu0 %v1097_v35  ;;  %675 = vmatmul.mubr.bf16.vlgmr.msra.gmra.mxu1 %v1100_v36 }
  0x51   : > { %650 = vmatprep.mubr.bf16.mxu0 %v1103_v37  ;;  %682 = vmatprep.mubr.bf16.mxu1 %v1105_v38  ;;  %v375_v37 = vld [vmem:[#allocation2 + $0x68] sm:$0xff] }
  0x58   : > { %651 = vmatmul.mubr.bf16.gmra.mxu0 %v1107_v39  ;;  %683 = vmatmul.mubr.bf16.gmra.mxu1 %v1108_v40  ;;  %v383_v39 = vld [vmem:[#allocation2 + $0x70] sm:$0xff] }
  0x59   : > { %658 = vmatprep.mubr.bf16.mxu0 %v1109_v41  ;;  %690 = vmatprep.mubr.bf16.mxu1 %v1111_v42 }
  0x60   : > { %659 = vmatmul.mubr.bf16.gmra.mxu0 %v1113_v43  ;;  %691 = vmatmul.mubr.bf16.gmra.mxu1 %v1114_v44 }
  0x61   : > { %666 = vmatprep.mubr.bf16.mxu0 %v1115_v45  ;;  %698 = vmatprep.mubr.bf16.mxu1 %v1117_v46 }
  0x68   : > { %667 = vmatmul.mubr.bf16.gmra.mxu0 %v1119_v47  ;;  %699 = vmatmul.mubr.bf16.gmra.mxu1 %v1120_v48  ;;  %v376_v47 = vld [vmem:[#allocation2 + $0x8] sm:$0xff] }
 0x110   : > { %v976_v49 = vpop.f32.mrf.mxu0  ;;  %v1000_v50 = vpop.f32.mrf.mxu1 }
 0x112   : > { %v977_v52 = vpop.f32.mrf.mxu0  ;;  %v1001_v54 = vpop.f32.mrf.mxu1 }
 0x113   : > { %v978_v55 = vadd.f32 %v977_v52, %v976_v49  ;;  %v1002_v56 = vadd.f32 %v1001_v54, %v1000_v50  ;;  %v384_v49 = vld [vmem:[#allocation2 + $0x78] sm:$0xff] }
 0x114   : > { %v979_v57 = vpop.f32.mrf.mxu0  ;;  %v1003_v58 = vpop.f32.mrf.mxu1 }
 0x115   : > { %v707_v59 = vadd.f32 %v978_v55, %v370_v51  ;;  %v715_v60 = vadd.f32 %v1002_v56, %v378_v53 }
 0x116   : > { %v980_v62 = vpop.f32.mrf.mxu0  ;;  %v1004_v0 = vpop.f32.mrf.mxu1 }
 0x117   : > { %723 = vst [vmem:[#allocation2 + $0x30] sm:$0xff] %v707_v59  ;;  %731 = vst [vmem:[#allocation2 + $0x40] sm:$0xff] %v715_v60  ;;  %v981_v1 = vadd.f32 %v980_v62, %v979_v57  ;;  %v1005_v2 = vadd.f32 %v1004_v0, %v1003_v58  ;;  %v377_v57 = vld [vmem:[#allocation2 + $0x48] sm:$0xff] }
 0x118   : > { %v982_v3 = vpop.f32.mrf.mxu0  ;;  %v1006_v4 = vpop.f32.mrf.mxu1  ;;  %v385_v59 = vld [vmem:[#allocation2 + $0x28] sm:$0xff] }
 0x119   : > { %v708_v5 = vadd.f32 %v981_v1, %v371_v61  ;;  %v716_v6 = vadd.f32 %v1005_v2, %v379_v63 }
 0x11a   : > { %v983_v8 = vpop.f32.mrf.mxu0  ;;  %v1007_v10 = vpop.f32.mrf.mxu1 }
 0x11b   : > { %724 = vst [vmem:[#allocation2] sm:$0xff] %v708_v5  ;;  %732 = vst [vmem:[#allocation2 + $0x20] sm:$0xff] %v716_v6  ;;  %v984_v11 = vadd.f32 %v983_v8, %v982_v3  ;;  %v1008_v12 = vadd.f32 %v1007_v10, %v1006_v4 }
 0x11c   : > { %v985_v13 = vpop.f32.mrf.mxu0  ;;  %v1009_v14 = vpop.f32.mrf.mxu1 }
 0x11d   : > { %v709_v15 = vadd.f32 %v984_v11, %v372_v7  ;;  %v717_v16 = vadd.f32 %v1008_v12, %v380_v9 }
 0x11e   : > { %v986_v18 = vpop.f32.mrf.mxu0  ;;  %v1010_v20 = vpop.f32.mrf.mxu1 }
 0x11f   : > { %725 = vst [vmem:[#allocation2 + $0x58] sm:$0xff] %v709_v15  ;;  %733 = vst [vmem:[#allocation2 + $0x10] sm:$0xff] %v717_v16  ;;  %v987_v21 = vadd.f32 %v986_v18, %v985_v13  ;;  %v1011_v22 = vadd.f32 %v1010_v20, %v1009_v14 }
 0x120   : > { %v988_v23 = vpop.f32.mrf.mxu0  ;;  %v1012_v24 = vpop.f32.mrf.mxu1 }
 0x121   : > { %v710_v25 = vadd.f32 %v987_v21, %v373_v17  ;;  %v718_v26 = vadd.f32 %v1011_v22, %v381_v19 }
 0x122   : > { %v989_v28 = vpop.f32.mrf.mxu0  ;;  %v1013_v30 = vpop.f32.mrf.mxu1 }
 0x123   : > { %726 = vst [vmem:[#allocation2 + $0x18] sm:$0xff] %v710_v25  ;;  %734 = vst [vmem:[#allocation2 + $0x38] sm:$0xff] %v718_v26  ;;  %v990_v31 = vadd.f32 %v989_v28, %v988_v23  ;;  %v1014_v32 = vadd.f32 %v1013_v30, %v1012_v24 }
 0x124   : > { %v991_v33 = vpop.f32.mrf.mxu0  ;;  %v1015_v34 = vpop.f32.mrf.mxu1 }
 0x125   : > { %v711_v35 = vadd.f32 %v990_v31, %v374_v27  ;;  %v719_v36 = vadd.f32 %v1014_v32, %v382_v29 }
 0x126   : > { %v992_v38 = vpop.f32.mrf.mxu0  ;;  %v1016_v40 = vpop.f32.mrf.mxu1 }
 0x127   : > { %727 = vst [vmem:[#allocation2 + $0x50] sm:$0xff] %v711_v35  ;;  %735 = vst [vmem:[#allocation2 + $0x60] sm:$0xff] %v719_v36  ;;  %v993_v41 = vadd.f32 %v992_v38, %v991_v33  ;;  %v1017_v42 = vadd.f32 %v1016_v40, %v1015_v34 }
 0x128   : > { %v994_v43 = vpop.f32.mrf.mxu0  ;;  %v1018_v44 = vpop.f32.mrf.mxu1 }
 0x129   : > { %v712_v45 = vadd.f32 %v993_v41, %v375_v37  ;;  %v720_v46 = vadd.f32 %v1017_v42, %v383_v39 }
 0x12a   : > { %v995_v48 = vpop.f32.mrf.mxu0  ;;  %v1019_v50 = vpop.f32.mrf.mxu1 }
 0x12b   : > { %728 = vst [vmem:[#allocation2 + $0x68] sm:$0xff] %v712_v45  ;;  %736 = vst [vmem:[#allocation2 + $0x70] sm:$0xff] %v720_v46  ;;  %v996_v51 = vadd.f32 %v995_v48, %v994_v43  ;;  %v1020_v52 = vadd.f32 %v1019_v50, %v1018_v44 }
 0x12c   : > { %v997_v53 = vpop.f32.mrf.mxu0  ;;  %v1021_v54 = vpop.f32.mrf.mxu1 }
 0x12d   : > { %v713_v55 = vadd.f32 %v996_v51, %v376_v47  ;;  %v721_v56 = vadd.f32 %v1020_v52, %v384_v49 }
 0x12e   : > { %v998_v58 = vpop.f32.mrf.mxu0  ;;  %v1022_v60 = vpop.f32.mrf.mxu1 }
 0x12f   : > { %729 = vst [vmem:[#allocation2 + $0x8] sm:$0xff] %v713_v55  ;;  %737 = vst [vmem:[#allocation2 + $0x78] sm:$0xff] %v721_v56  ;;  %v999_v61 = vadd.f32 %v998_v58, %v997_v53  ;;  %v1023_v62 = vadd.f32 %v1022_v60, %v1021_v54  ;;  %742 = sbr.rel (%p953_p11) target bundleno = 319 (0x13f), region = 78 }
 0x131   : > { %v714_v63 = vadd.f32 %v999_v61, %v377_v57  ;;  %v722_v0 = vadd.f32 %v1023_v62, %v385_v59 }
 0x133   : > { %730 = vst [vmem:[#allocation2 + $0x48] sm:$0xff] %v714_v63  ;;  %738 = vst [vmem:[#allocation2 + $0x28] sm:$0xff] %v722_v0 }
 0x134   : > { %v743_v1 = vld [vmem:[#allocation2 + $0x30] sm:$0xff]  ;;  %v954_v2 = vld [vmem:[%s1356_s2] ss:$0 sm:$0xff]  ;;  %v745_v6 = vld [vmem:[#allocation2 + $0x58] sm:$0xff] }
 0x135   : > { %v744_v3 = vld [vmem:[#allocation2] sm:$0xff]  ;;  %v766_v4 = vadd.f32 %v954_v2, %v743_v1  ;;  %v746_v7 = vld [vmem:[#allocation2 + $0x18] sm:$0xff]  ;;  %v747_v8 = vld [vmem:[#allocation2 + $0x50] sm:$0xff]  ;;  %v768_v9 = vadd.f32 %v954_v2, %v745_v6 }
 0x136   : > { %v767_v5 = vadd.f32 %v954_v2, %v744_v3  ;;  %v769_v10 = vadd.f32 %v954_v2, %v746_v7  ;;  %v770_v11 = vadd.f32 %v954_v2, %v747_v8  ;;  %v748_v12 = vld [vmem:[#allocation2 + $0x68] sm:$0xff]  ;;  %v751_v18 = vld [vmem:[#allocation2 + $0x40] sm:$0xff]  ;;  %v753_v20 = vld [vmem:[#allocation2 + $0x10] sm:$0xff] }
 0x137   : > { %v749_v13 = vld [vmem:[#allocation2 + $0x8] sm:$0xff]  ;;  %782 = vst [vmem:[%s1357_s3] sm:$0xff] %v766_v4  ;;  %v771_v15 = vadd.f32 %v954_v2, %v748_v12  ;;  %v752_v19 = vld [vmem:[#allocation2 + $0x20] sm:$0xff]  ;;  %784 = vst [vmem:[%s1357_s3 + $0x10] sm:$0xff] %v768_v9  ;;  %v774_v21 = vadd.f32 %v954_v2, %v751_v18  ;;  %v776_v23 = vadd.f32 %v954_v2, %v753_v20 }
 0x138   : > { %783 = vst [vmem:[%s1357_s3 + $0x8] sm:$0xff] %v767_v5  ;;  %v772_v16 = vadd.f32 %v954_v2, %v749_v13  ;;  %785 = vst [vmem:[%s1357_s3 + $0x18] sm:$0xff] %v769_v10  ;;  %v775_v22 = vadd.f32 %v954_v2, %v752_v19  ;;  %v754_v24 = vld [vmem:[#allocation2 + $0x38] sm:$0xff]  ;;  %v755_v25 = vld [vmem:[#allocation2 + $0x60] sm:$0xff] }
 0x139   : > { %786 = vst [vmem:[%s1357_s3 + $0x20] sm:$0xff] %v770_v11  ;;  %v756_v26 = vld [vmem:[#allocation2 + $0x70] sm:$0xff]  ;;  %787 = vst [vmem:[%s1357_s3 + $0x28] sm:$0xff] %v771_v15  ;;  %v777_v27 = vadd.f32 %v954_v2, %v754_v24  ;;  %v778_v28 = vadd.f32 %v954_v2, %v755_v25  ;;  %v757_v30 = vld [vmem:[#allocation2 + $0x78] sm:$0xff] }
 0x13a   : > { %v750_v14 = vld [vmem:[#allocation2 + $0x48] sm:$0xff]  ;;  %788 = vst [vmem:[%s1357_s3 + $0x30] sm:$0xff] %v772_v16  ;;  %v779_v29 = vadd.f32 %v954_v2, %v756_v26  ;;  %790 = vst [vmem:[%s1357_s3 + $0x40] sm:$0xff] %v774_v21  ;;  %v780_v32 = vadd.f32 %v954_v2, %v757_v30 }
 0x13b   : > { %v773_v17 = vadd.f32 %v954_v2, %v750_v14  ;;  %v758_v31 = vld [vmem:[#allocation2 + $0x28] sm:$0xff]  ;;  %791 = vst [vmem:[%s1357_s3 + $0x48] sm:$0xff] %v775_v22  ;;  %792 = vst [vmem:[%s1357_s3 + $0x50] sm:$0xff] %v776_v23 }
 0x13c   : > { %v781_v33 = vadd.f32 %v954_v2, %v758_v31  ;;  %793 = vst [vmem:[%s1357_s3 + $0x58] sm:$0xff] %v777_v27  ;;  %794 = vst [vmem:[%s1357_s3 + $0x60] sm:$0xff] %v778_v28 }
 0x13d   : > { %789 = vst [vmem:[%s1357_s3 + $0x38] sm:$0xff] %v773_v17  ;;  %795 = vst [vmem:[%s1357_s3 + $0x68] sm:$0xff] %v779_v29 }
 0x13e   : > { %796 = vst [vmem:[%s1357_s3 + $0x70] sm:$0xff] %v780_v32  ;;  %797 = vst [vmem:[%s1357_s3 + $0x78] sm:$0xff] %v781_v33 }
 0x13f PF: > { %s13_s16 = sadd.s32 1, %s1159_s16   ;;  %s1358_s12 = smov %s1147_s13 }
 0x140   : > { %p10_p12 = scmp.ge.s32.totalorder %s13_s16, 11   ;;  %s1359_s13 = smov %s1217_s20 }
 0x141   : > { %s1360_s14 = smov %s1155_s15  ;;  %s1361_s15 = smov %s1363_s17 }
 0x142   :  { %12 = sbr.rel (!%p10_p12) target bundleno = 3 (0x3), region = 119 }

// kernel: generator_forward.60
= control target key start
LH: loop header
LB: loop body
LE: loop exit
PB: predicated region body
PF: predicated region fallthrough
CT: control target
= control target key end

     0   :  { %s238_s0 = inlined_call_operand.vmem [shape: f32[128,128], index: 0, kind: input, shape index: {}]   ;;  %s239_s1 = inlined_call_operand.vmem [shape: f32[128,128], index: 1, kind: input, shape index: {}]   ;;  %s240_s2 = inlined_call_operand.vmem [shape: f32[128,128], index: 2, kind: output, shape index: {}]  }
   0x1   :  { %v11_v0 = vld [vmem:[%s238_s0] sm:$0xff]  ;;  %v12_v2 = vld [vmem:[%s238_s0 + $0x8] sm:$0xff]  ;;  %v13_v5 = vld [vmem:[%s238_s0 + $0x10] sm:$0xff] }
   0x2   :  { %v27_v1 = vld [vmem:[%s239_s1] sm:$0xff]  ;;  %v28_v4 = vld [vmem:[%s239_s1 + $0x8] sm:$0xff]  ;;  %v29_v6 = vld [vmem:[%s239_s1 + $0x10] sm:$0xff] }
   0x3   :  { %v43_v3 = vadd.f32 %v27_v1, %v11_v0  ;;  %v44_v7 = vadd.f32 %v28_v4, %v12_v2  ;;  %v45_v8 = vadd.f32 %v29_v6, %v13_v5  ;;  %v14_v9 = vld [vmem:[%s238_s0 + $0x18] sm:$0xff]  ;;  %v15_v11 = vld [vmem:[%s238_s0 + $0x20] sm:$0xff]  ;;  %v16_v14 = vld [vmem:[%s238_s0 + $0x28] sm:$0xff] }
   0x4   :  { %v30_v10 = vld [vmem:[%s239_s1 + $0x18] sm:$0xff]  ;;  %v31_v13 = vld [vmem:[%s239_s1 + $0x20] sm:$0xff]  ;;  %v32_v15 = vld [vmem:[%s239_s1 + $0x28] sm:$0xff] }
   0x5   :  { %59 = vst [vmem:[%s240_s2] sm:$0xff] %v43_v3  ;;  %v46_v12 = vadd.f32 %v30_v10, %v14_v9  ;;  %60 = vst [vmem:[%s240_s2 + $0x8] sm:$0xff] %v44_v7  ;;  %v47_v16 = vadd.f32 %v31_v13, %v15_v11  ;;  %v48_v17 = vadd.f32 %v32_v15, %v16_v14  ;;  %v17_v18 = vld [vmem:[%s238_s0 + $0x30] sm:$0xff]  ;;  %v18_v20 = vld [vmem:[%s238_s0 + $0x38] sm:$0xff] }
   0x6   :  { %61 = vst [vmem:[%s240_s2 + $0x10] sm:$0xff] %v45_v8  ;;  %v33_v19 = vld [vmem:[%s239_s1 + $0x30] sm:$0xff]  ;;  %v34_v22 = vld [vmem:[%s239_s1 + $0x38] sm:$0xff]  ;;  %v19_v23 = vld [vmem:[%s238_s0 + $0x40] sm:$0xff] }
   0x7   :  { %62 = vst [vmem:[%s240_s2 + $0x18] sm:$0xff] %v46_v12  ;;  %v49_v21 = vadd.f32 %v33_v19, %v17_v18  ;;  %v35_v24 = vld [vmem:[%s239_s1 + $0x40] sm:$0xff]  ;;  %63 = vst [vmem:[%s240_s2 + $0x20] sm:$0xff] %v47_v16  ;;  %v50_v25 = vadd.f32 %v34_v22, %v18_v20  ;;  %v20_v27 = vld [vmem:[%s238_s0 + $0x48] sm:$0xff] }
   0x8   :  { %64 = vst [vmem:[%s240_s2 + $0x28] sm:$0xff] %v48_v17  ;;  %v51_v26 = vadd.f32 %v35_v24, %v19_v23  ;;  %v36_v28 = vld [vmem:[%s239_s1 + $0x48] sm:$0xff]  ;;  %v21_v29 = vld [vmem:[%s238_s0 + $0x50] sm:$0xff]  ;;  %v22_v32 = vld [vmem:[%s238_s0 + $0x58] sm:$0xff] }
   0x9   :  { %65 = vst [vmem:[%s240_s2 + $0x30] sm:$0xff] %v49_v21  ;;  %v52_v30 = vadd.f32 %v36_v28, %v20_v27  ;;  %v37_v31 = vld [vmem:[%s239_s1 + $0x50] sm:$0xff]  ;;  %v38_v33 = vld [vmem:[%s239_s1 + $0x58] sm:$0xff]  ;;  %66 = vst [vmem:[%s240_s2 + $0x38] sm:$0xff] %v50_v25 }
   0xa   :  { %67 = vst [vmem:[%s240_s2 + $0x40] sm:$0xff] %v51_v26  ;;  %v53_v34 = vadd.f32 %v37_v31, %v21_v29  ;;  %v54_v35 = vadd.f32 %v38_v33, %v22_v32  ;;  %v23_v36 = vld [vmem:[%s238_s0 + $0x60] sm:$0xff]  ;;  %v24_v38 = vld [vmem:[%s238_s0 + $0x68] sm:$0xff]  ;;  %v25_v41 = vld [vmem:[%s238_s0 + $0x70] sm:$0xff] }
   0xb   :  { %v39_v37 = vld [vmem:[%s239_s1 + $0x60] sm:$0xff]  ;;  %68 = vst [vmem:[%s240_s2 + $0x48] sm:$0xff] %v52_v30  ;;  %v40_v40 = vld [vmem:[%s239_s1 + $0x68] sm:$0xff]  ;;  %v41_v42 = vld [vmem:[%s239_s1 + $0x70] sm:$0xff] }
   0xc   :  { %v55_v39 = vadd.f32 %v39_v37, %v23_v36  ;;  %69 = vst [vmem:[%s240_s2 + $0x50] sm:$0xff] %v53_v34  ;;  %70 = vst [vmem:[%s240_s2 + $0x58] sm:$0xff] %v54_v35  ;;  %v56_v43 = vadd.f32 %v40_v40, %v24_v38  ;;  %v57_v44 = vadd.f32 %v41_v42, %v25_v41  ;;  %v26_v45 = vld [vmem:[%s238_s0 + $0x78] sm:$0xff] }
   0xd   :  { %v42_v46 = vld [vmem:[%s239_s1 + $0x78] sm:$0xff] }
   0xe   :  { %71 = vst [vmem:[%s240_s2 + $0x60] sm:$0xff] %v55_v39  ;;  %v58_v47 = vadd.f32 %v42_v46, %v26_v45  ;;  %72 = vst [vmem:[%s240_s2 + $0x68] sm:$0xff] %v56_v43 }
   0xf   :  { %73 = vst [vmem:[%s240_s2 + $0x70] sm:$0xff] %v57_v44 }
  0x10   :  { %74 = vst [vmem:[%s240_s2 + $0x78] sm:$0xff] %v58_v47 }

// kernel: generator_forward.61
= control target key start
LH: loop header
LB: loop body
LE: loop exit
PB: predicated region body
PF: predicated region fallthrough
CT: control target
= control target key end

     0   :  { %s1419_s12 = smov 0   ;;  %s1421_s13 = smov 0   ;;  %s1680_s0 = inlined_call_operand.vmem [shape: bf16[512,1152], index: 0, kind: input, shape index: {}]   ;;  %s1681_s1 = inlined_call_operand.vmem [shape: bf16[1152,128], index: 1, kind: input, shape index: {}]   ;;  %s1682_s2 = inlined_call_operand.vmem [shape: f32[1,128], index: 2, kind: input, shape index: {}]   ;;  %s1683_s3 = inlined_call_operand.vmem [shape: f32[512,128], index: 3, kind: output, shape index: {}]  }
   0x1   :  { %s1423_s14 = smov 0   ;;  %s1425_s15 = smov 0  }
   0x2   :  { %s1427_s16 = smov 0   ;;  %s1429_s17 = smov 0  }
   0x3   :  { %s1431_s18 = smov 0  }
   0x4 LB: > { %s25_s19 = sadd.s32 1, %s1388_s16  ;;  %s32_s20 = sadd.s32 1, %s1392_s17  ;;  %s1396_s18 = sphi %s1431_s18, %s13_s18   ;;  %s1392_s17 = sphi %s1429_s17, %s1689_s17   ;;  %s1388_s16 = sphi %s1427_s16, %s1688_s16   ;;  %s1384_s15 = sphi %s1425_s15, %s1687_s15   ;;  %s1380_s14 = sphi %s1423_s14, %s1686_s14   ;;  %s1376_s13 = sphi %s1421_s13, %s1685_s13   ;;  %s1372_s12 = sphi %s1419_s12, %s1684_s12  }
   0x5   : > { %p26_p0 = scmp.ge.s32.totalorder %s25_s19, 9  ;;  %p48_p1 = scmp.ne.s32.totalorder %s1376_s13, %s1372_s12 }
   0x6   : > { %p49_p2 = scmp.eq.s32.totalorder %s1396_s18, 0  ;;  %s41_s24 = sadd.s32 1, %s1376_s13 }
   0x7   : > { %s1691_s19 = smov (%p26_p0, %s25_s19), 0  ;;  %s1693_s20 = smov (!%p26_p0, %s32_s20), %s1392_s17 }
   0x8   : > { %p50_p3 = por %p49_p2, %p48_p1  ;;  %p34_p4 = scmp.ge.s32.totalorder %s1693_s20, 2 }
   0x9   : > { %s37_s21 = ssub.s32 %s1388_s16, %s1691_s19  ;;  %p1132_p6 = scmp.ge.s32.totalorder %s1396_s18, 18 }
   0xa   : > { %s1695_s20 = smov (%p34_p4, %s1693_s20), 0 }
   0xb   : > { %s36_s22 = ssub.s32 %s1392_s17, %s1695_s20  ;;  %162 = sbr.rel (%p1132_p6) target bundleno = 44 (0x2c), region = 20 }
   0xc   : > { %s38_s23 = sor.u32 %s37_s21, %s36_s22 }
   0xd   : > { %p39_p5 = scmp.eq.s32.totalorder %s38_s23, 0 }
   0xf   : > { %s1470_s25 = scalar_select %p39_p5, %s1376_s13, %s41_s24  }
  0x10   : > { %165 = sbr.rel (!%p50_p3) target bundleno = 44 (0x2c), region = 24  ;;  %s167_s26 = sand.u32 (%p50_p3), 1, %s1376_s13  }
  0x11   : > { %s1260_s27 = smul.u32 (%p50_p3), 288, %s1392_s17  ;;  %s1133_s28 = sshll.u32 (%p50_p3), %s167_s26, 7 }
  0x12   : > { %s1484_s7 = scalar_lea.vmem (%p50_p3), [#allocation3], %s1133_s28 }
  0x13   : > { %s172_s29 = sadd.s32 (%p50_p3), %s1388_s16, %s1260_s27 }
  0x14   : > { %s1136_s30 = sshll.u32 (%p50_p3), %s172_s29, 2 }
  0x15   : > { %s1479_s6 = scalar_lea.vmem %s1680_s0, %s1136_s30 }
  0x16   : > { %v191_v0 = vld [vmem:[%s1479_s6] sm:$0xf]  ;;  %v193_v1 = vld [vmem:[%s1479_s6 + $0x24] sm:$0xf]  ;;  %v195_v2 = vld [vmem:[%s1479_s6 + $0x48] sm:$0xf] }
  0x17   : > { %192 = vst [vmem:[%s1484_s7] sm:$0xf] %v191_v0  ;;  %194 = vst [vmem:[%s1484_s7 + $0x4] sm:$0xf] %v193_v1  ;;  %v197_v3 = vld [vmem:[%s1479_s6 + $0x6c] sm:$0xf] }
  0x18   : > { %196 = vst [vmem:[%s1484_s7 + $0x8] sm:$0xf] %v195_v2  ;;  %v199_v4 = vld [vmem:[%s1479_s6 + $0x90] sm:$0xf]  ;;  %v201_v5 = vld [vmem:[%s1479_s6 + $0xb4] sm:$0xf] }
  0x19   : > { %198 = vst [vmem:[%s1484_s7 + $0xc] sm:$0xf] %v197_v3  ;;  %200 = vst [vmem:[%s1484_s7 + $0x10] sm:$0xf] %v199_v4  ;;  %v203_v6 = vld [vmem:[%s1479_s6 + $0xd8] sm:$0xf] }
  0x1a   : > { %202 = vst [vmem:[%s1484_s7 + $0x14] sm:$0xf] %v201_v5  ;;  %v205_v7 = vld [vmem:[%s1479_s6 + $0xfc] sm:$0xf]  ;;  %v207_v8 = vld [vmem:[%s1479_s6 + $0x120] sm:$0xf] }
  0x1b   : > { %204 = vst [vmem:[%s1484_s7 + $0x18] sm:$0xf] %v203_v6  ;;  %206 = vst [vmem:[%s1484_s7 + $0x1c] sm:$0xf] %v205_v7  ;;  %v209_v9 = vld [vmem:[%s1479_s6 + $0x144] sm:$0xf] }
  0x1c   : > { %208 = vst [vmem:[%s1484_s7 + $0x20] sm:$0xf] %v207_v8  ;;  %v211_v10 = vld [vmem:[%s1479_s6 + $0x168] sm:$0xf]  ;;  %v213_v11 = vld [vmem:[%s1479_s6 + $0x18c] sm:$0xf] }
  0x1d   : > { %210 = vst [vmem:[%s1484_s7 + $0x24] sm:$0xf] %v209_v9  ;;  %212 = vst [vmem:[%s1484_s7 + $0x28] sm:$0xf] %v211_v10  ;;  %v215_v12 = vld [vmem:[%s1479_s6 + $0x1b0] sm:$0xf] }
  0x1e   : > { %214 = vst [vmem:[%s1484_s7 + $0x2c] sm:$0xf] %v213_v11  ;;  %v217_v13 = vld [vmem:[%s1479_s6 + $0x1d4] sm:$0xf]  ;;  %v219_v14 = vld [vmem:[%s1479_s6 + $0x1f8] sm:$0xf] }
  0x1f   : > { %216 = vst [vmem:[%s1484_s7 + $0x30] sm:$0xf] %v215_v12  ;;  %218 = vst [vmem:[%s1484_s7 + $0x34] sm:$0xf] %v217_v13  ;;  %v221_v15 = vld [vmem:[%s1479_s6 + $0x21c] sm:$0xf] }
  0x20   : > { %220 = vst [vmem:[%s1484_s7 + $0x38] sm:$0xf] %v219_v14  ;;  %v223_v16 = vld [vmem:[%s1479_s6 + $0x240] sm:$0xf]  ;;  %v225_v17 = vld [vmem:[%s1479_s6 + $0x264] sm:$0xf] }
  0x21   : > { %222 = vst [vmem:[%s1484_s7 + $0x3c] sm:$0xf] %v221_v15  ;;  %224 = vst [vmem:[%s1484_s7 + $0x40] sm:$0xf] %v223_v16  ;;  %v227_v18 = vld [vmem:[%s1479_s6 + $0x288] sm:$0xf] }
  0x22   : > { %226 = vst [vmem:[%s1484_s7 + $0x44] sm:$0xf] %v225_v17  ;;  %v229_v19 = vld [vmem:[%s1479_s6 + $0x2ac] sm:$0xf]  ;;  %v231_v20 = vld [vmem:[%s1479_s6 + $0x2d0] sm:$0xf] }
  0x23   : > { %228 = vst [vmem:[%s1484_s7 + $0x48] sm:$0xf] %v227_v18  ;;  %230 = vst [vmem:[%s1484_s7 + $0x4c] sm:$0xf] %v229_v19  ;;  %v233_v21 = vld [vmem:[%s1479_s6 + $0x2f4] sm:$0xf] }
  0x24   : > { %232 = vst [vmem:[%s1484_s7 + $0x50] sm:$0xf] %v231_v20  ;;  %v235_v22 = vld [vmem:[%s1479_s6 + $0x318] sm:$0xf]  ;;  %v237_v23 = vld [vmem:[%s1479_s6 + $0x33c] sm:$0xf] }
  0x25   : > { %234 = vst [vmem:[%s1484_s7 + $0x54] sm:$0xf] %v233_v21  ;;  %236 = vst [vmem:[%s1484_s7 + $0x58] sm:$0xf] %v235_v22  ;;  %v239_v24 = vld [vmem:[%s1479_s6 + $0x360] sm:$0xf] }
  0x26   : > { %238 = vst [vmem:[%s1484_s7 + $0x5c] sm:$0xf] %v237_v23  ;;  %v241_v25 = vld [vmem:[%s1479_s6 + $0x384] sm:$0xf]  ;;  %v243_v26 = vld [vmem:[%s1479_s6 + $0x3a8] sm:$0xf] }
  0x27   : > { %240 = vst [vmem:[%s1484_s7 + $0x60] sm:$0xf] %v239_v24  ;;  %242 = vst [vmem:[%s1484_s7 + $0x64] sm:$0xf] %v241_v25  ;;  %v245_v27 = vld [vmem:[%s1479_s6 + $0x3cc] sm:$0xf] }
  0x28   : > { %244 = vst [vmem:[%s1484_s7 + $0x68] sm:$0xf] %v243_v26  ;;  %v247_v28 = vld [vmem:[%s1479_s6 + $0x3f0] sm:$0xf]  ;;  %v249_v29 = vld [vmem:[%s1479_s6 + $0x414] sm:$0xf] }
  0x29   : > { %246 = vst [vmem:[%s1484_s7 + $0x6c] sm:$0xf] %v245_v27  ;;  %248 = vst [vmem:[%s1484_s7 + $0x70] sm:$0xf] %v247_v28  ;;  %v251_v30 = vld [vmem:[%s1479_s6 + $0x438] sm:$0xf] }
  0x2a   : > { %250 = vst [vmem:[%s1484_s7 + $0x74] sm:$0xf] %v249_v29  ;;  %v253_v31 = vld [vmem:[%s1479_s6 + $0x45c] sm:$0xf]  ;;  %252 = vst [vmem:[%s1484_s7 + $0x78] sm:$0xf] %v251_v30 }
  0x2b   : > { %254 = vst [vmem:[%s1484_s7 + $0x7c] sm:$0xf] %v253_v31 }
  0x2c PF: > { %p1137_p7 = scmp.ge.s32.totalorder %s1396_s18, 1  ;;  %p353_p8 = scmp.lt.s32.totalorder %s1396_s18, 19 }
  0x2e   : > { %p354_p9 = pnand %p1137_p7, %p353_p8 }
  0x2f   : > { %s360_s8 = sand.u32 (!%p354_p9), 1, %s1372_s12   ;;  %s1139_s9 = sshll.u32 (!%p354_p9), %s1380_s14, 4 }
  0x30   : > { %357 = sbr.rel (%p354_p9) target bundleno = 356 (0x164), region = 69  ;;  %s1138_s10 = sshll.u32 (!%p354_p9), %s360_s8, 7 }
  0x31   : > { %p399_p10 = scmp.lt.s32.totalorder (!%p354_p9), %s1139_s9, 143  ;;  %s1141_s11 = sshll.u32 (!%p354_p9), %s1384_s15, 5 }
  0x32   : > { %p411_p11 = scmp.lt.s32.totalorder (!%p354_p9), %s1141_s11, 63  ;;  %s1562_s12 = scalar_lea.vmem (!%p354_p9), [#allocation3], %s1138_s10 }
  0x33   : > { %p1143_p12 = scmp.ne.s32.totalorder (!%p354_p9), %s1380_s14, 0 }
  0x35   : > { %s1697_s9 = smov (!%p399_p10, %s1139_s9), 143  ;;  %s1699_s11 = smov (!%p411_p11, %s1141_s11), 63 }
  0x36   : > { %s1140_s21 = sshll.u32 %s1697_s9, 2  ;;  %s1142_s26 = sshll.u32 %s1699_s11, 3 }
  0x37   : > { %s1555_s24 = scalar_lea.vmem %s1681_s1, %s1140_s21  ;;  %s1560_s29 = scalar_lea.vmem %s1683_s3, %s1142_s26 }
  0x38   : > { %423 = sbr.rel (%p1143_p12) target bundleno = 78 (0x4e), region = 77 }
  0x3d   : > { %v1398_v32 = vmov 0.0  }
  0x3e   : > { %424 = vst [vmem:[#allocation2 + $0xb0] sm:$0xff] %v1398_v32  ;;  %425 = vst [vmem:[#allocation2] sm:$0xff] %v1398_v32 }
  0x3f   : > { %426 = vst [vmem:[#allocation2 + $0xd8] sm:$0xff] %v1398_v32  ;;  %427 = vst [vmem:[#allocation2 + $0x18] sm:$0xff] %v1398_v32 }
  0x40   : > { %428 = vst [vmem:[#allocation2 + $0x50] sm:$0xff] %v1398_v32  ;;  %429 = vst [vmem:[#allocation2 + $0x68] sm:$0xff] %v1398_v32 }
  0x41   : > { %430 = vst [vmem:[#allocation2 + $0x30] sm:$0xff] %v1398_v32  ;;  %431 = vst [vmem:[#allocation2 + $0x48] sm:$0xff] %v1398_v32 }
  0x42   : > { %432 = vst [vmem:[#allocation2 + $0x80] sm:$0xff] %v1398_v32  ;;  %433 = vst [vmem:[#allocation2 + $0x88] sm:$0xff] %v1398_v32 }
  0x43   : > { %434 = vst [vmem:[#allocation2 + $0xe8] sm:$0xff] %v1398_v32  ;;  %435 = vst [vmem:[#allocation2 + $0xb8] sm:$0xff] %v1398_v32 }
  0x44   : > { %436 = vst [vmem:[#allocation2 + $0x60] sm:$0xff] %v1398_v32  ;;  %437 = vst [vmem:[#allocation2 + $0xf0] sm:$0xff] %v1398_v32 }
  0x45   : > { %438 = vst [vmem:[#allocation2 + $0x8] sm:$0xff] %v1398_v32  ;;  %439 = vst [vmem:[#allocation2 + $0x78] sm:$0xff] %v1398_v32 }
  0x46   : > { %440 = vst [vmem:[#allocation2 + $0x38] sm:$0xff] %v1398_v32  ;;  %441 = vst [vmem:[#allocation2 + $0x58] sm:$0xff] %v1398_v32 }
  0x47   : > { %442 = vst [vmem:[#allocation2 + $0x40] sm:$0xff] %v1398_v32  ;;  %443 = vst [vmem:[#allocation2 + $0xc8] sm:$0xff] %v1398_v32 }
  0x48   : > { %444 = vst [vmem:[#allocation2 + $0xe0] sm:$0xff] %v1398_v32  ;;  %445 = vst [vmem:[#allocation2 + $0x90] sm:$0xff] %v1398_v32 }
  0x49   : > { %446 = vst [vmem:[#allocation2 + $0x70] sm:$0xff] %v1398_v32  ;;  %447 = vst [vmem:[#allocation2 + $0xc0] sm:$0xff] %v1398_v32 }
  0x4a   : > { %448 = vst [vmem:[#allocation2 + $0xa8] sm:$0xff] %v1398_v32  ;;  %449 = vst [vmem:[#allocation2 + $0xd0] sm:$0xff] %v1398_v32 }
  0x4b   : > { %450 = vst [vmem:[#allocation2 + $0x10] sm:$0xff] %v1398_v32  ;;  %451 = vst [vmem:[#allocation2 + $0x28] sm:$0xff] %v1398_v32 }
  0x4c   : > { %452 = vst [vmem:[#allocation2 + $0xa0] sm:$0xff] %v1398_v32  ;;  %453 = vst [vmem:[#allocation2 + $0xf8] sm:$0xff] %v1398_v32 }
  0x4d   : > { %454 = vst [vmem:[#allocation2 + $0x20] sm:$0xff] %v1398_v32  ;;  %455 = vst [vmem:[#allocation2 + $0x98] sm:$0xff] %v1398_v32 }
  0x4e PF: > { %v1318_v33 = vld [vmem:[%s1555_s24 + $0x38] sm:$0xff]   ;;  %v1319_v34 = vld [vmem:[%s1555_s24 + $0x30] sm:$0xff]   ;;  %v1320_v35 = vld [vmem:[%s1555_s24 + $0x28] sm:$0xff]   ;;  %p1168_p13 = scmp.ne.s32.totalorder %s1380_s14, 8 }
  0x4f   : > { %1196 = vmatprep.subr.bf16.mxu0 %v1318_v33  ;;  %1244 = vmatprep.subr.bf16.mxu1 %v1318_v33  ;;  %v1321_v36 = vld [vmem:[%s1555_s24 + $0x20] sm:$0xff]   ;;  %v1322_v39 = vld [vmem:[%s1555_s24 + $0x18] sm:$0xff]   ;;  %v1323_v40 = vld [vmem:[%s1555_s24 + $0x10] sm:$0xff]  }
  0x50   : > { %1197 = vmatpush3.bf16.msra.mxu0 %v1318_v33  ;;  %1252 = vmatpush3.bf16.msra.mxu1 %v1318_v33  ;;  %v1326_v37 = vld [vmem:[%s1562_s12] sm:$0xff]   ;;  %v1324_v41 = vld [vmem:[%s1555_s24 + $0x8] sm:$0xff]   ;;  %v1330_v45 = vld [vmem:[%s1562_s12 + $0x10] sm:$0xff]  }
  0x51   : > { %1198 = vmatprep.subr.bf16.mxu0 %v1319_v34  ;;  %1245 = vmatprep.subr.bf16.mxu1 %v1319_v34  ;;  %v1327_v38 = vld [vmem:[%s1562_s12 + $0x40] sm:$0xff]   ;;  %v1328_v43 = vld [vmem:[%s1562_s12 + $0x8] sm:$0xff]   ;;  %v1331_v46 = vld [vmem:[%s1562_s12 + $0x50] sm:$0xff]  }
  0x52   : > { %1212 = vmatprep.mubr.bf16.mxu0 %v1326_v37  ;;  %1228 = vmatprep.mubr.bf16.mxu1 %v1327_v38  ;;  %v1325_v42 = vld [vmem:[%s1555_s24] sm:$0xff]   ;;  %v1329_v44 = vld [vmem:[%s1562_s12 + $0x48] sm:$0xff]   ;;  %v1332_v47 = vld [vmem:[%s1562_s12 + $0x18] sm:$0xff]  }
  0x53   : > { %v1333_v48 = vld [vmem:[%s1562_s12 + $0x58] sm:$0xff]   ;;  %v1334_v49 = vld [vmem:[%s1562_s12 + $0x20] sm:$0xff]   ;;  %v1336_v51 = vld [vmem:[%s1562_s12 + $0x28] sm:$0xff]  }
  0x54   : > { %1199 = vmatpush3.bf16.msra.mxu0 %v1319_v34  ;;  %1253 = vmatpush3.bf16.msra.mxu1 %v1319_v34  ;;  %v1335_v50 = vld [vmem:[%s1562_s12 + $0x60] sm:$0xff]   ;;  %v1337_v52 = vld [vmem:[%s1562_s12 + $0x68] sm:$0xff]   ;;  %v1338_v53 = vld [vmem:[%s1562_s12 + $0x30] sm:$0xff]  }
  0x55   : > { %1200 = vmatprep.subr.bf16.mxu0 %v1320_v35  ;;  %1246 = vmatprep.subr.bf16.mxu1 %v1320_v35  ;;  %v1339_v54 = vld [vmem:[%s1562_s12 + $0x70] sm:$0xff]   ;;  %v1340_v55 = vld [vmem:[%s1562_s12 + $0x38] sm:$0xff]   ;;  %v474_v58 = vld [vmem:[#allocation2 + $0x40] sm:$0xff] }
  0x56   : > { %v1341_v56 = vld [vmem:[%s1562_s12 + $0x78] sm:$0xff]   ;;  %v456_v61 = vld [vmem:[#allocation2 + $0xb0] sm:$0xff]  ;;  %v475_v4 = vld [vmem:[#allocation2 + $0xc8] sm:$0xff] }
  0x57   : > { %v458_v57 = vld [vmem:[#allocation2 + $0xd8] sm:$0xff]  ;;  %v457_v9 = vld [vmem:[#allocation2] sm:$0xff]  ;;  %v462_v15 = vld [vmem:[#allocation2 + $0x30] sm:$0xff] }
  0x58   : > { %1201 = vmatpush3.bf16.msra.mxu0 %v1320_v35  ;;  %1254 = vmatpush3.bf16.msra.mxu1 %v1320_v35  ;;  %v472_v62 = vld [vmem:[#allocation2 + $0x38] sm:$0xff]  ;;  %v478_v16 = vld [vmem:[#allocation2 + $0x70] sm:$0xff]  ;;  %v476_v22 = vld [vmem:[#allocation2 + $0xe0] sm:$0xff] }
  0x59   : > { %1202 = vmatprep.subr.bf16.mxu0 %v1321_v36  ;;  %1247 = vmatprep.subr.bf16.mxu1 %v1321_v36  ;;  %v459_v3 = vld [vmem:[#allocation2 + $0x18] sm:$0xff]  ;;  %v460_v21 = vld [vmem:[#allocation2 + $0x50] sm:$0xff]  ;;  %v463_v27 = vld [vmem:[#allocation2 + $0x48] sm:$0xff] }
  0x5a   : > { %v473_v10 = vld [vmem:[#allocation2 + $0x58] sm:$0xff]  ;;  %v479_v28 = vld [vmem:[#allocation2 + $0xc0] sm:$0xff]  ;;  %v461_v33 = vld [vmem:[#allocation2 + $0x68] sm:$0xff] }
  0x5b   : > { %v477_v34 = vld [vmem:[#allocation2 + $0x90] sm:$0xff] }
  0x5c   : > { %1203 = vmatpush3.bf16.msra.mxu0 %v1321_v36  ;;  %1255 = vmatpush3.bf16.msra.mxu1 %v1321_v36 }
  0x5d   : > { %1204 = vmatprep.subr.bf16.mxu0 %v1322_v39  ;;  %1248 = vmatprep.subr.bf16.mxu1 %v1322_v39 }
  0x60   : > { %1205 = vmatpush3.bf16.msra.mxu0 %v1322_v39  ;;  %1256 = vmatpush3.bf16.msra.mxu1 %v1322_v39  ;;  %v466_v39 = vld [vmem:[#allocation2 + $0xe8] sm:$0xff] }
  0x61   : > { %1206 = vmatprep.subr.bf16.mxu0 %v1323_v40  ;;  %1249 = vmatprep.subr.bf16.mxu1 %v1323_v40 }
  0x64   : > { %1207 = vmatpush3.bf16.msra.mxu0 %v1323_v40  ;;  %1257 = vmatpush3.bf16.msra.mxu1 %v1323_v40  ;;  %v482_v40 = vld [vmem:[#allocation2 + $0x10] sm:$0xff] }
  0x65   : > { %1208 = vmatprep.subr.bf16.mxu0 %v1324_v41  ;;  %1250 = vmatprep.subr.bf16.mxu1 %v1324_v41 }
  0x68   : > { %1209 = vmatpush3.bf16.msra.mxu0 %v1324_v41  ;;  %1258 = vmatpush3.bf16.msra.mxu1 %v1324_v41 }
  0x69   : > { %1210 = vmatprep.subr.bf16.mxu0 %v1325_v42  ;;  %1251 = vmatprep.subr.bf16.mxu1 %v1325_v42 }
  0x6c   : > { %1211 = vmatpush3.bf16.msra.mxu0 %v1325_v42  ;;  %1259 = vmatpush3.bf16.msra.mxu1 %v1325_v42 }
  0x6f   : > { %1213 = vmatmul.mubr.bf16.vlgmr.msra.gmra.mxu0 %v1328_v43  ;;  %1229 = vmatmul.mubr.bf16.vlgmr.msra.gmra.mxu1 %v1329_v44 }
  0x70   : > { %1216 = vmatprep.mubr.bf16.mxu0 %v1330_v45  ;;  %1232 = vmatprep.mubr.bf16.mxu1 %v1331_v46  ;;  %v464_v45 = vld [vmem:[#allocation2 + $0x80] sm:$0xff]  ;;  %v480_v46 = vld [vmem:[#allocation2 + $0xa8] sm:$0xff] }
  0x77   : > { %1217 = vmatmul.mubr.bf16.gmra.mxu0 %v1332_v47  ;;  %1233 = vmatmul.mubr.bf16.gmra.mxu1 %v1333_v48 }
  0x78   : > { %1220 = vmatprep.mubr.bf16.mxu0 %v1334_v49  ;;  %1236 = vmatprep.mubr.bf16.mxu1 %v1335_v50 }
  0x7f   : > { %1221 = vmatmul.mubr.bf16.gmra.mxu0 %v1336_v51  ;;  %1237 = vmatmul.mubr.bf16.gmra.mxu1 %v1337_v52  ;;  %v467_v51 = vld [vmem:[#allocation2 + $0xb8] sm:$0xff]  ;;  %v483_v52 = vld [vmem:[#allocation2 + $0x28] sm:$0xff] }
  0x80   : > { %1224 = vmatprep.mubr.bf16.mxu0 %v1338_v53  ;;  %1240 = vmatprep.mubr.bf16.mxu1 %v1339_v54 }
  0x87   : > { %1225 = vmatmul.mubr.bf16.gmra.mxu0 %v1340_v55  ;;  %1241 = vmatmul.mubr.bf16.gmra.mxu1 %v1341_v56 }
 0x12f   : > { %v1214_v59 = vpop.f32.mrf.mxu0  ;;  %v1230_v60 = vpop.f32.mrf.mxu1 }
 0x130   : > { %v843_v63 = vadd.f32 %v1214_v59, %v458_v57  ;;  %v859_v0 = vadd.f32 %v1230_v60, %v474_v58  ;;  %v465_v57 = vld [vmem:[#allocation2 + $0x88] sm:$0xff]  ;;  %v481_v58 = vld [vmem:[#allocation2 + $0xd0] sm:$0xff] }
 0x131   : > { %v714_v1 = vpop.f32.mrf.mxu0  ;;  %v778_v2 = vpop.f32.mrf.mxu1 }
 0x132   : > { %875 = vst [vmem:[#allocation2 + $0xd8] sm:$0xff] %v843_v63  ;;  %891 = vst [vmem:[#allocation2 + $0x40] sm:$0xff] %v859_v0  ;;  %v841_v5 = vadd.f32 %v714_v1, %v456_v61  ;;  %v857_v6 = vadd.f32 %v778_v2, %v472_v62  ;;  %v470_v63 = vld [vmem:[#allocation2 + $0x8] sm:$0xff]  ;;  %v486_v0 = vld [vmem:[#allocation2 + $0x20] sm:$0xff] }
 0x133   : > { %v1215_v7 = vpop.f32.mrf.mxu0  ;;  %v1231_v8 = vpop.f32.mrf.mxu1 }
 0x134   : > { %873 = vst [vmem:[#allocation2 + $0xb0] sm:$0xff] %v841_v5  ;;  %889 = vst [vmem:[#allocation2 + $0x38] sm:$0xff] %v857_v6  ;;  %v844_v11 = vadd.f32 %v1215_v7, %v459_v3  ;;  %v860_v12 = vadd.f32 %v1231_v8, %v475_v4  ;;  %v468_v5 = vld [vmem:[#allocation2 + $0x60] sm:$0xff] }
 0x135   : > { %v717_v13 = vpop.f32.mrf.mxu0  ;;  %v781_v14 = vpop.f32.mrf.mxu1  ;;  %v484_v6 = vld [vmem:[#allocation2 + $0xa0] sm:$0xff] }
 0x136   : > { %876 = vst [vmem:[#allocation2 + $0x18] sm:$0xff] %v844_v11  ;;  %892 = vst [vmem:[#allocation2 + $0xc8] sm:$0xff] %v860_v12  ;;  %v842_v17 = vadd.f32 %v717_v13, %v457_v9  ;;  %v858_v18 = vadd.f32 %v781_v14, %v473_v10  ;;  %v471_v11 = vld [vmem:[#allocation2 + $0x78] sm:$0xff] }
 0x137   : > { %v1218_v19 = vpop.f32.mrf.mxu0  ;;  %v1234_v20 = vpop.f32.mrf.mxu1  ;;  %v487_v12 = vld [vmem:[#allocation2 + $0x98] sm:$0xff] }
 0x138   : > { %874 = vst [vmem:[#allocation2] sm:$0xff] %v842_v17  ;;  %890 = vst [vmem:[#allocation2 + $0x58] sm:$0xff] %v858_v18  ;;  %v847_v23 = vadd.f32 %v1218_v19, %v462_v15  ;;  %v863_v24 = vadd.f32 %v1234_v20, %v478_v16  ;;  %v469_v17 = vld [vmem:[#allocation2 + $0xf0] sm:$0xff]  ;;  %v485_v18 = vld [vmem:[#allocation2 + $0xf8] sm:$0xff] }
 0x139   : > { %v730_v25 = vpop.f32.mrf.mxu0  ;;  %v794_v26 = vpop.f32.mrf.mxu1 }
 0x13a   : > { %879 = vst [vmem:[#allocation2 + $0x30] sm:$0xff] %v847_v23  ;;  %895 = vst [vmem:[#allocation2 + $0x70] sm:$0xff] %v863_v24  ;;  %v845_v29 = vadd.f32 %v730_v25, %v460_v21  ;;  %v861_v30 = vadd.f32 %v794_v26, %v476_v22 }
 0x13b   : > { %v1219_v31 = vpop.f32.mrf.mxu0  ;;  %v1235_v32 = vpop.f32.mrf.mxu1 }
 0x13c   : > { %877 = vst [vmem:[#allocation2 + $0x50] sm:$0xff] %v845_v29  ;;  %893 = vst [vmem:[#allocation2 + $0xe0] sm:$0xff] %v861_v30  ;;  %v848_v35 = vadd.f32 %v1219_v31, %v463_v27  ;;  %v864_v36 = vadd.f32 %v1235_v32, %v479_v28 }
 0x13d   : > { %v733_v37 = vpop.f32.mrf.mxu0  ;;  %v797_v38 = vpop.f32.mrf.mxu1 }
 0x13e   : > { %880 = vst [vmem:[#allocation2 + $0x48] sm:$0xff] %v848_v35  ;;  %896 = vst [vmem:[#allocation2 + $0xc0] sm:$0xff] %v864_v36  ;;  %v846_v41 = vadd.f32 %v733_v37, %v461_v33  ;;  %v862_v42 = vadd.f32 %v797_v38, %v477_v34 }
 0x13f   : > { %v1222_v43 = vpop.f32.mrf.mxu0  ;;  %v1238_v44 = vpop.f32.mrf.mxu1 }
 0x140   : > { %878 = vst [vmem:[#allocation2 + $0x68] sm:$0xff] %v846_v41  ;;  %894 = vst [vmem:[#allocation2 + $0x90] sm:$0xff] %v862_v42  ;;  %v851_v47 = vadd.f32 %v1222_v43, %v466_v39  ;;  %v867_v48 = vadd.f32 %v1238_v44, %v482_v40 }
 0x141   : > { %v746_v49 = vpop.f32.mrf.mxu0  ;;  %v810_v50 = vpop.f32.mrf.mxu1 }
 0x142   : > { %883 = vst [vmem:[#allocation2 + $0xe8] sm:$0xff] %v851_v47  ;;  %899 = vst [vmem:[#allocation2 + $0x10] sm:$0xff] %v867_v48  ;;  %v849_v53 = vadd.f32 %v746_v49, %v464_v45  ;;  %v865_v54 = vadd.f32 %v810_v50, %v480_v46 }
 0x143   : > { %v1223_v55 = vpop.f32.mrf.mxu0  ;;  %v1239_v56 = vpop.f32.mrf.mxu1 }
 0x144   : > { %881 = vst [vmem:[#allocation2 + $0x80] sm:$0xff] %v849_v53  ;;  %897 = vst [vmem:[#allocation2 + $0xa8] sm:$0xff] %v865_v54  ;;  %v852_v59 = vadd.f32 %v1223_v55, %v467_v51  ;;  %v868_v60 = vadd.f32 %v1239_v56, %v483_v52 }
 0x145   : > { %v749_v61 = vpop.f32.mrf.mxu0  ;;  %v813_v62 = vpop.f32.mrf.mxu1 }
 0x146   : > { %884 = vst [vmem:[#allocation2 + $0xb8] sm:$0xff] %v852_v59  ;;  %900 = vst [vmem:[#allocation2 + $0x28] sm:$0xff] %v868_v60  ;;  %v850_v1 = vadd.f32 %v749_v61, %v465_v57  ;;  %v866_v2 = vadd.f32 %v813_v62, %v481_v58 }
 0x147   : > { %v1226_v3 = vpop.f32.mrf.mxu0  ;;  %v1242_v4 = vpop.f32.mrf.mxu1 }
 0x148   : > { %882 = vst [vmem:[#allocation2 + $0x88] sm:$0xff] %v850_v1  ;;  %898 = vst [vmem:[#allocation2 + $0xd0] sm:$0xff] %v866_v2  ;;  %v855_v7 = vadd.f32 %v1226_v3, %v470_v63  ;;  %v871_v8 = vadd.f32 %v1242_v4, %v486_v0 }
 0x149   : > { %v762_v9 = vpop.f32.mrf.mxu0  ;;  %v826_v10 = vpop.f32.mrf.mxu1 }
 0x14a   : > { %887 = vst [vmem:[#allocation2 + $0x8] sm:$0xff] %v855_v7  ;;  %903 = vst [vmem:[#allocation2 + $0x20] sm:$0xff] %v871_v8  ;;  %v853_v13 = vadd.f32 %v762_v9, %v468_v5  ;;  %v869_v14 = vadd.f32 %v826_v10, %v484_v6 }
 0x14b   : > { %v1227_v15 = vpop.f32.mrf.mxu0  ;;  %v1243_v16 = vpop.f32.mrf.mxu1 }
 0x14c   : > { %885 = vst [vmem:[#allocation2 + $0x60] sm:$0xff] %v853_v13  ;;  %901 = vst [vmem:[#allocation2 + $0xa0] sm:$0xff] %v869_v14  ;;  %v856_v19 = vadd.f32 %v1227_v15, %v471_v11  ;;  %v872_v20 = vadd.f32 %v1243_v16, %v487_v12  ;;  %908 = sbr.rel (%p1168_p13) target bundleno = 356 (0x164), region = 81 }
 0x14d   : > { %v765_v21 = vpop.f32.mrf.mxu0  ;;  %v829_v22 = vpop.f32.mrf.mxu1 }
 0x14e   : > { %888 = vst [vmem:[#allocation2 + $0x78] sm:$0xff] %v856_v19  ;;  %904 = vst [vmem:[#allocation2 + $0x98] sm:$0xff] %v872_v20  ;;  %v854_v23 = vadd.f32 %v765_v21, %v469_v17  ;;  %v870_v24 = vadd.f32 %v829_v22, %v485_v18 }
 0x150   : > { %886 = vst [vmem:[#allocation2 + $0xf0] sm:$0xff] %v854_v23  ;;  %902 = vst [vmem:[#allocation2 + $0xf8] sm:$0xff] %v870_v24 }
 0x151   : > { %v909_v25 = vld [vmem:[#allocation2 + $0xb0] sm:$0xff]  ;;  %v1593_v26 = vld [vmem:[%s1682_s2] ss:$0 sm:$0xff]  ;;  %v911_v30 = vld [vmem:[#allocation2 + $0xd8] sm:$0xff] }
 0x152   : > { %v910_v27 = vld [vmem:[#allocation2] sm:$0xff]  ;;  %v948_v28 = vadd.f32 %v1593_v26, %v909_v25  ;;  %v912_v31 = vld [vmem:[#allocation2 + $0x18] sm:$0xff]  ;;  %v913_v32 = vld [vmem:[#allocation2 + $0x50] sm:$0xff]  ;;  %v950_v33 = vadd.f32 %v1593_v26, %v911_v30 }
 0x153   : > { %v949_v29 = vadd.f32 %v1593_v26, %v910_v27  ;;  %v951_v34 = vadd.f32 %v1593_v26, %v912_v31  ;;  %v952_v35 = vadd.f32 %v1593_v26, %v913_v32  ;;  %v914_v36 = vld [vmem:[#allocation2 + $0x68] sm:$0xff]  ;;  %v915_v37 = vld [vmem:[#allocation2 + $0x30] sm:$0xff]  ;;  %v917_v42 = vld [vmem:[#allocation2 + $0x80] sm:$0xff] }
 0x154   : > { %v916_v38 = vld [vmem:[#allocation2 + $0x48] sm:$0xff]  ;;  %980 = vst [vmem:[%s1560_s29] sm:$0xff] %v948_v28  ;;  %v953_v39 = vadd.f32 %v1593_v26, %v914_v36  ;;  %v954_v40 = vadd.f32 %v1593_v26, %v915_v37  ;;  %982 = vst [vmem:[%s1560_s29 + $0x10] sm:$0xff] %v950_v33  ;;  %v956_v45 = vadd.f32 %v1593_v26, %v917_v42  ;;  %v920_v48 = vld [vmem:[#allocation2 + $0xb8] sm:$0xff] }
 0x155   : > { %981 = vst [vmem:[%s1560_s29 + $0x8] sm:$0xff] %v949_v29  ;;  %v955_v41 = vadd.f32 %v1593_v26, %v916_v38  ;;  %v918_v43 = vld [vmem:[#allocation2 + $0x88] sm:$0xff]  ;;  %983 = vst [vmem:[%s1560_s29 + $0x18] sm:$0xff] %v951_v34  ;;  %v921_v49 = vld [vmem:[#allocation2 + $0x60] sm:$0xff]  ;;  %v959_v51 = vadd.f32 %v1593_v26, %v920_v48 }
 0x156   : > { %v919_v44 = vld [vmem:[#allocation2 + $0xe8] sm:$0xff]  ;;  %984 = vst [vmem:[%s1560_s29 + $0x20] sm:$0xff] %v952_v35  ;;  %v957_v46 = vadd.f32 %v1593_v26, %v918_v43  ;;  %985 = vst [vmem:[%s1560_s29 + $0x28] sm:$0xff] %v953_v39  ;;  %v960_v52 = vadd.f32 %v1593_v26, %v921_v49  ;;  %v924_v55 = vld [vmem:[#allocation2 + $0x78] sm:$0xff] }
 0x157   : > { %v958_v47 = vadd.f32 %v1593_v26, %v919_v44  ;;  %v922_v50 = vld [vmem:[#allocation2 + $0xf0] sm:$0xff]  ;;  %986 = vst [vmem:[%s1560_s29 + $0x30] sm:$0xff] %v954_v40  ;;  %987 = vst [vmem:[%s1560_s29 + $0x38] sm:$0xff] %v955_v41  ;;  %v923_v54 = vld [vmem:[#allocation2 + $0x8] sm:$0xff]  ;;  %v963_v58 = vadd.f32 %v1593_v26, %v924_v55 }
 0x158   : > { %v961_v53 = vadd.f32 %v1593_v26, %v922_v50  ;;  %v925_v56 = vld [vmem:[#allocation2 + $0x38] sm:$0xff]  ;;  %988 = vst [vmem:[%s1560_s29 + $0x40] sm:$0xff] %v956_v45  ;;  %989 = vst [vmem:[%s1560_s29 + $0x48] sm:$0xff] %v957_v46  ;;  %v962_v57 = vadd.f32 %v1593_v26, %v923_v54  ;;  %v927_v61 = vld [vmem:[#allocation2 + $0x40] sm:$0xff] }
 0x159   : > { %990 = vst [vmem:[%s1560_s29 + $0x50] sm:$0xff] %v958_v47  ;;  %v964_v59 = vadd.f32 %v1593_v26, %v925_v56  ;;  %v926_v60 = vld [vmem:[#allocation2 + $0x58] sm:$0xff]  ;;  %v928_v62 = vld [vmem:[#allocation2 + $0xc8] sm:$0xff]  ;;  %991 = vst [vmem:[%s1560_s29 + $0x58] sm:$0xff] %v959_v51  ;;  %v966_v0 = vadd.f32 %v1593_v26, %v927_v61 }
 0x15a   : > { %992 = vst [vmem:[%s1560_s29 + $0x60] sm:$0xff] %v960_v52  ;;  %993 = vst [vmem:[%s1560_s29 + $0x68] sm:$0xff] %v961_v53  ;;  %v965_v63 = vadd.f32 %v1593_v26, %v926_v60  ;;  %v967_v1 = vadd.f32 %v1593_v26, %v928_v62  ;;  %v929_v2 = vld [vmem:[#allocation2 + $0xe0] sm:$0xff]  ;;  %v930_v3 = vld [vmem:[#allocation2 + $0x90] sm:$0xff] }
 0x15b   : > { %v931_v4 = vld [vmem:[#allocation2 + $0x70] sm:$0xff]  ;;  %994 = vst [vmem:[%s1560_s29 + $0x70] sm:$0xff] %v962_v57  ;;  %995 = vst [vmem:[%s1560_s29 + $0x78] sm:$0xff] %v963_v58  ;;  %v968_v5 = vadd.f32 %v1593_v26, %v929_v2  ;;  %v969_v6 = vadd.f32 %v1593_v26, %v930_v3  ;;  %v932_v8 = vld [vmem:[#allocation2 + $0xc0] sm:$0xff] }
 0x15c   : > { %996 = vst [vmem:[%s1560_s29 + $0x80] sm:$0xff] %v964_v59  ;;  %v970_v7 = vadd.f32 %v1593_v26, %v931_v4  ;;  %v933_v9 = vld [vmem:[#allocation2 + $0xa8] sm:$0xff]  ;;  %v934_v10 = vld [vmem:[#allocation2 + $0xd0] sm:$0xff]  ;;  %997 = vst [vmem:[%s1560_s29 + $0x88] sm:$0xff] %v965_v63  ;;  %v971_v11 = vadd.f32 %v1593_v26, %v932_v8 }
 0x15d   : > { %998 = vst [vmem:[%s1560_s29 + $0x90] sm:$0xff] %v966_v0  ;;  %999 = vst [vmem:[%s1560_s29 + $0x98] sm:$0xff] %v967_v1  ;;  %v972_v12 = vadd.f32 %v1593_v26, %v933_v9  ;;  %v973_v13 = vadd.f32 %v1593_v26, %v934_v10  ;;  %v935_v14 = vld [vmem:[#allocation2 + $0x10] sm:$0xff]  ;;  %v936_v15 = vld [vmem:[#allocation2 + $0x28] sm:$0xff] }
 0x15e   : > { %v937_v16 = vld [vmem:[#allocation2 + $0xa0] sm:$0xff]  ;;  %1000 = vst [vmem:[%s1560_s29 + $0xa0] sm:$0xff] %v968_v5  ;;  %1001 = vst [vmem:[%s1560_s29 + $0xa8] sm:$0xff] %v969_v6  ;;  %v974_v17 = vadd.f32 %v1593_v26, %v935_v14  ;;  %v975_v18 = vadd.f32 %v1593_v26, %v936_v15  ;;  %v938_v20 = vld [vmem:[#allocation2 + $0xf8] sm:$0xff] }
 0x15f   : > { %1002 = vst [vmem:[%s1560_s29 + $0xb0] sm:$0xff] %v970_v7  ;;  %v976_v19 = vadd.f32 %v1593_v26, %v937_v16  ;;  %v939_v21 = vld [vmem:[#allocation2 + $0x20] sm:$0xff]  ;;  %v940_v22 = vld [vmem:[#allocation2 + $0x98] sm:$0xff]  ;;  %1003 = vst [vmem:[%s1560_s29 + $0xb8] sm:$0xff] %v971_v11  ;;  %v977_v23 = vadd.f32 %v1593_v26, %v938_v20 }
 0x160   : > { %1004 = vst [vmem:[%s1560_s29 + $0xc0] sm:$0xff] %v972_v12  ;;  %1005 = vst [vmem:[%s1560_s29 + $0xc8] sm:$0xff] %v973_v13  ;;  %v978_v24 = vadd.f32 %v1593_v26, %v939_v21  ;;  %v979_v25 = vadd.f32 %v1593_v26, %v940_v22 }
 0x161   : > { %1006 = vst [vmem:[%s1560_s29 + $0xd0] sm:$0xff] %v974_v17  ;;  %1007 = vst [vmem:[%s1560_s29 + $0xd8] sm:$0xff] %v975_v18 }
 0x162   : > { %1008 = vst [vmem:[%s1560_s29 + $0xe0] sm:$0xff] %v976_v19  ;;  %1009 = vst [vmem:[%s1560_s29 + $0xe8] sm:$0xff] %v977_v23 }
 0x163   : > { %1010 = vst [vmem:[%s1560_s29 + $0xf0] sm:$0xff] %v978_v24  ;;  %1011 = vst [vmem:[%s1560_s29 + $0xf8] sm:$0xff] %v979_v25 }
 0x164 PF: > { %s13_s18 = sadd.s32 1, %s1396_s18   ;;  %s1684_s12 = smov %s1376_s13 }
 0x165   : > { %p10_p0 = scmp.ge.s32.totalorder %s13_s18, 20   ;;  %s1685_s13 = smov %s1470_s25 }
 0x166   : > { %s1686_s14 = smov %s1388_s16  ;;  %s1687_s15 = smov %s1392_s17 }
 0x167   : > { %s1688_s16 = smov %s1691_s19  ;;  %s1689_s17 = smov %s1695_s20 }
 0x168   :  { %12 = sbr.rel (!%p10_p0) target bundleno = 4 (0x4), region = 122 }

// kernel: generator_forward.63
= control target key start
LH: loop header
LB: loop body
LE: loop exit
PB: predicated region body
PF: predicated region fallthrough
CT: control target
= control target key end

     0   :  { %s1419_s12 = smov 0   ;;  %s1421_s13 = smov 0   ;;  %s1680_s0 = inlined_call_operand.vmem [shape: bf16[512,3200], index: 0, kind: input, shape index: {}]   ;;  %s1681_s1 = inlined_call_operand.vmem [shape: bf16[3200,128], index: 1, kind: input, shape index: {}]   ;;  %s1682_s2 = inlined_call_operand.vmem [shape: f32[1,128], index: 2, kind: input, shape index: {}]   ;;  %s1683_s3 = inlined_call_operand.vmem [shape: f32[512,128], index: 3, kind: output, shape index: {}]  }
   0x1   :  { %s1423_s14 = smov 0   ;;  %s1425_s15 = smov 0  }
   0x2   :  { %s1427_s16 = smov 0   ;;  %s1429_s17 = smov 0  }
   0x3   :  { %s1431_s18 = smov 0  }
   0x4 LB: > { %s25_s19 = sadd.s32 1, %s1388_s16  ;;  %s32_s20 = sadd.s32 1, %s1392_s17  ;;  %s1396_s18 = sphi %s1431_s18, %s13_s18   ;;  %s1392_s17 = sphi %s1429_s17, %s1689_s17   ;;  %s1388_s16 = sphi %s1427_s16, %s1688_s16   ;;  %s1384_s15 = sphi %s1425_s15, %s1687_s15   ;;  %s1380_s14 = sphi %s1423_s14, %s1686_s14   ;;  %s1376_s13 = sphi %s1421_s13, %s1685_s13   ;;  %s1372_s12 = sphi %s1419_s12, %s1684_s12  }
   0x5   : > { %p26_p0 = scmp.ge.s32.totalorder %s25_s19, 25  ;;  %p48_p1 = scmp.ne.s32.totalorder %s1376_s13, %s1372_s12 }
   0x6   : > { %p49_p2 = scmp.eq.s32.totalorder %s1396_s18, 0  ;;  %s41_s24 = sadd.s32 1, %s1376_s13 }
   0x7   : > { %s1691_s19 = smov (%p26_p0, %s25_s19), 0  ;;  %s1693_s20 = smov (!%p26_p0, %s32_s20), %s1392_s17 }
   0x8   : > { %p50_p3 = por %p49_p2, %p48_p1  ;;  %p34_p4 = scmp.ge.s32.totalorder %s1693_s20, 2 }
   0x9   : > { %s37_s21 = ssub.s32 %s1388_s16, %s1691_s19  ;;  %p1132_p6 = scmp.ge.s32.totalorder %s1396_s18, 50 }
   0xa   : > { %s1695_s20 = smov (%p34_p4, %s1693_s20), 0 }
   0xb   : > { %s36_s22 = ssub.s32 %s1392_s17, %s1695_s20  ;;  %162 = sbr.rel (%p1132_p6) target bundleno = 44 (0x2c), region = 20 }
   0xc   : > { %s38_s23 = sor.u32 %s37_s21, %s36_s22 }
   0xd   : > { %p39_p5 = scmp.eq.s32.totalorder %s38_s23, 0 }
   0xf   : > { %s1470_s25 = scalar_select %p39_p5, %s1376_s13, %s41_s24  }
  0x10   : > { %165 = sbr.rel (!%p50_p3) target bundleno = 44 (0x2c), region = 24  ;;  %s167_s26 = sand.u32 (%p50_p3), 1, %s1376_s13  }
  0x11   : > { %s1260_s27 = smul.u32 (%p50_p3), 800, %s1392_s17  ;;  %s1133_s28 = sshll.u32 (%p50_p3), %s167_s26, 7 }
  0x12   : > { %s1484_s7 = scalar_lea.vmem (%p50_p3), [#allocation3], %s1133_s28 }
  0x13   : > { %s172_s29 = sadd.s32 (%p50_p3), %s1388_s16, %s1260_s27 }
  0x14   : > { %s1136_s30 = sshll.u32 (%p50_p3), %s172_s29, 2 }
  0x15   : > { %s1479_s6 = scalar_lea.vmem %s1680_s0, %s1136_s30 }
  0x16   : > { %v191_v0 = vld [vmem:[%s1479_s6] sm:$0xf]  ;;  %v193_v1 = vld [vmem:[%s1479_s6 + $0x64] sm:$0xf]  ;;  %v195_v2 = vld [vmem:[%s1479_s6 + $0xc8] sm:$0xf] }
  0x17   : > { %192 = vst [vmem:[%s1484_s7] sm:$0xf] %v191_v0  ;;  %194 = vst [vmem:[%s1484_s7 + $0x4] sm:$0xf] %v193_v1  ;;  %v197_v3 = vld [vmem:[%s1479_s6 + $0x12c] sm:$0xf] }
  0x18   : > { %196 = vst [vmem:[%s1484_s7 + $0x8] sm:$0xf] %v195_v2  ;;  %v199_v4 = vld [vmem:[%s1479_s6 + $0x190] sm:$0xf]  ;;  %v201_v5 = vld [vmem:[%s1479_s6 + $0x1f4] sm:$0xf] }
  0x19   : > { %198 = vst [vmem:[%s1484_s7 + $0xc] sm:$0xf] %v197_v3  ;;  %200 = vst [vmem:[%s1484_s7 + $0x10] sm:$0xf] %v199_v4  ;;  %v203_v6 = vld [vmem:[%s1479_s6 + $0x258] sm:$0xf] }
  0x1a   : > { %202 = vst [vmem:[%s1484_s7 + $0x14] sm:$0xf] %v201_v5  ;;  %v205_v7 = vld [vmem:[%s1479_s6 + $0x2bc] sm:$0xf]  ;;  %v207_v8 = vld [vmem:[%s1479_s6 + $0x320] sm:$0xf] }
  0x1b   : > { %204 = vst [vmem:[%s1484_s7 + $0x18] sm:$0xf] %v203_v6  ;;  %206 = vst [vmem:[%s1484_s7 + $0x1c] sm:$0xf] %v205_v7  ;;  %v209_v9 = vld [vmem:[%s1479_s6 + $0x384] sm:$0xf] }
  0x1c   : > { %208 = vst [vmem:[%s1484_s7 + $0x20] sm:$0xf] %v207_v8  ;;  %v211_v10 = vld [vmem:[%s1479_s6 + $0x3e8] sm:$0xf]  ;;  %v213_v11 = vld [vmem:[%s1479_s6 + $0x44c] sm:$0xf] }
  0x1d   : > { %210 = vst [vmem:[%s1484_s7 + $0x24] sm:$0xf] %v209_v9  ;;  %212 = vst [vmem:[%s1484_s7 + $0x28] sm:$0xf] %v211_v10  ;;  %v215_v12 = vld [vmem:[%s1479_s6 + $0x4b0] sm:$0xf] }
  0x1e   : > { %214 = vst [vmem:[%s1484_s7 + $0x2c] sm:$0xf] %v213_v11  ;;  %v217_v13 = vld [vmem:[%s1479_s6 + $0x514] sm:$0xf]  ;;  %v219_v14 = vld [vmem:[%s1479_s6 + $0x578] sm:$0xf] }
  0x1f   : > { %216 = vst [vmem:[%s1484_s7 + $0x30] sm:$0xf] %v215_v12  ;;  %218 = vst [vmem:[%s1484_s7 + $0x34] sm:$0xf] %v217_v13  ;;  %v221_v15 = vld [vmem:[%s1479_s6 + $0x5dc] sm:$0xf] }
  0x20   : > { %220 = vst [vmem:[%s1484_s7 + $0x38] sm:$0xf] %v219_v14  ;;  %v223_v16 = vld [vmem:[%s1479_s6 + $0x640] sm:$0xf]  ;;  %v225_v17 = vld [vmem:[%s1479_s6 + $0x6a4] sm:$0xf] }
  0x21   : > { %222 = vst [vmem:[%s1484_s7 + $0x3c] sm:$0xf] %v221_v15  ;;  %224 = vst [vmem:[%s1484_s7 + $0x40] sm:$0xf] %v223_v16  ;;  %v227_v18 = vld [vmem:[%s1479_s6 + $0x708] sm:$0xf] }
  0x22   : > { %226 = vst [vmem:[%s1484_s7 + $0x44] sm:$0xf] %v225_v17  ;;  %v229_v19 = vld [vmem:[%s1479_s6 + $0x76c] sm:$0xf]  ;;  %v231_v20 = vld [vmem:[%s1479_s6 + $0x7d0] sm:$0xf] }
  0x23   : > { %228 = vst [vmem:[%s1484_s7 + $0x48] sm:$0xf] %v227_v18  ;;  %230 = vst [vmem:[%s1484_s7 + $0x4c] sm:$0xf] %v229_v19  ;;  %v233_v21 = vld [vmem:[%s1479_s6 + $0x834] sm:$0xf] }
  0x24   : > { %232 = vst [vmem:[%s1484_s7 + $0x50] sm:$0xf] %v231_v20  ;;  %v235_v22 = vld [vmem:[%s1479_s6 + $0x898] sm:$0xf]  ;;  %v237_v23 = vld [vmem:[%s1479_s6 + $0x8fc] sm:$0xf] }
  0x25   : > { %234 = vst [vmem:[%s1484_s7 + $0x54] sm:$0xf] %v233_v21  ;;  %236 = vst [vmem:[%s1484_s7 + $0x58] sm:$0xf] %v235_v22  ;;  %v239_v24 = vld [vmem:[%s1479_s6 + $0x960] sm:$0xf] }
  0x26   : > { %238 = vst [vmem:[%s1484_s7 + $0x5c] sm:$0xf] %v237_v23  ;;  %v241_v25 = vld [vmem:[%s1479_s6 + $0x9c4] sm:$0xf]  ;;  %v243_v26 = vld [vmem:[%s1479_s6 + $0xa28] sm:$0xf] }
  0x27   : > { %240 = vst [vmem:[%s1484_s7 + $0x60] sm:$0xf] %v239_v24  ;;  %242 = vst [vmem:[%s1484_s7 + $0x64] sm:$0xf] %v241_v25  ;;  %v245_v27 = vld [vmem:[%s1479_s6 + $0xa8c] sm:$0xf] }
  0x28   : > { %244 = vst [vmem:[%s1484_s7 + $0x68] sm:$0xf] %v243_v26  ;;  %v247_v28 = vld [vmem:[%s1479_s6 + $0xaf0] sm:$0xf]  ;;  %v249_v29 = vld [vmem:[%s1479_s6 + $0xb54] sm:$0xf] }
  0x29   : > { %246 = vst [vmem:[%s1484_s7 + $0x6c] sm:$0xf] %v245_v27  ;;  %248 = vst [vmem:[%s1484_s7 + $0x70] sm:$0xf] %v247_v28  ;;  %v251_v30 = vld [vmem:[%s1479_s6 + $0xbb8] sm:$0xf] }
  0x2a   : > { %250 = vst [vmem:[%s1484_s7 + $0x74] sm:$0xf] %v249_v29  ;;  %v253_v31 = vld [vmem:[%s1479_s6 + $0xc1c] sm:$0xf]  ;;  %252 = vst [vmem:[%s1484_s7 + $0x78] sm:$0xf] %v251_v30 }
  0x2b   : > { %254 = vst [vmem:[%s1484_s7 + $0x7c] sm:$0xf] %v253_v31 }
  0x2c PF: > { %p1137_p7 = scmp.ge.s32.totalorder %s1396_s18, 1  ;;  %p353_p8 = scmp.lt.s32.totalorder %s1396_s18, 51 }
  0x2e   : > { %p354_p9 = pnand %p1137_p7, %p353_p8 }
  0x2f   : > { %s360_s8 = sand.u32 (!%p354_p9), 1, %s1372_s12   ;;  %s1139_s9 = sshll.u32 (!%p354_p9), %s1380_s14, 4 }
  0x30   : > { %357 = sbr.rel (%p354_p9) target bundleno = 356 (0x164), region = 69  ;;  %s1138_s10 = sshll.u32 (!%p354_p9), %s360_s8, 7 }
  0x31   : > { %p399_p10 = scmp.lt.s32.totalorder (!%p354_p9), %s1139_s9, 399  ;;  %s1141_s11 = sshll.u32 (!%p354_p9), %s1384_s15, 5 }
  0x32   : > { %p411_p11 = scmp.lt.s32.totalorder (!%p354_p9), %s1141_s11, 63  ;;  %s1562_s12 = scalar_lea.vmem (!%p354_p9), [#allocation3], %s1138_s10 }
  0x33   : > { %p1143_p12 = scmp.ne.s32.totalorder (!%p354_p9), %s1380_s14, 0 }
  0x35   : > { %s1697_s9 = smov (!%p399_p10, %s1139_s9), 399  ;;  %s1699_s11 = smov (!%p411_p11, %s1141_s11), 63 }
  0x36   : > { %s1140_s21 = sshll.u32 %s1697_s9, 2  ;;  %s1142_s26 = sshll.u32 %s1699_s11, 3 }
  0x37   : > { %s1555_s24 = scalar_lea.vmem %s1681_s1, %s1140_s21  ;;  %s1560_s29 = scalar_lea.vmem %s1683_s3, %s1142_s26 }
  0x38   : > { %423 = sbr.rel (%p1143_p12) target bundleno = 78 (0x4e), region = 77 }
  0x3d   : > { %v1398_v32 = vmov 0.0  }
  0x3e   : > { %424 = vst [vmem:[#allocation2 + $0xb0] sm:$0xff] %v1398_v32  ;;  %425 = vst [vmem:[#allocation2] sm:$0xff] %v1398_v32 }
  0x3f   : > { %426 = vst [vmem:[#allocation2 + $0xd8] sm:$0xff] %v1398_v32  ;;  %427 = vst [vmem:[#allocation2 + $0x18] sm:$0xff] %v1398_v32 }
  0x40   : > { %428 = vst [vmem:[#allocation2 + $0x50] sm:$0xff] %v1398_v32  ;;  %429 = vst [vmem:[#allocation2 + $0x68] sm:$0xff] %v1398_v32 }
  0x41   : > { %430 = vst [vmem:[#allocation2 + $0x30] sm:$0xff] %v1398_v32  ;;  %431 = vst [vmem:[#allocation2 + $0x48] sm:$0xff] %v1398_v32 }
  0x42   : > { %432 = vst [vmem:[#allocation2 + $0x80] sm:$0xff] %v1398_v32  ;;  %433 = vst [vmem:[#allocation2 + $0x88] sm:$0xff] %v1398_v32 }
  0x43   : > { %434 = vst [vmem:[#allocation2 + $0xe8] sm:$0xff] %v1398_v32  ;;  %435 = vst [vmem:[#allocation2 + $0xb8] sm:$0xff] %v1398_v32 }
  0x44   : > { %436 = vst [vmem:[#allocation2 + $0x60] sm:$0xff] %v1398_v32  ;;  %437 = vst [vmem:[#allocation2 + $0xf0] sm:$0xff] %v1398_v32 }
  0x45   : > { %438 = vst [vmem:[#allocation2 + $0x8] sm:$0xff] %v1398_v32  ;;  %439 = vst [vmem:[#allocation2 + $0x78] sm:$0xff] %v1398_v32 }
  0x46   : > { %440 = vst [vmem:[#allocation2 + $0x38] sm:$0xff] %v1398_v32  ;;  %441 = vst [vmem:[#allocation2 + $0x58] sm:$0xff] %v1398_v32 }
  0x47   : > { %442 = vst [vmem:[#allocation2 + $0x40] sm:$0xff] %v1398_v32  ;;  %443 = vst [vmem:[#allocation2 + $0xc8] sm:$0xff] %v1398_v32 }
  0x48   : > { %444 = vst [vmem:[#allocation2 + $0xe0] sm:$0xff] %v1398_v32  ;;  %445 = vst [vmem:[#allocation2 + $0x90] sm:$0xff] %v1398_v32 }
  0x49   : > { %446 = vst [vmem:[#allocation2 + $0x70] sm:$0xff] %v1398_v32  ;;  %447 = vst [vmem:[#allocation2 + $0xc0] sm:$0xff] %v1398_v32 }
  0x4a   : > { %448 = vst [vmem:[#allocation2 + $0xa8] sm:$0xff] %v1398_v32  ;;  %449 = vst [vmem:[#allocation2 + $0xd0] sm:$0xff] %v1398_v32 }
  0x4b   : > { %450 = vst [vmem:[#allocation2 + $0x10] sm:$0xff] %v1398_v32  ;;  %451 = vst [vmem:[#allocation2 + $0x28] sm:$0xff] %v1398_v32 }
  0x4c   : > { %452 = vst [vmem:[#allocation2 + $0xa0] sm:$0xff] %v1398_v32  ;;  %453 = vst [vmem:[#allocation2 + $0xf8] sm:$0xff] %v1398_v32 }
  0x4d   : > { %454 = vst [vmem:[#allocation2 + $0x20] sm:$0xff] %v1398_v32  ;;  %455 = vst [vmem:[#allocation2 + $0x98] sm:$0xff] %v1398_v32 }
  0x4e PF: > { %v1318_v33 = vld [vmem:[%s1555_s24 + $0x38] sm:$0xff]   ;;  %v1319_v34 = vld [vmem:[%s1555_s24 + $0x30] sm:$0xff]   ;;  %v1320_v35 = vld [vmem:[%s1555_s24 + $0x28] sm:$0xff]   ;;  %p1168_p13 = scmp.ne.s32.totalorder %s1380_s14, 24 }
  0x4f   : > { %1196 = vmatprep.subr.bf16.mxu0 %v1318_v33  ;;  %1244 = vmatprep.subr.bf16.mxu1 %v1318_v33  ;;  %v1321_v36 = vld [vmem:[%s1555_s24 + $0x20] sm:$0xff]   ;;  %v1322_v39 = vld [vmem:[%s1555_s24 + $0x18] sm:$0xff]   ;;  %v1323_v40 = vld [vmem:[%s1555_s24 + $0x10] sm:$0xff]  }
  0x50   : > { %1197 = vmatpush3.bf16.msra.mxu0 %v1318_v33  ;;  %1252 = vmatpush3.bf16.msra.mxu1 %v1318_v33  ;;  %v1326_v37 = vld [vmem:[%s1562_s12] sm:$0xff]   ;;  %v1324_v41 = vld [vmem:[%s1555_s24 + $0x8] sm:$0xff]   ;;  %v1330_v45 = vld [vmem:[%s1562_s12 + $0x10] sm:$0xff]  }
  0x51   : > { %1198 = vmatprep.subr.bf16.mxu0 %v1319_v34  ;;  %1245 = vmatprep.subr.bf16.mxu1 %v1319_v34  ;;  %v1327_v38 = vld [vmem:[%s1562_s12 + $0x40] sm:$0xff]   ;;  %v1328_v43 = vld [vmem:[%s1562_s12 + $0x8] sm:$0xff]   ;;  %v1331_v46 = vld [vmem:[%s1562_s12 + $0x50] sm:$0xff]  }
  0x52   : > { %1212 = vmatprep.mubr.bf16.mxu0 %v1326_v37  ;;  %1228 = vmatprep.mubr.bf16.mxu1 %v1327_v38  ;;  %v1325_v42 = vld [vmem:[%s1555_s24] sm:$0xff]   ;;  %v1329_v44 = vld [vmem:[%s1562_s12 + $0x48] sm:$0xff]   ;;  %v1332_v47 = vld [vmem:[%s1562_s12 + $0x18] sm:$0xff]  }
  0x53   : > { %v1333_v48 = vld [vmem:[%s1562_s12 + $0x58] sm:$0xff]   ;;  %v1334_v49 = vld [vmem:[%s1562_s12 + $0x20] sm:$0xff]   ;;  %v1336_v51 = vld [vmem:[%s1562_s12 + $0x28] sm:$0xff]  }
  0x54   : > { %1199 = vmatpush3.bf16.msra.mxu0 %v1319_v34  ;;  %1253 = vmatpush3.bf16.msra.mxu1 %v1319_v34  ;;  %v1335_v50 = vld [vmem:[%s1562_s12 + $0x60] sm:$0xff]   ;;  %v1337_v52 = vld [vmem:[%s1562_s12 + $0x68] sm:$0xff]   ;;  %v1338_v53 = vld [vmem:[%s1562_s12 + $0x30] sm:$0xff]  }
  0x55   : > { %1200 = vmatprep.subr.bf16.mxu0 %v1320_v35  ;;  %1246 = vmatprep.subr.bf16.mxu1 %v1320_v35  ;;  %v1339_v54 = vld [vmem:[%s1562_s12 + $0x70] sm:$0xff]   ;;  %v1340_v55 = vld [vmem:[%s1562_s12 + $0x38] sm:$0xff]   ;;  %v474_v58 = vld [vmem:[#allocation2 + $0x40] sm:$0xff] }
  0x56   : > { %v1341_v56 = vld [vmem:[%s1562_s12 + $0x78] sm:$0xff]   ;;  %v456_v61 = vld [vmem:[#allocation2 + $0xb0] sm:$0xff]  ;;  %v475_v4 = vld [vmem:[#allocation2 + $0xc8] sm:$0xff] }
  0x57   : > { %v458_v57 = vld [vmem:[#allocation2 + $0xd8] sm:$0xff]  ;;  %v457_v9 = vld [vmem:[#allocation2] sm:$0xff]  ;;  %v462_v15 = vld [vmem:[#allocation2 + $0x30] sm:$0xff] }
  0x58   : > { %1201 = vmatpush3.bf16.msra.mxu0 %v1320_v35  ;;  %1254 = vmatpush3.bf16.msra.mxu1 %v1320_v35  ;;  %v472_v62 = vld [vmem:[#allocation2 + $0x38] sm:$0xff]  ;;  %v478_v16 = vld [vmem:[#allocation2 + $0x70] sm:$0xff]  ;;  %v476_v22 = vld [vmem:[#allocation2 + $0xe0] sm:$0xff] }
  0x59   : > { %1202 = vmatprep.subr.bf16.mxu0 %v1321_v36  ;;  %1247 = vmatprep.subr.bf16.mxu1 %v1321_v36  ;;  %v459_v3 = vld [vmem:[#allocation2 + $0x18] sm:$0xff]  ;;  %v460_v21 = vld [vmem:[#allocation2 + $0x50] sm:$0xff]  ;;  %v463_v27 = vld [vmem:[#allocation2 + $0x48] sm:$0xff] }
  0x5a   : > { %v473_v10 = vld [vmem:[#allocation2 + $0x58] sm:$0xff]  ;;  %v479_v28 = vld [vmem:[#allocation2 + $0xc0] sm:$0xff]  ;;  %v461_v33 = vld [vmem:[#allocation2 + $0x68] sm:$0xff] }
  0x5b   : > { %v477_v34 = vld [vmem:[#allocation2 + $0x90] sm:$0xff] }
  0x5c   : > { %1203 = vmatpush3.bf16.msra.mxu0 %v1321_v36  ;;  %1255 = vmatpush3.bf16.msra.mxu1 %v1321_v36 }
  0x5d   : > { %1204 = vmatprep.subr.bf16.mxu0 %v1322_v39  ;;  %1248 = vmatprep.subr.bf16.mxu1 %v1322_v39 }
  0x60   : > { %1205 = vmatpush3.bf16.msra.mxu0 %v1322_v39  ;;  %1256 = vmatpush3.bf16.msra.mxu1 %v1322_v39  ;;  %v466_v39 = vld [vmem:[#allocation2 + $0xe8] sm:$0xff] }
  0x61   : > { %1206 = vmatprep.subr.bf16.mxu0 %v1323_v40  ;;  %1249 = vmatprep.subr.bf16.mxu1 %v1323_v40 }
  0x64   : > { %1207 = vmatpush3.bf16.msra.mxu0 %v1323_v40  ;;  %1257 = vmatpush3.bf16.msra.mxu1 %v1323_v40  ;;  %v482_v40 = vld [vmem:[#allocation2 + $0x10] sm:$0xff] }
  0x65   : > { %1208 = vmatprep.subr.bf16.mxu0 %v1324_v41  ;;  %1250 = vmatprep.subr.bf16.mxu1 %v1324_v41 }
  0x68   : > { %1209 = vmatpush3.bf16.msra.mxu0 %v1324_v41  ;;  %1258 = vmatpush3.bf16.msra.mxu1 %v1324_v41 }
  0x69   : > { %1210 = vmatprep.subr.bf16.mxu0 %v1325_v42  ;;  %1251 = vmatprep.subr.bf16.mxu1 %v1325_v42 }
  0x6c   : > { %1211 = vmatpush3.bf16.msra.mxu0 %v1325_v42  ;;  %1259 = vmatpush3.bf16.msra.mxu1 %v1325_v42 }
  0x6f   : > { %1213 = vmatmul.mubr.bf16.vlgmr.msra.gmra.mxu0 %v1328_v43  ;;  %1229 = vmatmul.mubr.bf16.vlgmr.msra.gmra.mxu1 %v1329_v44 }
  0x70   : > { %1216 = vmatprep.mubr.bf16.mxu0 %v1330_v45  ;;  %1232 = vmatprep.mubr.bf16.mxu1 %v1331_v46  ;;  %v464_v45 = vld [vmem:[#allocation2 + $0x80] sm:$0xff]  ;;  %v480_v46 = vld [vmem:[#allocation2 + $0xa8] sm:$0xff] }
  0x77   : > { %1217 = vmatmul.mubr.bf16.gmra.mxu0 %v1332_v47  ;;  %1233 = vmatmul.mubr.bf16.gmra.mxu1 %v1333_v48 }
  0x78   : > { %1220 = vmatprep.mubr.bf16.mxu0 %v1334_v49  ;;  %1236 = vmatprep.mubr.bf16.mxu1 %v1335_v50 }
  0x7f   : > { %1221 = vmatmul.mubr.bf16.gmra.mxu0 %v1336_v51  ;;  %1237 = vmatmul.mubr.bf16.gmra.mxu1 %v1337_v52  ;;  %v467_v51 = vld [vmem:[#allocation2 + $0xb8] sm:$0xff]  ;;  %v483_v52 = vld [vmem:[#allocation2 + $0x28] sm:$0xff] }
  0x80   : > { %1224 = vmatprep.mubr.bf16.mxu0 %v1338_v53  ;;  %1240 = vmatprep.mubr.bf16.mxu1 %v1339_v54 }
  0x87   : > { %1225 = vmatmul.mubr.bf16.gmra.mxu0 %v1340_v55  ;;  %1241 = vmatmul.mubr.bf16.gmra.mxu1 %v1341_v56 }
 0x12f   : > { %v1214_v59 = vpop.f32.mrf.mxu0  ;;  %v1230_v60 = vpop.f32.mrf.mxu1 }
 0x130   : > { %v843_v63 = vadd.f32 %v1214_v59, %v458_v57  ;;  %v859_v0 = vadd.f32 %v1230_v60, %v474_v58  ;;  %v465_v57 = vld [vmem:[#allocation2 + $0x88] sm:$0xff]  ;;  %v481_v58 = vld [vmem:[#allocation2 + $0xd0] sm:$0xff] }
 0x131   : > { %v714_v1 = vpop.f32.mrf.mxu0  ;;  %v778_v2 = vpop.f32.mrf.mxu1 }
 0x132   : > { %875 = vst [vmem:[#allocation2 + $0xd8] sm:$0xff] %v843_v63  ;;  %891 = vst [vmem:[#allocation2 + $0x40] sm:$0xff] %v859_v0  ;;  %v841_v5 = vadd.f32 %v714_v1, %v456_v61  ;;  %v857_v6 = vadd.f32 %v778_v2, %v472_v62  ;;  %v470_v63 = vld [vmem:[#allocation2 + $0x8] sm:$0xff]  ;;  %v486_v0 = vld [vmem:[#allocation2 + $0x20] sm:$0xff] }
 0x133   : > { %v1215_v7 = vpop.f32.mrf.mxu0  ;;  %v1231_v8 = vpop.f32.mrf.mxu1 }
 0x134   : > { %873 = vst [vmem:[#allocation2 + $0xb0] sm:$0xff] %v841_v5  ;;  %889 = vst [vmem:[#allocation2 + $0x38] sm:$0xff] %v857_v6  ;;  %v844_v11 = vadd.f32 %v1215_v7, %v459_v3  ;;  %v860_v12 = vadd.f32 %v1231_v8, %v475_v4  ;;  %v468_v5 = vld [vmem:[#allocation2 + $0x60] sm:$0xff] }
 0x135   : > { %v717_v13 = vpop.f32.mrf.mxu0  ;;  %v781_v14 = vpop.f32.mrf.mxu1  ;;  %v484_v6 = vld [vmem:[#allocation2 + $0xa0] sm:$0xff] }
 0x136   : > { %876 = vst [vmem:[#allocation2 + $0x18] sm:$0xff] %v844_v11  ;;  %892 = vst [vmem:[#allocation2 + $0xc8] sm:$0xff] %v860_v12  ;;  %v842_v17 = vadd.f32 %v717_v13, %v457_v9  ;;  %v858_v18 = vadd.f32 %v781_v14, %v473_v10  ;;  %v471_v11 = vld [vmem:[#allocation2 + $0x78] sm:$0xff] }
 0x137   : > { %v1218_v19 = vpop.f32.mrf.mxu0  ;;  %v1234_v20 = vpop.f32.mrf.mxu1  ;;  %v487_v12 = vld [vmem:[#allocation2 + $0x98] sm:$0xff] }
 0x138   : > { %874 = vst [vmem:[#allocation2] sm:$0xff] %v842_v17  ;;  %890 = vst [vmem:[#allocation2 + $0x58] sm:$0xff] %v858_v18  ;;  %v847_v23 = vadd.f32 %v1218_v19, %v462_v15  ;;  %v863_v24 = vadd.f32 %v1234_v20, %v478_v16  ;;  %v469_v17 = vld [vmem:[#allocation2 + $0xf0] sm:$0xff]  ;;  %v485_v18 = vld [vmem:[#allocation2 + $0xf8] sm:$0xff] }
 0x139   : > { %v730_v25 = vpop.f32.mrf.mxu0  ;;  %v794_v26 = vpop.f32.mrf.mxu1 }
 0x13a   : > { %879 = vst [vmem:[#allocation2 + $0x30] sm:$0xff] %v847_v23  ;;  %895 = vst [vmem:[#allocation2 + $0x70] sm:$0xff] %v863_v24  ;;  %v845_v29 = vadd.f32 %v730_v25, %v460_v21  ;;  %v861_v30 = vadd.f32 %v794_v26, %v476_v22 }
 0x13b   : > { %v1219_v31 = vpop.f32.mrf.mxu0  ;;  %v1235_v32 = vpop.f32.mrf.mxu1 }
 0x13c   : > { %877 = vst [vmem:[#allocation2 + $0x50] sm:$0xff] %v845_v29  ;;  %893 = vst [vmem:[#allocation2 + $0xe0] sm:$0xff] %v861_v30  ;;  %v848_v35 = vadd.f32 %v1219_v31, %v463_v27  ;;  %v864_v36 = vadd.f32 %v1235_v32, %v479_v28 }
 0x13d   : > { %v733_v37 = vpop.f32.mrf.mxu0  ;;  %v797_v38 = vpop.f32.mrf.mxu1 }
 0x13e   : > { %880 = vst [vmem:[#allocation2 + $0x48] sm:$0xff] %v848_v35  ;;  %896 = vst [vmem:[#allocation2 + $0xc0] sm:$0xff] %v864_v36  ;;  %v846_v41 = vadd.f32 %v733_v37, %v461_v33  ;;  %v862_v42 = vadd.f32 %v797_v38, %v477_v34 }
 0x13f   : > { %v1222_v43 = vpop.f32.mrf.mxu0  ;;  %v1238_v44 = vpop.f32.mrf.mxu1 }
 0x140   : > { %878 = vst [vmem:[#allocation2 + $0x68] sm:$0xff] %v846_v41  ;;  %894 = vst [vmem:[#allocation2 + $0x90] sm:$0xff] %v862_v42  ;;  %v851_v47 = vadd.f32 %v1222_v43, %v466_v39  ;;  %v867_v48 = vadd.f32 %v1238_v44, %v482_v40 }
 0x141   : > { %v746_v49 = vpop.f32.mrf.mxu0  ;;  %v810_v50 = vpop.f32.mrf.mxu1 }
 0x142   : > { %883 = vst [vmem:[#allocation2 + $0xe8] sm:$0xff] %v851_v47  ;;  %899 = vst [vmem:[#allocation2 + $0x10] sm:$0xff] %v867_v48  ;;  %v849_v53 = vadd.f32 %v746_v49, %v464_v45  ;;  %v865_v54 = vadd.f32 %v810_v50, %v480_v46 }
 0x143   : > { %v1223_v55 = vpop.f32.mrf.mxu0  ;;  %v1239_v56 = vpop.f32.mrf.mxu1 }
 0x144   : > { %881 = vst [vmem:[#allocation2 + $0x80] sm:$0xff] %v849_v53  ;;  %897 = vst [vmem:[#allocation2 + $0xa8] sm:$0xff] %v865_v54  ;;  %v852_v59 = vadd.f32 %v1223_v55, %v467_v51  ;;  %v868_v60 = vadd.f32 %v1239_v56, %v483_v52 }
 0x145   : > { %v749_v61 = vpop.f32.mrf.mxu0  ;;  %v813_v62 = vpop.f32.mrf.mxu1 }
 0x146   : > { %884 = vst [vmem:[#allocation2 + $0xb8] sm:$0xff] %v852_v59  ;;  %900 = vst [vmem:[#allocation2 + $0x28] sm:$0xff] %v868_v60  ;;  %v850_v1 = vadd.f32 %v749_v61, %v465_v57  ;;  %v866_v2 = vadd.f32 %v813_v62, %v481_v58 }
 0x147   : > { %v1226_v3 = vpop.f32.mrf.mxu0  ;;  %v1242_v4 = vpop.f32.mrf.mxu1 }
 0x148   : > { %882 = vst [vmem:[#allocation2 + $0x88] sm:$0xff] %v850_v1  ;;  %898 = vst [vmem:[#allocation2 + $0xd0] sm:$0xff] %v866_v2  ;;  %v855_v7 = vadd.f32 %v1226_v3, %v470_v63  ;;  %v871_v8 = vadd.f32 %v1242_v4, %v486_v0 }
 0x149   : > { %v762_v9 = vpop.f32.mrf.mxu0  ;;  %v826_v10 = vpop.f32.mrf.mxu1 }
 0x14a   : > { %887 = vst [vmem:[#allocation2 + $0x8] sm:$0xff] %v855_v7  ;;  %903 = vst [vmem:[#allocation2 + $0x20] sm:$0xff] %v871_v8  ;;  %v853_v13 = vadd.f32 %v762_v9, %v468_v5  ;;  %v869_v14 = vadd.f32 %v826_v10, %v484_v6 }
 0x14b   : > { %v1227_v15 = vpop.f32.mrf.mxu0  ;;  %v1243_v16 = vpop.f32.mrf.mxu1 }
 0x14c   : > { %885 = vst [vmem:[#allocation2 + $0x60] sm:$0xff] %v853_v13  ;;  %901 = vst [vmem:[#allocation2 + $0xa0] sm:$0xff] %v869_v14  ;;  %v856_v19 = vadd.f32 %v1227_v15, %v471_v11  ;;  %v872_v20 = vadd.f32 %v1243_v16, %v487_v12  ;;  %908 = sbr.rel (%p1168_p13) target bundleno = 356 (0x164), region = 81 }
 0x14d   : > { %v765_v21 = vpop.f32.mrf.mxu0  ;;  %v829_v22 = vpop.f32.mrf.mxu1 }
 0x14e   : > { %888 = vst [vmem:[#allocation2 + $0x78] sm:$0xff] %v856_v19  ;;  %904 = vst [vmem:[#allocation2 + $0x98] sm:$0xff] %v872_v20  ;;  %v854_v23 = vadd.f32 %v765_v21, %v469_v17  ;;  %v870_v24 = vadd.f32 %v829_v22, %v485_v18 }
 0x150   : > { %886 = vst [vmem:[#allocation2 + $0xf0] sm:$0xff] %v854_v23  ;;  %902 = vst [vmem:[#allocation2 + $0xf8] sm:$0xff] %v870_v24 }
 0x151   : > { %v909_v25 = vld [vmem:[#allocation2 + $0xb0] sm:$0xff]  ;;  %v1593_v26 = vld [vmem:[%s1682_s2] ss:$0 sm:$0xff]  ;;  %v911_v30 = vld [vmem:[#allocation2 + $0xd8] sm:$0xff] }
 0x152   : > { %v910_v27 = vld [vmem:[#allocation2] sm:$0xff]  ;;  %v948_v28 = vadd.f32 %v1593_v26, %v909_v25  ;;  %v912_v31 = vld [vmem:[#allocation2 + $0x18] sm:$0xff]  ;;  %v913_v32 = vld [vmem:[#allocation2 + $0x50] sm:$0xff]  ;;  %v950_v33 = vadd.f32 %v1593_v26, %v911_v30 }
 0x153   : > { %v949_v29 = vadd.f32 %v1593_v26, %v910_v27  ;;  %v951_v34 = vadd.f32 %v1593_v26, %v912_v31  ;;  %v952_v35 = vadd.f32 %v1593_v26, %v913_v32  ;;  %v914_v36 = vld [vmem:[#allocation2 + $0x68] sm:$0xff]  ;;  %v915_v37 = vld [vmem:[#allocation2 + $0x30] sm:$0xff]  ;;  %v917_v42 = vld [vmem:[#allocation2 + $0x80] sm:$0xff] }
 0x154   : > { %v916_v38 = vld [vmem:[#allocation2 + $0x48] sm:$0xff]  ;;  %980 = vst [vmem:[%s1560_s29] sm:$0xff] %v948_v28  ;;  %v953_v39 = vadd.f32 %v1593_v26, %v914_v36  ;;  %v954_v40 = vadd.f32 %v1593_v26, %v915_v37  ;;  %982 = vst [vmem:[%s1560_s29 + $0x10] sm:$0xff] %v950_v33  ;;  %v956_v45 = vadd.f32 %v1593_v26, %v917_v42  ;;  %v920_v48 = vld [vmem:[#allocation2 + $0xb8] sm:$0xff] }
 0x155   : > { %981 = vst [vmem:[%s1560_s29 + $0x8] sm:$0xff] %v949_v29  ;;  %v955_v41 = vadd.f32 %v1593_v26, %v916_v38  ;;  %v918_v43 = vld [vmem:[#allocation2 + $0x88] sm:$0xff]  ;;  %983 = vst [vmem:[%s1560_s29 + $0x18] sm:$0xff] %v951_v34  ;;  %v921_v49 = vld [vmem:[#allocation2 + $0x60] sm:$0xff]  ;;  %v959_v51 = vadd.f32 %v1593_v26, %v920_v48 }
 0x156   : > { %v919_v44 = vld [vmem:[#allocation2 + $0xe8] sm:$0xff]  ;;  %984 = vst [vmem:[%s1560_s29 + $0x20] sm:$0xff] %v952_v35  ;;  %v957_v46 = vadd.f32 %v1593_v26, %v918_v43  ;;  %985 = vst [vmem:[%s1560_s29 + $0x28] sm:$0xff] %v953_v39  ;;  %v960_v52 = vadd.f32 %v1593_v26, %v921_v49  ;;  %v924_v55 = vld [vmem:[#allocation2 + $0x78] sm:$0xff] }
 0x157   : > { %v958_v47 = vadd.f32 %v1593_v26, %v919_v44  ;;  %v922_v50 = vld [vmem:[#allocation2 + $0xf0] sm:$0xff]  ;;  %986 = vst [vmem:[%s1560_s29 + $0x30] sm:$0xff] %v954_v40  ;;  %987 = vst [vmem:[%s1560_s29 + $0x38] sm:$0xff] %v955_v41  ;;  %v923_v54 = vld [vmem:[#allocation2 + $0x8] sm:$0xff]  ;;  %v963_v58 = vadd.f32 %v1593_v26, %v924_v55 }
 0x158   : > { %v961_v53 = vadd.f32 %v1593_v26, %v922_v50  ;;  %v925_v56 = vld [vmem:[#allocation2 + $0x38] sm:$0xff]  ;;  %988 = vst [vmem:[%s1560_s29 + $0x40] sm:$0xff] %v956_v45  ;;  %989 = vst [vmem:[%s1560_s29 + $0x48] sm:$0xff] %v957_v46  ;;  %v962_v57 = vadd.f32 %v1593_v26, %v923_v54  ;;  %v927_v61 = vld [vmem:[#allocation2 + $0x40] sm:$0xff] }
 0x159   : > { %990 = vst [vmem:[%s1560_s29 + $0x50] sm:$0xff] %v958_v47  ;;  %v964_v59 = vadd.f32 %v1593_v26, %v925_v56  ;;  %v926_v60 = vld [vmem:[#allocation2 + $0x58] sm:$0xff]  ;;  %v928_v62 = vld [vmem:[#allocation2 + $0xc8] sm:$0xff]  ;;  %991 = vst [vmem:[%s1560_s29 + $0x58] sm:$0xff] %v959_v51  ;;  %v966_v0 = vadd.f32 %v1593_v26, %v927_v61 }
 0x15a   : > { %992 = vst [vmem:[%s1560_s29 + $0x60] sm:$0xff] %v960_v52  ;;  %993 = vst [vmem:[%s1560_s29 + $0x68] sm:$0xff] %v961_v53  ;;  %v965_v63 = vadd.f32 %v1593_v26, %v926_v60  ;;  %v967_v1 = vadd.f32 %v1593_v26, %v928_v62  ;;  %v929_v2 = vld [vmem:[#allocation2 + $0xe0] sm:$0xff]  ;;  %v930_v3 = vld [vmem:[#allocation2 + $0x90] sm:$0xff] }
 0x15b   : > { %v931_v4 = vld [vmem:[#allocation2 + $0x70] sm:$0xff]  ;;  %994 = vst [vmem:[%s1560_s29 + $0x70] sm:$0xff] %v962_v57  ;;  %995 = vst [vmem:[%s1560_s29 + $0x78] sm:$0xff] %v963_v58  ;;  %v968_v5 = vadd.f32 %v1593_v26, %v929_v2  ;;  %v969_v6 = vadd.f32 %v1593_v26, %v930_v3  ;;  %v932_v8 = vld [vmem:[#allocation2 + $0xc0] sm:$0xff] }
 0x15c   : > { %996 = vst [vmem:[%s1560_s29 + $0x80] sm:$0xff] %v964_v59  ;;  %v970_v7 = vadd.f32 %v1593_v26, %v931_v4  ;;  %v933_v9 = vld [vmem:[#allocation2 + $0xa8] sm:$0xff]  ;;  %v934_v10 = vld [vmem:[#allocation2 + $0xd0] sm:$0xff]  ;;  %997 = vst [vmem:[%s1560_s29 + $0x88] sm:$0xff] %v965_v63  ;;  %v971_v11 = vadd.f32 %v1593_v26, %v932_v8 }
 0x15d   : > { %998 = vst [vmem:[%s1560_s29 + $0x90] sm:$0xff] %v966_v0  ;;  %999 = vst [vmem:[%s1560_s29 + $0x98] sm:$0xff] %v967_v1  ;;  %v972_v12 = vadd.f32 %v1593_v26, %v933_v9  ;;  %v973_v13 = vadd.f32 %v1593_v26, %v934_v10  ;;  %v935_v14 = vld [vmem:[#allocation2 + $0x10] sm:$0xff]  ;;  %v936_v15 = vld [vmem:[#allocation2 + $0x28] sm:$0xff] }
 0x15e   : > { %v937_v16 = vld [vmem:[#allocation2 + $0xa0] sm:$0xff]  ;;  %1000 = vst [vmem:[%s1560_s29 + $0xa0] sm:$0xff] %v968_v5  ;;  %1001 = vst [vmem:[%s1560_s29 + $0xa8] sm:$0xff] %v969_v6  ;;  %v974_v17 = vadd.f32 %v1593_v26, %v935_v14  ;;  %v975_v18 = vadd.f32 %v1593_v26, %v936_v15  ;;  %v938_v20 = vld [vmem:[#allocation2 + $0xf8] sm:$0xff] }
 0x15f   : > { %1002 = vst [vmem:[%s1560_s29 + $0xb0] sm:$0xff] %v970_v7  ;;  %v976_v19 = vadd.f32 %v1593_v26, %v937_v16  ;;  %v939_v21 = vld [vmem:[#allocation2 + $0x20] sm:$0xff]  ;;  %v940_v22 = vld [vmem:[#allocation2 + $0x98] sm:$0xff]  ;;  %1003 = vst [vmem:[%s1560_s29 + $0xb8] sm:$0xff] %v971_v11  ;;  %v977_v23 = vadd.f32 %v1593_v26, %v938_v20 }
 0x160   : > { %1004 = vst [vmem:[%s1560_s29 + $0xc0] sm:$0xff] %v972_v12  ;;  %1005 = vst [vmem:[%s1560_s29 + $0xc8] sm:$0xff] %v973_v13  ;;  %v978_v24 = vadd.f32 %v1593_v26, %v939_v21  ;;  %v979_v25 = vadd.f32 %v1593_v26, %v940_v22 }
 0x161   : > { %1006 = vst [vmem:[%s1560_s29 + $0xd0] sm:$0xff] %v974_v17  ;;  %1007 = vst [vmem:[%s1560_s29 + $0xd8] sm:$0xff] %v975_v18 }
 0x162   : > { %1008 = vst [vmem:[%s1560_s29 + $0xe0] sm:$0xff] %v976_v19  ;;  %1009 = vst [vmem:[%s1560_s29 + $0xe8] sm:$0xff] %v977_v23 }
 0x163   : > { %1010 = vst [vmem:[%s1560_s29 + $0xf0] sm:$0xff] %v978_v24  ;;  %1011 = vst [vmem:[%s1560_s29 + $0xf8] sm:$0xff] %v979_v25 }
 0x164 PF: > { %s13_s18 = sadd.s32 1, %s1396_s18   ;;  %s1684_s12 = smov %s1376_s13 }
 0x165   : > { %p10_p0 = scmp.ge.s32.totalorder %s13_s18, 52   ;;  %s1685_s13 = smov %s1470_s25 }
 0x166   : > { %s1686_s14 = smov %s1388_s16  ;;  %s1687_s15 = smov %s1392_s17 }
 0x167   : > { %s1688_s16 = smov %s1691_s19  ;;  %s1689_s17 = smov %s1695_s20 }
 0x168   :  { %12 = sbr.rel (!%p10_p0) target bundleno = 4 (0x4), region = 122 }

// kernel: generator_forward.64
= control target key start
LH: loop header
LB: loop body
LE: loop exit
PB: predicated region body
PF: predicated region fallthrough
CT: control target
= control target key end

     0   :  { %s903_s12 = smov 0   ;;  %s905_s13 = smov 0   ;;  %s1537_s0 = inlined_call_operand.vmem [shape: f32[2,256,3], index: 0, kind: input, shape index: {}]   ;;  %s1538_s1 = inlined_call_operand.vmem [shape: f32[1,3], index: 1, kind: input, shape index: {}]   ;;  %s1539_s2 = inlined_call_operand.vmem [shape: f32[1,3], index: 2, kind: input, shape index: {}]   ;;  %s1540_s3 = inlined_call_operand.vmem [shape: f32[2,256,3], index: 3, kind: output, shape index: {}]  }
   0x1   :  { %s907_s14 = smov 0  }
   0x2 LB: > { %s25_s15 = sadd.s32 1, %s877_s13  ;;  %p758_p0 = scmp.ge.s32.totalorder %s881_s14, 1  ;;  %s881_s14 = sphi %s907_s14, %s13_s14   ;;  %s877_s13 = sphi %s905_s13, %s1542_s13   ;;  %s873_s12 = sphi %s903_s12, %s1541_s12  }
   0x3   : > { %p27_p1 = scmp.ge.s32.totalorder %s25_s15, 2  ;;  %p172_p2 = scmp.lt.s32.totalorder %s881_s14, 3 }
   0x5   : > { %s1544_s15 = smov (%p27_p1, %s25_s15), 0  ;;  %p173_p3 = pnand %p758_p0, %p172_p2 }
   0x6   : > { %p208_p4 = scmp.lt.s32.totalorder (!%p173_p3), %s873_s12, 1 }
   0x7   : > { %176 = sbr.rel (%p173_p3) target bundleno = 242 (0xf2), region = 32 }
   0xc   : > { %s1546_s12 = smov (!%p208_p4, %s873_s12), 1  ;;  %vm262_vm0 = vcmask 23552  }
   0xd   : > { %s767_s16 = sshll.u32 %s1546_s12, 8 }
   0xe   : > { %s929_s19 = scalar_lea.vmem %s1537_s0, %s767_s16  ;;  %s1410_s26 = scalar_lea.vmem %s1540_s3, %s767_s16 }
   0xf   : > { %v932_v0 = vld [vmem:[%s929_s19] sm:$0xff]  ;;  %v935_v1 = vld [vmem:[%s929_s19 + $0x8] sm:$0xff]  ;;  %v938_v2 = vld [vmem:[%s929_s19 + $0x10] sm:$0xff] }
  0x10   : > { %v941_v3 = vld [vmem:[%s929_s19 + $0x18] sm:$0xff]  ;;  %v263_v4 = vsel %vm262_vm0, %v932_v0, 0.0  ;;  %v264_v5 = vsel %vm262_vm0, %v935_v1, 0.0  ;;  %v266_v6 = vsel %vm262_vm0, %v938_v2, 0.0  ;;  %v950_v7 = vld [vmem:[%s929_s19 + $0x20] sm:$0xff]  ;;  %v955_v10 = vld [vmem:[%s929_s19 + $0x28] sm:$0xff] }
  0x11   : > { %v265_v8 = vadd.f32 %v264_v5, %v263_v4  ;;  %v268_v9 = vsel %vm262_vm0, %v941_v3, 0.0  ;;  %v270_v12 = vsel %vm262_vm0, %v950_v7, 0.0  ;;  %v960_v13 = vld [vmem:[%s929_s19 + $0x30] sm:$0xff]  ;;  %v272_v15 = vsel %vm262_vm0, %v955_v10, 0.0  ;;  %v965_v16 = vld [vmem:[%s929_s19 + $0x38] sm:$0xff]  ;;  %v970_v19 = vld [vmem:[%s929_s19 + $0x40] sm:$0xff] }
  0x12   : > { %v274_v18 = vsel %vm262_vm0, %v960_v13, 0.0  ;;  %v276_v21 = vsel %vm262_vm0, %v965_v16, 0.0  ;;  %v975_v22 = vld [vmem:[%s929_s19 + $0x48] sm:$0xff]  ;;  %v278_v24 = vsel %vm262_vm0, %v970_v19, 0.0  ;;  %v980_v25 = vld [vmem:[%s929_s19 + $0x50] sm:$0xff]  ;;  %v985_v28 = vld [vmem:[%s929_s19 + $0x58] sm:$0xff] }
  0x13   : > { %v267_v11 = vadd.f32 %v266_v6, %v265_v8  ;;  %v280_v27 = vsel %vm262_vm0, %v975_v22, 0.0  ;;  %v282_v30 = vsel %vm262_vm0, %v980_v25, 0.0  ;;  %v990_v31 = vld [vmem:[%s929_s19 + $0x60] sm:$0xff]  ;;  %v284_v33 = vsel %vm262_vm0, %v985_v28, 0.0  ;;  %v995_v34 = vld [vmem:[%s929_s19 + $0x68] sm:$0xff]  ;;  %v1000_v37 = vld [vmem:[%s929_s19 + $0x70] sm:$0xff] }
  0x14   : > { %v286_v36 = vsel %vm262_vm0, %v990_v31, 0.0  ;;  %v288_v39 = vsel %vm262_vm0, %v995_v34, 0.0  ;;  %v1005_v40 = vld [vmem:[%s929_s19 + $0x78] sm:$0xff]  ;;  %v290_v42 = vsel %vm262_vm0, %v1000_v37, 0.0  ;;  %v1010_v43 = vld [vmem:[%s929_s19 + $0x80] sm:$0xff]  ;;  %v1015_v46 = vld [vmem:[%s929_s19 + $0x88] sm:$0xff] }
  0x15   : > { %v269_v14 = vadd.f32 %v268_v9, %v267_v11  ;;  %v292_v45 = vsel %vm262_vm0, %v1005_v40, 0.0  ;;  %v294_v48 = vsel %vm262_vm0, %v1010_v43, 0.0  ;;  %v1020_v49 = vld [vmem:[%s929_s19 + $0x90] sm:$0xff]  ;;  %v296_v51 = vsel %vm262_vm0, %v1015_v46, 0.0  ;;  %v1025_v52 = vld [vmem:[%s929_s19 + $0x98] sm:$0xff]  ;;  %v1030_v55 = vld [vmem:[%s929_s19 + $0xa0] sm:$0xff] }
  0x16   : > { %v298_v54 = vsel %vm262_vm0, %v1020_v49, 0.0  ;;  %v300_v57 = vsel %vm262_vm0, %v1025_v52, 0.0  ;;  %v1035_v58 = vld [vmem:[%s929_s19 + $0xa8] sm:$0xff]  ;;  %v302_v60 = vsel %vm262_vm0, %v1030_v55, 0.0  ;;  %v1040_v61 = vld [vmem:[%s929_s19 + $0xb0] sm:$0xff]  ;;  %v1045_v4 = vld [vmem:[%s929_s19 + $0xb8] sm:$0xff] }
  0x17   : > { %v271_v17 = vadd.f32 %v270_v12, %v269_v14  ;;  %v304_v63 = vsel %vm262_vm0, %v1035_v58, 0.0  ;;  %v306_v6 = vsel %vm262_vm0, %v1040_v61, 0.0  ;;  %v1050_v8 = vld [vmem:[%s929_s19 + $0xc0] sm:$0xff]  ;;  %v308_v11 = vsel %vm262_vm0, %v1045_v4, 0.0  ;;  %v1055_v12 = vld [vmem:[%s929_s19 + $0xc8] sm:$0xff] }
  0x19   : > { %v273_v20 = vadd.f32 %v272_v15, %v271_v17  ;;  %v310_v15 = vsel %vm262_vm0, %v1050_v8, 0.0  ;;  %v1060_v17 = vld [vmem:[%s929_s19 + $0xd0] sm:$0xff] }
  0x1b   : > { %v275_v23 = vadd.f32 %v274_v18, %v273_v20  ;;  %v312_v20 = vsel %vm262_vm0, %v1055_v12, 0.0 }
  0x1d   : > { %v277_v26 = vadd.f32 %v276_v21, %v275_v23  ;;  %v1065_v21 = vld [vmem:[%s929_s19 + $0xd8] sm:$0xff] }
  0x1f   : > { %v279_v29 = vadd.f32 %v278_v24, %v277_v26  ;;  %v314_v24 = vsel %vm262_vm0, %v1060_v17, 0.0  ;;  %v1070_v26 = vld [vmem:[%s929_s19 + $0xe0] sm:$0xff] }
  0x21   : > { %v281_v32 = vadd.f32 %v280_v27, %v279_v29  ;;  %v316_v29 = vsel %vm262_vm0, %v1065_v21, 0.0 }
  0x23   : > { %v283_v35 = vadd.f32 %v282_v30, %v281_v32  ;;  %v1075_v30 = vld [vmem:[%s929_s19 + $0xe8] sm:$0xff] }
  0x25   : > { %v285_v38 = vadd.f32 %v284_v33, %v283_v35  ;;  %v318_v33 = vsel %vm262_vm0, %v1070_v26, 0.0  ;;  %v1080_v35 = vld [vmem:[%s929_s19 + $0xf0] sm:$0xff] }
  0x27   : > { %v287_v41 = vadd.f32 %v286_v36, %v285_v38  ;;  %v320_v38 = vsel %vm262_vm0, %v1075_v30, 0.0 }
  0x29   : > { %v289_v44 = vadd.f32 %v288_v39, %v287_v41  ;;  %v1085_v39 = vld [vmem:[%s929_s19 + $0xf8] sm:$0xff] }
  0x2b   : > { %v291_v47 = vadd.f32 %v290_v42, %v289_v44  ;;  %v322_v42 = vsel %vm262_vm0, %v1080_v35, 0.0 }
  0x2d   : > { %v293_v50 = vadd.f32 %v292_v45, %v291_v47  ;;  %v324_v45 = vsel %vm262_vm0, %v1085_v39, 0.0 }
  0x2f   : > { %v295_v53 = vadd.f32 %v294_v48, %v293_v50 }
  0x31   : > { %v297_v56 = vadd.f32 %v296_v51, %v295_v53 }
  0x33   : > { %v299_v59 = vadd.f32 %v298_v54, %v297_v56 }
  0x35   : > { %v301_v62 = vadd.f32 %v300_v57, %v299_v59 }
  0x37   : > { %v303_v5 = vadd.f32 %v302_v60, %v301_v62 }
  0x39   : > { %v305_v9 = vadd.f32 %v304_v63, %v303_v5 }
  0x3b   : > { %v307_v14 = vadd.f32 %v306_v6, %v305_v9 }
  0x3d   : > { %v309_v18 = vadd.f32 %v308_v11, %v307_v14 }
  0x3f   : > { %v311_v23 = vadd.f32 %v310_v15, %v309_v18 }
  0x41   : > { %v313_v27 = vadd.f32 %v312_v20, %v311_v23 }
  0x43   : > { %v315_v32 = vadd.f32 %v314_v24, %v313_v27 }
  0x45   : > { %v317_v36 = vadd.f32 %v316_v29, %v315_v32 }
  0x47   : > { %v319_v41 = vadd.f32 %v318_v33, %v317_v36 }
  0x49   : > { %v321_v44 = vadd.f32 %v320_v38, %v319_v41 }
  0x4b   : > { %v323_v47 = vadd.f32 %v322_v42, %v321_v44 }
  0x4d   : > { %v325_v48 = vadd.f32 %v324_v45, %v323_v47 }
  0x4f   : > { %v326_v50 = vrot.slane %v325_v48, 4 }
  0x51   : > { %v327_v51 = vadd.f32 %v326_v50, %v325_v48 }
  0x53   : > { %v328_v53 = vrot.slane %v327_v51, 2 }
  0x55   : > { %v329_v54 = vadd.f32 %v328_v53, %v327_v51 }
  0x57   : > { %v330_v56 = vrot.slane %v329_v54, 1 }
  0x59   : > { %v331_v57 = vadd.f32 %v330_v56, %v329_v54 }
  0x5b   : > { %v1091_v59 = vmul.f32 0.00390625, %v331_v57 }
  0x5d   : > { %v1095_v60 = vsub.f32 %v932_v0, %v1091_v59  ;;  %v1099_v62 = vsub.f32 %v935_v1, %v1091_v59  ;;  %v1103_v63 = vsub.f32 %v938_v2, %v1091_v59  ;;  %v1107_v5 = vsub.f32 %v941_v3, %v1091_v59 }
  0x5e   : > { %v1111_v6 = vsub.f32 %v950_v7, %v1091_v59  ;;  %v1121_v2 = vsub.f32 %v955_v10, %v1091_v59  ;;  %v1127_v7 = vsub.f32 %v960_v13, %v1091_v59  ;;  %v1136_v10 = vsub.f32 %v965_v16, %v1091_v59 }
  0x5f   : > { %v366_v0 = vmul.f32 %v1095_v60, %v1095_v60  ;;  %v367_v9 = vmul.f32 %v1099_v62, %v1099_v62  ;;  %v368_v1 = vmul.f32 %v1103_v63, %v1103_v63  ;;  %v369_v3 = vmul.f32 %v1107_v5, %v1107_v5 }
  0x60   : > { %v370_v11 = vmul.f32 %v1111_v6, %v1111_v6  ;;  %v371_v23 = vmul.f32 %v1121_v2, %v1121_v2  ;;  %v1143_v27 = vsub.f32 %v970_v19, %v1091_v59  ;;  %v372_v29 = vmul.f32 %v1127_v7, %v1127_v7 }
  0x61   : > { %v398_v14 = vsel %vm262_vm0, %v366_v0, 0.0  ;;  %v399_v15 = vsel %vm262_vm0, %v367_v9, 0.0  ;;  %v401_v18 = vsel %vm262_vm0, %v368_v1, 0.0  ;;  %v403_v13 = vsel %vm262_vm0, %v369_v3, 0.0 }
  0x62   : > { %v400_v20 = vadd.f32 %v399_v15, %v398_v14  ;;  %v405_v32 = vsel %vm262_vm0, %v370_v11, 0.0  ;;  %v1150_v16 = vsub.f32 %v975_v22, %v1091_v59  ;;  %v373_v36 = vmul.f32 %v1136_v10, %v1136_v10 }
  0x63   : > { %v407_v38 = vsel %vm262_vm0, %v371_v23, 0.0  ;;  %v1157_v19 = vsub.f32 %v980_v25, %v1091_v59  ;;  %v374_v42 = vmul.f32 %v1143_v27, %v1143_v27  ;;  %v409_v44 = vsel %vm262_vm0, %v372_v29, 0.0 }
  0x64   : > { %v402_v24 = vadd.f32 %v401_v18, %v400_v20  ;;  %v1164_v22 = vsub.f32 %v985_v28, %v1091_v59  ;;  %v375_v47 = vmul.f32 %v1150_v16, %v1150_v16  ;;  %v411_v48 = vsel %vm262_vm0, %v373_v36, 0.0 }
  0x65   : > { %v1171_v25 = vsub.f32 %v990_v31, %v1091_v59  ;;  %v376_v51 = vmul.f32 %v1157_v19, %v1157_v19  ;;  %v413_v53 = vsel %vm262_vm0, %v374_v42, 0.0  ;;  %v1178_v28 = vsub.f32 %v995_v34, %v1091_v59 }
  0x66   : > { %v404_v33 = vadd.f32 %v403_v13, %v402_v24  ;;  %v377_v56 = vmul.f32 %v1164_v22, %v1164_v22  ;;  %v415_v57 = vsel %vm262_vm0, %v375_v47, 0.0  ;;  %v1185_v31 = vsub.f32 %v1000_v37, %v1091_v59 }
  0x67   : > { %v378_v9 = vmul.f32 %v1171_v25, %v1171_v25  ;;  %v417_v1 = vsel %vm262_vm0, %v376_v51, 0.0  ;;  %v1192_v34 = vsub.f32 %v1005_v40, %v1091_v59  ;;  %v379_v11 = vmul.f32 %v1178_v28, %v1178_v28 }
  0x68   : > { %v406_v41 = vadd.f32 %v405_v32, %v404_v33  ;;  %v419_v14 = vsel %vm262_vm0, %v377_v56, 0.0  ;;  %v1199_v37 = vsub.f32 %v1010_v43, %v1091_v59  ;;  %v380_v18 = vmul.f32 %v1185_v31, %v1185_v31 }
  0x69   : > { %v421_v20 = vsel %vm262_vm0, %v378_v9, 0.0  ;;  %v1206_v40 = vsub.f32 %v1015_v46, %v1091_v59  ;;  %v381_v13 = vmul.f32 %v1192_v34, %v1192_v34  ;;  %v423_v24 = vsel %vm262_vm0, %v379_v11, 0.0 }
  0x6a   : > { %v408_v45 = vadd.f32 %v407_v38, %v406_v41  ;;  %v1213_v43 = vsub.f32 %v1020_v49, %v1091_v59  ;;  %v382_v32 = vmul.f32 %v1199_v37, %v1199_v37  ;;  %v425_v33 = vsel %vm262_vm0, %v380_v18, 0.0 }
  0x6b   : > { %v1220_v46 = vsub.f32 %v1025_v52, %v1091_v59  ;;  %v383_v38 = vmul.f32 %v1206_v40, %v1206_v40  ;;  %v427_v41 = vsel %vm262_vm0, %v381_v13, 0.0  ;;  %v1227_v49 = vsub.f32 %v1030_v55, %v1091_v59 }
  0x6c   : > { %v410_v50 = vadd.f32 %v409_v44, %v408_v45  ;;  %v384_v44 = vmul.f32 %v1213_v43, %v1213_v43  ;;  %v429_v45 = vsel %vm262_vm0, %v382_v32, 0.0  ;;  %v1234_v52 = vsub.f32 %v1035_v58, %v1091_v59 }
  0x6d   : > { %v1241_v55 = vsub.f32 %v1040_v61, %v1091_v59  ;;  %v1248_v58 = vsub.f32 %v1045_v4, %v1091_v59  ;;  %v1255_v61 = vsub.f32 %v1050_v8, %v1091_v59  ;;  %v1262_v4 = vsub.f32 %v1055_v12, %v1091_v59 }
  0x6e   : > { %v412_v54 = vadd.f32 %v411_v48, %v410_v50  ;;  %v385_v48 = vmul.f32 %v1220_v46, %v1220_v46  ;;  %v431_v50 = vsel %vm262_vm0, %v383_v38, 0.0  ;;  %v1269_v8 = vsub.f32 %v1060_v17, %v1091_v59 }
  0x6f   : > { %v1276_v12 = vsub.f32 %v1065_v21, %v1091_v59  ;;  %v1283_v17 = vsub.f32 %v1070_v26, %v1091_v59  ;;  %v1290_v21 = vsub.f32 %v1075_v30, %v1091_v59  ;;  %v1297_v26 = vsub.f32 %v1080_v35, %v1091_v59 }
  0x70   : > { %v414_v0 = vadd.f32 %v413_v53, %v412_v54  ;;  %v386_v53 = vmul.f32 %v1227_v49, %v1227_v49  ;;  %v433_v54 = vsel %vm262_vm0, %v384_v44, 0.0  ;;  %v1304_v30 = vsub.f32 %v1085_v39, %v1091_v59 }
  0x71   : > { %v396_v35 = vmul.f32 %v1297_v26, %v1297_v26 }
  0x72   : > { %v416_v3 = vadd.f32 %v415_v57, %v414_v0  ;;  %v387_v57 = vmul.f32 %v1234_v52, %v1234_v52  ;;  %v435_v0 = vsel %vm262_vm0, %v385_v48, 0.0 }
  0x73   : > { %v457_v39 = vsel %vm262_vm0, %v396_v35, 0.0 }
  0x74   : > { %v418_v15 = vadd.f32 %v417_v1, %v416_v3  ;;  %v388_v1 = vmul.f32 %v1241_v55, %v1241_v55  ;;  %v437_v3 = vsel %vm262_vm0, %v386_v53, 0.0 }
  0x76   : > { %v420_v23 = vadd.f32 %v419_v14, %v418_v15  ;;  %v389_v14 = vmul.f32 %v1248_v58, %v1248_v58  ;;  %v439_v15 = vsel %vm262_vm0, %v387_v57, 0.0  ;;  %v397_v57 = vmul.f32 %v1304_v30, %v1304_v30 }
  0x78   : > { %v422_v29 = vadd.f32 %v421_v20, %v420_v23  ;;  %v390_v20 = vmul.f32 %v1255_v61, %v1255_v61  ;;  %v441_v23 = vsel %vm262_vm0, %v388_v1, 0.0  ;;  %v459_v1 = vsel %vm262_vm0, %v397_v57, 0.0 }
  0x7a   : > { %v424_v36 = vadd.f32 %v423_v24, %v422_v29  ;;  %v391_v24 = vmul.f32 %v1262_v4, %v1262_v4  ;;  %v443_v29 = vsel %vm262_vm0, %v389_v14, 0.0 }
  0x7c   : > { %v426_v42 = vadd.f32 %v425_v33, %v424_v36  ;;  %v392_v33 = vmul.f32 %v1269_v8, %v1269_v8  ;;  %v445_v36 = vsel %vm262_vm0, %v390_v20, 0.0 }
  0x7e   : > { %v428_v47 = vadd.f32 %v427_v41, %v426_v42  ;;  %v393_v41 = vmul.f32 %v1276_v12, %v1276_v12  ;;  %v447_v42 = vsel %vm262_vm0, %v391_v24, 0.0 }
  0x80   : > { %v430_v51 = vadd.f32 %v429_v45, %v428_v47  ;;  %v394_v45 = vmul.f32 %v1283_v17, %v1283_v17  ;;  %v449_v47 = vsel %vm262_vm0, %v392_v33, 0.0  ;;  %v1322_v33 = vld [vmem:[%s1538_s1] ss:$0 sm:$0xff] }
  0x82   : > { %v432_v56 = vadd.f32 %v431_v50, %v430_v51  ;;  %v395_v50 = vmul.f32 %v1290_v21, %v1290_v21  ;;  %v451_v51 = vsel %vm262_vm0, %v393_v41, 0.0 }
  0x84   : > { %v434_v9 = vadd.f32 %v433_v54, %v432_v56  ;;  %v453_v54 = vsel %vm262_vm0, %v394_v45, 0.0 }
  0x86   : > { %v436_v11 = vadd.f32 %v435_v0, %v434_v9  ;;  %v455_v0 = vsel %vm262_vm0, %v395_v50, 0.0 }
  0x88   : > { %v438_v18 = vadd.f32 %v437_v3, %v436_v11 }
  0x8a   : > { %v440_v13 = vadd.f32 %v439_v15, %v438_v18 }
  0x8c   : > { %v442_v32 = vadd.f32 %v441_v23, %v440_v13 }
  0x8e   : > { %v444_v38 = vadd.f32 %v443_v29, %v442_v32 }
  0x90   : > { %v446_v44 = vadd.f32 %v445_v36, %v444_v38 }
  0x92   : > { %v448_v48 = vadd.f32 %v447_v42, %v446_v44  ;;  %v1335_v44 = vld [vmem:[%s1539_s2] ss:$0 sm:$0xff] }
  0x94   : > { %v450_v53 = vadd.f32 %v449_v47, %v448_v48 }
  0x96   : > { %v452_v56 = vadd.f32 %v451_v51, %v450_v53 }
  0x98   : > { %v454_v9 = vadd.f32 %v453_v54, %v452_v56 }
  0x9a   : > { %v456_v59 = vadd.f32 %v455_v0, %v454_v9 }
  0x9c   : > { %v458_v3 = vadd.f32 %v457_v39, %v456_v59 }
  0x9e   : > { %v460_v11 = vadd.f32 %v459_v1, %v458_v3 }
  0xa0   : > { %v461_v14 = vrot.slane %v460_v11, 4 }
  0xa2   : > { %v462_v15 = vadd.f32 %v461_v14, %v460_v11 }
  0xa4   : > { %v463_v18 = vrot.slane %v462_v15, 2 }
  0xa6   : > { %v464_v20 = vadd.f32 %v463_v18, %v462_v15 }
  0xa8   : > { %v465_v23 = vrot.slane %v464_v20, 1 }
  0xaa   : > { %v466_v13 = vadd.f32 %v465_v23, %v464_v20 }
  0xac   : > { %v467_v24 = vmul.f32 0.00390625, %v466_v13 }
  0xae   : > { %v468_v29 = vadd.f32 1e-05, %v467_v24 }
  0xb0   : > { %793 = vrsqrt.f32 %v468_v29 }
  0xbd   : > { %v1317_v32 = vpop.eup %793 }
  0xbe   : > { %v470_v36 = vmul.f32 %v1317_v32, %v1095_v60  ;;  %v471_v38 = vmul.f32 %v1317_v32, %v1099_v62  ;;  %v472_v41 = vmul.f32 %v1317_v32, %v1103_v63  ;;  %v473_v42 = vmul.f32 %v1317_v32, %v1107_v5 }
  0xbf   : > { %v474_v45 = vmul.f32 %v1317_v32, %v1111_v6  ;;  %v475_v60 = vmul.f32 %v1317_v32, %v1121_v2  ;;  %v476_v62 = vmul.f32 %v1317_v32, %v1127_v7  ;;  %v477_v63 = vmul.f32 %v1317_v32, %v1136_v10 }
  0xc0   : > { %v509_v47 = vmul.f32 %v1322_v33, %v470_v36  ;;  %v510_v5 = vmul.f32 %v1322_v33, %v471_v38  ;;  %v511_v48 = vmul.f32 %v1322_v33, %v472_v41  ;;  %v512_v50 = vmul.f32 %v1322_v33, %v473_v42 }
  0xc1   : > { %v513_v51 = vmul.f32 %v1322_v33, %v474_v45  ;;  %v514_v6 = vmul.f32 %v1322_v33, %v475_v60  ;;  %v515_v2 = vmul.f32 %v1322_v33, %v476_v62  ;;  %v516_v35 = vmul.f32 %v1322_v33, %v477_v63 }
  0xc2   : > { %v548_v53 = vadd.f32 %v1335_v44, %v509_v47  ;;  %v549_v7 = vadd.f32 %v1335_v44, %v510_v5  ;;  %v550_v10 = vadd.f32 %v1335_v44, %v511_v48  ;;  %v551_v54 = vadd.f32 %v1335_v44, %v512_v50 }
  0xc3   : > { %v552_v56 = vadd.f32 %v1335_v44, %v513_v51  ;;  %v553_v57 = vadd.f32 %v1335_v44, %v514_v6  ;;  %v554_v0 = vadd.f32 %v1335_v44, %v515_v2  ;;  %v478_v9 = vmul.f32 %v1317_v32, %v1143_v27 }
  0xc4   : > { %795 = vtanh.f32 %v548_v53  ;;  %v479_v39 = vmul.f32 %v1317_v32, %v1150_v16  ;;  %v480_v59 = vmul.f32 %v1317_v32, %v1157_v19  ;;  %v481_v1 = vmul.f32 %v1317_v32, %v1164_v22 }
  0xc5   : > { %797 = vtanh.f32 %v549_v7  ;;  %v482_v3 = vmul.f32 %v1317_v32, %v1171_v25  ;;  %v483_v11 = vmul.f32 %v1317_v32, %v1178_v28  ;;  %v517_v14 = vmul.f32 %v1322_v33, %v478_v9 }
  0xc6   : > { %799 = vtanh.f32 %v550_v10  ;;  %v518_v27 = vmul.f32 %v1322_v33, %v479_v39  ;;  %v519_v16 = vmul.f32 %v1322_v33, %v480_v59  ;;  %v555_v19 = vadd.f32 %v1335_v44, %v516_v35 }
  0xc7   : > { %801 = vtanh.f32 %v551_v54  ;;  %v520_v15 = vmul.f32 %v1322_v33, %v481_v1  ;;  %v521_v22 = vmul.f32 %v1322_v33, %v482_v3  ;;  %v556_v25 = vadd.f32 %v1335_v44, %v517_v14 }
  0xc8   : > { %803 = vtanh.f32 %v552_v56  ;;  %v557_v18 = vadd.f32 %v1335_v44, %v518_v27  ;;  %v522_v28 = vmul.f32 %v1322_v33, %v483_v11  ;;  %v558_v20 = vadd.f32 %v1335_v44, %v519_v16 }
  0xc9   : > { %805 = vtanh.f32 %v553_v57  ;;  %v559_v23 = vadd.f32 %v1335_v44, %v520_v15  ;;  %v560_v13 = vadd.f32 %v1335_v44, %v521_v22  ;;  %v484_v24 = vmul.f32 %v1317_v32, %v1185_v31 }
  0xca   : > { %807 = vtanh.f32 %v554_v0  ;;  %v485_v29 = vmul.f32 %v1317_v32, %v1192_v34  ;;  %v486_v36 = vmul.f32 %v1317_v32, %v1199_v37  ;;  %v487_v38 = vmul.f32 %v1317_v32, %v1206_v40 }
  0xcb   : > { %809 = vtanh.f32 %v555_v19  ;;  %v488_v41 = vmul.f32 %v1317_v32, %v1213_v43  ;;  %v489_v42 = vmul.f32 %v1317_v32, %v1220_v46  ;;  %v523_v31 = vmul.f32 %v1322_v33, %v484_v24 }
  0xcc   : > { %811 = vtanh.f32 %v556_v25  ;;  %v524_v45 = vmul.f32 %v1322_v33, %v485_v29  ;;  %v525_v34 = vmul.f32 %v1322_v33, %v486_v36  ;;  %v561_v37 = vadd.f32 %v1335_v44, %v522_v28 }
  0xcd   : > { %813 = vtanh.f32 %v557_v18  ;;  %v526_v60 = vmul.f32 %v1322_v33, %v487_v38  ;;  %v527_v40 = vmul.f32 %v1322_v33, %v488_v41  ;;  %v562_v43 = vadd.f32 %v1335_v44, %v523_v31 }
  0xce   : > { %815 = vtanh.f32 %v558_v20  ;;  %v563_v62 = vadd.f32 %v1335_v44, %v524_v45  ;;  %v528_v46 = vmul.f32 %v1322_v33, %v489_v42  ;;  %v564_v63 = vadd.f32 %v1335_v44, %v525_v34 }
  0xcf   : > { %817 = vtanh.f32 %v559_v23  ;;  %v565_v47 = vadd.f32 %v1335_v44, %v526_v60  ;;  %v566_v5 = vadd.f32 %v1335_v44, %v527_v40  ;;  %v490_v48 = vmul.f32 %v1317_v32, %v1227_v49 }
  0xd0   : > { %819 = vtanh.f32 %v560_v13  ;;  %v491_v50 = vmul.f32 %v1317_v32, %v1234_v52  ;;  %v492_v51 = vmul.f32 %v1317_v32, %v1241_v55  ;;  %v493_v2 = vmul.f32 %v1317_v32, %v1248_v58 }
  0xd1   : > { %v796_v6 = vpop.eup %795  ;;  %821 = vtanh.f32 %v561_v37  ;;  %v494_v53 = vmul.f32 %v1317_v32, %v1255_v61  ;;  %v495_v7 = vmul.f32 %v1317_v32, %v1262_v4  ;;  %v529_v49 = vmul.f32 %v1322_v33, %v490_v48 }
  0xd2   : > { %v798_v10 = vpop.eup %797  ;;  %612 = vst.msk [vmem:[%s1410_s26] sm:$0xff] %vm262_vm0, %v796_v6  ;;  %823 = vtanh.f32 %v562_v43  ;;  %v530_v52 = vmul.f32 %v1322_v33, %v491_v50  ;;  %v531_v55 = vmul.f32 %v1322_v33, %v492_v51  ;;  %v567_v58 = vadd.f32 %v1335_v44, %v528_v46 }
  0xd3   : > { %v800_v35 = vpop.eup %799  ;;  %613 = vst.msk [vmem:[%s1410_s26 + $0x8] sm:$0xff] %vm262_vm0, %v798_v10  ;;  %825 = vtanh.f32 %v563_v62  ;;  %v532_v61 = vmul.f32 %v1322_v33, %v493_v2  ;;  %v533_v4 = vmul.f32 %v1322_v33, %v494_v53  ;;  %v568_v56 = vadd.f32 %v1335_v44, %v529_v49 }
  0xd4   : > { %v802_v54 = vpop.eup %801  ;;  %614 = vst.msk [vmem:[%s1410_s26 + $0x10] sm:$0xff] %vm262_vm0, %v800_v35  ;;  %827 = vtanh.f32 %v564_v63  ;;  %v569_v57 = vadd.f32 %v1335_v44, %v530_v52  ;;  %v534_v0 = vmul.f32 %v1322_v33, %v495_v7  ;;  %v570_v39 = vadd.f32 %v1335_v44, %v531_v55 }
  0xd5   : > { %v804_v9 = vpop.eup %803  ;;  %615 = vst.msk [vmem:[%s1410_s26 + $0x18] sm:$0xff] %vm262_vm0, %v802_v54  ;;  %829 = vtanh.f32 %v565_v47  ;;  %v571_v59 = vadd.f32 %v1335_v44, %v532_v61  ;;  %v572_v1 = vadd.f32 %v1335_v44, %v533_v4  ;;  %v496_v11 = vmul.f32 %v1317_v32, %v1269_v8 }
  0xd6   : > { %v806_v3 = vpop.eup %805  ;;  %616 = vst.msk [vmem:[%s1410_s26 + $0x20] sm:$0xff] %vm262_vm0, %v804_v9  ;;  %831 = vtanh.f32 %v566_v5  ;;  %v497_v14 = vmul.f32 %v1317_v32, %v1276_v12  ;;  %v498_v27 = vmul.f32 %v1317_v32, %v1283_v17  ;;  %v499_v19 = vmul.f32 %v1317_v32, %v1290_v21 }
  0xd7   : > { %v808_v16 = vpop.eup %807  ;;  %617 = vst.msk [vmem:[%s1410_s26 + $0x28] sm:$0xff] %vm262_vm0, %v806_v3  ;;  %833 = vtanh.f32 %v567_v58  ;;  %v500_v15 = vmul.f32 %v1317_v32, %v1297_v26  ;;  %v501_v8 = vmul.f32 %v1317_v32, %v1304_v30  ;;  %v535_v12 = vmul.f32 %v1322_v33, %v496_v11 }
  0xd8   : > { %v810_v22 = vpop.eup %809  ;;  %618 = vst.msk [vmem:[%s1410_s26 + $0x30] sm:$0xff] %vm262_vm0, %v808_v16  ;;  %835 = vtanh.f32 %v568_v56  ;;  %v536_v17 = vmul.f32 %v1322_v33, %v497_v14  ;;  %v537_v25 = vmul.f32 %v1322_v33, %v498_v27  ;;  %v573_v21 = vadd.f32 %v1335_v44, %v534_v0 }
  0xd9   : > { %v812_v18 = vpop.eup %811  ;;  %619 = vst.msk [vmem:[%s1410_s26 + $0x38] sm:$0xff] %vm262_vm0, %v810_v22  ;;  %837 = vtanh.f32 %v569_v57  ;;  %v538_v26 = vmul.f32 %v1322_v33, %v499_v19  ;;  %v574_v32 = vadd.f32 %v1335_v44, %v535_v12  ;;  %v539_v28 = vmul.f32 %v1322_v33, %v500_v15 }
  0xda   : > { %v814_v30 = vpop.eup %813  ;;  %620 = vst.msk [vmem:[%s1410_s26 + $0x40] sm:$0xff] %vm262_vm0, %v812_v18  ;;  %839 = vtanh.f32 %v570_v39  ;;  %v575_v23 = vadd.f32 %v1335_v44, %v536_v17  ;;  %v540_v13 = vmul.f32 %v1322_v33, %v501_v8  ;;  %v576_v29 = vadd.f32 %v1335_v44, %v537_v25 }
  0xdb   : > { %v816_v20 = vpop.eup %815  ;;  %621 = vst.msk [vmem:[%s1410_s26 + $0x48] sm:$0xff] %vm262_vm0, %v814_v30  ;;  %841 = vtanh.f32 %v571_v59  ;;  %v577_v38 = vadd.f32 %v1335_v44, %v538_v26  ;;  %v578_v33 = vadd.f32 %v1335_v44, %v539_v28 }
  0xdc   : > { %v818_v24 = vpop.eup %817  ;;  %622 = vst.msk [vmem:[%s1410_s26 + $0x50] sm:$0xff] %vm262_vm0, %v816_v20  ;;  %843 = vtanh.f32 %v572_v1  ;;  %v579_v31 = vadd.f32 %v1335_v44, %v540_v13 }
  0xdd   : > { %v820_v36 = vpop.eup %819  ;;  %623 = vst.msk [vmem:[%s1410_s26 + $0x58] sm:$0xff] %vm262_vm0, %v818_v24  ;;  %845 = vtanh.f32 %v573_v21 }
  0xde   : > { %v822_v41 = vpop.eup %821  ;;  %624 = vst.msk [vmem:[%s1410_s26 + $0x60] sm:$0xff] %vm262_vm0, %v820_v36  ;;  %847 = vtanh.f32 %v574_v32 }
  0xdf   : > { %v824_v42 = vpop.eup %823  ;;  %625 = vst.msk [vmem:[%s1410_s26 + $0x68] sm:$0xff] %vm262_vm0, %v822_v41  ;;  %849 = vtanh.f32 %v575_v23 }
  0xe0   : > { %v826_v45 = vpop.eup %825  ;;  %626 = vst.msk [vmem:[%s1410_s26 + $0x70] sm:$0xff] %vm262_vm0, %v824_v42  ;;  %851 = vtanh.f32 %v576_v29 }
  0xe1   : > { %v828_v34 = vpop.eup %827  ;;  %627 = vst.msk [vmem:[%s1410_s26 + $0x78] sm:$0xff] %vm262_vm0, %v826_v45  ;;  %853 = vtanh.f32 %v577_v38 }
  0xe2   : > { %v830_v37 = vpop.eup %829  ;;  %628 = vst.msk [vmem:[%s1410_s26 + $0x80] sm:$0xff] %vm262_vm0, %v828_v34  ;;  %855 = vtanh.f32 %v578_v33 }
  0xe3   : > { %v832_v60 = vpop.eup %831  ;;  %629 = vst.msk [vmem:[%s1410_s26 + $0x88] sm:$0xff] %vm262_vm0, %v830_v37  ;;  %857 = vtanh.f32 %v579_v31 }
  0xe4   : > { %v834_v44 = vpop.eup %833  ;;  %630 = vst.msk [vmem:[%s1410_s26 + $0x90] sm:$0xff] %vm262_vm0, %v832_v60 }
  0xe5   : > { %v836_v40 = vpop.eup %835  ;;  %631 = vst.msk [vmem:[%s1410_s26 + $0x98] sm:$0xff] %vm262_vm0, %v834_v44 }
  0xe6   : > { %v838_v43 = vpop.eup %837  ;;  %632 = vst.msk [vmem:[%s1410_s26 + $0xa0] sm:$0xff] %vm262_vm0, %v836_v40 }
  0xe7   : > { %v840_v62 = vpop.eup %839  ;;  %633 = vst.msk [vmem:[%s1410_s26 + $0xa8] sm:$0xff] %vm262_vm0, %v838_v43 }
  0xe8   : > { %v842_v46 = vpop.eup %841  ;;  %634 = vst.msk [vmem:[%s1410_s26 + $0xb0] sm:$0xff] %vm262_vm0, %v840_v62 }
  0xe9   : > { %v844_v63 = vpop.eup %843  ;;  %635 = vst.msk [vmem:[%s1410_s26 + $0xb8] sm:$0xff] %vm262_vm0, %v842_v46 }
  0xea   : > { %v846_v47 = vpop.eup %845  ;;  %636 = vst.msk [vmem:[%s1410_s26 + $0xc0] sm:$0xff] %vm262_vm0, %v844_v63 }
  0xeb   : > { %v848_v5 = vpop.eup %847  ;;  %637 = vst.msk [vmem:[%s1410_s26 + $0xc8] sm:$0xff] %vm262_vm0, %v846_v47 }
  0xec   : > { %v850_v48 = vpop.eup %849  ;;  %638 = vst.msk [vmem:[%s1410_s26 + $0xd0] sm:$0xff] %vm262_vm0, %v848_v5 }
  0xed   : > { %v852_v50 = vpop.eup %851  ;;  %639 = vst.msk [vmem:[%s1410_s26 + $0xd8] sm:$0xff] %vm262_vm0, %v850_v48 }
  0xee   : > { %v854_v51 = vpop.eup %853  ;;  %640 = vst.msk [vmem:[%s1410_s26 + $0xe0] sm:$0xff] %vm262_vm0, %v852_v50 }
  0xef   : > { %v856_v6 = vpop.eup %855  ;;  %641 = vst.msk [vmem:[%s1410_s26 + $0xe8] sm:$0xff] %vm262_vm0, %v854_v51 }
  0xf0   : > { %v858_v2 = vpop.eup %857  ;;  %642 = vst.msk [vmem:[%s1410_s26 + $0xf0] sm:$0xff] %vm262_vm0, %v856_v6 }
  0xf1   : > { %643 = vst.msk [vmem:[%s1410_s26 + $0xf8] sm:$0xff] %vm262_vm0, %v858_v2 }
  0xf2 PF: > { %s13_s14 = sadd.s32 1, %s881_s14   ;;  %s1541_s12 = smov %s877_s13 }
  0xf3   : > { %p10_p5 = scmp.ge.s32.totalorder %s13_s14, 4   ;;  %s1542_s13 = smov %s1544_s15 }
  0xf5   :  { %12 = sbr.rel (!%p10_p5) target bundleno = 2 (0x2), region = 68 }

// kernel: generator_forward.65
= control target key start
LH: loop header
LB: loop body
LE: loop exit
PB: predicated region body
PF: predicated region fallthrough
CT: control target
= control target key end

     0   :  { %s97_s0 = inlined_call_operand.<no memory space> [shape: f32[1], index: 0, kind: input, shape index: {}]   ;;  %s98_s1 = inlined_call_operand.vmem [shape: f32[6,256], index: 1, kind: input, shape index: {}]   ;;  %s99_s2 = inlined_call_operand.vmem [shape: f32[6,256], index: 2, kind: input, shape index: {}]   ;;  %s100_s4 = inlined_call_operand.vmem [shape: f32[6,256], index: 4, kind: output, shape index: {1}]   ;;  %s101_s3 = inlined_call_operand.vmem [shape: f32[6,256], index: 3, kind: output, shape index: {0}]  }
   0x1   :  { %v18_v0 = vld [vmem:[%s99_s2] sm:$0x3f]  ;;  %v20_v1 = vstv %s97_s0  ;;  %v19_v3 = vld [vmem:[%s99_s2 + $0x8] sm:$0x3f] }
   0x2   :  { %v25_v2 = vld [vmem:[%s98_s1] sm:$0x3f]  ;;  %v21_v4 = vmul.f32 %v20_v1, %v18_v0  ;;  %v22_v5 = vmul.f32 %v20_v1, %v19_v3  ;;  %v26_v6 = vld [vmem:[%s98_s1 + $0x8] sm:$0x3f] }
   0x4   :  { %23 = vst [vmem:[%s100_s4] sm:$0x3f] %v21_v4  ;;  %v27_v7 = vsub.f32 %v25_v2, %v21_v4  ;;  %24 = vst [vmem:[%s100_s4 + $0x8] sm:$0x3f] %v22_v5  ;;  %v28_v8 = vsub.f32 %v26_v6, %v22_v5 }
   0x6   :  { %41 = vtanh.f32 %v27_v7 }
   0x7   :  { %43 = vtanh.f32 %v28_v8 }
  0x13   :  { %v42_v9 = vpop.eup %41 }
  0x14   :  { %v44_v10 = vpop.eup %43  ;;  %31 = vst [vmem:[%s101_s3] sm:$0x3f] %v42_v9 }
  0x15   :  { %32 = vst [vmem:[%s101_s3 + $0x8] sm:$0x3f] %v44_v10 }

</bundles_post_ra>
